<compile_context>
chip_gen: v6e
topology: v6e:2x2x1
jax: 0.10.0
libtpu: 0.0.40
codegen_flags: <defaults>
</compile_context>

<pallas_src>
import functools
import math

import jax
import jax.numpy as jnp
from jax import lax
from jax.experimental import pallas as pl
from jax.experimental.pallas import tpu as pltpu


def _round_up(x, m):
    return ((x + m - 1) // m) * m


def _decoder_kernel(mem_ref, tgt_ref, wctx_ref, wtok_ref, whid_ref, b_ref,
                    wc_ref, bc_ref, out_ref, *,
                    teacher_forcing: bool, hp: int, vp: int, t_real: int,
                    scale: float):
    """Processes one batch tile; the full S-step recurrence runs in-kernel.

    mem_ref : (Bt, Tp, Ep)      f32    encoder memory (T, E zero-padded)
    tgt_ref : (S, Bt, Vp) bf16 (teacher forcing)  or  (Bt, Vp) bf16 (t=0 only)
    wctx_ref: (Ep, 4*Hp)        bf16   W_ih[:, :E]^T   (gate-major columns)
    wtok_ref: (Vp, 4*Hp)        bf16   W_ih[:, E:]^T
    whid_ref: (Hp, 4*Hp)        bf16   W_hh^T
    b_ref   : (1, 4*Hp)         f32    b_ih + b_hh (gate-padded)
    wc_ref  : (Hp, Vp)          bf16   classifier weight^T
    bc_ref  : (1, Vp)           f32    classifier bias (pad lanes = -1e9)
    out_ref : (S, Bt, Vp)       bf16   logits, time-major
    """
    Bt, Tp, Ep = mem_ref.shape
    S = out_ref.shape[0]
    f32, bf16 = jnp.float32, jnp.bfloat16

    mem = mem_ref[...]                                   # (Bt, Tp, Ep) f32
    mem_s = mem * scale                                  # one-time pre-scale for scores
    w_ctx = wctx_ref[...]                                # (Ep, 4Hp) bf16
    w_tok = wtok_ref[...]                                # (Vp, 4Hp) bf16
    w_hid = whid_ref[...]                                # (Hp, 4Hp) bf16
    wc = wc_ref[...]                                     # (Hp, Vp)  bf16
    # Pre-broadcast biases once; JAX does not CSE broadcast_in_dim inside loops.
    bias = jnp.broadcast_to(b_ref[...], (Bt, 4 * hp)).astype(f32)
    bias_c = jnp.broadcast_to(bc_ref[...], (Bt, vp)).astype(f32)

    # Additive score mask for zero-padded memory timesteps (static branch).
    if Tp > t_real:
        tmask = lax.broadcasted_iota(jnp.int32, (1, Tp), 1) < t_real
        score_bias = jnp.where(tmask, 0.0, -1e30).astype(f32)       # (1, Tp)
    else:
        score_bias = None

    def attention(hidden):
        # VPU/XLU scaled dot-product attention (q = hidden, length-1 query).
        scores = jnp.sum(hidden[:, None, :] * mem_s, axis=-1)       # (Bt, Tp)
        if score_bias is not None:
            scores = scores + score_bias
        smax = jnp.max(scores, axis=-1, keepdims=True)
        sexp = jnp.exp(scores - smax)
        attw = sexp * pl.reciprocal(jnp.sum(sexp, axis=-1, keepdims=True),
                                    approx=True)                    # (Bt, Tp)
        return jnp.sum(attw[:, :, None] * mem, axis=1)               # (Bt, Ep)

    def step_core(tok, hidden, cell):
        # tok/hidden matmuls + bias are independent of attention -> issue first;
        # the VPU/XLU attention runs concurrently with these MXU pushes.
        pre = (jnp.dot(tok.astype(bf16), w_tok, preferred_element_type=f32)
               + jnp.dot(hidden.astype(bf16), w_hid, preferred_element_type=f32)
               + bias)
        ctx = attention(hidden)
        gates = pre + jnp.dot(ctx.astype(bf16), w_ctx, preferred_element_type=f32)
        i_g = jax.nn.sigmoid(gates[:, 0:hp])
        f_g = jax.nn.sigmoid(gates[:, hp:2 * hp])
        g_g = jnp.tanh(gates[:, 2 * hp:3 * hp])
        o_g = jax.nn.sigmoid(gates[:, 3 * hp:4 * hp])
        new_cell = f_g * cell + i_g * g_g
        new_hidden = o_g * jnp.tanh(new_cell)
        logits = jnp.dot(new_hidden.astype(bf16), wc,
                         preferred_element_type=f32) + bias_c        # (Bt, Vp) f32
        return new_hidden, new_cell, logits

    h0 = jnp.zeros((Bt, hp), f32)
    c0 = jnp.zeros((Bt, hp), f32)
    full_unroll = S <= 8   # small S: straight-line code; large S: fori_loop(unroll=2)

    if teacher_forcing:
        # No output softmax needed when teacher forcing: lighter body & carry.
        def step(t, carry):
            hidden, cell = carry
            tok = tgt_ref[t]
            hidden, cell, logits = step_core(tok, hidden, cell)
            out_ref[t] = logits.astype(out_ref.dtype)
            return hidden, cell

        if full_unroll:
            carry = (h0, c0)
            for t in range(S):
                carry = step(t, carry)
        else:
            lax.fori_loop(0, S, step, (h0, c0), unroll=2)
    else:
        # Only tgt[:, 0] is ever used: it is the initial "previous token".
        tok0 = tgt_ref[...].astype(f32)                               # (Bt, Vp)

        def step(t, carry):
            hidden, cell, tok = carry
            hidden, cell, logits = step_core(tok, hidden, cell)
            out_ref[t] = logits.astype(out_ref.dtype)
            # softmax(logits) feeds the next step; exact divide here so the
            # approximation error is not recycled through the recurrence.
            # Padded vocab lanes carry -1e9 logits -> exactly zero probability.
            lmax = jnp.max(logits, axis=-1, keepdims=True)
            lexp = jnp.exp(logits - lmax)
            probs = lexp / jnp.sum(lexp, axis=-1, keepdims=True)
            return hidden, cell, probs

        if full_unroll:
            carry = (h0, c0, tok0)
            for t in range(S):
                carry = step(t, carry)
        else:
            lax.fori_loop(0, S, step, (h0, c0, tok0), unroll=2)


def attention_lstm_decoder_forward(memory, tgt, params, teacher_forcing=False,
                                   block_b=128, vmem_limit_bytes=None):
    """memory: (B, T, E) f32; tgt: (B, S, V) f32. Returns (B, S, V) f32 logits.

    block_b: batch tile (rounded to a multiple of 16, clamped to the padded
    batch). For v7x, pick block_b so bp//block_b >= 2 to feed both TensorCores
    and/or halve it to respect the 64 MiB per-TC VMEM.
    """
    B, T, E = memory.shape
    S, V = tgt.shape[1], tgt.shape[2]
    H = params["w_hh"].shape[1]
    assert H == E, "scaled dot-product attention requires hidden_size == E"

    f32, bf16 = jnp.float32, jnp.bfloat16
    hp = _round_up(H, 128)          # lane-aligned gate width
    ep = _round_up(E, 128)          # == hp since H == E
    vp = _round_up(V, 128)          # lane-dense output / token width
    tp = _round_up(T, 8)            # sublane-dense f32 memory plane

    block_b = max(16, min(_round_up(block_b, 16), _round_up(B, 16)))
    bp = _round_up(B, block_b)
    nb = bp // block_b

    # --- inputs (padded) ---
    mem_p = jnp.zeros((bp, tp, ep), f32).at[:B, :T, :E].set(memory.astype(f32))

    if teacher_forcing:
        tgt_tm = jnp.transpose(tgt, (1, 0, 2)).astype(bf16)           # (S, B, V)
        tgt_in = jnp.zeros((S, bp, vp), bf16).at[:, :B, :V].set(tgt_tm)
        tgt_spec = pl.BlockSpec((S, block_b, vp), lambda i: (0, i, 0))
        s_tgt = S
    else:
        # Only tgt[:, 0] is read when not teacher forcing.
        tgt_in = jnp.zeros((bp, vp), bf16).at[:B, :V].set(tgt[:, 0].astype(bf16))
        tgt_spec = pl.BlockSpec((block_b, vp), lambda i: (i, 0))
        s_tgt = 1

    # --- split, lane-padded LSTM weights (gate order i, f, g, o) ---
    w_ih = params["w_ih"].astype(f32).reshape(4, H, E + V)
    w_hh = params["w_hh"].astype(f32).reshape(4, H, H)

    def pack(w, real_in, pad_in):
        # w: (4, H, real_in) -> (pad_in, 4*hp) bf16, column index = gate*hp + h
        wp = jnp.zeros((4, hp, pad_in), f32).at[:, :H, :real_in].set(w)
        return jnp.transpose(wp, (2, 0, 1)).reshape(pad_in, 4 * hp).astype(bf16)

    w_ctx = pack(w_ih[:, :, :E], E, ep)                                # context part
    w_tok = pack(w_ih[:, :, E:], V, vp)                                # token part
    w_hid = pack(w_hh, H, hp)                                          # hidden part

    b = (params["b_ih"] + params["b_hh"]).astype(f32).reshape(4, H)
    b_p = jnp.zeros((4, hp), f32).at[:, :H].set(b).reshape(1, 4 * hp)

    wc_p = jnp.zeros((hp, vp), bf16).at[:H, :V].set(
        jnp.transpose(params["w_c"]).astype(bf16))
    # Padded vocab lanes get a large negative bias -> zero softmax probability.
    bc_p = jnp.full((1, vp), -1e9, f32).at[0, :V].set(params["b_c"].astype(f32))

    if vmem_limit_bytes is None:
        mem_blk = block_b * tp * ep * 4
        tgt_blk = s_tgt * block_b * vp * 2
        out_blk = S * block_b * vp * 2
        w_bytes = (ep + vp + hp) * 4 * hp * 2 + hp * vp * 2 + (4 * hp + vp) * 4
        # double-buffered operands + in-kernel live copies of memory + slack
        est = 2 * (mem_blk + tgt_blk + out_blk + w_bytes) + 3 * mem_blk + (8 << 20)
        vmem_limit_bytes = int(min(max(est, 32 << 20), 100 << 20))

    kernel = functools.partial(
        _decoder_kernel, teacher_forcing=bool(teacher_forcing),
        hp=hp, vp=vp, t_real=T, scale=1.0 / math.sqrt(E))

    out_tm = pl.pallas_call(
        kernel,
        out_shape=jax.ShapeDtypeStruct((S, bp, vp), bf16),
        grid=(nb,),
        in_specs=[
            pl.BlockSpec((block_b, tp, ep), lambda i: (i, 0, 0)),      # memory
            tgt_spec,                                                  # tgt (full or t=0)
            pl.BlockSpec((ep, 4 * hp), lambda i: (0, 0)),              # W_ctx
            pl.BlockSpec((vp, 4 * hp), lambda i: (0, 0)),              # W_tok
            pl.BlockSpec((hp, 4 * hp), lambda i: (0, 0)),              # W_hid
            pl.BlockSpec((1, 4 * hp), lambda i: (0, 0)),               # gate bias
            pl.BlockSpec((hp, vp), lambda i: (0, 0)),                  # classifier W^T
            pl.BlockSpec((1, vp), lambda i: (0, 0)),                   # classifier bias
        ],
        out_specs=pl.BlockSpec((S, block_b, vp), lambda i: (0, i, 0)),
        compiler_params=pltpu.CompilerParams(
            dimension_semantics=("parallel",),
            vmem_limit_bytes=vmem_limit_bytes,
        ),
    )(mem_p, tgt_in, w_ctx, w_tok, w_hid, b_p, wc_p, bc_p)

    out = jnp.transpose(out_tm.astype(f32), (1, 0, 2))                 # (Bp, S, Vp)
    return out[:B, :, :V]


def _reference_forward(memory, tgt, params, teacher_forcing=False):
    """Pure-JAX reference mirroring the PyTorch forward (f32 attention, bf16
    weight storage with f32 accumulation, matching the kernel)."""
    B, T, E = memory.shape
    S, V = tgt.shape[1], tgt.shape[2]
    H = params["w_hh"].shape[1]
    bf16, f32 = jnp.bfloat16, jnp.float32
    mem = memory.astype(f32)
    w_ih_ctx = params["w_ih"][:, :E].astype(bf16)
    w_ih_tok = params["w_ih"][:, E:].astype(bf16)
    w_hh = params["w_hh"].astype(bf16)
    w_c = params["w_c"].astype(bf16)
    b = (params["b_ih"] + params["b_hh"]).astype(f32)
    b_c = params["b_c"].astype(f32)
    scale = 1.0 / math.sqrt(E)

    h = jnp.zeros((B, H), f32)
    c = jnp.zeros((B, H), f32)
    outs = []
    for t in range(S):
        scores = jnp.einsum("be,bte->bt", h, mem) * scale
        attw = jax.nn.softmax(scores, axis=-1)
        ctx = jnp.einsum("bt,bte->be", attw, mem)
        if teacher_forcing or t == 0:
            tok = tgt[:, t].astype(f32)
        else:
            tok = jax.nn.softmax(outs[-1], axis=-1)
        gates = (jnp.dot(ctx.astype(bf16), w_ih_ctx.T, preferred_element_type=f32)
                 + jnp.dot(tok.astype(bf16), w_ih_tok.T, preferred_element_type=f32)
                 + jnp.dot(h.astype(bf16), w_hh.T, preferred_element_type=f32)
                 + b)
        i_g = jax.nn.sigmoid(gates[:, 0:H])
        f_g = jax.nn.sigmoid(gates[:, H:2 * H])
        g_g = jnp.tanh(gates[:, 2 * H:3 * H])
        o_g = jax.nn.sigmoid(gates[:, 3 * H:4 * H])
        c = f_g * c + i_g * g_g
        h = o_g * jnp.tanh(c)
        outs.append(jnp.dot(h.astype(bf16), w_c.T, preferred_element_type=f32) + b_c)
    return jnp.stack(outs, axis=1)


if __name__ == "__main__":
    # Small deterministic shapes: B=2, T=8 (memory length), E=H=32, V=16, S=6.
    B, T, E, H, V, S = 2, 8, 32, 32, 16, 6
    key = jax.random.PRNGKey(0)
    k_mem, k_tok, k1, k2, k3, k4, k5, k6 = jax.random.split(key, 8)

    memory = jax.random.normal(k_mem, (B, T, E), dtype=jnp.float32)
    tok_ids = jax.random.randint(k_tok, (B, S), 0, V)
    tgt = jax.nn.one_hot(tok_ids, V, dtype=jnp.float32)               # (B, S, V)

    bound = 1.0 / math.sqrt(H)
    params = {
        "w_ih": jax.random.uniform(k1, (4 * H, E + V), jnp.float32, -bound, bound),
        "w_hh": jax.random.uniform(k2, (4 * H, H), jnp.float32, -bound, bound),
        "b_ih": jax.random.uniform(k3, (4 * H,), jnp.float32, -bound, bound),
        "b_hh": jax.random.uniform(k4, (4 * H,), jnp.float32, -bound, bound),
        "w_c": jax.random.uniform(k5, (V, H), jnp.float32, -bound, bound),
        "b_c": jax.random.uniform(k6, (V,), jnp.float32, -bound, bound),
    }

    out = attention_lstm_decoder_forward(memory, tgt, params, teacher_forcing=False)
    out = jax.block_until_ready(out)
    assert out.shape == (B, S, V)

    ref = _reference_forward(memory, tgt, params, teacher_forcing=False)
    diff = float(jnp.max(jnp.abs(out - ref)))
    assert jnp.allclose(out, ref, atol=2e-2, rtol=2e-2), (
        "mismatch vs reference: max abs diff = %f" % diff)

    # Also exercise the teacher-forcing path (full-tgt kernel variant).
    out_tf = attention_lstm_decoder_forward(memory, tgt, params, teacher_forcing=True)
    out_tf = jax.block_until_ready(out_tf)
    ref_tf = _reference_forward(memory, tgt, params, teacher_forcing=True)
    diff_tf = float(jnp.max(jnp.abs(out_tf - ref_tf)))
    assert jnp.allclose(out_tf, ref_tf, atol=2e-2, rtol=2e-2), (
        "TF mismatch vs reference: max abs diff = %f" % diff_tf)

    print("KERNEL_OK")
</pallas_src>

<mosaic_0001>
module attributes {stable_mosaic.version = 11 : i64} {
  func.func @_decoder_kernel(%arg0: i32, %arg1: memref<16x8x128xf32, #tpu.memory_space<vmem>>, %arg2: memref<16x128xbf16, #tpu.memory_space<vmem>>, %arg3: memref<128x512xbf16, #tpu.memory_space<vmem>>, %arg4: memref<128x512xbf16, #tpu.memory_space<vmem>>, %arg5: memref<128x512xbf16, #tpu.memory_space<vmem>>, %arg6: memref<1x512xf32, #tpu.memory_space<vmem>>, %arg7: memref<128x128xbf16, #tpu.memory_space<vmem>>, %arg8: memref<1x128xf32, #tpu.memory_space<vmem>>, %arg9: memref<6x16x128xbf16, #tpu.memory_space<vmem>>) attributes {dimension_semantics = [#tpu.dimension_semantics<parallel>], iteration_bounds = array<i64: 1>, scalar_prefetch = 0 : i64, scratch_operands = 0 : i64, tpu.core_type = #tpu.core_type<tc>, window_params = [{transform_indices = @transform_0, window_bounds = array<i64: 16, 8, 128>}, {transform_indices = @transform_1, window_bounds = array<i64: 16, 128>}, {pipeline_mode = #tpu.pipeline_mode<synchronous>, transform_indices = @transform_2, window_bounds = array<i64: 128, 512>}, {pipeline_mode = #tpu.pipeline_mode<synchronous>, transform_indices = @transform_3, window_bounds = array<i64: 128, 512>}, {pipeline_mode = #tpu.pipeline_mode<synchronous>, transform_indices = @transform_4, window_bounds = array<i64: 128, 512>}, {pipeline_mode = #tpu.pipeline_mode<synchronous>, transform_indices = @transform_5, window_bounds = array<i64: 1, 512>}, {pipeline_mode = #tpu.pipeline_mode<synchronous>, transform_indices = @transform_6, window_bounds = array<i64: 128, 128>}, {pipeline_mode = #tpu.pipeline_mode<synchronous>, transform_indices = @transform_7, window_bounds = array<i64: 1, 128>}, {transform_indices = @transform_8, window_bounds = array<i64: 6, 16, 128>}]} {
    %c0 = arith.constant 0 : index
    %c0_0 = arith.constant 0 : index
    %c0_1 = arith.constant 0 : index
    %0 = vector.load %arg1[%c0, %c0_0, %c0_1] : memref<16x8x128xf32, #tpu.memory_space<vmem>>, vector<16x8x128xf32>
    %cst = arith.constant 0.176776692 : f32
    %1 = vector.broadcast %cst : f32 to vector<16x8x128xf32>
    %2 = arith.mulf %0, %1 : vector<16x8x128xf32>
    %c0_2 = arith.constant 0 : index
    %c0_3 = arith.constant 0 : index
    %3 = vector.load %arg3[%c0_2, %c0_3] : memref<128x512xbf16, #tpu.memory_space<vmem>>, vector<128x512xbf16>
    %c0_4 = arith.constant 0 : index
    %c0_5 = arith.constant 0 : index
    %4 = vector.load %arg4[%c0_4, %c0_5] : memref<128x512xbf16, #tpu.memory_space<vmem>>, vector<128x512xbf16>
    %c0_6 = arith.constant 0 : index
    %c0_7 = arith.constant 0 : index
    %5 = vector.load %arg5[%c0_6, %c0_7] : memref<128x512xbf16, #tpu.memory_space<vmem>>, vector<128x512xbf16>
    %c0_8 = arith.constant 0 : index
    %c0_9 = arith.constant 0 : index
    %6 = vector.load %arg7[%c0_8, %c0_9] : memref<128x128xbf16, #tpu.memory_space<vmem>>, vector<128x128xbf16>
    %c0_10 = arith.constant 0 : index
    %c0_11 = arith.constant 0 : index
    %7 = vector.load %arg6[%c0_10, %c0_11] : memref<1x512xf32, #tpu.memory_space<vmem>>, vector<1x512xf32>
    %8 = vector.shape_cast %7 : vector<1x512xf32> to vector<1x512xf32>
    %9 = vector.broadcast %8 : vector<1x512xf32> to vector<16x512xf32>
    %c0_12 = arith.constant 0 : index
    %c0_13 = arith.constant 0 : index
    %10 = vector.load %arg8[%c0_12, %c0_13] : memref<1x128xf32, #tpu.memory_space<vmem>>, vector<1x128xf32>
    %11 = vector.shape_cast %10 : vector<1x128xf32> to vector<1x128xf32>
    %12 = vector.broadcast %11 : vector<1x128xf32> to vector<16x128xf32>
    %cst_14 = arith.constant 0.000000e+00 : f32
    %13 = vector.broadcast %cst_14 : f32 to vector<16x128xf32>
    %cst_15 = arith.constant 0.000000e+00 : f32
    %14 = vector.broadcast %cst_15 : f32 to vector<16x128xf32>
    %c0_16 = arith.constant 0 : index
    %c0_17 = arith.constant 0 : index
    %15 = vector.load %arg2[%c0_16, %c0_17] : memref<16x128xbf16, #tpu.memory_space<vmem>>, vector<16x128xbf16>
    %16 = arith.extf %15 : vector<16x128xbf16> to vector<16x128xf32>
    %17 = arith.truncf %16 : vector<16x128xf32> to vector<16x128xbf16>
    %cst_18 = arith.constant dense<0.000000e+00> : vector<16x512xf32>
    %18 = tpu.matmul %17, %4, %cst_18 {dimension_numbers = #tpu.dot_dimension_numbers<[1], [0], [0], [1], [0, 0, 1, 1], [], []>} : vector<16x128xbf16>, vector<128x512xbf16>, vector<16x512xf32> -> vector<16x512xf32>
    %19 = arith.truncf %13 : vector<16x128xf32> to vector<16x128xbf16>
    %cst_19 = arith.constant dense<0.000000e+00> : vector<16x512xf32>
    %20 = tpu.matmul %19, %5, %cst_19 {dimension_numbers = #tpu.dot_dimension_numbers<[1], [0], [0], [1], [0, 0, 1, 1], [], []>} : vector<16x128xbf16>, vector<128x512xbf16>, vector<16x512xf32> -> vector<16x512xf32>
    %21 = arith.addf %18, %20 : vector<16x512xf32>
    %22 = arith.addf %21, %9 : vector<16x512xf32>
    %23 = vector.shape_cast %13 : vector<16x128xf32> to vector<16x1x128xf32>
    %24 = vector.broadcast %23 : vector<16x1x128xf32> to vector<16x8x128xf32>
    %25 = arith.mulf %24, %2 : vector<16x8x128xf32>
    %cst_20 = arith.constant dense<0.000000e+00> : vector<16x8xf32>
    %26 = vector.multi_reduction <add>, %25, %cst_20 [2] : vector<16x8x128xf32> to vector<16x8xf32>
    %cst_21 = arith.constant dense<0xFF800000> : vector<16xf32>
    %27 = vector.multi_reduction <maximumf>, %26, %cst_21 [1] : vector<16x8xf32> to vector<16xf32>
    %28 = vector.shape_cast %27 : vector<16xf32> to vector<16x1xf32>
    %29 = vector.broadcast %28 : vector<16x1xf32> to vector<16x8xf32>
    %30 = arith.subf %26, %29 : vector<16x8xf32>
    %31 = math.exp %30 : vector<16x8xf32>
    %cst_22 = arith.constant dense<0.000000e+00> : vector<16xf32>
    %32 = vector.multi_reduction <add>, %31, %cst_22 [1] : vector<16x8xf32> to vector<16xf32>
    %33 = vector.shape_cast %32 : vector<16xf32> to vector<16x1xf32>
    %34 = tpu.reciprocal %33 {approx = true} : vector<16x1xf32> -> vector<16x1xf32>
    %35 = vector.broadcast %34 : vector<16x1xf32> to vector<16x8xf32>
    %36 = arith.mulf %31, %35 : vector<16x8xf32>
    %37 = vector.shape_cast %36 : vector<16x8xf32> to vector<16x8x1xf32>
    %38 = vector.broadcast %37 : vector<16x8x1xf32> to vector<16x8x128xf32>
    %39 = arith.mulf %38, %0 : vector<16x8x128xf32>
    %cst_23 = arith.constant dense<0.000000e+00> : vector<16x128xf32>
    %40 = vector.multi_reduction <add>, %39, %cst_23 [1] : vector<16x8x128xf32> to vector<16x128xf32>
    %41 = arith.truncf %40 : vector<16x128xf32> to vector<16x128xbf16>
    %cst_24 = arith.constant dense<0.000000e+00> : vector<16x512xf32>
    %42 = tpu.matmul %41, %3, %cst_24 {dimension_numbers = #tpu.dot_dimension_numbers<[1], [0], [0], [1], [0, 0, 1, 1], [], []>} : vector<16x128xbf16>, vector<128x512xbf16>, vector<16x512xf32> -> vector<16x512xf32>
    %43 = arith.addf %22, %42 : vector<16x512xf32>
    %44 = vector.extract_strided_slice %43 {offsets = [0, 0], sizes = [16, 128], strides = [1, 1]} : vector<16x512xf32> to vector<16x128xf32>
    %45 = arith.negf %44 : vector<16x128xf32>
    %46 = math.exp %45 : vector<16x128xf32>
    %cst_25 = arith.constant 1.000000e+00 : f32
    %47 = vector.broadcast %cst_25 : f32 to vector<16x128xf32>
    %48 = arith.addf %47, %46 : vector<16x128xf32>
    %49 = arith.divf %47, %48 : vector<16x128xf32>
    %50 = vector.extract_strided_slice %43 {offsets = [0, 128], sizes = [16, 128], strides = [1, 1]} : vector<16x512xf32> to vector<16x128xf32>
    %51 = arith.negf %50 : vector<16x128xf32>
    %52 = math.exp %51 : vector<16x128xf32>
    %cst_26 = arith.constant 1.000000e+00 : f32
    %53 = vector.broadcast %cst_26 : f32 to vector<16x128xf32>
    %54 = arith.addf %53, %52 : vector<16x128xf32>
    %55 = arith.divf %53, %54 : vector<16x128xf32>
    %56 = vector.extract_strided_slice %43 {offsets = [0, 256], sizes = [16, 128], strides = [1, 1]} : vector<16x512xf32> to vector<16x128xf32>
    %57 = math.tanh %56 : vector<16x128xf32>
    %58 = vector.extract_strided_slice %43 {offsets = [0, 384], sizes = [16, 128], strides = [1, 1]} : vector<16x512xf32> to vector<16x128xf32>
    %59 = arith.negf %58 : vector<16x128xf32>
    %60 = math.exp %59 : vector<16x128xf32>
    %cst_27 = arith.constant 1.000000e+00 : f32
    %61 = vector.broadcast %cst_27 : f32 to vector<16x128xf32>
    %62 = arith.addf %61, %60 : vector<16x128xf32>
    %63 = arith.divf %61, %62 : vector<16x128xf32>
    %64 = arith.mulf %55, %14 : vector<16x128xf32>
    %65 = arith.mulf %49, %57 : vector<16x128xf32>
    %66 = arith.addf %64, %65 : vector<16x128xf32>
    %67 = math.tanh %66 : vector<16x128xf32>
    %68 = arith.mulf %63, %67 : vector<16x128xf32>
    %69 = arith.truncf %68 : vector<16x128xf32> to vector<16x128xbf16>
    %cst_28 = arith.constant dense<0.000000e+00> : vector<16x128xf32>
    %70 = tpu.matmul %69, %6, %cst_28 {dimension_numbers = #tpu.dot_dimension_numbers<[1], [0], [0], [1], [0, 0, 1, 1], [], []>} : vector<16x128xbf16>, vector<128x128xbf16>, vector<16x128xf32> -> vector<16x128xf32>
    %71 = arith.addf %70, %12 : vector<16x128xf32>
    %72 = arith.truncf %71 : vector<16x128xf32> to vector<16x128xbf16>
    %c0_29 = arith.constant 0 : index
    %c0_30 = arith.constant 0 : index
    %c0_31 = arith.constant 0 : index
    %73 = vector.load %arg9[%c0_29, %c0_30, %c0_31] : memref<6x16x128xbf16, #tpu.memory_space<vmem>>, vector<1x16x128xbf16>
    %74 = vector.shape_cast %73 : vector<1x16x128xbf16> to vector<16x128xbf16>
    %75 = vector.shape_cast %72 : vector<16x128xbf16> to vector<1x16x128xbf16>
    tpu.vector_store %arg9[%c0_29, %c0_30, %c0_31], %75 {strides = array<i32>} : memref<6x16x128xbf16, #tpu.memory_space<vmem>>, vector<1x16x128xbf16>,
    %cst_32 = arith.constant dense<0xFF800000> : vector<16xf32>
    %76 = vector.multi_reduction <maximumf>, %71, %cst_32 [1] : vector<16x128xf32> to vector<16xf32>
    %77 = vector.shape_cast %76 : vector<16xf32> to vector<16x1xf32>
    %78 = vector.broadcast %77 : vector<16x1xf32> to vector<16x128xf32>
    %79 = arith.subf %71, %78 : vector<16x128xf32>
    %80 = math.exp %79 : vector<16x128xf32>
    %cst_33 = arith.constant dense<0.000000e+00> : vector<16xf32>
    %81 = vector.multi_reduction <add>, %80, %cst_33 [1] : vector<16x128xf32> to vector<16xf32>
    %82 = vector.shape_cast %81 : vector<16xf32> to vector<16x1xf32>
    %83 = vector.broadcast %82 : vector<16x1xf32> to vector<16x128xf32>
    %84 = arith.divf %80, %83 : vector<16x128xf32>
    %85 = arith.truncf %84 : vector<16x128xf32> to vector<16x128xbf16>
    %cst_34 = arith.constant dense<0.000000e+00> : vector<16x512xf32>
    %86 = tpu.matmul %85, %4, %cst_34 {dimension_numbers = #tpu.dot_dimension_numbers<[1], [0], [0], [1], [0, 0, 1, 1], [], []>} : vector<16x128xbf16>, vector<128x512xbf16>, vector<16x512xf32> -> vector<16x512xf32>
    %87 = arith.truncf %68 : vector<16x128xf32> to vector<16x128xbf16>
    %cst_35 = arith.constant dense<0.000000e+00> : vector<16x512xf32>
    %88 = tpu.matmul %87, %5, %cst_35 {dimension_numbers = #tpu.dot_dimension_numbers<[1], [0], [0], [1], [0, 0, 1, 1], [], []>} : vector<16x128xbf16>, vector<128x512xbf16>, vector<16x512xf32> -> vector<16x512xf32>
    %89 = arith.addf %86, %88 : vector<16x512xf32>
    %90 = arith.addf %89, %9 : vector<16x512xf32>
    %91 = vector.shape_cast %68 : vector<16x128xf32> to vector<16x1x128xf32>
    %92 = vector.broadcast %91 : vector<16x1x128xf32> to vector<16x8x128xf32>
    %93 = arith.mulf %92, %2 : vector<16x8x128xf32>
    %cst_36 = arith.constant dense<0.000000e+00> : vector<16x8xf32>
    %94 = vector.multi_reduction <add>, %93, %cst_36 [2] : vector<16x8x128xf32> to vector<16x8xf32>
    %cst_37 = arith.constant dense<0xFF800000> : vector<16xf32>
    %95 = vector.multi_reduction <maximumf>, %94, %cst_37 [1] : vector<16x8xf32> to vector<16xf32>
    %96 = vector.shape_cast %95 : vector<16xf32> to vector<16x1xf32>
    %97 = vector.broadcast %96 : vector<16x1xf32> to vector<16x8xf32>
    %98 = arith.subf %94, %97 : vector<16x8xf32>
    %99 = math.exp %98 : vector<16x8xf32>
    %cst_38 = arith.constant dense<0.000000e+00> : vector<16xf32>
    %100 = vector.multi_reduction <add>, %99, %cst_38 [1] : vector<16x8xf32> to vector<16xf32>
    %101 = vector.shape_cast %100 : vector<16xf32> to vector<16x1xf32>
    %102 = tpu.reciprocal %101 {approx = true} : vector<16x1xf32> -> vector<16x1xf32>
    %103 = vector.broadcast %102 : vector<16x1xf32> to vector<16x8xf32>
    %104 = arith.mulf %99, %103 : vector<16x8xf32>
    %105 = vector.shape_cast %104 : vector<16x8xf32> to vector<16x8x1xf32>
    %106 = vector.broadcast %105 : vector<16x8x1xf32> to vector<16x8x128xf32>
    %107 = arith.mulf %106, %0 : vector<16x8x128xf32>
    %cst_39 = arith.constant dense<0.000000e+00> : vector<16x128xf32>
    %108 = vector.multi_reduction <add>, %107, %cst_39 [1] : vector<16x8x128xf32> to vector<16x128xf32>
    %109 = arith.truncf %108 : vector<16x128xf32> to vector<16x128xbf16>
    %cst_40 = arith.constant dense<0.000000e+00> : vector<16x512xf32>
    %110 = tpu.matmul %109, %3, %cst_40 {dimension_numbers = #tpu.dot_dimension_numbers<[1], [0], [0], [1], [0, 0, 1, 1], [], []>} : vector<16x128xbf16>, vector<128x512xbf16>, vector<16x512xf32> -> vector<16x512xf32>
    %111 = arith.addf %90, %110 : vector<16x512xf32>
    %112 = vector.extract_strided_slice %111 {offsets = [0, 0], sizes = [16, 128], strides = [1, 1]} : vector<16x512xf32> to vector<16x128xf32>
    %113 = arith.negf %112 : vector<16x128xf32>
    %114 = math.exp %113 : vector<16x128xf32>
    %cst_41 = arith.constant 1.000000e+00 : f32
    %115 = vector.broadcast %cst_41 : f32 to vector<16x128xf32>
    %116 = arith.addf %115, %114 : vector<16x128xf32>
    %117 = arith.divf %115, %116 : vector<16x128xf32>
    %118 = vector.extract_strided_slice %111 {offsets = [0, 128], sizes = [16, 128], strides = [1, 1]} : vector<16x512xf32> to vector<16x128xf32>
    %119 = arith.negf %118 : vector<16x128xf32>
    %120 = math.exp %119 : vector<16x128xf32>
    %cst_42 = arith.constant 1.000000e+00 : f32
    %121 = vector.broadcast %cst_42 : f32 to vector<16x128xf32>
    %122 = arith.addf %121, %120 : vector<16x128xf32>
    %123 = arith.divf %121, %122 : vector<16x128xf32>
    %124 = vector.extract_strided_slice %111 {offsets = [0, 256], sizes = [16, 128], strides = [1, 1]} : vector<16x512xf32> to vector<16x128xf32>
    %125 = math.tanh %124 : vector<16x128xf32>
    %126 = vector.extract_strided_slice %111 {offsets = [0, 384], sizes = [16, 128], strides = [1, 1]} : vector<16x512xf32> to vector<16x128xf32>
    %127 = arith.negf %126 : vector<16x128xf32>
    %128 = math.exp %127 : vector<16x128xf32>
    %cst_43 = arith.constant 1.000000e+00 : f32
    %129 = vector.broadcast %cst_43 : f32 to vector<16x128xf32>
    %130 = arith.addf %129, %128 : vector<16x128xf32>
    %131 = arith.divf %129, %130 : vector<16x128xf32>
    %132 = arith.mulf %123, %66 : vector<16x128xf32>
    %133 = arith.mulf %117, %125 : vector<16x128xf32>
    %134 = arith.addf %132, %133 : vector<16x128xf32>
    %135 = math.tanh %134 : vector<16x128xf32>
    %136 = arith.mulf %131, %135 : vector<16x128xf32>
    %137 = arith.truncf %136 : vector<16x128xf32> to vector<16x128xbf16>
    %cst_44 = arith.constant dense<0.000000e+00> : vector<16x128xf32>
    %138 = tpu.matmul %137, %6, %cst_44 {dimension_numbers = #tpu.dot_dimension_numbers<[1], [0], [0], [1], [0, 0, 1, 1], [], []>} : vector<16x128xbf16>, vector<128x128xbf16>, vector<16x128xf32> -> vector<16x128xf32>
    %139 = arith.addf %138, %12 : vector<16x128xf32>
    %140 = arith.truncf %139 : vector<16x128xf32> to vector<16x128xbf16>
    %c1 = arith.constant 1 : index
    %c0_45 = arith.constant 0 : index
    %c0_46 = arith.constant 0 : index
    %141 = vector.load %arg9[%c1, %c0_45, %c0_46] : memref<6x16x128xbf16, #tpu.memory_space<vmem>>, vector<1x16x128xbf16>
    %142 = vector.shape_cast %141 : vector<1x16x128xbf16> to vector<16x128xbf16>
    %143 = vector.shape_cast %140 : vector<16x128xbf16> to vector<1x16x128xbf16>
    tpu.vector_store %arg9[%c1, %c0_45, %c0_46], %143 {strides = array<i32>} : memref<6x16x128xbf16, #tpu.memory_space<vmem>>, vector<1x16x128xbf16>,
    %cst_47 = arith.constant dense<0xFF800000> : vector<16xf32>
    %144 = vector.multi_reduction <maximumf>, %139, %cst_47 [1] : vector<16x128xf32> to vector<16xf32>
    %145 = vector.shape_cast %144 : vector<16xf32> to vector<16x1xf32>
    %146 = vector.broadcast %145 : vector<16x1xf32> to vector<16x128xf32>
    %147 = arith.subf %139, %146 : vector<16x128xf32>
    %148 = math.exp %147 : vector<16x128xf32>
    %cst_48 = arith.constant dense<0.000000e+00> : vector<16xf32>
    %149 = vector.multi_reduction <add>, %148, %cst_48 [1] : vector<16x128xf32> to vector<16xf32>
    %150 = vector.shape_cast %149 : vector<16xf32> to vector<16x1xf32>
    %151 = vector.broadcast %150 : vector<16x1xf32> to vector<16x128xf32>
    %152 = arith.divf %148, %151 : vector<16x128xf32>
    %153 = arith.truncf %152 : vector<16x128xf32> to vector<16x128xbf16>
    %cst_49 = arith.constant dense<0.000000e+00> : vector<16x512xf32>
    %154 = tpu.matmul %153, %4, %cst_49 {dimension_numbers = #tpu.dot_dimension_numbers<[1], [0], [0], [1], [0, 0, 1, 1], [], []>} : vector<16x128xbf16>, vector<128x512xbf16>, vector<16x512xf32> -> vector<16x512xf32>
    %155 = arith.truncf %136 : vector<16x128xf32> to vector<16x128xbf16>
    %cst_50 = arith.constant dense<0.000000e+00> : vector<16x512xf32>
    %156 = tpu.matmul %155, %5, %cst_50 {dimension_numbers = #tpu.dot_dimension_numbers<[1], [0], [0], [1], [0, 0, 1, 1], [], []>} : vector<16x128xbf16>, vector<128x512xbf16>, vector<16x512xf32> -> vector<16x512xf32>
    %157 = arith.addf %154, %156 : vector<16x512xf32>
    %158 = arith.addf %157, %9 : vector<16x512xf32>
    %159 = vector.shape_cast %136 : vector<16x128xf32> to vector<16x1x128xf32>
    %160 = vector.broadcast %159 : vector<16x1x128xf32> to vector<16x8x128xf32>
    %161 = arith.mulf %160, %2 : vector<16x8x128xf32>
    %cst_51 = arith.constant dense<0.000000e+00> : vector<16x8xf32>
    %162 = vector.multi_reduction <add>, %161, %cst_51 [2] : vector<16x8x128xf32> to vector<16x8xf32>
    %cst_52 = arith.constant dense<0xFF800000> : vector<16xf32>
    %163 = vector.multi_reduction <maximumf>, %162, %cst_52 [1] : vector<16x8xf32> to vector<16xf32>
    %164 = vector.shape_cast %163 : vector<16xf32> to vector<16x1xf32>
    %165 = vector.broadcast %164 : vector<16x1xf32> to vector<16x8xf32>
    %166 = arith.subf %162, %165 : vector<16x8xf32>
    %167 = math.exp %166 : vector<16x8xf32>
    %cst_53 = arith.constant dense<0.000000e+00> : vector<16xf32>
    %168 = vector.multi_reduction <add>, %167, %cst_53 [1] : vector<16x8xf32> to vector<16xf32>
    %169 = vector.shape_cast %168 : vector<16xf32> to vector<16x1xf32>
    %170 = tpu.reciprocal %169 {approx = true} : vector<16x1xf32> -> vector<16x1xf32>
    %171 = vector.broadcast %170 : vector<16x1xf32> to vector<16x8xf32>
    %172 = arith.mulf %167, %171 : vector<16x8xf32>
    %173 = vector.shape_cast %172 : vector<16x8xf32> to vector<16x8x1xf32>
    %174 = vector.broadcast %173 : vector<16x8x1xf32> to vector<16x8x128xf32>
    %175 = arith.mulf %174, %0 : vector<16x8x128xf32>
    %cst_54 = arith.constant dense<0.000000e+00> : vector<16x128xf32>
    %176 = vector.multi_reduction <add>, %175, %cst_54 [1] : vector<16x8x128xf32> to vector<16x128xf32>
    %177 = arith.truncf %176 : vector<16x128xf32> to vector<16x128xbf16>
    %cst_55 = arith.constant dense<0.000000e+00> : vector<16x512xf32>
    %178 = tpu.matmul %177, %3, %cst_55 {dimension_numbers = #tpu.dot_dimension_numbers<[1], [0], [0], [1], [0, 0, 1, 1], [], []>} : vector<16x128xbf16>, vector<128x512xbf16>, vector<16x512xf32> -> vector<16x512xf32>
    %179 = arith.addf %158, %178 : vector<16x512xf32>
    %180 = vector.extract_strided_slice %179 {offsets = [0, 0], sizes = [16, 128], strides = [1, 1]} : vector<16x512xf32> to vector<16x128xf32>
    %181 = arith.negf %180 : vector<16x128xf32>
    %182 = math.exp %181 : vector<16x128xf32>
    %cst_56 = arith.constant 1.000000e+00 : f32
    %183 = vector.broadcast %cst_56 : f32 to vector<16x128xf32>
    %184 = arith.addf %183, %182 : vector<16x128xf32>
    %185 = arith.divf %183, %184 : vector<16x128xf32>
    %186 = vector.extract_strided_slice %179 {offsets = [0, 128], sizes = [16, 128], strides = [1, 1]} : vector<16x512xf32> to vector<16x128xf32>
    %187 = arith.negf %186 : vector<16x128xf32>
    %188 = math.exp %187 : vector<16x128xf32>
    %cst_57 = arith.constant 1.000000e+00 : f32
    %189 = vector.broadcast %cst_57 : f32 to vector<16x128xf32>
    %190 = arith.addf %189, %188 : vector<16x128xf32>
    %191 = arith.divf %189, %190 : vector<16x128xf32>
    %192 = vector.extract_strided_slice %179 {offsets = [0, 256], sizes = [16, 128], strides = [1, 1]} : vector<16x512xf32> to vector<16x128xf32>
    %193 = math.tanh %192 : vector<16x128xf32>
    %194 = vector.extract_strided_slice %179 {offsets = [0, 384], sizes = [16, 128], strides = [1, 1]} : vector<16x512xf32> to vector<16x128xf32>
    %195 = arith.negf %194 : vector<16x128xf32>
    %196 = math.exp %195 : vector<16x128xf32>
    %cst_58 = arith.constant 1.000000e+00 : f32
    %197 = vector.broadcast %cst_58 : f32 to vector<16x128xf32>
    %198 = arith.addf %197, %196 : vector<16x128xf32>
    %199 = arith.divf %197, %198 : vector<16x128xf32>
    %200 = arith.mulf %191, %134 : vector<16x128xf32>
    %201 = arith.mulf %185, %193 : vector<16x128xf32>
    %202 = arith.addf %200, %201 : vector<16x128xf32>
    %203 = math.tanh %202 : vector<16x128xf32>
    %204 = arith.mulf %199, %203 : vector<16x128xf32>
    %205 = arith.truncf %204 : vector<16x128xf32> to vector<16x128xbf16>
    %cst_59 = arith.constant dense<0.000000e+00> : vector<16x128xf32>
    %206 = tpu.matmul %205, %6, %cst_59 {dimension_numbers = #tpu.dot_dimension_numbers<[1], [0], [0], [1], [0, 0, 1, 1], [], []>} : vector<16x128xbf16>, vector<128x128xbf16>, vector<16x128xf32> -> vector<16x128xf32>
    %207 = arith.addf %206, %12 : vector<16x128xf32>
    %208 = arith.truncf %207 : vector<16x128xf32> to vector<16x128xbf16>
    %c2 = arith.constant 2 : index
    %c0_60 = arith.constant 0 : index
    %c0_61 = arith.constant 0 : index
    %209 = vector.load %arg9[%c2, %c0_60, %c0_61] : memref<6x16x128xbf16, #tpu.memory_space<vmem>>, vector<1x16x128xbf16>
    %210 = vector.shape_cast %209 : vector<1x16x128xbf16> to vector<16x128xbf16>
    %211 = vector.shape_cast %208 : vector<16x128xbf16> to vector<1x16x128xbf16>
    tpu.vector_store %arg9[%c2, %c0_60, %c0_61], %211 {strides = array<i32>} : memref<6x16x128xbf16, #tpu.memory_space<vmem>>, vector<1x16x128xbf16>,
    %cst_62 = arith.constant dense<0xFF800000> : vector<16xf32>
    %212 = vector.multi_reduction <maximumf>, %207, %cst_62 [1] : vector<16x128xf32> to vector<16xf32>
    %213 = vector.shape_cast %212 : vector<16xf32> to vector<16x1xf32>
    %214 = vector.broadcast %213 : vector<16x1xf32> to vector<16x128xf32>
    %215 = arith.subf %207, %214 : vector<16x128xf32>
    %216 = math.exp %215 : vector<16x128xf32>
    %cst_63 = arith.constant dense<0.000000e+00> : vector<16xf32>
    %217 = vector.multi_reduction <add>, %216, %cst_63 [1] : vector<16x128xf32> to vector<16xf32>
    %218 = vector.shape_cast %217 : vector<16xf32> to vector<16x1xf32>
    %219 = vector.broadcast %218 : vector<16x1xf32> to vector<16x128xf32>
    %220 = arith.divf %216, %219 : vector<16x128xf32>
    %221 = arith.truncf %220 : vector<16x128xf32> to vector<16x128xbf16>
    %cst_64 = arith.constant dense<0.000000e+00> : vector<16x512xf32>
    %222 = tpu.matmul %221, %4, %cst_64 {dimension_numbers = #tpu.dot_dimension_numbers<[1], [0], [0], [1], [0, 0, 1, 1], [], []>} : vector<16x128xbf16>, vector<128x512xbf16>, vector<16x512xf32> -> vector<16x512xf32>
    %223 = arith.truncf %204 : vector<16x128xf32> to vector<16x128xbf16>
    %cst_65 = arith.constant dense<0.000000e+00> : vector<16x512xf32>
    %224 = tpu.matmul %223, %5, %cst_65 {dimension_numbers = #tpu.dot_dimension_numbers<[1], [0], [0], [1], [0, 0, 1, 1], [], []>} : vector<16x128xbf16>, vector<128x512xbf16>, vector<16x512xf32> -> vector<16x512xf32>
    %225 = arith.addf %222, %224 : vector<16x512xf32>
    %226 = arith.addf %225, %9 : vector<16x512xf32>
    %227 = vector.shape_cast %204 : vector<16x128xf32> to vector<16x1x128xf32>
    %228 = vector.broadcast %227 : vector<16x1x128xf32> to vector<16x8x128xf32>
    %229 = arith.mulf %228, %2 : vector<16x8x128xf32>
    %cst_66 = arith.constant dense<0.000000e+00> : vector<16x8xf32>
    %230 = vector.multi_reduction <add>, %229, %cst_66 [2] : vector<16x8x128xf32> to vector<16x8xf32>
    %cst_67 = arith.constant dense<0xFF800000> : vector<16xf32>
    %231 = vector.multi_reduction <maximumf>, %230, %cst_67 [1] : vector<16x8xf32> to vector<16xf32>
    %232 = vector.shape_cast %231 : vector<16xf32> to vector<16x1xf32>
    %233 = vector.broadcast %232 : vector<16x1xf32> to vector<16x8xf32>
    %234 = arith.subf %230, %233 : vector<16x8xf32>
    %235 = math.exp %234 : vector<16x8xf32>
    %cst_68 = arith.constant dense<0.000000e+00> : vector<16xf32>
    %236 = vector.multi_reduction <add>, %235, %cst_68 [1] : vector<16x8xf32> to vector<16xf32>
    %237 = vector.shape_cast %236 : vector<16xf32> to vector<16x1xf32>
    %238 = tpu.reciprocal %237 {approx = true} : vector<16x1xf32> -> vector<16x1xf32>
    %239 = vector.broadcast %238 : vector<16x1xf32> to vector<16x8xf32>
    %240 = arith.mulf %235, %239 : vector<16x8xf32>
    %241 = vector.shape_cast %240 : vector<16x8xf32> to vector<16x8x1xf32>
    %242 = vector.broadcast %241 : vector<16x8x1xf32> to vector<16x8x128xf32>
    %243 = arith.mulf %242, %0 : vector<16x8x128xf32>
    %cst_69 = arith.constant dense<0.000000e+00> : vector<16x128xf32>
    %244 = vector.multi_reduction <add>, %243, %cst_69 [1] : vector<16x8x128xf32> to vector<16x128xf32>
    %245 = arith.truncf %244 : vector<16x128xf32> to vector<16x128xbf16>
    %cst_70 = arith.constant dense<0.000000e+00> : vector<16x512xf32>
    %246 = tpu.matmul %245, %3, %cst_70 {dimension_numbers = #tpu.dot_dimension_numbers<[1], [0], [0], [1], [0, 0, 1, 1], [], []>} : vector<16x128xbf16>, vector<128x512xbf16>, vector<16x512xf32> -> vector<16x512xf32>
    %247 = arith.addf %226, %246 : vector<16x512xf32>
    %248 = vector.extract_strided_slice %247 {offsets = [0, 0], sizes = [16, 128], strides = [1, 1]} : vector<16x512xf32> to vector<16x128xf32>
    %249 = arith.negf %248 : vector<16x128xf32>
    %250 = math.exp %249 : vector<16x128xf32>
    %cst_71 = arith.constant 1.000000e+00 : f32
    %251 = vector.broadcast %cst_71 : f32 to vector<16x128xf32>
    %252 = arith.addf %251, %250 : vector<16x128xf32>
    %253 = arith.divf %251, %252 : vector<16x128xf32>
    %254 = vector.extract_strided_slice %247 {offsets = [0, 128], sizes = [16, 128], strides = [1, 1]} : vector<16x512xf32> to vector<16x128xf32>
    %255 = arith.negf %254 : vector<16x128xf32>
    %256 = math.exp %255 : vector<16x128xf32>
    %cst_72 = arith.constant 1.000000e+00 : f32
    %257 = vector.broadcast %cst_72 : f32 to vector<16x128xf32>
    %258 = arith.addf %257, %256 : vector<16x128xf32>
    %259 = arith.divf %257, %258 : vector<16x128xf32>
    %260 = vector.extract_strided_slice %247 {offsets = [0, 256], sizes = [16, 128], strides = [1, 1]} : vector<16x512xf32> to vector<16x128xf32>
    %261 = math.tanh %260 : vector<16x128xf32>
    %262 = vector.extract_strided_slice %247 {offsets = [0, 384], sizes = [16, 128], strides = [1, 1]} : vector<16x512xf32> to vector<16x128xf32>
    %263 = arith.negf %262 : vector<16x128xf32>
    %264 = math.exp %263 : vector<16x128xf32>
    %cst_73 = arith.constant 1.000000e+00 : f32
    %265 = vector.broadcast %cst_73 : f32 to vector<16x128xf32>
    %266 = arith.addf %265, %264 : vector<16x128xf32>
    %267 = arith.divf %265, %266 : vector<16x128xf32>
    %268 = arith.mulf %259, %202 : vector<16x128xf32>
    %269 = arith.mulf %253, %261 : vector<16x128xf32>
    %270 = arith.addf %268, %269 : vector<16x128xf32>
    %271 = math.tanh %270 : vector<16x128xf32>
    %272 = arith.mulf %267, %271 : vector<16x128xf32>
    %273 = arith.truncf %272 : vector<16x128xf32> to vector<16x128xbf16>
    %cst_74 = arith.constant dense<0.000000e+00> : vector<16x128xf32>
    %274 = tpu.matmul %273, %6, %cst_74 {dimension_numbers = #tpu.dot_dimension_numbers<[1], [0], [0], [1], [0, 0, 1, 1], [], []>} : vector<16x128xbf16>, vector<128x128xbf16>, vector<16x128xf32> -> vector<16x128xf32>
    %275 = arith.addf %274, %12 : vector<16x128xf32>
    %276 = arith.truncf %275 : vector<16x128xf32> to vector<16x128xbf16>
    %c3 = arith.constant 3 : index
    %c0_75 = arith.constant 0 : index
    %c0_76 = arith.constant 0 : index
    %277 = vector.load %arg9[%c3, %c0_75, %c0_76] : memref<6x16x128xbf16, #tpu.memory_space<vmem>>, vector<1x16x128xbf16>
    %278 = vector.shape_cast %277 : vector<1x16x128xbf16> to vector<16x128xbf16>
    %279 = vector.shape_cast %276 : vector<16x128xbf16> to vector<1x16x128xbf16>
    tpu.vector_store %arg9[%c3, %c0_75, %c0_76], %279 {strides = array<i32>} : memref<6x16x128xbf16, #tpu.memory_space<vmem>>, vector<1x16x128xbf16>,
    %cst_77 = arith.constant dense<0xFF800000> : vector<16xf32>
    %280 = vector.multi_reduction <maximumf>, %275, %cst_77 [1] : vector<16x128xf32> to vector<16xf32>
    %281 = vector.shape_cast %280 : vector<16xf32> to vector<16x1xf32>
    %282 = vector.broadcast %281 : vector<16x1xf32> to vector<16x128xf32>
    %283 = arith.subf %275, %282 : vector<16x128xf32>
    %284 = math.exp %283 : vector<16x128xf32>
    %cst_78 = arith.constant dense<0.000000e+00> : vector<16xf32>
    %285 = vector.multi_reduction <add>, %284, %cst_78 [1] : vector<16x128xf32> to vector<16xf32>
    %286 = vector.shape_cast %285 : vector<16xf32> to vector<16x1xf32>
    %287 = vector.broadcast %286 : vector<16x1xf32> to vector<16x128xf32>
    %288 = arith.divf %284, %287 : vector<16x128xf32>
    %289 = arith.truncf %288 : vector<16x128xf32> to vector<16x128xbf16>
    %cst_79 = arith.constant dense<0.000000e+00> : vector<16x512xf32>
    %290 = tpu.matmul %289, %4, %cst_79 {dimension_numbers = #tpu.dot_dimension_numbers<[1], [0], [0], [1], [0, 0, 1, 1], [], []>} : vector<16x128xbf16>, vector<128x512xbf16>, vector<16x512xf32> -> vector<16x512xf32>
    %291 = arith.truncf %272 : vector<16x128xf32> to vector<16x128xbf16>
    %cst_80 = arith.constant dense<0.000000e+00> : vector<16x512xf32>
    %292 = tpu.matmul %291, %5, %cst_80 {dimension_numbers = #tpu.dot_dimension_numbers<[1], [0], [0], [1], [0, 0, 1, 1], [], []>} : vector<16x128xbf16>, vector<128x512xbf16>, vector<16x512xf32> -> vector<16x512xf32>
    %293 = arith.addf %290, %292 : vector<16x512xf32>
    %294 = arith.addf %293, %9 : vector<16x512xf32>
    %295 = vector.shape_cast %272 : vector<16x128xf32> to vector<16x1x128xf32>
    %296 = vector.broadcast %295 : vector<16x1x128xf32> to vector<16x8x128xf32>
    %297 = arith.mulf %296, %2 : vector<16x8x128xf32>
    %cst_81 = arith.constant dense<0.000000e+00> : vector<16x8xf32>
    %298 = vector.multi_reduction <add>, %297, %cst_81 [2] : vector<16x8x128xf32> to vector<16x8xf32>
    %cst_82 = arith.constant dense<0xFF800000> : vector<16xf32>
    %299 = vector.multi_reduction <maximumf>, %298, %cst_82 [1] : vector<16x8xf32> to vector<16xf32>
    %300 = vector.shape_cast %299 : vector<16xf32> to vector<16x1xf32>
    %301 = vector.broadcast %300 : vector<16x1xf32> to vector<16x8xf32>
    %302 = arith.subf %298, %301 : vector<16x8xf32>
    %303 = math.exp %302 : vector<16x8xf32>
    %cst_83 = arith.constant dense<0.000000e+00> : vector<16xf32>
    %304 = vector.multi_reduction <add>, %303, %cst_83 [1] : vector<16x8xf32> to vector<16xf32>
    %305 = vector.shape_cast %304 : vector<16xf32> to vector<16x1xf32>
    %306 = tpu.reciprocal %305 {approx = true} : vector<16x1xf32> -> vector<16x1xf32>
    %307 = vector.broadcast %306 : vector<16x1xf32> to vector<16x8xf32>
    %308 = arith.mulf %303, %307 : vector<16x8xf32>
    %309 = vector.shape_cast %308 : vector<16x8xf32> to vector<16x8x1xf32>
    %310 = vector.broadcast %309 : vector<16x8x1xf32> to vector<16x8x128xf32>
    %311 = arith.mulf %310, %0 : vector<16x8x128xf32>
    %cst_84 = arith.constant dense<0.000000e+00> : vector<16x128xf32>
    %312 = vector.multi_reduction <add>, %311, %cst_84 [1] : vector<16x8x128xf32> to vector<16x128xf32>
    %313 = arith.truncf %312 : vector<16x128xf32> to vector<16x128xbf16>
    %cst_85 = arith.constant dense<0.000000e+00> : vector<16x512xf32>
    %314 = tpu.matmul %313, %3, %cst_85 {dimension_numbers = #tpu.dot_dimension_numbers<[1], [0], [0], [1], [0, 0, 1, 1], [], []>} : vector<16x128xbf16>, vector<128x512xbf16>, vector<16x512xf32> -> vector<16x512xf32>
    %315 = arith.addf %294, %314 : vector<16x512xf32>
    %316 = vector.extract_strided_slice %315 {offsets = [0, 0], sizes = [16, 128], strides = [1, 1]} : vector<16x512xf32> to vector<16x128xf32>
    %317 = arith.negf %316 : vector<16x128xf32>
    %318 = math.exp %317 : vector<16x128xf32>
    %cst_86 = arith.constant 1.000000e+00 : f32
    %319 = vector.broadcast %cst_86 : f32 to vector<16x128xf32>
    %320 = arith.addf %319, %318 : vector<16x128xf32>
    %321 = arith.divf %319, %320 : vector<16x128xf32>
    %322 = vector.extract_strided_slice %315 {offsets = [0, 128], sizes = [16, 128], strides = [1, 1]} : vector<16x512xf32> to vector<16x128xf32>
    %323 = arith.negf %322 : vector<16x128xf32>
    %324 = math.exp %323 : vector<16x128xf32>
    %cst_87 = arith.constant 1.000000e+00 : f32
    %325 = vector.broadcast %cst_87 : f32 to vector<16x128xf32>
    %326 = arith.addf %325, %324 : vector<16x128xf32>
    %327 = arith.divf %325, %326 : vector<16x128xf32>
    %328 = vector.extract_strided_slice %315 {offsets = [0, 256], sizes = [16, 128], strides = [1, 1]} : vector<16x512xf32> to vector<16x128xf32>
    %329 = math.tanh %328 : vector<16x128xf32>
    %330 = vector.extract_strided_slice %315 {offsets = [0, 384], sizes = [16, 128], strides = [1, 1]} : vector<16x512xf32> to vector<16x128xf32>
    %331 = arith.negf %330 : vector<16x128xf32>
    %332 = math.exp %331 : vector<16x128xf32>
    %cst_88 = arith.constant 1.000000e+00 : f32
    %333 = vector.broadcast %cst_88 : f32 to vector<16x128xf32>
    %334 = arith.addf %333, %332 : vector<16x128xf32>
    %335 = arith.divf %333, %334 : vector<16x128xf32>
    %336 = arith.mulf %327, %270 : vector<16x128xf32>
    %337 = arith.mulf %321, %329 : vector<16x128xf32>
    %338 = arith.addf %336, %337 : vector<16x128xf32>
    %339 = math.tanh %338 : vector<16x128xf32>
    %340 = arith.mulf %335, %339 : vector<16x128xf32>
    %341 = arith.truncf %340 : vector<16x128xf32> to vector<16x128xbf16>
    %cst_89 = arith.constant dense<0.000000e+00> : vector<16x128xf32>
    %342 = tpu.matmul %341, %6, %cst_89 {dimension_numbers = #tpu.dot_dimension_numbers<[1], [0], [0], [1], [0, 0, 1, 1], [], []>} : vector<16x128xbf16>, vector<128x128xbf16>, vector<16x128xf32> -> vector<16x128xf32>
    %343 = arith.addf %342, %12 : vector<16x128xf32>
    %344 = arith.truncf %343 : vector<16x128xf32> to vector<16x128xbf16>
    %c4 = arith.constant 4 : index
    %c0_90 = arith.constant 0 : index
    %c0_91 = arith.constant 0 : index
    %345 = vector.load %arg9[%c4, %c0_90, %c0_91] : memref<6x16x128xbf16, #tpu.memory_space<vmem>>, vector<1x16x128xbf16>
    %346 = vector.shape_cast %345 : vector<1x16x128xbf16> to vector<16x128xbf16>
    %347 = vector.shape_cast %344 : vector<16x128xbf16> to vector<1x16x128xbf16>
    tpu.vector_store %arg9[%c4, %c0_90, %c0_91], %347 {strides = array<i32>} : memref<6x16x128xbf16, #tpu.memory_space<vmem>>, vector<1x16x128xbf16>,
    %cst_92 = arith.constant dense<0xFF800000> : vector<16xf32>
    %348 = vector.multi_reduction <maximumf>, %343, %cst_92 [1] : vector<16x128xf32> to vector<16xf32>
    %349 = vector.shape_cast %348 : vector<16xf32> to vector<16x1xf32>
    %350 = vector.broadcast %349 : vector<16x1xf32> to vector<16x128xf32>
    %351 = arith.subf %343, %350 : vector<16x128xf32>
    %352 = math.exp %351 : vector<16x128xf32>
    %cst_93 = arith.constant dense<0.000000e+00> : vector<16xf32>
    %353 = vector.multi_reduction <add>, %352, %cst_93 [1] : vector<16x128xf32> to vector<16xf32>
    %354 = vector.shape_cast %353 : vector<16xf32> to vector<16x1xf32>
    %355 = vector.broadcast %354 : vector<16x1xf32> to vector<16x128xf32>
    %356 = arith.divf %352, %355 : vector<16x128xf32>
    %357 = arith.truncf %356 : vector<16x128xf32> to vector<16x128xbf16>
    %cst_94 = arith.constant dense<0.000000e+00> : vector<16x512xf32>
    %358 = tpu.matmul %357, %4, %cst_94 {dimension_numbers = #tpu.dot_dimension_numbers<[1], [0], [0], [1], [0, 0, 1, 1], [], []>} : vector<16x128xbf16>, vector<128x512xbf16>, vector<16x512xf32> -> vector<16x512xf32>
    %359 = arith.truncf %340 : vector<16x128xf32> to vector<16x128xbf16>
    %cst_95 = arith.constant dense<0.000000e+00> : vector<16x512xf32>
    %360 = tpu.matmul %359, %5, %cst_95 {dimension_numbers = #tpu.dot_dimension_numbers<[1], [0], [0], [1], [0, 0, 1, 1], [], []>} : vector<16x128xbf16>, vector<128x512xbf16>, vector<16x512xf32> -> vector<16x512xf32>
    %361 = arith.addf %358, %360 : vector<16x512xf32>
    %362 = arith.addf %361, %9 : vector<16x512xf32>
    %363 = vector.shape_cast %340 : vector<16x128xf32> to vector<16x1x128xf32>
    %364 = vector.broadcast %363 : vector<16x1x128xf32> to vector<16x8x128xf32>
    %365 = arith.mulf %364, %2 : vector<16x8x128xf32>
    %cst_96 = arith.constant dense<0.000000e+00> : vector<16x8xf32>
    %366 = vector.multi_reduction <add>, %365, %cst_96 [2] : vector<16x8x128xf32> to vector<16x8xf32>
    %cst_97 = arith.constant dense<0xFF800000> : vector<16xf32>
    %367 = vector.multi_reduction <maximumf>, %366, %cst_97 [1] : vector<16x8xf32> to vector<16xf32>
    %368 = vector.shape_cast %367 : vector<16xf32> to vector<16x1xf32>
    %369 = vector.broadcast %368 : vector<16x1xf32> to vector<16x8xf32>
    %370 = arith.subf %366, %369 : vector<16x8xf32>
    %371 = math.exp %370 : vector<16x8xf32>
    %cst_98 = arith.constant dense<0.000000e+00> : vector<16xf32>
    %372 = vector.multi_reduction <add>, %371, %cst_98 [1] : vector<16x8xf32> to vector<16xf32>
    %373 = vector.shape_cast %372 : vector<16xf32> to vector<16x1xf32>
    %374 = tpu.reciprocal %373 {approx = true} : vector<16x1xf32> -> vector<16x1xf32>
    %375 = vector.broadcast %374 : vector<16x1xf32> to vector<16x8xf32>
    %376 = arith.mulf %371, %375 : vector<16x8xf32>
    %377 = vector.shape_cast %376 : vector<16x8xf32> to vector<16x8x1xf32>
    %378 = vector.broadcast %377 : vector<16x8x1xf32> to vector<16x8x128xf32>
    %379 = arith.mulf %378, %0 : vector<16x8x128xf32>
    %cst_99 = arith.constant dense<0.000000e+00> : vector<16x128xf32>
    %380 = vector.multi_reduction <add>, %379, %cst_99 [1] : vector<16x8x128xf32> to vector<16x128xf32>
    %381 = arith.truncf %380 : vector<16x128xf32> to vector<16x128xbf16>
    %cst_100 = arith.constant dense<0.000000e+00> : vector<16x512xf32>
    %382 = tpu.matmul %381, %3, %cst_100 {dimension_numbers = #tpu.dot_dimension_numbers<[1], [0], [0], [1], [0, 0, 1, 1], [], []>} : vector<16x128xbf16>, vector<128x512xbf16>, vector<16x512xf32> -> vector<16x512xf32>
    %383 = arith.addf %362, %382 : vector<16x512xf32>
    %384 = vector.extract_strided_slice %383 {offsets = [0, 0], sizes = [16, 128], strides = [1, 1]} : vector<16x512xf32> to vector<16x128xf32>
    %385 = arith.negf %384 : vector<16x128xf32>
    %386 = math.exp %385 : vector<16x128xf32>
    %cst_101 = arith.constant 1.000000e+00 : f32
    %387 = vector.broadcast %cst_101 : f32 to vector<16x128xf32>
    %388 = arith.addf %387, %386 : vector<16x128xf32>
    %389 = arith.divf %387, %388 : vector<16x128xf32>
    %390 = vector.extract_strided_slice %383 {offsets = [0, 128], sizes = [16, 128], strides = [1, 1]} : vector<16x512xf32> to vector<16x128xf32>
    %391 = arith.negf %390 : vector<16x128xf32>
    %392 = math.exp %391 : vector<16x128xf32>
    %cst_102 = arith.constant 1.000000e+00 : f32
    %393 = vector.broadcast %cst_102 : f32 to vector<16x128xf32>
    %394 = arith.addf %393, %392 : vector<16x128xf32>
    %395 = arith.divf %393, %394 : vector<16x128xf32>
    %396 = vector.extract_strided_slice %383 {offsets = [0, 256], sizes = [16, 128], strides = [1, 1]} : vector<16x512xf32> to vector<16x128xf32>
    %397 = math.tanh %396 : vector<16x128xf32>
    %398 = vector.extract_strided_slice %383 {offsets = [0, 384], sizes = [16, 128], strides = [1, 1]} : vector<16x512xf32> to vector<16x128xf32>
    %399 = arith.negf %398 : vector<16x128xf32>
    %400 = math.exp %399 : vector<16x128xf32>
    %cst_103 = arith.constant 1.000000e+00 : f32
    %401 = vector.broadcast %cst_103 : f32 to vector<16x128xf32>
    %402 = arith.addf %401, %400 : vector<16x128xf32>
    %403 = arith.divf %401, %402 : vector<16x128xf32>
    %404 = arith.mulf %395, %338 : vector<16x128xf32>
    %405 = arith.mulf %389, %397 : vector<16x128xf32>
    %406 = arith.addf %404, %405 : vector<16x128xf32>
    %407 = math.tanh %406 : vector<16x128xf32>
    %408 = arith.mulf %403, %407 : vector<16x128xf32>
    %409 = arith.truncf %408 : vector<16x128xf32> to vector<16x128xbf16>
    %cst_104 = arith.constant dense<0.000000e+00> : vector<16x128xf32>
    %410 = tpu.matmul %409, %6, %cst_104 {dimension_numbers = #tpu.dot_dimension_numbers<[1], [0], [0], [1], [0, 0, 1, 1], [], []>} : vector<16x128xbf16>, vector<128x128xbf16>, vector<16x128xf32> -> vector<16x128xf32>
    %411 = arith.addf %410, %12 : vector<16x128xf32>
    %412 = arith.truncf %411 : vector<16x128xf32> to vector<16x128xbf16>
    %c5 = arith.constant 5 : index
    %c0_105 = arith.constant 0 : index
    %c0_106 = arith.constant 0 : index
    %413 = vector.load %arg9[%c5, %c0_105, %c0_106] : memref<6x16x128xbf16, #tpu.memory_space<vmem>>, vector<1x16x128xbf16>
    %414 = vector.shape_cast %413 : vector<1x16x128xbf16> to vector<16x128xbf16>
    %415 = vector.shape_cast %412 : vector<16x128xbf16> to vector<1x16x128xbf16>
    tpu.vector_store %arg9[%c5, %c0_105, %c0_106], %415 {strides = array<i32>} : memref<6x16x128xbf16, #tpu.memory_space<vmem>>, vector<1x16x128xbf16>,
    return
  }
  func.func @transform_0(%arg0: i32) -> (i32, i32, i32) {
    %c0_i32 = arith.constant 0 : i32
    %c0_i32_0 = arith.constant 0 : i32
    %c0_i32_1 = arith.constant 0 : i32
    return %arg0, %c0_i32, %c0_i32_0 : i32, i32, i32
  }
  func.func @transform_1(%arg0: i32) -> (i32, i32) {
    %c0_i32 = arith.constant 0 : i32
    %c0_i32_0 = arith.constant 0 : i32
    return %arg0, %c0_i32 : i32, i32
  }
  func.func @transform_2(%arg0: i32) -> (i32, i32) {
    %c0_i32 = arith.constant 0 : i32
    %c0_i32_0 = arith.constant 0 : i32
    %c0_i32_1 = arith.constant 0 : i32
    return %c0_i32, %c0_i32_0 : i32, i32
  }
  func.func @transform_3(%arg0: i32) -> (i32, i32) {
    %c0_i32 = arith.constant 0 : i32
    %c0_i32_0 = arith.constant 0 : i32
    %c0_i32_1 = arith.constant 0 : i32
    return %c0_i32, %c0_i32_0 : i32, i32
  }
  func.func @transform_4(%arg0: i32) -> (i32, i32) {
    %c0_i32 = arith.constant 0 : i32
    %c0_i32_0 = arith.constant 0 : i32
    %c0_i32_1 = arith.constant 0 : i32
    return %c0_i32, %c0_i32_0 : i32, i32
  }
  func.func @transform_5(%arg0: i32) -> (i32, i32) {
    %c0_i32 = arith.constant 0 : i32
    %c0_i32_0 = arith.constant 0 : i32
    %c0_i32_1 = arith.constant 0 : i32
    return %c0_i32, %c0_i32_0 : i32, i32
  }
  func.func @transform_6(%arg0: i32) -> (i32, i32) {
    %c0_i32 = arith.constant 0 : i32
    %c0_i32_0 = arith.constant 0 : i32
    %c0_i32_1 = arith.constant 0 : i32
    return %c0_i32, %c0_i32_0 : i32, i32
  }
  func.func @transform_7(%arg0: i32) -> (i32, i32) {
    %c0_i32 = arith.constant 0 : i32
    %c0_i32_0 = arith.constant 0 : i32
    %c0_i32_1 = arith.constant 0 : i32
    return %c0_i32, %c0_i32_0 : i32, i32
  }
  func.func @transform_8(%arg0: i32) -> (i32, i32, i32) {
    %c0_i32 = arith.constant 0 : i32
    %c0_i32_0 = arith.constant 0 : i32
    %c0_i32_1 = arith.constant 0 : i32
    return %c0_i32, %arg0, %c0_i32_0 : i32, i32, i32
  }
}

</mosaic_0001>

<bundles_post_ra>
// kernel: tpu_custom_call.1
= control target key start
LH: loop header
LB: loop body
LE: loop exit
PB: predicated region body
PF: predicated region fallthrough
CT: control target
= control target key end

     0   :  { %13 = vsyncpa [#allocation3], 0  ;;  %s13011_s0 = inlined_call_operand.hbm [shape: f32[16,8,128], index: 0, kind: input, shape index: {}]   ;;  %s13012_s1 = inlined_call_operand.hbm [shape: bf16[16,128], index: 1, kind: input, shape index: {}]   ;;  %s13013_s2 = inlined_call_operand.hbm [shape: bf16[128,512], index: 2, kind: input, shape index: {}]   ;;  %s13014_s3 = inlined_call_operand.hbm [shape: bf16[128,512], index: 3, kind: input, shape index: {}]   ;;  %s13015_s4 = inlined_call_operand.hbm [shape: bf16[128,512], index: 4, kind: input, shape index: {}]   ;;  %s13016_s5 = inlined_call_operand.vmem [shape: f32[1,512], index: 5, kind: input, shape index: {}]   ;;  %s13017_s6 = inlined_call_operand.hbm [shape: bf16[128,128], index: 6, kind: input, shape index: {}]   ;;  %s13018_s7 = inlined_call_operand.vmem [shape: f32[1,128], index: 7, kind: input, shape index: {}]   ;;  %s13019_s8 = inlined_call_operand.hbm [shape: bf16[6,16,128], index: 8, kind: output, shape index: {}]  }
   0x1   :  { %14 = vsyncpa [#allocation6], 0 }
   0x2   :  { %15 = vsyncpa [#allocation9], 0 }
   0x3   :  { %16 = vsyncpa [#allocation12], 0 }
   0x4   :  { %17 = vsyncpa [#allocation4], 0  ;;  %s10555_s27 = smov [#allocation5]  }
   0x5   :  { %s35_s28 = sshll.u32 %s10555_s27, 4  ;;  %s36_s28 = int_to_ptr.vmem [resolvable:$true] %s35_s28 }
   0x6   :  { %s10413_s29 = scalar_lea.vmem %s36_s28, 128  ;;  %p10418_p1 = scmp.lt.s32.totalorder %s36_s28, %s36_s28 }
   0x7   :  { %p10414_p0 = scmp.ne.s32.totalorder %s36_s28, %s10413_s29  ;;  %p10419_p2 = scmp.lt.s32.totalorder %s10413_s29, %s10413_s29 }
   0x9   :  { %p10420_p3 = por %p10419_p2, %p10418_p1 }
   0xb   :  { %p10421_p4 = pnand %p10420_p3, %p10414_p0 }
   0xd   :  { %10424 = shalt.err (!%p10421_p4)
}
   0xe   :  { %s10556_s30 = smov 64   ;;  %s10557_s9 = smov 4  }
   0xf   :  { %41 = dma.hbm_to_vmem [thread:$0]  %s13012_s1, 128, %s36_s28, [#allocation6], %s10556_s30, %s10556_s30, %s10557_s9  }
  0x10   :  { %s10558_s12 = smov [#allocation8]   ;;  %s10559_s14 = smov [#allocation2]  }
  0x11   :  { %s59_s13 = sshll.u32 %s10558_s12, 4  ;;  %s23_s15 = sshll.u32 %s10559_s14, 4  ;;  %s60_s13 = int_to_ptr.vmem [resolvable:$true] %s59_s13  ;;  %s24_s15 = int_to_ptr.vmem [resolvable:$true] %s23_s15 }
  0x12   :  { %s10433_s16 = scalar_lea.vmem %s60_s13, 4096  ;;  %p10438_p6 = scmp.lt.s32.totalorder %s60_s13, %s60_s13 }
  0x13   :  { %p10434_p5 = scmp.ne.s32.totalorder %s60_s13, %s10433_s16  ;;  %p10439_p7 = scmp.lt.s32.totalorder %s10433_s16, %s10433_s16 }
  0x15   :  { %p10440_p8 = por %p10439_p7, %p10438_p6 }
  0x17   :  { %p10441_p9 = pnand %p10440_p8, %p10434_p5 }
  0x19   :  { %10444 = shalt.err (!%p10441_p9)
}
  0x1a   :  { %s10560_s17 = smov 256   ;;  %s10561_s18 = smov 16  }
  0x1b   :  { %65 = dma.hbm_to_vmem [thread:$0]  %s13014_s3, 4096, %s60_s13, [#allocation9], %s10560_s17, %s10560_s17, %s10561_s18  }
  0x1c   :  { %s10453_s1 = scalar_lea.vmem %s24_s15, 2048  ;;  %p10458_p11 = scmp.lt.s32.totalorder %s24_s15, %s24_s15 }
  0x1d   :  { %p10454_p10 = scmp.ne.s32.totalorder %s24_s15, %s10453_s1  ;;  %p10459_p12 = scmp.lt.s32.totalorder %s10453_s1, %s10453_s1 }
  0x1f   :  { %p10460_p13 = por %p10459_p12, %p10458_p11 }
  0x21   :  { %p10461_p0 = pnand %p10460_p13, %p10454_p10 }
  0x23   :  { %10464 = shalt.err (!%p10461_p0)
}
  0x24   :  { %s10562_s21 = smov 128   ;;  %s10563_s22 = smov 8  }
  0x25   :  { %29 = dma.hbm_to_vmem [thread:$0]  %s13011_s0, 2048, %s24_s15, [#allocation3], %s10562_s21, %s10562_s21, %s10563_s22  }
  0x26   :  { %s10564_s25 = smov [#allocation7]   ;;  %s10565_s27 = smov [#allocation10]  }
  0x27   :  { %s47_s26 = sshll.u32 %s10564_s25, 4  ;;  %s71_s28 = sshll.u32 %s10565_s27, 4  ;;  %s48_s26 = int_to_ptr.vmem [resolvable:$true] %s47_s26  ;;  %s72_s28 = int_to_ptr.vmem [resolvable:$true] %s71_s28 }
  0x28   :  { %s10473_s3 = scalar_lea.vmem %s48_s26, 4096  ;;  %p10478_p2 = scmp.lt.s32.totalorder %s48_s26, %s48_s26 }
  0x29   :  { %p10474_p1 = scmp.ne.s32.totalorder %s48_s26, %s10473_s3  ;;  %p10479_p3 = scmp.lt.s32.totalorder %s10473_s3, %s10473_s3 }
  0x2b   :  { %p10480_p4 = por %p10479_p3, %p10478_p2 }
  0x2d   :  { %p10481_p5 = pnand %p10480_p4, %p10474_p1 }
  0x2f   :  { %10484 = shalt.err (!%p10481_p5)
}
  0x30   :  { %53 = dma.hbm_to_vmem [thread:$0]  %s13013_s2, 4096, %s48_s26, [#allocation6], %s10560_s17, %s10560_s17, %s10561_s18  }
  0x31   :  { %s10493_s0 = scalar_lea.vmem %s72_s28, 4096  ;;  %p10498_p7 = scmp.lt.s32.totalorder %s72_s28, %s72_s28 }
  0x32   :  { %p10494_p6 = scmp.ne.s32.totalorder %s72_s28, %s10493_s0  ;;  %p10499_p8 = scmp.lt.s32.totalorder %s10493_s0, %s10493_s0 }
  0x34   :  { %p10500_p9 = por %p10499_p8, %p10498_p7 }
  0x36   :  { %p10501_p10 = pnand %p10500_p9, %p10494_p6 }
  0x38   :  { %10504 = shalt.err (!%p10501_p10)
}
  0x39   :  { %77 = dma.hbm_to_vmem [thread:$0]  %s13015_s4, 4096, %s72_s28, [#allocation9], %s10560_s17, %s10560_s17, %s10561_s18  }
  0x3a   :  { %s10566_s13 = smov [#allocation11]  }
  0x3b   :  { %s85_s14 = sshll.u32 %s10566_s13, 4  ;;  %s86_s14 = int_to_ptr.vmem [resolvable:$true] %s85_s14 }
  0x3c   :  { %s10513_s15 = scalar_lea.vmem %s86_s14, 1024  ;;  %p10518_p12 = scmp.lt.s32.totalorder %s86_s14, %s86_s14 }
  0x3d   :  { %p10514_p11 = scmp.ne.s32.totalorder %s86_s14, %s10513_s15  ;;  %p10519_p13 = scmp.lt.s32.totalorder %s10513_s15, %s10513_s15 }
  0x3f   :  { %p10520_p0 = por %p10519_p13, %p10518_p12 }
  0x41   :  { %p10521_p1 = pnand %p10520_p0, %p10514_p11 }
  0x43   :  { %10524 = shalt.err (!%p10521_p1)
}
  0x44   :  { %91 = dma.hbm_to_vmem [thread:$0]  %s13017_s6, 1024, %s86_s14, [#allocation12], %s10556_s30, %s10556_s30, %s10557_s9  }
  0x45   :  { %10545 = dma.done.wait [#allocation3], 2048  }
  0x46   :  { %10546 = vsyncadd [#allocation3], 4294965248 }
  0x47   :  { %10547 = dma.done.wait [#allocation6], 4224  }
  0x48   :  { %10548 = vsyncadd [#allocation6], 4294963072 }
  0x49   :  { %10549 = dma.done.wait [#allocation9], 8192  }
  0x4a   :  { %10550 = vsyncadd [#allocation9], 4294959104 }
  0x4b   :  { %10551 = dma.done.wait [#allocation12], 1024  }
  0x4c   :  { %10552 = vsyncadd [#allocation12], 4294966272  ;;  %v121_v0 = vld [vmem:[#allocation2 + $0x40] sm:$0xff]  ;;  %v122_v2 = vld [vmem:[#allocation2 + $0x48] sm:$0xff]  ;;  %v259_v54 = vlaneseq  ;;  %vm924_vm0 = vcmask 1041409   ;;  %vm926_vm1 = vcmask 1042434  }
  0x4d   :  { %v113_v1 = vld [vmem:[#allocation2] sm:$0xff]  ;;  %v10650_v3 = vmul.f32 0.17677669, %v121_v0  ;;  %v10654_v5 = vmul.f32 0.17677669, %v122_v2  ;;  %v114_v6 = vld [vmem:[#allocation2 + $0x8] sm:$0xff] }
  0x4e   :  { %v10652_v4 = vmul.f32 0.17677669, %v113_v1  ;;  %v123_v7 = vld [vmem:[#allocation2 + $0x50] sm:$0xff]  ;;  %v10658_v11 = vmul.f32 0.17677669, %v114_v6  ;;  %v124_v16 = vld [vmem:[#allocation2 + $0x58] sm:$0xff] }
  0x4f   :  { %13083 = vst [vmem:[#allocation19_spill] sm:$0xff] %v10650_v3  ;;  %13085 = vst [vmem:[#allocation21_spill] sm:$0xff] %v10654_v5  ;;  %v115_v8 = vld [vmem:[#allocation2 + $0x10] sm:$0xff]  ;;  %v802_v9 = vmul.f32 0.0, %v10650_v3  ;;  %v803_v12 = vmul.f32 0.0, %v10654_v5  ;;  %v116_v17 = vld [vmem:[#allocation2 + $0x18] sm:$0xff] }
  0x50   :  { %13084 = vst [vmem:[#allocation20_spill] sm:$0xff] %v10652_v4  ;;  %v794_v10 = vmul.f32 0.0, %v10652_v4  ;;  %13086 = vst [vmem:[#allocation22_spill] sm:$0xff] %v10658_v11  ;;  %v795_v13 = vmul.f32 0.0, %v10658_v11  ;;  %v10662_v14 = vmul.f32 0.17677669, %v123_v7 }
  0x51   :  { %826 = vadd.xlane.f32.xlu1 %v802_v9  ;;  %v10664_v15 = vmul.f32 0.17677669, %v115_v8  ;;  %v10666_v18 = vmul.f32 0.17677669, %v124_v16  ;;  %v10670_v21 = vmul.f32 0.17677669, %v116_v17 }
  0x52   :  { %810 = vadd.xlane.f32.xlu0 %v794_v10  ;;  %13087 = vst [vmem:[#allocation23_spill] sm:$0xff] %v10662_v14  ;;  %v804_v19 = vmul.f32 0.0, %v10662_v14  ;;  %v125_v22 = vld [vmem:[#allocation2 + $0x60] sm:$0xff]  ;;  %v126_v26 = vld [vmem:[#allocation2 + $0x68] sm:$0xff]  ;;  %v127_v30 = vld [vmem:[#allocation2 + $0x70] sm:$0xff]  ;;  %v10714_v57 = vshrl.u32 %v259_v54, 7 }
  0x53   :  { %13088 = vst [vmem:[#allocation24_spill] sm:$0xff] %v10664_v15  ;;  %13089 = vst [vmem:[#allocation25_spill] sm:$0xff] %v10666_v18  ;;  %v796_v20 = vmul.f32 0.0, %v10664_v15  ;;  %v117_v23 = vld [vmem:[#allocation2 + $0x20] sm:$0xff]  ;;  %v805_v24 = vmul.f32 0.0, %v10666_v18  ;;  %v118_v27 = vld [vmem:[#allocation2 + $0x28] sm:$0xff] }
  0x54   :  { %13090 = vst [vmem:[#allocation26_spill] sm:$0xff] %v10670_v21  ;;  %v10673_v25 = vmul.f32 0.17677669, %v125_v22  ;;  %v797_v28 = vmul.f32 0.0, %v10670_v21  ;;  %v10676_v29 = vmul.f32 0.17677669, %v117_v23 }
  0x55   :  { %828 = vadd.xlane.f32.xlu1 %v803_v12  ;;  %v10679_v32 = vmul.f32 0.17677669, %v126_v26  ;;  %v119_v33 = vld [vmem:[#allocation2 + $0x30] sm:$0xff]  ;;  %v10682_v35 = vmul.f32 0.17677669, %v118_v27  ;;  %v128_v36 = vld [vmem:[#allocation2 + $0x78] sm:$0xff] }
  0x56   :  { %812 = vadd.xlane.f32.xlu0 %v795_v13  ;;  %13091 = vst [vmem:[#allocation27_spill] sm:$0xff] %v10673_v25  ;;  %13092 = vst [vmem:[#allocation28_spill] sm:$0xff] %v10676_v29  ;;  %v806_v31 = vmul.f32 0.0, %v10673_v25  ;;  %v798_v34 = vmul.f32 0.0, %v10676_v29  ;;  %v10685_v38 = vmul.f32 0.17677669, %v127_v30 }
  0x57   :  { %13093 = vst [vmem:[#allocation29_spill] sm:$0xff] %v10679_v32  ;;  %13094 = vst [vmem:[#allocation30_spill] sm:$0xff] %v10682_v35  ;;  %v807_v37 = vmul.f32 0.0, %v10679_v32  ;;  %v120_v39 = vld [vmem:[#allocation2 + $0x38] sm:$0xff]  ;;  %v799_v40 = vmul.f32 0.0, %v10682_v35  ;;  %v859_v58 = vand.u32 127, %v259_v54 }
  0x58   :  { %13095 = vst [vmem:[#allocation31_spill] sm:$0xff] %v10685_v38  ;;  %v10688_v41 = vmul.f32 0.17677669, %v119_v33  ;;  %v808_v42 = vmul.f32 0.0, %v10685_v38  ;;  %v10691_v43 = vmul.f32 0.17677669, %v128_v36 }
  0x59   :  { %830 = vadd.xlane.f32.xlu1 %v804_v19  ;;  %v10694_v45 = vmul.f32 0.17677669, %v120_v39  ;;  %13099 = vst [vmem:[#allocation35_spill] sm:$0xff] %v10714_v57  ;;  %v10721_v61 = vsub.s32 %v859_v58, %v10714_v57  ;;  %vm928_vm2 = vcmask 1043459   ;;  %vm930_vm3 = vcmask 1044484   ;;  %s10571_s25 = smov [#allocation13]  }
  0x5a   :  { %814 = vadd.xlane.f32.xlu0 %v796_v20  ;;  %13096 = vst [vmem:[#allocation32_spill] sm:$0xff] %v10688_v41  ;;  %13097 = vst [vmem:[#allocation33_spill] sm:$0xff] %v10691_v43  ;;  %v800_v44 = vmul.f32 0.0, %v10688_v41  ;;  %v809_v46 = vmul.f32 0.0, %v10691_v43  ;;  %vm932_vm4 = vcmask 1045509   ;;  %vm934_vm5 = vcmask 1046534  }
  0x5b   :  { %13098 = vst [vmem:[#allocation34_spill] sm:$0xff] %v10694_v45  ;;  %v801_v47 = vmul.f32 0.0, %v10694_v45  ;;  %13100 = vst [vmem:[#allocation36_spill] sm:$0xff] %v10721_v61  ;;  %vm936_vm6 = vcmask 1047559   ;;  %vm947_vm7 = vcmask 64512   ;;  %v13108_v38 = vmov 0  }
  0x5c   :  { %v9260_v43 = vld [vmem:[#allocation10 + $0x8] ss:$16 sps:$4 sm:$0xff]   ;;  %v9264_v45 = vld [vmem:[#allocation8 + $0xec] ss:$16 sps:$4 sm:$0xff]   ;;  %v9249_v35 = vld [vmem:[#allocation8 + $0xa4] ss:$16 sps:$4 sm:$0xff]  }
  0x5d   :  { %832 = vadd.xlane.f32.xlu1 %v805_v24  ;;  %v9266_v41 = vld [vmem:[#allocation8 + $0xe8] ss:$16 sps:$4 sm:$0xff]   ;;  %v9270_v32 = vld [vmem:[#allocation8 + $0xcc] ss:$16 sps:$4 sm:$0xff]   ;;  %v9261_v21 = vld [vmem:[#allocation8 + $0x64] ss:$16 sps:$4 sm:$0xff]  }
  0x5e   :  { %816 = vadd.xlane.f32.xlu0 %v797_v28  ;;  %v9276_v18 = vld [vmem:[#allocation8 + $0xac] ss:$16 sps:$4 sm:$0xff]   ;;  %v9284_v25 = vld [vmem:[#allocation8 + $0x88] ss:$16 sps:$4 sm:$0xff]   ;;  %vm10569_vm8 = vmmov 0   ;;  %s8797_s26 = sshll.u32 %s10571_s25, 4  ;;  %s8798_s26 = int_to_ptr.vmem [resolvable:$true] %s8797_s26 }
  0x5f   :  { %v9286_v3 = vld [vmem:[#allocation8 + $0x6c] ss:$16 sps:$4 sm:$0xff]   ;;  %s10525_s3 = scalar_lea.vmem %s8798_s26, 768  ;;  %p10530_p3 = scmp.lt.s32.totalorder %s8798_s26, %s8798_s26 }
  0x60   :  { %p10526_p2 = scmp.ne.s32.totalorder %s8798_s26, %s10525_s3  ;;  %p10531_p4 = scmp.lt.s32.totalorder %s10525_s3, %s10525_s3 }
  0x61   :  { %834 = vadd.xlane.f32.xlu1 %v806_v31 }
  0x62   :  { %818 = vadd.xlane.f32.xlu0 %v798_v34  ;;  %p10532_p5 = por %p10531_p4, %p10530_p3 }
  0x64   :  { %p10533_p6 = pnand %p10532_p5, %p10526_p2 }
  0x65   :  { %836 = vadd.xlane.f32.xlu1 %v807_v37 }
  0x66   :  { %820 = vadd.xlane.f32.xlu0 %v799_v40 }
  0x69   :  { %838 = vadd.xlane.f32.xlu1 %v808_v42 }
  0x6a   :  { %822 = vadd.xlane.f32.xlu0 %v800_v44 }
  0x6d   :  { %840 = vadd.xlane.f32.xlu1 %v809_v46 }
  0x6e   :  { %824 = vadd.xlane.f32.xlu0 %v801_v47 }
  0xda   :  { %v10698_v48 = vpop.xlane.xlu1 %826 }
  0xdb   :  { %v10700_v49 = vpop.xlane.xlu0 %810  ;;  %v895_v0 = vrot.slane %v10698_v48, %v10721_v61 }
  0xdc   :  { %v863_v8 = vrot.slane %v10700_v49, %v10721_v61 }
  0xde   :  { %v10702_v50 = vpop.xlane.xlu1 %828 }
  0xdf   :  { %v10704_v51 = vpop.xlane.xlu0 %812  ;;  %v899_v1 = vrot.slane %v10702_v50, %v10721_v61 }
  0xe0   :  { %v867_v2 = vrot.slane %v10704_v51, %v10721_v61 }
  0xe1   :  { %v938_v19 = vsel %vm924_vm0, %v899_v1, %v895_v0 }
  0xe2   :  { %v10706_v52 = vpop.xlane.xlu1 %830  ;;  %v925_v20 = vsel %vm924_vm0, %v867_v2, %v863_v8  ;;  %v13020_v2 = vmov 0  }
  0xe3   :  { %v10708_v53 = vpop.xlane.xlu0 %814  ;;  %v903_v6 = vrot.slane %v10706_v52, %v10721_v61  ;;  %9200 = vset.pattern.permute.xlu1 %v13020_v2  ;;  %9199 = vset.pattern.permute.xlu0 %v13020_v2 }
  0xe4   :  { %v871_v7 = vrot.slane %v10708_v53, %v10721_v61  ;;  %480 = vmatprep.mubr.bf16.mxu0 %v13020_v2  ;;  %523 = vmatprep.mubr.bf16.mxu1 %v13020_v2 }
  0xe5   :  { %v939_v24 = vsel %vm926_vm1, %v903_v6, %v938_v19  ;;  %v10785_v6 = vsub.s32 0, %v10714_v57  ;;  %v10800_v19 = vsub.s32 5, %v10714_v57 }
  0xe6   :  { %v10710_v55 = vpop.xlane.xlu1 %832  ;;  %v927_v26 = vsel %vm926_vm1, %v871_v7, %v925_v20  ;;  %v10788_v7 = vsub.s32 1, %v10714_v57 }
  0xe7   :  { %v10712_v56 = vpop.xlane.xlu0 %816  ;;  %v907_v9 = vrot.slane %v10710_v55, %v10721_v61  ;;  %13103 = vst [vmem:[#allocation39_spill] sm:$0xff] %v10800_v19 }
  0xe8   :  { %v875_v10 = vrot.slane %v10712_v56, %v10721_v61  ;;  %13101 = vst [vmem:[#allocation37_spill] sm:$0xff] %v10788_v7 }
  0xe9   :  { %v940_v30 = vsel %vm928_vm2, %v907_v9, %v939_v24  ;;  %v10793_v9 = vsub.s32 4, %v10714_v57 }
  0xea   :  { %v10716_v59 = vpop.xlane.xlu1 %834  ;;  %v929_v31 = vsel %vm928_vm2, %v875_v10, %v927_v26  ;;  %v10807_v26 = vsub.s32 2, %v10714_v57 }
  0xeb   :  { %v10718_v60 = vpop.xlane.xlu0 %818  ;;  %v911_v12 = vrot.slane %v10716_v59, %v10721_v61  ;;  %13102 = vst [vmem:[#allocation38_spill] sm:$0xff] %v10793_v9 }
  0xec   :  { %v879_v13 = vrot.slane %v10718_v60, %v10721_v61  ;;  %13104 = vst [vmem:[#allocation40_spill] sm:$0xff] %v10807_v26 }
  0xed   :  { %v941_v33 = vsel %vm930_vm3, %v911_v12, %v940_v30 }
  0xee   :  { %v10723_v62 = vpop.xlane.xlu1 %836  ;;  %v931_v34 = vsel %vm930_vm3, %v879_v13, %v929_v31 }
  0xef   :  { %v10725_v63 = vpop.xlane.xlu0 %820  ;;  %v915_v22 = vrot.slane %v10723_v62, %v10721_v61 }
  0xf0   :  { %v883_v23 = vrot.slane %v10725_v63, %v10721_v61 }
  0xf1   :  { %v942_v42 = vsel %vm932_vm4, %v915_v22, %v941_v33 }
  0xf2   :  { %v10747_v16 = vpop.xlane.xlu1 %838  ;;  %v933_v44 = vsel %vm932_vm4, %v883_v23, %v931_v34 }
  0xf3   :  { %v10749_v17 = vpop.xlane.xlu0 %822  ;;  %v919_v27 = vrot.slane %v10747_v16, %v10721_v61 }
  0xf4   :  { %v887_v28 = vrot.slane %v10749_v17, %v10721_v61 }
  0xf5   :  { %v943_v46 = vsel %vm934_vm5, %v919_v27, %v942_v42  ;;  %v10810_v27 = vsub.s32 6, %v10714_v57 }
  0xf6   :  { %v841_v36 = vpop.xlane.xlu1 %840  ;;  %v935_v47 = vsel %vm934_vm5, %v887_v28, %v933_v44 }
  0xf7   :  { %v10767_v37 = vpop.xlane.xlu0 %824  ;;  %v923_v39 = vrot.slane %v841_v36, %v10721_v61  ;;  %13105 = vst [vmem:[#allocation41_spill] sm:$0xff] %v10810_v27 }
  0xf8   :  { %v891_v40 = vrot.slane %v10767_v37, %v10721_v61 }
  0xf9   :  { %v944_v54 = vsel %vm936_vm6, %v923_v39, %v943_v46 }
  0xfa   :  { %v937_v58 = vsel %vm936_vm6, %v891_v40, %v935_v47  ;;  %v951_v0 = vsel %vm947_vm7, %v944_v54, -inf }
  0xfb   :  { %v948_v1 = vsel %vm947_vm7, %v937_v58, -inf  ;;  %952 = vmax.xlane.f32.xlu1 %v951_v0 }
  0xfc   :  { %949 = vmax.xlane.f32.xlu0 %v948_v1 }
 0x184   :  { %v953_v10 = vpop.xlane.xlu1 %952 }
 0x185   :  { %v10790_v8 = vpop.xlane.xlu0 %949  ;;  %v1007_v20 = vrot.slane %v953_v10, %v10793_v9  ;;  %v991_v22 = vrot.slane %v953_v10, %v10785_v6  ;;  %v1011_v28 = vrot.slane %v953_v10, %v10800_v19  ;;  %v995_v31 = vrot.slane %v953_v10, %v10788_v7 }
 0x186   :  { %v959_v12 = vrot.slane %v10790_v8, %v10785_v6  ;;  %v963_v13 = vrot.slane %v10790_v8, %v10788_v7 }
 0x187   :  { %v1048_v30 = vsub.f32 %v10716_v59, %v1007_v20  ;;  %v1044_v33 = vsub.f32 %v10698_v48, %v991_v22  ;;  %v1049_v40 = vsub.f32 %v10723_v62, %v1011_v28  ;;  %v1045_v44 = vsub.f32 %v10702_v50, %v995_v31 }
 0x188   :  { %v1036_v23 = vsub.f32 %v10700_v49, %v959_v12  ;;  %v1037_v24 = vsub.f32 %v10704_v51, %v963_v13  ;;  %v10817_v49 = vsub.s32 7, %v10714_v57  ;;  %v1015_v51 = vrot.slane %v953_v10, %v10810_v27 }
 0x189   :  { %v1076_v42 = vmul.f32 1.442695, %v1048_v30  ;;  %v1068_v46 = vmul.f32 1.442695, %v1044_v33  ;;  %v967_v59 = vrot.slane %v10790_v8, %v10807_v26  ;;  %v10825_v48 = vsub.s32 3, %v10714_v57 }
 0x18a   :  { %v1052_v34 = vmul.f32 1.442695, %v1036_v23  ;;  %v1054_v39 = vmul.f32 1.442695, %v1037_v24  ;;  %13106 = vst [vmem:[#allocation42_spill] sm:$0xff] %v10817_v49  ;;  %v1019_v47 = vrot.slane %v953_v10, %v10817_v49  ;;  %v1050_v54 = vsub.f32 %v10747_v16, %v1015_v51 }
 0x18b   :  { %13107 = vst [vmem:[#allocation43_spill] sm:$0xff] %v10825_v48  ;;  %v1078_v58 = vmul.f32 1.442695, %v1049_v40  ;;  %v999_v62 = vrot.slane %v953_v10, %v10807_v26  ;;  %v1070_v0 = vmul.f32 1.442695, %v1045_v44  ;;  %v1038_v50 = vsub.f32 %v10708_v53, %v967_v59 }
 0x18c   :  { %9354 = vpow2.f32 %v1052_v34  ;;  %v1051_v1 = vsub.f32 %v841_v36, %v1019_v47  ;;  %v1080_v12 = vmul.f32 1.442695, %v1050_v54  ;;  %v971_v20 = vrot.slane %v10790_v8, %v10825_v48 }
 0x18d   :  { %9356 = vpow2.f32 %v1054_v39  ;;  %v1046_v13 = vsub.f32 %v10706_v52, %v999_v62  ;;  %v1056_v22 = vmul.f32 1.442695, %v1038_v50  ;;  %v1003_v24 = vrot.slane %v953_v10, %v10825_v48 }
 0x18e   :  { %9358 = vpow2.f32 %v1076_v42  ;;  %v1082_v16 = vmul.f32 1.442695, %v1051_v1  ;;  %v1039_v30 = vsub.f32 %v10712_v56, %v971_v20  ;;  %v975_v31 = vrot.slane %v10790_v8, %v10793_v9 }
 0x18f   :  { %9360 = vpow2.f32 %v1068_v46  ;;  %v1072_v28 = vmul.f32 1.442695, %v1046_v13  ;;  %v1047_v36 = vsub.f32 %v10710_v55, %v1003_v24  ;;  %v979_v39 = vrot.slane %v10790_v8, %v10800_v19 }
 0x190   :  { %9362 = vpow2.f32 %v1078_v58  ;;  %v1058_v10 = vmul.f32 1.442695, %v1039_v30  ;;  %v1040_v51 = vsub.f32 %v10718_v60, %v975_v31  ;;  %v983_v42 = vrot.slane %v10790_v8, %v10810_v27 }
 0x191   :  { %9364 = vpow2.f32 %v1070_v0  ;;  %v1074_v34 = vmul.f32 1.442695, %v1047_v36  ;;  %v1041_v44 = vsub.f32 %v10725_v63, %v979_v39  ;;  %v987_v47 = vrot.slane %v10790_v8, %v10817_v49 }
 0x192   :  { %9366 = vpow2.f32 %v1080_v12  ;;  %v1060_v46 = vmul.f32 1.442695, %v1040_v51  ;;  %v1042_v54 = vsub.f32 %v10749_v17, %v983_v42 }
 0x193   :  { %9368 = vpow2.f32 %v1056_v22  ;;  %v1062_v58 = vmul.f32 1.442695, %v1041_v44  ;;  %v1043_v63 = vsub.f32 %v10767_v37, %v987_v47 }
 0x194   :  { %9370 = vpow2.f32 %v1082_v16  ;;  %v1064_v0 = vmul.f32 1.442695, %v1042_v54 }
 0x195   :  { %9372 = vpow2.f32 %v1072_v28  ;;  %v1066_v8 = vmul.f32 1.442695, %v1043_v63 }
 0x196   :  { %9374 = vpow2.f32 %v1058_v10 }
 0x197   :  { %9376 = vpow2.f32 %v1074_v34 }
 0x198   :  { %9378 = vpow2.f32 %v1060_v46 }
 0x199   :  { %v10834_v23 = vpop.eup %9354  ;;  %9380 = vpow2.f32 %v1062_v58 }
 0x19a   :  { %v10838_v53 = vpop.eup %9356  ;;  %1101 = vperm.xlu0 %9199, %v10834_v23   ;;  %9382 = vpow2.f32 %v1064_v0 }
 0x19b   :  { %1104 = vperm.xlu1 %9200, %v10838_v53   ;;  %v10842_v52 = vpop.eup %9358  ;;  %9384 = vpow2.f32 %v1066_v8 }
 0x19c   :  { %v10847_v33 = vpop.eup %9360 }
 0x19d   :  { %v10851_v56 = vpop.eup %9362 }
 0x19e   :  { %1137 = vperm.xlu0 %9199, %v10842_v52   ;;  %v10856_v55 = vpop.eup %9364 }
 0x19f   :  { %1125 = vperm.xlu1 %9200, %v10847_v33   ;;  %v10860_v40 = vpop.eup %9366 }
 0x1a0   :  { %v10865_v59 = vpop.eup %9368 }
 0x1a1   :  { %v10869_v60 = vpop.eup %9370 }
 0x1a2   :  { %1140 = vperm.xlu0 %9199, %v10851_v56   ;;  %v10874_v62 = vpop.eup %9372 }
 0x1a3   :  { %1128 = vperm.xlu1 %9200, %v10856_v55   ;;  %v10879_v50 = vpop.eup %9374 }
 0x1a4   :  { %v10882_v1 = vpop.eup %9376 }
 0x1a5   :  { %v10885_v17 = vpop.eup %9378 }
 0x1a6   :  { %1143 = vperm.xlu0 %9199, %v10860_v40   ;;  %v10888_v12 = vpop.eup %9380 }
 0x1a7   :  { %1107 = vperm.xlu1 %9200, %v10865_v59   ;;  %v10891_v37 = vpop.eup %9382 }
 0x1a8   :  { %v10894_v13 = vpop.eup %9384 }
 0x1aa   :  { %1146 = vperm.xlu0 %9199, %v10869_v60  }
 0x1ab   :  { %1131 = vperm.xlu1 %9200, %v10874_v62  }
 0x1af   :  { %1110 = vperm.xlu1 %9200, %v10879_v50  }
 0x1b3   :  { %1134 = vperm.xlu1 %9200, %v10882_v1  }
 0x1b7   :  { %1113 = vperm.xlu1 %9200, %v10885_v17  }
 0x1bb   :  { %1116 = vperm.xlu1 %9200, %v10888_v12  }
 0x1bf   :  { %1119 = vperm.xlu1 %9200, %v10891_v37  }
 0x1c3   :  { %1122 = vperm.xlu1 %9200, %v10894_v13  }
 0x215   :  { %v1102_v22 = vpop.permute.xlu0 %1101 }
 0x216   :  { %v1105_v20 = vpop.permute.xlu1 %1104 }
 0x219   :  { %v1138_v24 = vpop.permute.xlu0 %1137 }
 0x21a   :  { %v1126_v16 = vpop.permute.xlu1 %1125  ;;  %v1199_v54 = vrot.slane %v1138_v24, %v10721_v61 }
 0x21b   :  { %v1183_v42 = vrot.slane %v1126_v16, %v10721_v61 }
 0x21d   :  { %v1141_v36 = vpop.permute.xlu0 %1140 }
 0x21e   :  { %v1129_v28 = vpop.permute.xlu1 %1128  ;;  %v1203_v0 = vrot.slane %v1141_v36, %v10721_v61  ;;  %v1155_v36 = vrot.slane %v1105_v20, %v10721_v61 }
 0x21f   :  { %v1187_v39 = vrot.slane %v1129_v28, %v10721_v61 }
 0x221   :  { %v1144_v10 = vpop.permute.xlu0 %1143  ;;  %v1219_v46 = vsel %vm924_vm0, %v1187_v39, %v1183_v42 }
 0x222   :  { %v1108_v30 = vpop.permute.xlu1 %1107  ;;  %v1207_v28 = vrot.slane %v1144_v10, %v10721_v61 }
 0x223   :  { %v1159_v10 = vrot.slane %v1108_v30, %v10721_v61 }
 0x225   :  { %v1147_v63 = vpop.permute.xlu0 %1146 }
 0x226   :  { %v1132_v31 = vpop.permute.xlu1 %1131  ;;  %v1211_v16 = vrot.slane %v1147_v63, %v10721_v61 }
 0x227   :  { %v1191_v51 = vrot.slane %v1132_v31, %v10721_v61 }
 0x229   :  { %v1220_v58 = vsel %vm926_vm1, %v1191_v51, %v1219_v46  ;;  %v1151_v46 = vrot.slane %v1102_v22, %v10721_v61 }
 0x22a   :  { %v1111_v34 = vpop.permute.xlu1 %1110 }
 0x22b   :  { %v1212_v63 = vsel %vm924_vm0, %v1155_v36, %v1151_v46  ;;  %v10939_v36 = vld [vmem:[#allocation10 + $0xec] ss:$16 sps:$4 sm:$0xff]   ;;  %v9218_v46 = vld [vmem:[#allocation10 + $0xe8] ss:$16 sps:$4 sm:$0xff]  }
 0x22c   :  { %491 = vmatprep.subr.bf16.mxu1 %v10939_v36 }
 0x22d   :  { %492 = vmatpush1.bf16.msra.mxu1 %v9218_v46  ;;  %v9246_v46 = vld [vmem:[#allocation10 + $0x4c] ss:$16 sps:$4 sm:$0xff]  }
 0x22e   :  { %v1135_v44 = vpop.permute.xlu1 %1134 }
 0x22f   :  { %v1195_v47 = vrot.slane %v1135_v44, %v10721_v61 }
 0x231   :  { %v1221_v8 = vsel %vm928_vm2, %v1195_v47, %v1220_v58  ;;  %v1163_v47 = vrot.slane %v1111_v34, %v10721_v61 }
 0x232   :  { %v1114_v2 = vpop.permute.xlu1 %1113  ;;  %v1222_v31 = vsel %vm930_vm3, %v1199_v54, %v1221_v8  ;;  %v1213_v8 = vsel %vm926_vm1, %v1159_v10, %v1212_v63  ;;  %v10942_v10 = vld [vmem:[#allocation10 + $0xa4] ss:$16 sps:$4 sm:$0xff]   ;;  %v9228_v63 = vld [vmem:[#allocation10 + $0xac] ss:$16 sps:$4 sm:$0xff]  }
 0x233   :  { %v1223_v39 = vsel %vm932_vm4, %v1203_v0, %v1222_v31  ;;  %v1167_v54 = vrot.slane %v1114_v2, %v10721_v61  ;;  %v1214_v20 = vsel %vm928_vm2, %v1163_v47, %v1213_v8  ;;  %v9222_v47 = vld [vmem:[#allocation10 + $0xcc] ss:$16 sps:$4 sm:$0xff]   ;;  %v9230_v8 = vld [vmem:[#allocation10 + $0xa8] ss:$16 sps:$4 sm:$0xff]  }
 0x234   :  { %v1224_v42 = vsel %vm934_vm5, %v1207_v28, %v1223_v39  ;;  %493 = vmatprep.subr.bf16.mxu1 %v9222_v47  ;;  %v10967_v47 = vld [vmem:[#allocation10 + $0x24] ss:$16 sps:$4 sm:$0xff]  }
 0x235   :  { %v1225_v24 = vsel %vm936_vm6, %v1211_v16, %v1224_v42  ;;  %v1215_v22 = vsel %vm930_vm3, %v1167_v54, %v1214_v20  ;;  %v10929_v42 = vld [vmem:[#allocation10 + $0xe4] ss:$16 sps:$4 sm:$0xff]   ;;  %v9224_v54 = vld [vmem:[#allocation10 + $0xc8] ss:$16 sps:$4 sm:$0xff]   ;;  %v9234_v20 = vld [vmem:[#allocation10 + $0x8c] ss:$16 sps:$4 sm:$0xff]  }
 0x236   :  { %v1117_v44 = vpop.permute.xlu1 %1116  ;;  %v1231_v51 = vsel %vm947_vm7, %v1225_v24, 0.0  ;;  %v10931_v24 = vld [vmem:[#allocation10 + $0xe0] ss:$16 sps:$4 sm:$0xff]   ;;  %448 = vmatprep.subr.bf16.mxu0 %v10929_v42  ;;  %494 = vmatpush1.bf16.msra.mxu1 %v9224_v54  ;;  %v9248_v54 = vld [vmem:[#allocation10 + $0x48] ss:$16 sps:$4 sm:$0xff]  }
 0x237   :  { %1232 = vadd.xlane.f32.xlu0 %v1231_v51  ;;  %v1171_v0 = vrot.slane %v1117_v44, %v10721_v61  ;;  %v10933_v44 = vld [vmem:[#allocation10 + $0xc4] ss:$16 sps:$4 sm:$0xff]   ;;  %449 = vmatpush1.bf16.msra.mxu0 %v10931_v24  ;;  %v10937_v51 = vld [vmem:[#allocation10 + $0xc0] ss:$16 sps:$4 sm:$0xff]  }
 0x238   :  { %450 = vmatprep.subr.bf16.mxu0 %v10933_v44  ;;  %495 = vmatprep.subr.bf16.mxu1 %v9228_v63  ;;  %v10970_v63 = vld [vmem:[#allocation10 + $0x20] ss:$16 sps:$4 sm:$0xff]  }
 0x239   :  { %v1216_v34 = vsel %vm932_vm4, %v1171_v0, %v1215_v22  ;;  %v10949_v0 = vld [vmem:[#allocation10 + $0x84] ss:$16 sps:$4 sm:$0xff]  }
 0x23a   :  { %v1120_v58 = vpop.permute.xlu1 %1119  ;;  %v10955_v22 = vld [vmem:[#allocation10 + $0x64] ss:$16 sps:$4 sm:$0xff]   ;;  %496 = vmatpush1.bf16.msra.mxu1 %v9230_v8  ;;  %v9252_v8 = vld [vmem:[#allocation10 + $0x2c] ss:$16 sps:$4 sm:$0xff]  }
 0x23b   :  { %v1175_v28 = vrot.slane %v1120_v58, %v10721_v61  ;;  %451 = vmatpush1.bf16.msra.mxu0 %v10937_v51  ;;  %v10946_v58 = vld [vmem:[#allocation10 + $0xa0] ss:$16 sps:$4 sm:$0xff]   ;;  %497 = vmatprep.subr.bf16.mxu1 %v9234_v20  ;;  %v10973_v20 = vld [vmem:[#allocation10 + $0x4] ss:$16 sps:$4 sm:$0xff]  }
 0x23c   :  { %452 = vmatprep.subr.bf16.mxu0 %v10942_v10 }
 0x23d   :  { %v1217_v2 = vsel %vm934_vm5, %v1175_v28, %v1216_v34  ;;  %v10952_v28 = vld [vmem:[#allocation10 + $0x80] ss:$16 sps:$4 sm:$0xff]   ;;  %v9240_v34 = vld [vmem:[#allocation10 + $0x6c] ss:$16 sps:$4 sm:$0xff]  }
 0x23e   :  { %v1123_v31 = vpop.permute.xlu1 %1122 }
 0x23f   :  { %v1179_v30 = vrot.slane %v1123_v31, %v10721_v61  ;;  %453 = vmatpush1.bf16.msra.mxu0 %v10946_v58  ;;  %v9236_v31 = vld [vmem:[#allocation10 + $0x88] ss:$16 sps:$4 sm:$0xff]   ;;  %v9258_v61 = vld [vmem:[#allocation10 + $0xc] ss:$16 sps:$4 sm:$0xff]  }
 0x240   :  { %454 = vmatprep.subr.bf16.mxu0 %v10949_v0  ;;  %498 = vmatpush1.bf16.msra.mxu1 %v9236_v31  ;;  %v9254_v31 = vld [vmem:[#allocation10 + $0x28] ss:$16 sps:$4 sm:$0xff]  }
 0x241   :  { %v1218_v16 = vsel %vm936_vm6, %v1179_v30, %v1217_v2  ;;  %v10958_v30 = vld [vmem:[#allocation10 + $0x60] ss:$16 sps:$4 sm:$0xff]   ;;  %v10961_v2 = vld [vmem:[#allocation10 + $0x44] ss:$16 sps:$4 sm:$0xff]   ;;  %499 = vmatprep.subr.bf16.mxu1 %v9240_v34 }
 0x242   :  { %v1228_v39 = vsel %vm947_vm7, %v1218_v16, 0.0  ;;  %v9242_v16 = vld [vmem:[#allocation10 + $0x68] ss:$16 sps:$4 sm:$0xff]   ;;  %v10976_v34 = vld [vmem:[#allocation10] ss:$16 sps:$4 sm:$0xff]  }
 0x243   :  { %1229 = vadd.xlane.f32.xlu1 %v1228_v39  ;;  %455 = vmatpush1.bf16.msra.mxu0 %v10952_v28  ;;  %v10964_v39 = vld [vmem:[#allocation10 + $0x40] ss:$16 sps:$4 sm:$0xff]  }
 0x244   :  { %456 = vmatprep.subr.bf16.mxu0 %v10955_v22  ;;  %500 = vmatpush1.bf16.msra.mxu1 %v9242_v16  ;;  %v10979_v16 = vld [vmem:[#allocation8 + $0xe4] ss:$16 sps:$4 sm:$0xff]  }
 0x245   :  { %501 = vmatprep.subr.bf16.mxu1 %v9246_v46  ;;  %v9239_v46 = vld [vmem:[#allocation8 + $0xe0] ss:$16 sps:$4 sm:$0xff]  }
 0x247   :  { %457 = vmatpush1.bf16.msra.mxu0 %v10958_v30 }
 0x248   :  { %458 = vmatprep.subr.bf16.mxu0 %v10961_v2  ;;  %502 = vmatpush1.bf16.msra.mxu1 %v9248_v54  ;;  %v9243_v54 = vld [vmem:[#allocation8 + $0xc4] ss:$16 sps:$4 sm:$0xff]  }
 0x249   :  { %503 = vmatprep.subr.bf16.mxu1 %v9252_v8  ;;  %v9245_v8 = vld [vmem:[#allocation8 + $0xc0] ss:$16 sps:$4 sm:$0xff]  }
 0x24b   :  { %459 = vmatpush1.bf16.msra.mxu0 %v10964_v39 }
 0x24c   :  { %460 = vmatprep.subr.bf16.mxu0 %v10967_v47  ;;  %504 = vmatpush1.bf16.msra.mxu1 %v9254_v31  ;;  %v9251_v31 = vld [vmem:[#allocation8 + $0xa0] ss:$16 sps:$4 sm:$0xff]  }
 0x24d   :  { %505 = vmatprep.subr.bf16.mxu1 %v9258_v61  ;;  %v9272_v61 = vld [vmem:[#allocation8 + $0xc8] ss:$16 sps:$4 sm:$0xff]  }
 0x24f   :  { %461 = vmatpush1.bf16.msra.mxu0 %v10970_v63 }
 0x250   :  { %462 = vmatprep.subr.bf16.mxu0 %v10973_v20  ;;  %506 = vmatpush1.bf16.msra.mxu1 %v9260_v43  ;;  %v9255_v43 = vld [vmem:[#allocation8 + $0x84] ss:$16 sps:$4 sm:$0xff]  }
 0x251   :  { %743 = vmatprep.subr.bf16.mxu1 %v9264_v45  ;;  %v9257_v45 = vld [vmem:[#allocation8 + $0x80] ss:$16 sps:$4 sm:$0xff]  }
 0x253   :  { %463 = vmatpush1.bf16.msra.mxu0 %v10976_v34  ;;  %524 = vmatmul.mubr.bf16.vlgmr.msra.gmra.mxu1 %v13108_v38 }
 0x254   :  { %700 = vmatprep.subr.bf16.mxu0 %v10979_v16  ;;  %744 = vmatpush1.bf16.msra.mxu1 %v9266_v41  ;;  %v9263_v41 = vld [vmem:[#allocation8 + $0x60] ss:$16 sps:$4 sm:$0xff]  }
 0x255   :  { %775 = vmatprep.mubr.bf16.mxu1 %v13108_v38  ;;  %745 = vmatprep.subr.bf16.mxu1 %v9270_v32  ;;  %v9288_v32 = vld [vmem:[#allocation8 + $0x68] ss:$16 sps:$4 sm:$0xff]  }
 0x256   :  { %481 = vmatmul.mubr.bf16.vlgmr.msra.gmra.mxu0 %v13108_v38 }
 0x257   :  { %701 = vmatpush1.bf16.msra.mxu0 %v9239_v46  ;;  %732 = vmatprep.mubr.bf16.mxu0 %v13108_v38  ;;  %v9278_v46 = vld [vmem:[#allocation8 + $0xa8] ss:$16 sps:$4 sm:$0xff]  }
 0x258   :  { %702 = vmatprep.subr.bf16.mxu0 %v9243_v54  ;;  %746 = vmatpush1.bf16.msra.mxu1 %v9272_v61  ;;  %v9282_v54 = vld [vmem:[#allocation8 + $0x8c] ss:$16 sps:$4 sm:$0xff]  }
 0x259   :  { %747 = vmatprep.subr.bf16.mxu1 %v9276_v18  ;;  %v9289_v61 = vld [vmem:[#allocation8 + $0x4c] ss:$16 sps:$4 sm:$0xff]   ;;  %v9291_v18 = vld [vmem:[#allocation8 + $0x48] ss:$16 sps:$4 sm:$0xff]  }
 0x25b   :  { %703 = vmatpush1.bf16.msra.mxu0 %v9245_v8  ;;  %v9267_v8 = vld [vmem:[#allocation8 + $0x44] ss:$16 sps:$4 sm:$0xff]  }
 0x25c   :  { %704 = vmatprep.subr.bf16.mxu0 %v9249_v35  ;;  %748 = vmatpush1.bf16.msra.mxu1 %v9278_v46  ;;  %v9269_v35 = vld [vmem:[#allocation8 + $0x40] ss:$16 sps:$4 sm:$0xff]   ;;  %v9292_v46 = vld [vmem:[#allocation8 + $0x2c] ss:$16 sps:$4 sm:$0xff]  }
 0x25d   :  { %749 = vmatprep.subr.bf16.mxu1 %v9282_v54  ;;  %v9294_v54 = vld [vmem:[#allocation8 + $0x28] ss:$16 sps:$4 sm:$0xff]  }
 0x25f   :  { %705 = vmatpush1.bf16.msra.mxu0 %v9251_v31  ;;  %v9273_v31 = vld [vmem:[#allocation8 + $0x24] ss:$16 sps:$4 sm:$0xff]  }
 0x260   :  { %706 = vmatprep.subr.bf16.mxu0 %v9255_v43  ;;  %750 = vmatpush1.bf16.msra.mxu1 %v9284_v25  ;;  %v9275_v43 = vld [vmem:[#allocation8 + $0x20] ss:$16 sps:$4 sm:$0xff]   ;;  %v9295_v25 = vld [vmem:[#allocation8 + $0xc] ss:$16 sps:$4 sm:$0xff]  }
 0x261   :  { %751 = vmatprep.subr.bf16.mxu1 %v9286_v3  ;;  %v9297_v3 = vld [vmem:[#allocation8 + $0x8] ss:$16 sps:$4 sm:$0xff]  }
 0x263   :  { %707 = vmatpush1.bf16.msra.mxu0 %v9257_v45  ;;  %v9279_v45 = vld [vmem:[#allocation8 + $0x4] ss:$16 sps:$4 sm:$0xff]  }
 0x264   :  { %708 = vmatprep.subr.bf16.mxu0 %v9261_v21  ;;  %752 = vmatpush1.bf16.msra.mxu1 %v9288_v32  ;;  %v9281_v21 = vld [vmem:[#allocation8] ss:$16 sps:$4 sm:$0xff]  }
 0x265   :  { %753 = vmatprep.subr.bf16.mxu1 %v9289_v61 }
 0x267   :  { %709 = vmatpush1.bf16.msra.mxu0 %v9263_v41  ;;  %v9285_v41 = vld [vmem:[#allocation5] sm:$0xff]  }
 0x268   :  { %710 = vmatprep.subr.bf16.mxu0 %v9267_v8  ;;  %754 = vmatpush1.bf16.msra.mxu1 %v9291_v18 }
 0x269   :  { %755 = vmatprep.subr.bf16.mxu1 %v9292_v46 }
 0x26b   :  { %711 = vmatpush1.bf16.msra.mxu0 %v9269_v35 }
 0x26c   :  { %712 = vmatprep.subr.bf16.mxu0 %v9273_v31  ;;  %756 = vmatpush1.bf16.msra.mxu1 %v9294_v54 }
 0x26d   :  { %757 = vmatprep.subr.bf16.mxu1 %v9295_v25 }
 0x26f   :  { %713 = vmatpush1.bf16.msra.mxu0 %v9275_v43 }
 0x270   :  { %714 = vmatprep.subr.bf16.mxu0 %v9279_v45  ;;  %758 = vmatpush1.bf16.msra.mxu1 %v9297_v3 }
 0x273   :  { %715 = vmatpush1.bf16.msra.mxu0 %v9281_v21  ;;  %776 = vmatmul.mubr.bf16.vlgmr.msra.gmra.mxu1 %v9285_v41 }
 0x274   :  { %1825 = vmatprep.mubr.bf16.mxu1 %v13108_v38 }
 0x276   :  { %733 = vmatmul.mubr.bf16.vlgmr.msra.gmra.mxu0 %v9285_v41 }
 0x277   :  { %1782 = vmatprep.mubr.bf16.mxu0 %v13108_v38 }
 0x2c0   :  { %v1233_v8 = vpop.xlane.xlu0 %1232 }
 0x2c1   :  { %9386 = vrcp.f32 %v1233_v8 }
 0x2cc   :  { %v1230_v32 = vpop.xlane.xlu1 %1229 }
 0x2cd   :  { %9388 = vrcp.f32 %v1230_v32 }
 0x2ce   :  { %v10989_v35 = vpop.eup %9386 }
 0x2cf   :  { %v1277_v45 = vrot.slane %v10989_v35, %v10788_v7  ;;  %v1273_v54 = vrot.slane %v10989_v35, %v10785_v6  ;;  %v1281_v41 = vrot.slane %v10989_v35, %v10807_v26  ;;  %v1285_v8 = vrot.slane %v10989_v35, %v10825_v48 }
 0x2d1   :  { %v1327_v21 = vmul.f32 %v10856_v55, %v1277_v45  ;;  %v1326_v25 = vmul.f32 %v10847_v33, %v1273_v54  ;;  %v1329_v33 = vmul.f32 %v10882_v1, %v1285_v8  ;;  %v9308_v8 = vld [vmem:[#allocation7 + $0xc0] ss:$16 sps:$4 sm:$0xff]  }
 0x2da   :  { %v10991_v61 = vpop.eup %9388 }
 0x2db   :  { %v1245_v31 = vrot.slane %v10991_v61, %v10788_v7  ;;  %v1241_v18 = vrot.slane %v10991_v61, %v10785_v6  ;;  %v1253_v55 = vrot.slane %v10991_v61, %v10825_v48  ;;  %v1261_v1 = vrot.slane %v10991_v61, %v10800_v19 }
 0x2dd   :  { %v1319_v43 = vmul.f32 %v10838_v53, %v1245_v31  ;;  %v1318_v46 = vmul.f32 %v10834_v23, %v1241_v18  ;;  %v1249_v53 = vrot.slane %v10991_v61, %v10807_v26  ;;  %v1328_v23 = vmul.f32 %v10874_v62, %v1281_v41  ;;  %v9304_v41 = vld [vmem:[#allocation7 + $0xc4] ss:$16 sps:$4 sm:$0xff]  }
 0x2de   :  { %v1321_v32 = vmul.f32 %v10879_v50, %v1253_v55  ;;  %v1289_v31 = vrot.slane %v10989_v35, %v10793_v9  ;;  %v1257_v62 = vrot.slane %v10991_v61, %v10793_v9  ;;  %v9298_v50 = vld [vmem:[#allocation7 + $0xe4] ss:$16 sps:$4 sm:$0xff]   ;;  %v1323_v54 = vmul.f32 %v10888_v12, %v1261_v1  ;;  %v9309_v55 = vld [vmem:[#allocation7 + $0xc8] ss:$16 sps:$4 sm:$0xff]   ;;  %v9326_v1 = vld [vmem:[#allocation7 + $0x60] ss:$16 sps:$4 sm:$0xff]  }
 0x2df   :  { %1341 = vperm.xlu1 %9200, %v1319_v43   ;;  %1336 = vperm.xlu0 %9199, %v1318_v46   ;;  %v1320_v3 = vmul.f32 %v10865_v59, %v1249_v53  ;;  %v1293_v43 = vrot.slane %v10989_v35, %v10800_v19  ;;  %v9300_v46 = vld [vmem:[#allocation7 + $0xec] ss:$16 sps:$4 sm:$0xff]  }
 0x2e0   :  { %v1330_v59 = vmul.f32 %v10842_v52, %v1289_v31  ;;  %v1322_v18 = vmul.f32 %v10885_v17, %v1257_v62  ;;  %v1265_v52 = vrot.slane %v10991_v61, %v10810_v27  ;;  %v9302_v17 = vld [vmem:[#allocation7 + $0xe0] ss:$16 sps:$4 sm:$0xff]   ;;  %1750 = vmatprep.subr.bf16.mxu0 %v9298_v50  ;;  %1793 = vmatprep.subr.bf16.mxu1 %v9300_v46  ;;  %v9306_v53 = vld [vmem:[#allocation7 + $0xcc] ss:$16 sps:$4 sm:$0xff]   ;;  %v9315_v62 = vld [vmem:[#allocation7 + $0xa8] ss:$16 sps:$4 sm:$0xff]  }
 0x2e1   :  { %v1331_v45 = vmul.f32 %v10851_v56, %v1293_v43  ;;  %1751 = vmatpush1.bf16.msra.mxu0 %v9302_v17  ;;  %v9314_v31 = vld [vmem:[#allocation7 + $0xa0] ss:$16 sps:$4 sm:$0xff]   ;;  %v9322_v43 = vld [vmem:[#allocation7 + $0x64] ss:$16 sps:$4 sm:$0xff]   ;;  %v9330_v46 = vld [vmem:[#allocation7 + $0x4c] ss:$16 sps:$4 sm:$0xff]  }
 0x2e2   :  { %v1324_v12 = vmul.f32 %v10891_v37, %v1265_v52  ;;  %1752 = vmatprep.subr.bf16.mxu0 %v9304_v41  ;;  %v9328_v50 = vld [vmem:[#allocation7 + $0x44] ss:$16 sps:$4 sm:$0xff]   ;;  %v9336_v52 = vld [vmem:[#allocation7 + $0x2c] ss:$16 sps:$4 sm:$0xff]   ;;  %v9338_v17 = vld [vmem:[#allocation7 + $0x20] ss:$16 sps:$4 sm:$0xff]  }
 0x2e3   :  { %1381 = vperm.xlu0 %9199, %v1327_v21   ;;  %1376 = vperm.xlu1 %9200, %v1326_v25   ;;  %v1297_v21 = vrot.slane %v10989_v35, %v10810_v27  ;;  %v9303_v25 = vld [vmem:[#allocation7 + $0xe8] ss:$16 sps:$4 sm:$0xff]   ;;  %v9340_v41 = vld [vmem:[#allocation7 + $0x4] ss:$16 sps:$4 sm:$0xff]  }
 0x2e4   :  { %1794 = vmatpush1.bf16.msra.mxu1 %v9303_v25  ;;  %v9339_v25 = vld [vmem:[#allocation7 + $0x28] ss:$16 sps:$4 sm:$0xff]  }
 0x2e5   :  { %v1332_v56 = vmul.f32 %v10860_v40, %v1297_v21  ;;  %1795 = vmatprep.subr.bf16.mxu1 %v9306_v53  ;;  %1753 = vmatpush1.bf16.msra.mxu0 %v9308_v8  ;;  %v9334_v21 = vld [vmem:[#allocation7 + $0x24] ss:$16 sps:$4 sm:$0xff]   ;;  %v9342_v53 = vld [vmem:[#allocation7 + $0xc] ss:$16 sps:$4 sm:$0xff]  }
 0x2e6   :  { %v9802_v8 = vld [vmem:[#allocation2 + $0x8] sm:$0xff]  ;;  %v9811_v27 = vld [vmem:[#allocation2 + $0x60] sm:$0xff] }
 0x2e7   :  { %1386 = vperm.xlu0 %9199, %v1328_v23   ;;  %1346 = vperm.xlu1 %9200, %v1320_v3   ;;  %v1301_v23 = vrot.slane %v10989_v35, %v10817_v49  ;;  %v1269_v3 = vrot.slane %v10991_v61, %v10817_v49  ;;  %v9316_v35 = vld [vmem:[#allocation7 + $0x84] ss:$16 sps:$4 sm:$0xff]   ;;  %v9318_v61 = vld [vmem:[#allocation7 + $0x8c] ss:$16 sps:$4 sm:$0xff]  }
 0x2e8   :  { %1796 = vmatpush1.bf16.msra.mxu1 %v9309_v55 }
 0x2e9   :  { %v1333_v40 = vmul.f32 %v10869_v60, %v1301_v23  ;;  %v1325_v37 = vmul.f32 %v10894_v13, %v1269_v3  ;;  %v9324_v60 = vld [vmem:[#allocation7 + $0x6c] ss:$16 sps:$4 sm:$0xff]   ;;  %v9327_v13 = vld [vmem:[#allocation7 + $0x68] ss:$16 sps:$4 sm:$0xff]  }
 0x2eb   :  { %1391 = vperm.xlu0 %9199, %v1329_v33   ;;  %1351 = vperm.xlu1 %9200, %v1321_v32   ;;  %v9310_v33 = vld [vmem:[#allocation7 + $0xa4] ss:$16 sps:$4 sm:$0xff]   ;;  %v9312_v32 = vld [vmem:[#allocation7 + $0xac] ss:$16 sps:$4 sm:$0xff]  }
 0x2ec   :  { %1754 = vmatprep.subr.bf16.mxu0 %v9310_v33  ;;  %1797 = vmatprep.subr.bf16.mxu1 %v9312_v32  ;;  %v9803_v33 = vld [vmem:[#allocation2] sm:$0xff] }
 0x2ed   :  { %1755 = vmatpush1.bf16.msra.mxu0 %v9314_v31  ;;  %1798 = vmatpush1.bf16.msra.mxu1 %v9315_v62 }
 0x2ee   :  { %1756 = vmatprep.subr.bf16.mxu0 %v9316_v35  ;;  %1799 = vmatprep.subr.bf16.mxu1 %v9318_v61 }
 0x2ef   :  { %1396 = vperm.xlu0 %9199, %v1330_v59   ;;  %1356 = vperm.xlu1 %9200, %v1322_v18   ;;  %v9320_v59 = vld [vmem:[#allocation7 + $0x80] ss:$16 sps:$4 sm:$0xff]   ;;  %v9321_v18 = vld [vmem:[#allocation7 + $0x88] ss:$16 sps:$4 sm:$0xff]  }
 0x2f1   :  { %1757 = vmatpush1.bf16.msra.mxu0 %v9320_v59  ;;  %1800 = vmatpush1.bf16.msra.mxu1 %v9321_v18  ;;  %v9804_v59 = vld [vmem:[#allocation2 + $0x40] sm:$0xff] }
 0x2f2   :  { %1758 = vmatprep.subr.bf16.mxu0 %v9322_v43  ;;  %1801 = vmatprep.subr.bf16.mxu1 %v9324_v60  ;;  %v9805_v43 = vld [vmem:[#allocation2 + $0x48] sm:$0xff] }
 0x2f3   :  { %1401 = vperm.xlu0 %9199, %v1331_v45   ;;  %1361 = vperm.xlu1 %9200, %v1323_v54   ;;  %v9332_v45 = vld [vmem:[#allocation7 + $0x40] ss:$16 sps:$4 sm:$0xff]   ;;  %v9333_v54 = vld [vmem:[#allocation7 + $0x48] ss:$16 sps:$4 sm:$0xff]  }
 0x2f5   :  { %1759 = vmatpush1.bf16.msra.mxu0 %v9326_v1  ;;  %1802 = vmatpush1.bf16.msra.mxu1 %v9327_v13 }
 0x2f6   :  { %1760 = vmatprep.subr.bf16.mxu0 %v9328_v50  ;;  %1803 = vmatprep.subr.bf16.mxu1 %v9330_v46 }
 0x2f7   :  { %1406 = vperm.xlu0 %9199, %v1332_v56   ;;  %1366 = vperm.xlu1 %9200, %v1324_v12   ;;  %v9344_v56 = vld [vmem:[#allocation7] ss:$16 sps:$4 sm:$0xff]   ;;  %v9345_v12 = vld [vmem:[#allocation7 + $0x8] ss:$16 sps:$4 sm:$0xff]  }
 0x2f9   :  { %1761 = vmatpush1.bf16.msra.mxu0 %v9332_v45  ;;  %1804 = vmatpush1.bf16.msra.mxu1 %v9333_v54 }
 0x2fa   :  { %1762 = vmatprep.subr.bf16.mxu0 %v9334_v21  ;;  %1805 = vmatprep.subr.bf16.mxu1 %v9336_v52  ;;  %v9806_v52 = vld [vmem:[#allocation2 + $0x10] sm:$0xff] }
 0x2fb   :  { %1411 = vperm.xlu0 %9199, %v1333_v40   ;;  %1371 = vperm.xlu1 %9200, %v1325_v37  }
 0x2fd   :  { %1763 = vmatpush1.bf16.msra.mxu0 %v9338_v17  ;;  %1806 = vmatpush1.bf16.msra.mxu1 %v9339_v25  ;;  %v9807_v25 = vld [vmem:[#allocation2 + $0x50] sm:$0xff] }
 0x2fe   :  { %1764 = vmatprep.subr.bf16.mxu0 %v9340_v41  ;;  %1807 = vmatprep.subr.bf16.mxu1 %v9342_v53 }
 0x301   :  { %1765 = vmatpush1.bf16.msra.mxu0 %v9344_v56  ;;  %1808 = vmatpush1.bf16.msra.mxu1 %v9345_v12 }
 0x302   :  { %2011 = vmatprep.subr.bf16.mxu1 %v10929_v42 }
 0x35a   :  { %v1342_v23 = vpop.permute.xlu1 %1341  ;;  %v1337_v3 = vpop.permute.xlu0 %1336 }
 0x35b   :  { %v1415_v55 = vmul.f32 %v9802_v8, %v1342_v23  ;;  %v1414_v32 = vmul.f32 %v9803_v33, %v1337_v3 }
 0x35d   :  { %v1436_v40 = vrot.slane %v1415_v55, 4  ;;  %v1430_v37 = vrot.slane %v1414_v32, 4 }
 0x35e   :  { %v1377_v31 = vpop.permute.xlu1 %1376  ;;  %v1382_v62 = vpop.permute.xlu0 %1381 }
 0x35f   :  { %v1437_v35 = vadd.f32 %v1436_v40, %v1415_v55  ;;  %v1431_v61 = vadd.f32 %v1430_v37, %v1414_v32  ;;  %v1422_v18 = vmul.f32 %v9804_v59, %v1377_v31  ;;  %v1423_v60 = vmul.f32 %v9805_v43, %v1382_v62  ;;  %v9808_v40 = vld [vmem:[#allocation2 + $0x18] sm:$0xff] }
 0x360   :  { %v9809_v31 = vld [vmem:[#allocation2 + $0x58] sm:$0xff] }
 0x361   :  { %v1438_v1 = vrot.slane %v1437_v35, 2  ;;  %v1432_v13 = vrot.slane %v1431_v61, 2  ;;  %v1478_v50 = vrot.slane %v1422_v18, 4  ;;  %v1484_v42 = vrot.slane %v1423_v60, 4 }
 0x362   :  { %v1347_v46 = vpop.permute.xlu1 %1346  ;;  %v1387_v45 = vpop.permute.xlu0 %1386 }
 0x363   :  { %v1479_v54 = vadd.f32 %v1478_v50, %v1422_v18  ;;  %v1485_v21 = vadd.f32 %v1484_v42, %v1423_v60  ;;  %v1416_v17 = vmul.f32 %v9806_v52, %v1347_v46  ;;  %v1424_v41 = vmul.f32 %v9807_v25, %v1387_v45  ;;  %v9810_v52 = vld [vmem:[#allocation2 + $0x20] sm:$0xff] }
 0x364   :  { %v1439_v53 = vadd.f32 %v1438_v1, %v1437_v35  ;;  %v1433_v56 = vadd.f32 %v1432_v13, %v1431_v61 }
 0x365   :  { %v1480_v12 = vrot.slane %v1479_v54, 2  ;;  %v1486_v23 = vrot.slane %v1485_v21, 2  ;;  %v1442_v3 = vrot.slane %v1416_v17, 4  ;;  %v1490_v32 = vrot.slane %v1424_v41, 4 }
 0x366   :  { %v1352_v8 = vpop.permute.xlu1 %1351  ;;  %v1392_v55 = vpop.permute.xlu0 %1391  ;;  %v1440_v59 = vrot.slane %v1439_v53, 1  ;;  %v1434_v18 = vrot.slane %v1433_v56, 1 }
 0x367   :  { %v1481_v33 = vadd.f32 %v1480_v12, %v1479_v54  ;;  %v1417_v37 = vmul.f32 %v9808_v40, %v1352_v8  ;;  %v1425_v62 = vmul.f32 %v9809_v31, %v1392_v55  ;;  %v1487_v43 = vadd.f32 %v1486_v23, %v1485_v21 }
 0x368   :  { %v1443_v60 = vadd.f32 %v1442_v3, %v1416_v17  ;;  %v1491_v1 = vadd.f32 %v1490_v32, %v1424_v41  ;;  %v1441_v54 = vadd.f32 %v1440_v59, %v1439_v53  ;;  %v1435_v12 = vadd.f32 %v1434_v18, %v1433_v56  ;;  %v9812_v41 = vld [vmem:[#allocation2 + $0x28] sm:$0xff] }
 0x369   :  { %v1448_v50 = vrot.slane %v1417_v37, 4  ;;  %v1496_v42 = vrot.slane %v1425_v62, 4  ;;  %v1482_v61 = vrot.slane %v1481_v33, 1  ;;  %v1488_v49 = vrot.slane %v1487_v43, 1 }
 0x36a   :  { %v1357_v46 = vpop.permute.xlu1 %1356  ;;  %v1397_v35 = vpop.permute.xlu0 %1396  ;;  %v1444_v8 = vrot.slane %v1443_v60, 2  ;;  %v1492_v23 = vrot.slane %v1491_v1, 2 }
 0x36b   :  { %v1449_v13 = vadd.f32 %v1448_v50, %v1417_v37  ;;  %v1497_v45 = vadd.f32 %v1496_v42, %v1425_v62  ;;  %v1418_v25 = vmul.f32 %v9810_v52, %v1357_v46  ;;  %v1426_v21 = vmul.f32 %v9811_v27, %v1397_v35  ;;  %v9813_v42 = vld [vmem:[#allocation2 + $0x68] sm:$0xff] }
 0x36c   :  { %v1483_v17 = vadd.f32 %v1482_v61, %v1481_v33  ;;  %v1527_v37 = vpack.c.bf16 %v1441_v54, %v1441_v54  ;;  %v1526_v62 = vpack.c.bf16 %v1435_v12, %v1435_v12  ;;  %v1489_v50 = vadd.f32 %v1488_v49, %v1487_v43 }
 0x36d   :  { %v1454_v31 = vrot.slane %v1418_v25, 4  ;;  %v1450_v3 = vrot.slane %v1449_v13, 2  ;;  %v1498_v19 = vrot.slane %v1497_v45, 2  ;;  %v1502_v14 = vrot.slane %v1426_v21, 4 }
 0x36e   :  { %v1362_v40 = vpop.permute.xlu1 %1361  ;;  %v1402_v55 = vpop.permute.xlu0 %1401  ;;  %v1445_v53 = vadd.f32 %v1444_v8, %v1443_v60  ;;  %v1534_v27 = vpack.c.bf16 %v1483_v17, %v1483_v17  ;;  %v1493_v33 = vadd.f32 %v1492_v23, %v1491_v1  ;;  %v11042_v15 = vunpack.c.l.b16 %v1527_v37 }
 0x36f   :  { %v1455_v9 = vadd.f32 %v1454_v31, %v1418_v25  ;;  %v1419_v32 = vmul.f32 %v9812_v41, %v1362_v40  ;;  %v1503_v59 = vadd.f32 %v1502_v14, %v1426_v21  ;;  %v1427_v46 = vmul.f32 %v9813_v42, %v1402_v55  ;;  %v9814_v21 = vld [vmem:[#allocation2 + $0x30] sm:$0xff] }
 0x370   :  { %v1451_v35 = vadd.f32 %v1450_v3, %v1449_v13  ;;  %v1499_v61 = vadd.f32 %v1498_v19, %v1497_v45  ;;  %v11044_v54 = vunpack.c.l.b16 %v1526_v62  ;;  %v1535_v49 = vpack.c.bf16 %v1489_v50, %v1489_v50  ;;  %v9815_v13 = vld [vmem:[#allocation2 + $0x70] sm:$0xff] }
 0x371   :  { %v1456_v56 = vrot.slane %v1455_v9, 2  ;;  %v1460_v18 = vrot.slane %v1419_v32, 4  ;;  %v1504_v5 = vrot.slane %v1503_v59, 2  ;;  %v1508_v31 = vrot.slane %v1427_v46, 4 }
 0x372   :  { %v1367_v52 = vpop.permute.xlu1 %1366  ;;  %v1407_v29 = vpop.permute.xlu0 %1406  ;;  %v1446_v43 = vrot.slane %v1445_v53, 1  ;;  %v11046_v40 = vunpack.c.l.b16 %v1534_v27  ;;  %v1494_v55 = vrot.slane %v1493_v33, 1  ;;  %v1452_v45 = vrot.slane %v1451_v35, 1  ;;  %v9816_v27 = vld [vmem:[#allocation2 + $0x38] sm:$0xff] }
 0x373   :  { %v1461_v25 = vadd.f32 %v1460_v18, %v1419_v32  ;;  %v1457_v60 = vadd.f32 %v1456_v56, %v1455_v9  ;;  %v1505_v14 = vadd.f32 %v1504_v5, %v1503_v59  ;;  %v1509_v8 = vadd.f32 %v1508_v31, %v1427_v46  ;;  %v9817_v31 = vld [vmem:[#allocation2 + $0x78] sm:$0xff] }
 0x374   :  { %v1420_v1 = vmul.f32 %v9814_v21, %v1367_v52  ;;  %v1428_v19 = vmul.f32 %v9815_v13, %v1407_v29  ;;  %v1500_v17 = vrot.slane %v1499_v61, 1  ;;  %v1567_v37 = vunpack.c.l.b16 %v1535_v49 }
 0x375   :  { %v1462_v12 = vrot.slane %v1461_v25, 2  ;;  %v1510_v3 = vrot.slane %v1509_v8, 2  ;;  %v1447_v62 = vadd.f32 %v1446_v43, %v1445_v53  ;;  %v1458_v5 = vrot.slane %v1457_v60, 1 }
 0x376   :  { %v1372_v41 = vpop.permute.xlu1 %1371  ;;  %v1412_v32 = vpop.permute.xlu0 %1411  ;;  %v1466_v50 = vrot.slane %v1420_v1, 4  ;;  %v1514_v9 = vrot.slane %v1428_v19, 4  ;;  %v1506_v56 = vrot.slane %v1505_v14, 1  ;;  %v1495_v21 = vadd.f32 %v1494_v55, %v1493_v33 }
 0x377   :  { %v1463_v23 = vadd.f32 %v1462_v12, %v1461_v25  ;;  %v1511_v18 = vadd.f32 %v1510_v3, %v1509_v8  ;;  %v1421_v52 = vmul.f32 %v9816_v27, %v1372_v41  ;;  %v1429_v29 = vmul.f32 %v9817_v31, %v1412_v32 }
 0x378   :  { %v1467_v42 = vadd.f32 %v1466_v50, %v1420_v1  ;;  %v1515_v46 = vadd.f32 %v1514_v9, %v1428_v19  ;;  %v1453_v13 = vadd.f32 %v1452_v45, %v1451_v35  ;;  %v1501_v25 = vadd.f32 %v1500_v17, %v1499_v61 }
 0x379   :  { %v1464_v59 = vrot.slane %v1463_v23, 1  ;;  %v1512_v12 = vrot.slane %v1511_v18, 1  ;;  %v1472_v49 = vrot.slane %v1421_v52, 4  ;;  %v1520_v53 = vrot.slane %v1429_v29, 4 }
 0x37a   :  { %v1468_v11 = vrot.slane %v1467_v42, 2  ;;  %v1516_v4 = vrot.slane %v1515_v46, 2  ;;  %v1459_v43 = vadd.f32 %v1458_v5, %v1457_v60  ;;  %v1507_v57 = vadd.f32 %v1506_v56, %v1505_v14 }
 0x37b   :  { %v1465_v26 = vadd.f32 %v1464_v59, %v1463_v23  ;;  %v1513_v48 = vadd.f32 %v1512_v12, %v1511_v18  ;;  %v1473_v1 = vadd.f32 %v1472_v49, %v1421_v52  ;;  %v1521_v19 = vadd.f32 %v1520_v53, %v1429_v29 }
 0x37c   :  { %v1469_v7 = vadd.f32 %v1468_v11, %v1467_v42  ;;  %v1517_v8 = vadd.f32 %v1516_v4, %v1515_v46  ;;  %v1528_v3 = vpack.c.bf16 %v1447_v62, %v1447_v62  ;;  %v1536_v41 = vpack.c.bf16 %v1495_v21, %v1495_v21 }
 0x37d   :  { %v1529_v50 = vpack.c.bf16 %v1453_v13, %v1453_v13  ;;  %v1537_v32 = vpack.c.bf16 %v1501_v25, %v1501_v25  ;;  %v1474_v61 = vrot.slane %v1473_v1, 2  ;;  %v1522_v55 = vrot.slane %v1521_v19, 2 }
 0x37e   :  { %v1470_v33 = vrot.slane %v1469_v7, 1  ;;  %v1518_v35 = vrot.slane %v1517_v8, 1  ;;  %v1530_v45 = vpack.c.bf16 %v1459_v43, %v1459_v43  ;;  %v1538_v17 = vpack.c.bf16 %v1507_v57, %v1507_v57 }
 0x37f   :  { %v1531_v9 = vpack.c.bf16 %v1465_v26, %v1465_v26  ;;  %v1539_v27 = vpack.c.bf16 %v1513_v48, %v1513_v48  ;;  %v1475_v23 = vadd.f32 %v1474_v61, %v1473_v1  ;;  %v1523_v5 = vadd.f32 %v1522_v55, %v1521_v19 }
 0x380   :  { %v1471_v60 = vadd.f32 %v1470_v33, %v1469_v7  ;;  %v1519_v14 = vadd.f32 %v1518_v35, %v1517_v8  ;;  %v1560_v11 = vunpack.c.l.b16 %v1528_v3  ;;  %v1568_v4 = vunpack.c.l.b16 %v1536_v41 }
 0x381   :  { %v1561_v56 = vunpack.c.l.b16 %v1529_v50  ;;  %v1569_v59 = vunpack.c.l.b16 %v1537_v32  ;;  %v1476_v42 = vrot.slane %v1475_v23, 1  ;;  %v1524_v46 = vrot.slane %v1523_v5, 1 }
 0x382   :  { %v1532_v62 = vpack.c.bf16 %v1471_v60, %v1471_v60  ;;  %v1540_v18 = vpack.c.bf16 %v1519_v14, %v1519_v14  ;;  %v1574_v52 = vsel %vm924_vm0, %v11042_v15, %v11044_v54  ;;  %v1581_v57 = vsel %vm924_vm0, %v1567_v37, %v11046_v40 }
 0x383   :  { %v1562_v26 = vunpack.c.l.b16 %v1530_v45  ;;  %v1570_v7 = vunpack.c.l.b16 %v1538_v17  ;;  %v1563_v48 = vunpack.c.l.b16 %v1531_v9  ;;  %v1571_v31 = vunpack.c.l.b16 %v1539_v27  ;;  %v257_v27 = vld [vmem:[%s13016_s5] sm:$0xf] }
 0x384   :  { %v1477_v29 = vadd.f32 %v1476_v42, %v1475_v23  ;;  %v1525_v21 = vadd.f32 %v1524_v46, %v1523_v5  ;;  %v1575_v13 = vsel %vm926_vm1, %v1560_v11, %v1574_v52  ;;  %v1582_v25 = vsel %vm926_vm1, %v1568_v4, %v1581_v57  ;;  %v13109_v11 = vld [vmem:[#allocation37_spill] sm:$0xff] }
 0x385   :  { %v1564_v12 = vunpack.c.l.b16 %v1532_v62  ;;  %v1572_v49 = vunpack.c.l.b16 %v1540_v18  ;;  %v1576_v53 = vsel %vm928_vm2, %v1561_v56, %v1575_v13  ;;  %v1583_v43 = vsel %vm928_vm2, %v1569_v59, %v1582_v25 }
 0x386   :  { %v1533_v15 = vpack.c.bf16 %v1477_v29, %v1477_v29  ;;  %v1541_v54 = vpack.c.bf16 %v1525_v21, %v1525_v21  ;;  %v1577_v40 = vsel %vm930_vm3, %v1562_v26, %v1576_v53  ;;  %v1584_v37 = vsel %vm930_vm3, %v1570_v7, %v1583_v43  ;;  %v13110_v43 = vld [vmem:[#allocation43_spill] sm:$0xff] }
 0x387   :  { %v1578_v19 = vsel %vm932_vm4, %v1563_v48, %v1577_v40  ;;  %v1585_v3 = vsel %vm932_vm4, %v1571_v31, %v1584_v37  ;;  %v11100_v4 = vrot.slane %v257_v27, %v13109_v11 }
 0x388   :  { %v1565_v8 = vunpack.c.l.b16 %v1533_v15  ;;  %v1573_v1 = vunpack.c.l.b16 %v1541_v54  ;;  %v1579_v41 = vsel %vm934_vm5, %v1564_v12, %v1578_v19  ;;  %v1586_v50 = vsel %vm934_vm5, %v1572_v49, %v1585_v3 }
 0x389   :  { %v11107_v15 = vrot.slane %v257_v27, %v13110_v43 }
 0x38a   :  { %v1580_v32 = vsel %vm936_vm6, %v1565_v8, %v1579_v41  ;;  %v1587_v33 = vsel %vm936_vm6, %v1573_v1, %v1586_v50  ;;  %v13111_v50 = vld [vmem:[#allocation40_spill] sm:$0xff] }
 0x38b   :  { %v1588_v35 = vpack.c.b16 %v1587_v33, %v1580_v32  ;;  %v11111_v32 = vrot.slane %v257_v27, %v13111_v50 }
 0x38d   :  { %1783 = vmatmul.mubr.bf16.vlgmr.msra.gmra.mxu0 %v1588_v35  ;;  %1826 = vmatmul.mubr.bf16.vlgmr.msra.gmra.mxu1 %v1588_v35 }
 0x38e   :  { %2012 = vmatpush1.bf16.msra.mxu1 %v10931_v24  ;;  %2043 = vmatprep.mubr.bf16.mxu1 %v13108_v38  ;;  %v9346_v24 = vld [vmem:[#allocation11 + $0x38] sm:$0xff]  }
 0x38f   :  { %2013 = vmatprep.subr.bf16.mxu1 %v10933_v44  ;;  %v13071_v44 = vmov 0.0  }
 0x390   :  { %9062 = vmatprep.subr.bf16.mxu0 %v13071_v44  ;;  %9078 = vmatprep.mubr.msk.bf16.mxu0 %vm10569_vm8, %v13071_v44 }
 0x391   :  { %9063 = vmatpush3.bf16.msra.mxu0 %v9346_v24 }
 0x392   :  { %2014 = vmatpush1.bf16.msra.mxu1 %v10937_v51  ;;  %9064 = vmatprep.subr.bf16.mxu0 %v13071_v44  ;;  %v9347_v51 = vld [vmem:[#allocation11 + $0x30] sm:$0xff]  }
 0x393   :  { %2015 = vmatprep.subr.bf16.mxu1 %v10942_v10  ;;  %v9348_v10 = vld [vmem:[#allocation11 + $0x28] sm:$0xff]  }
 0x395   :  { %9065 = vmatpush3.bf16.msra.mxu0 %v9347_v51 }
 0x396   :  { %2016 = vmatpush1.bf16.msra.mxu1 %v10946_v58  ;;  %9066 = vmatprep.subr.bf16.mxu0 %v13071_v44  ;;  %v9349_v58 = vld [vmem:[#allocation11 + $0x20] sm:$0xff]  }
 0x397   :  { %2017 = vmatprep.subr.bf16.mxu1 %v10949_v0  ;;  %v9350_v0 = vld [vmem:[#allocation11 + $0x18] sm:$0xff]  }
 0x399   :  { %9067 = vmatpush3.bf16.msra.mxu0 %v9348_v10 }
 0x39a   :  { %2018 = vmatpush1.bf16.msra.mxu1 %v10952_v28  ;;  %9068 = vmatprep.subr.bf16.mxu0 %v13071_v44  ;;  %v9351_v28 = vld [vmem:[#allocation11 + $0x10] sm:$0xff]  }
 0x39b   :  { %2019 = vmatprep.subr.bf16.mxu1 %v10955_v22  ;;  %v9352_v22 = vld [vmem:[#allocation11 + $0x8] sm:$0xff]  }
 0x39d   :  { %9069 = vmatpush3.bf16.msra.mxu0 %v9349_v58 }
 0x39e   :  { %2020 = vmatpush1.bf16.msra.mxu1 %v10958_v30  ;;  %9070 = vmatprep.subr.bf16.mxu0 %v13071_v44  ;;  %v9353_v30 = vld [vmem:[#allocation11] sm:$0xff]  }
 0x39f   :  { %2021 = vmatprep.subr.bf16.mxu1 %v10961_v2  ;;  %v482_v2 = vpop.f32.mrf.mxu0 }
 0x3a1   :  { %9071 = vmatpush3.bf16.msra.mxu0 %v9350_v0 }
 0x3a2   :  { %2022 = vmatpush1.bf16.msra.mxu1 %v10964_v39  ;;  %9072 = vmatprep.subr.bf16.mxu0 %v13071_v44  ;;  %v525_v39 = vpop.f32.mrf.mxu1 }
 0x3a3   :  { %2023 = vmatprep.subr.bf16.mxu1 %v10967_v47  ;;  %v484_v47 = vpop.f32.mrf.mxu0 }
 0x3a5   :  { %9073 = vmatpush3.bf16.msra.mxu0 %v9351_v28 }
 0x3a6   :  { %2024 = vmatpush1.bf16.msra.mxu1 %v10970_v63  ;;  %9074 = vmatprep.subr.bf16.mxu0 %v13071_v44  ;;  %v527_v63 = vpop.f32.mrf.mxu1 }
 0x3a7   :  { %2025 = vmatprep.subr.bf16.mxu1 %v10973_v20  ;;  %v486_v20 = vpop.f32.mrf.mxu0 }
 0x3a9   :  { %9075 = vmatpush3.bf16.msra.mxu0 %v9352_v22 }
 0x3aa   :  { %2026 = vmatpush1.bf16.msra.mxu1 %v10976_v34  ;;  %9076 = vmatprep.subr.bf16.mxu0 %v13071_v44  ;;  %v529_v34 = vpop.f32.mrf.mxu1 }
 0x3ab   :  { %2097 = vmatprep.subr.bf16.mxu1 %v10979_v16  ;;  %v488_v16 = vpop.f32.mrf.mxu0 }
 0x3ac   :  { %v531_v61 = vpop.f32.mrf.mxu1 }
 0x3ad   :  { %9077 = vmatpush3.bf16.msra.mxu0 %v9353_v30  ;;  %v734_v55 = vpop.f32.mrf.mxu0 }
 0x3ae   :  { %2054 = vmatprep.subr.bf16.mxu0 %v10939_v36  ;;  %v777_v45 = vpop.f32.mrf.mxu1  ;;  %v735_v14 = vadd.f32 %v734_v55, %v482_v2  ;;  %v11097_v36 = vrot.slane %v257_v27, %v10785_v6 }
 0x3af   :  { %v736_v17 = vpop.f32.mrf.mxu0  ;;  %v778_v41 = vadd.f32 %v777_v45, %v525_v39 }
 0x3b0   :  { %v779_v9 = vpop.f32.mrf.mxu1  ;;  %v737_v5 = vadd.f32 %v736_v17, %v484_v47  ;;  %v786_v18 = vadd.f32 %v735_v14, %v11097_v36 }
 0x3b1   :  { %v738_v60 = vpop.f32.mrf.mxu0  ;;  %v780_v53 = vadd.f32 %v779_v9, %v527_v63  ;;  %v788_v10 = vadd.f32 %v778_v41, %v11111_v32 }
 0x3b2   :  { %v781_v23 = vpop.f32.mrf.mxu1  ;;  %v739_v59 = vadd.f32 %v738_v60, %v486_v20  ;;  %v787_v26 = vadd.f32 %v737_v5, %v11100_v4 }
 0x3b3   :  { %v740_v56 = vpop.f32.mrf.mxu0  ;;  %v789_v3 = vadd.f32 %v780_v53, %v11107_v15  ;;  %v782_v51 = vadd.f32 %v781_v23, %v529_v34 }
 0x3b4   :  { %v783_v62 = vpop.f32.mrf.mxu1  ;;  %v741_v46 = vadd.f32 %v740_v56, %v488_v16  ;;  %v790_v29 = vadd.f32 %v739_v59, %v11097_v36 }
 0x3b5   :  { %v784_v19 = vadd.f32 %v783_v62, %v531_v61  ;;  %v792_v47 = vadd.f32 %v782_v51, %v11111_v32  ;;  %v13113_v51 = vld [vmem:[#allocation20_spill] sm:$0xff] }
 0x3b6   :  { %v791_v49 = vadd.f32 %v741_v46, %v11100_v4 }
 0x3b7   :  { %v793_v24 = vadd.f32 %v784_v19, %v11107_v15 }
 0x44d   :  { %v1784_v42 = vpop.f32.mrf.mxu0  ;;  %v1827_v57 = vpop.f32.mrf.mxu1 }
 0x44e   :  { %v1836_v52 = vadd.f32 %v1784_v42, %v786_v18  ;;  %v1838_v22 = vadd.f32 %v1827_v57, %v788_v10 }
 0x44f   :  { %v1786_v7 = vpop.f32.mrf.mxu0  ;;  %v1829_v25 = vpop.f32.mrf.mxu1 }
 0x450   :  { %v8910_v48 = vmul.f32 -1.442695, %v1836_v52  ;;  %v1837_v31 = vadd.f32 %v1786_v7, %v787_v26  ;;  %v1839_v33 = vadd.f32 %v1829_v25, %v789_v3  ;;  %v10570_v26 = vmov 1966171168  }
 0x451   :  { %v1788_v21 = vpop.f32.mrf.mxu0  ;;  %v1831_v8 = vpop.f32.mrf.mxu1  ;;  %v2195_v7 = vunpack.c.l.s4 %v10570_v26 }
 0x452   :  { %9390 = vpow2.f32 %v8910_v48  ;;  %v8912_v13 = vmul.f32 -1.442695, %v1837_v31  ;;  %v1840_v12 = vadd.f32 %v1788_v21, %v790_v29  ;;  %v8914_v58 = vmul.f32 -1.442695, %v1839_v33  ;;  %v13112_v29 = vld [vmem:[#allocation35_spill] sm:$0xff] }
 0x453   :  { %v1790_v54 = vpop.f32.mrf.mxu0  ;;  %v1833_v35 = vpop.f32.mrf.mxu1  ;;  %v1842_v16 = vadd.f32 %v1831_v8, %v792_v47  ;;  %v2196_v48 = vunpack.c.0.s8 %v2195_v7 }
 0x454   :  { %9392 = vpow2.f32 %v8912_v13  ;;  %v8911_v40 = vmul.f32 -1.442695, %v1840_v12  ;;  %v1841_v37 = vadd.f32 %v1790_v54, %v791_v49  ;;  %v1843_v0 = vadd.f32 %v1833_v35, %v793_v24 }
 0x455   :  { %v11123_v21 = vsub.s32 %v2196_v48, %v13112_v29  ;;  %v13118_v29 = vld [vmem:[#allocation23_spill] sm:$0xff] }
 0x456   :  { %9394 = vpow2.f32 %v8911_v40  ;;  %v8913_v1 = vmul.f32 -1.442695, %v1841_v37  ;;  %v8915_v39 = vmul.f32 -1.442695, %v1843_v0  ;;  %v9818_v0 = vld [vmem:[#allocation10 + $0xe8] ss:$16 sps:$4 sm:$0xff]  }
 0x458   :  { %9396 = vpow2.f32 %v8913_v1 }
 0x459   :  { %9398 = vpow2.f32 %v8914_v58 }
 0x45f   :  { %v9391_v28 = vpop.eup %9390 }
 0x460   :  { %v1850_v30 = vadd.f32 1.0, %v9391_v28 }
 0x461   :  { %v9393_v2 = vpop.eup %9392 }
 0x462   :  { %9400 = vrcp.f32 %v1850_v30  ;;  %v1862_v63 = vadd.f32 1.0, %v9393_v2  ;;  %v9819_v30 = vld [vmem:[#allocation10 + $0xcc] ss:$16 sps:$4 sm:$0xff]  }
 0x463   :  { %v9395_v20 = vpop.eup %9394  ;;  %9402 = vtanh.f32 %v1838_v22  ;;  %v13114_v2 = vld [vmem:[#allocation22_spill] sm:$0xff] }
 0x464   :  { %9404 = vrcp.f32 %v1862_v63  ;;  %v1851_v61 = vadd.f32 1.0, %v9395_v20 }
 0x465   :  { %v9397_v34 = vpop.eup %9396  ;;  %9406 = vpow2.f32 %v8915_v39 }
 0x466   :  { %9408 = vrcp.f32 %v1851_v61  ;;  %v1863_v55 = vadd.f32 1.0, %v9397_v34  ;;  %v9399_v45 = vpop.eup %9398  ;;  %v9820_v34 = vld [vmem:[#allocation10 + $0xc8] ss:$16 sps:$4 sm:$0xff]  }
 0x467   :  { %9410 = vtanh.f32 %v1842_v16  ;;  %v1876_v60 = vadd.f32 1.0, %v9399_v45  ;;  %v9821_v45 = vld [vmem:[#allocation10 + $0xac] ss:$16 sps:$4 sm:$0xff]  }
 0x468   :  { %9412 = vrcp.f32 %v1863_v55 }
 0x469   :  { %9414 = vrcp.f32 %v1876_v60  ;;  %v13116_v60 = vld [vmem:[#allocation21_spill] sm:$0xff] }
 0x46f   :  { %v9401_v17 = vpop.eup %9400 }
 0x470   :  { %v9403_v9 = vpop.eup %9402 }
 0x471   :  { %v9405_v27 = vpop.eup %9404  ;;  %v1884_v5 = vmul.f32 %v9403_v9, %v9401_v17  ;;  %v13115_v17 = vld [vmem:[#allocation24_spill] sm:$0xff] }
 0x472   :  { %v9407_v14 = vpop.eup %9406  ;;  %v1882_v23 = vmul.f32 0.0, %v9405_v27 }
 0x473   :  { %v9409_v56 = vpop.eup %9408  ;;  %v1877_v42 = vadd.f32 1.0, %v9407_v14 }
 0x474   :  { %v9411_v59 = vpop.eup %9410  ;;  %v11116_v62 = vadd.f32 %v1884_v5, %v1882_v23 }
 0x475   :  { %v9413_v18 = vpop.eup %9412  ;;  %v1885_v52 = vmul.f32 %v9411_v59, %v9409_v56  ;;  %v9822_v56 = vld [vmem:[#allocation8 + $0xe0] ss:$16 sps:$4 sm:$0xff]   ;;  %v9823_v59 = vld [vmem:[#allocation10 + $0xa8] ss:$16 sps:$4 sm:$0xff]  }
 0x476   :  { %9416 = vtanh.f32 %v11116_v62  ;;  %v1883_v46 = vmul.f32 0.0, %v9413_v18  ;;  %v9415_v31 = vpop.eup %9414 }
 0x477   :  { %9418 = vrcp.f32 %v1877_v42 }
 0x478   :  { %v11119_v57 = vadd.f32 %v1885_v52, %v1883_v46  ;;  %v9824_v46 = vld [vmem:[#allocation10 + $0x8c] ss:$16 sps:$4 sm:$0xff]  }
 0x479   :  { %v13117_v52 = vld [vmem:[#allocation28_spill] sm:$0xff] }
 0x47a   :  { %9420 = vtanh.f32 %v11119_v57 }
 0x483   :  { %v9417_v13 = vpop.eup %9416 }
 0x484   :  { %v1890_v25 = vmul.f32 %v9417_v13, %v9415_v31  ;;  %v9419_v12 = vpop.eup %9418  ;;  %v9825_v31 = vld [vmem:[#allocation8 + $0xc4] ss:$16 sps:$4 sm:$0xff]  }
 0x486   :  { %v2200_v49 = vrot.slane %v1890_v25, %v11123_v21  ;;  %v2193_v53 = vcombine.high %v1890_v25, %v1890_v25 }
 0x487   :  { %v9421_v54 = vpop.eup %9420 }
 0x488   :  { %v1891_v40 = vmul.f32 %v9421_v54, %v9419_v12  ;;  %v2216_v37 = vrot.slane %v2200_v49, %v11123_v21  ;;  %v2208_v8 = vcombine.high %v2200_v49, %v2200_v49  ;;  %v11128_v1 = vrot.slane %v2193_v53, %v11123_v21  ;;  %v9826_v49 = vld [vmem:[#allocation8 + $0xc0] ss:$16 sps:$4 sm:$0xff]   ;;  %v9827_v53 = vld [vmem:[#allocation8 + $0xa4] ss:$16 sps:$4 sm:$0xff]   ;;  %v9828_v54 = vld [vmem:[#allocation10 + $0x88] ss:$16 sps:$4 sm:$0xff]  }
 0x48a   :  { %v11130_v19 = vpack.c.bf16 %v1891_v40, %v1890_v25  ;;  %v2294_v3 = vrot.slane %v2216_v37, %v10785_v6  ;;  %v11134_v41 = vrot.slane %v2208_v8, %v11123_v21  ;;  %v2238_v33 = vcombine.high %v2216_v37, %v2216_v37  ;;  %v13119_v37 = vld [vmem:[#allocation19_spill] sm:$0xff] }
 0x48b   :  { %v2249_v35 = vrot.slane %v1891_v40, %v11123_v21  ;;  %v2242_v24 = vcombine.high %v1891_v40, %v1891_v40  ;;  %v11147_v63 = vrot.slane %v11128_v1, %v11123_v21  ;;  %v2209_v42 = vcombine.high %v11128_v1, %v11128_v1  ;;  %v9829_v40 = vld [vmem:[#allocation10 + $0x6c] ss:$16 sps:$4 sm:$0xff]  }
 0x48c   :  { %9079 = vmatmul.mubr.bf16.vlgmr.msra.gmra.mxu0 %v11130_v19  ;;  %2044 = vmatmul.mubr.bf16.vlgmr.msra.gmra.mxu1 %v11130_v19  ;;  %v2371_v10 = vmul.f32 %v2294_v3, %v13113_v51  ;;  %v2298_v58 = vrot.slane %v11134_v41, %v10785_v6  ;;  %v2302_v39 = vrot.slane %v2238_v33, %v10785_v6 }
 0x48d   :  { %2055 = vmatpush1.bf16.msra.mxu0 %v9818_v0  ;;  %v2257_v28 = vcombine.high %v2249_v35, %v2249_v35  ;;  %v2265_v22 = vrot.slane %v2249_v35, %v11123_v21  ;;  %v2256_v61 = vrot.slane %v2242_v24, %v11123_v21  ;;  %2086 = vmatprep.mubr.bf16.mxu0 %v13108_v38  ;;  %v9832_v0 = vld [vmem:[#allocation10 + $0x68] ss:$16 sps:$4 sm:$0xff]  }
 0x48e   :  { %2387 = vadd.xlane.f32.xlu1 %v2371_v10  ;;  %2056 = vmatprep.subr.bf16.mxu0 %v9819_v30  ;;  %v2372_v47 = vmul.f32 %v2298_v58, %v13114_v2  ;;  %v2373_v9 = vmul.f32 %v2302_v39, %v13115_v17  ;;  %v2310_v27 = vrot.slane %v11147_v63, %v10785_v6  ;;  %v9830_v10 = vld [vmem:[#allocation8 + $0xa0] ss:$16 sps:$4 sm:$0xff]   ;;  %v9831_v58 = vld [vmem:[#allocation8 + $0x84] ss:$16 sps:$4 sm:$0xff]  }
 0x48f   :  { %v2279_v20 = vrot.slane %v2257_v28, %v11123_v21  ;;  %v2287_v16 = vcombine.high %v2265_v22, %v2265_v22  ;;  %v11159_v5 = vrot.slane %v2256_v61, %v11123_v21  ;;  %2098 = vmatpush1.bf16.msra.mxu1 %v9822_v56  ;;  %v2240_v18 = vcombine.high %v11134_v41, %v11134_v41  ;;  %v13120_v41 = vld [vmem:[#allocation27_spill] sm:$0xff]  ;;  %v9833_v28 = vld [vmem:[#allocation10 + $0x4c] ss:$16 sps:$4 sm:$0xff]  }
 0x490   :  { %2389 = vadd.xlane.f32.xlu0 %v2372_v47  ;;  %v2375_v26 = vmul.f32 %v2310_v27, %v13117_v52  ;;  %v2326_v7 = vrot.slane %v2265_v22, %v10785_v6  ;;  %v2258_v48 = vcombine.high %v2256_v61, %v2256_v61  ;;  %2099 = vmatprep.subr.bf16.mxu1 %v9825_v31  ;;  %v13121_v22 = vld [vmem:[#allocation26_spill] sm:$0xff]  ;;  %v13125_v31 = vld [vmem:[#allocation32_spill] sm:$0xff] }
 0x491   :  { %2057 = vmatpush1.bf16.msra.mxu0 %v9820_v34  ;;  %v2330_v55 = vrot.slane %v2279_v20, %v10785_v6  ;;  %v2334_v23 = vrot.slane %v2287_v16, %v10785_v6  ;;  %v2342_v25 = vrot.slane %v11159_v5, %v10785_v6  ;;  %v2289_v12 = vcombine.high %v2279_v20, %v2279_v20  ;;  %v13122_v20 = vld [vmem:[#allocation25_spill] sm:$0xff]  ;;  %v9837_v27 = vld [vmem:[#allocation10 + $0x2c] ss:$16 sps:$4 sm:$0xff]  }
 0x492   :  { %2058 = vmatprep.subr.bf16.mxu0 %v9821_v45  ;;  %2129 = vmatprep.mubr.bf16.mxu1 %v13108_v38  ;;  %v2379_v8 = vmul.f32 %v2326_v7, %v13119_v37  ;;  %v2306_v1 = vrot.slane %v2240_v18, %v10785_v6  ;;  %v2237_v3 = vrot.slane %v2209_v42, %v11123_v21  ;;  %v9835_v45 = vld [vmem:[#allocation8 + $0x64] ss:$16 sps:$4 sm:$0xff]   ;;  %v9840_v7 = vld [vmem:[#allocation10 + $0x28] ss:$16 sps:$4 sm:$0xff]  }
 0x493   :  { %v2380_v14 = vmul.f32 %v2330_v55, %v13116_v60  ;;  %v2381_v13 = vmul.f32 %v2334_v23, %v13118_v29  ;;  %2100 = vmatpush1.bf16.msra.mxu1 %v9826_v49  ;;  %v2383_v33 = vmul.f32 %v2342_v25, %v13120_v41  ;;  %v2338_v35 = vrot.slane %v2289_v12, %v10785_v6  ;;  %v9834_v55 = vld [vmem:[#allocation8 + $0x80] ss:$16 sps:$4 sm:$0xff]  }
 0x494   :  { %2391 = vadd.xlane.f32.xlu0 %v2373_v9  ;;  %2101 = vmatprep.subr.bf16.mxu1 %v9827_v53  ;;  %v2286_v24 = vrot.slane %v2258_v48, %v11123_v21  ;;  %v2374_v30 = vmul.f32 %v2306_v1, %v13121_v22  ;;  %v2314_v47 = vrot.slane %v2237_v3, %v10785_v6  ;;  %v9836_v9 = vld [vmem:[#allocation10 + $0x48] ss:$16 sps:$4 sm:$0xff]   ;;  %v9841_v48 = vld [vmem:[#allocation10 + $0xc] ss:$16 sps:$4 sm:$0xff]   ;;  %v13126_v12 = vld [vmem:[#allocation31_spill] sm:$0xff] }
 0x495   :  { %2405 = vadd.xlane.f32.xlu1 %v2380_v14  ;;  %2059 = vmatpush1.bf16.msra.mxu0 %v9823_v59  ;;  %v2239_v39 = vcombine.high %v11147_v63, %v11147_v63  ;;  %v2382_v16 = vmul.f32 %v2338_v35, %v13122_v20  ;;  %v2288_v34 = vcombine.high %v11159_v5, %v11159_v5  ;;  %v13123_v14 = vld [vmem:[#allocation30_spill] sm:$0xff]  ;;  %v13124_v59 = vld [vmem:[#allocation29_spill] sm:$0xff] }
 0x496   :  { %2060 = vmatprep.subr.bf16.mxu0 %v9824_v46  ;;  %v2346_v61 = vrot.slane %v2286_v24, %v10785_v6  ;;  %v2376_v23 = vmul.f32 %v2314_v47, %v13123_v14  ;;  %v2241_v56 = vcombine.high %v2237_v3, %v2237_v3  ;;  %v2290_v5 = vcombine.high %v2286_v24, %v2286_v24  ;;  %v9838_v46 = vld [vmem:[#allocation8 + $0x60] ss:$16 sps:$4 sm:$0xff]   ;;  %v13127_v1 = vld [vmem:[#allocation34_spill] sm:$0xff]  ;;  %v9851_v47 = vld [vmem:[#allocation7 + $0xe4] ss:$16 sps:$4 sm:$0xff]  }
 0x497   :  { %2102 = vmatpush1.bf16.msra.mxu1 %v9830_v10  ;;  %v2318_v63 = vrot.slane %v2239_v39, %v10785_v6  ;;  %v2350_v42 = vrot.slane %v2288_v34, %v10785_v6  ;;  %v13128_v35 = vld [vmem:[#allocation33_spill] sm:$0xff]  ;;  %v9852_v39 = vld [vmem:[#allocation8 + $0xc8] ss:$16 sps:$4 sm:$0xff]  }
 0x498   :  { %2395 = vadd.xlane.f32.xlu0 %v2375_v26  ;;  %2103 = vmatprep.subr.bf16.mxu1 %v9831_v58  ;;  %v2384_v18 = vmul.f32 %v2346_v61, %v13124_v59  ;;  %v9839_v26 = vld [vmem:[#allocation8 + $0x44] ss:$16 sps:$4 sm:$0xff]   ;;  %v2322_v25 = vrot.slane %v2241_v56, %v10785_v6  ;;  %v2354_v53 = vrot.slane %v2290_v5, %v10785_v6  ;;  %v9846_v10 = vld [vmem:[#allocation8 + $0x20] ss:$16 sps:$4 sm:$0xff]   ;;  %v9847_v58 = vld [vmem:[#allocation8 + $0xe8] ss:$16 sps:$4 sm:$0xff]  }
 0x499   :  { %2407 = vadd.xlane.f32.xlu1 %v2381_v13  ;;  %2061 = vmatpush1.bf16.msra.mxu0 %v9828_v54  ;;  %v2377_v13 = vmul.f32 %v2318_v63, %v13125_v31  ;;  %v2385_v49 = vmul.f32 %v2350_v42, %v13126_v12  ;;  %v9842_v54 = vld [vmem:[#allocation8 + $0x40] ss:$16 sps:$4 sm:$0xff]   ;;  %v9854_v61 = vld [vmem:[#allocation8 + $0xa8] ss:$16 sps:$4 sm:$0xff]   ;;  %v9863_v56 = vld [vmem:[#allocation8 + $0xc] ss:$16 sps:$4 sm:$0xff]  }
 0x49a   :  { %2062 = vmatprep.subr.bf16.mxu0 %v9829_v40  ;;  %v9843_v40 = vld [vmem:[#allocation8 + $0x24] ss:$16 sps:$4 sm:$0xff]   ;;  %v2378_v3 = vmul.f32 %v2322_v25, %v13127_v1  ;;  %v2386_v24 = vmul.f32 %v2354_v53, %v13128_v35  ;;  %v9856_v34 = vld [vmem:[#allocation8 + $0x88] ss:$16 sps:$4 sm:$0xff]   ;;  %v9865_v42 = vld [vmem:[#allocation7 + $0xec] ss:$16 sps:$4 sm:$0xff]  }
 0x49b   :  { %2104 = vmatpush1.bf16.msra.mxu1 %v9834_v55  ;;  %v9857_v55 = vld [vmem:[#allocation8 + $0x6c] ss:$16 sps:$4 sm:$0xff]   ;;  %v9862_v63 = vld [vmem:[#allocation8 + $0x28] ss:$16 sps:$4 sm:$0xff]  }
 0x49c   :  { %2403 = vadd.xlane.f32.xlu0 %v2379_v8  ;;  %2105 = vmatprep.subr.bf16.mxu1 %v9835_v45  ;;  %v9844_v8 = vld [vmem:[#allocation10 + $0x8] ss:$16 sps:$4 sm:$0xff]  }
 0x49d   :  { %2411 = vadd.xlane.f32.xlu1 %v2383_v33  ;;  %2063 = vmatpush1.bf16.msra.mxu0 %v9832_v0  ;;  %v9845_v33 = vld [vmem:[#allocation8 + $0xec] ss:$16 sps:$4 sm:$0xff]   ;;  %v9858_v45 = vld [vmem:[#allocation8 + $0x68] ss:$16 sps:$4 sm:$0xff]  }
 0x49e   :  { %2064 = vmatprep.subr.bf16.mxu0 %v9833_v28  ;;  %v9848_v0 = vld [vmem:[#allocation8 + $0xcc] ss:$16 sps:$4 sm:$0xff]   ;;  %v9849_v28 = vld [vmem:[#allocation8 + $0x4] ss:$16 sps:$4 sm:$0xff]  }
 0x49f   :  { %2106 = vmatpush1.bf16.msra.mxu1 %v9838_v46 }
 0x4a0   :  { %2393 = vadd.xlane.f32.xlu0 %v2374_v30  ;;  %2107 = vmatprep.subr.bf16.mxu1 %v9839_v26  ;;  %v9850_v30 = vld [vmem:[#allocation8] ss:$16 sps:$4 sm:$0xff]  }
 0x4a1   :  { %2409 = vadd.xlane.f32.xlu1 %v2382_v16  ;;  %2065 = vmatpush1.bf16.msra.mxu0 %v9836_v9  ;;  %v9853_v16 = vld [vmem:[#allocation8 + $0xac] ss:$16 sps:$4 sm:$0xff]  }
 0x4a2   :  { %2066 = vmatprep.subr.bf16.mxu0 %v9837_v27  ;;  %v9859_v9 = vld [vmem:[#allocation8 + $0x4c] ss:$16 sps:$4 sm:$0xff]   ;;  %v9860_v27 = vld [vmem:[#allocation8 + $0x48] ss:$16 sps:$4 sm:$0xff]  }
 0x4a3   :  { %2108 = vmatpush1.bf16.msra.mxu1 %v9842_v54 }
 0x4a4   :  { %2397 = vadd.xlane.f32.xlu0 %v2376_v23  ;;  %2109 = vmatprep.subr.bf16.mxu1 %v9843_v40  ;;  %v9861_v23 = vld [vmem:[#allocation8 + $0x2c] ss:$16 sps:$4 sm:$0xff]  }
 0x4a5   :  { %2413 = vadd.xlane.f32.xlu1 %v2384_v18  ;;  %2067 = vmatpush1.bf16.msra.mxu0 %v9840_v7  ;;  %v9864_v18 = vld [vmem:[#allocation8 + $0x8] ss:$16 sps:$4 sm:$0xff]  }
 0x4a6   :  { %2068 = vmatprep.subr.bf16.mxu0 %v9841_v48  ;;  %v13129_v40 = vld [vmem:[#allocation36_spill] sm:$0xff] }
 0x4a7   :  { %2110 = vmatpush1.bf16.msra.mxu1 %v9846_v10 }
 0x4a8   :  { %2399 = vadd.xlane.f32.xlu0 %v2377_v13  ;;  %2111 = vmatprep.subr.bf16.mxu1 %v9849_v28 }
 0x4a9   :  { %2415 = vadd.xlane.f32.xlu1 %v2385_v49  ;;  %2069 = vmatpush1.bf16.msra.mxu0 %v9844_v8 }
 0x4aa   :  { %2140 = vmatprep.subr.bf16.mxu0 %v9845_v33 }
 0x4ab   :  { %2112 = vmatpush1.bf16.msra.mxu1 %v9850_v30 }
 0x4ac   :  { %2087 = vmatmul.mubr.bf16.vlgmr.msra.gmra.mxu0 %v11130_v19  ;;  %2401 = vadd.xlane.f32.xlu0 %v2378_v3  ;;  %v9855_v19 = vld [vmem:[#allocation8 + $0x8c] ss:$16 sps:$4 sm:$0xff]  }
 0x4ad   :  { %2417 = vadd.xlane.f32.xlu1 %v2386_v24  ;;  %2141 = vmatpush1.bf16.msra.mxu0 %v9847_v58 }
 0x4ae   :  { %2142 = vmatprep.subr.bf16.mxu0 %v9848_v0  ;;  %2172 = vmatprep.mubr.bf16.mxu0 %v13108_v38 }
 0x4af   :  { %3157 = vmatprep.subr.bf16.mxu1 %v9851_v47 }
 0x4b1   :  { %2143 = vmatpush1.bf16.msra.mxu0 %v9852_v39 }
 0x4b2   :  { %2144 = vmatprep.subr.bf16.mxu0 %v9853_v16 }
 0x4b5   :  { %2145 = vmatpush1.bf16.msra.mxu0 %v9854_v61 }
 0x4b6   :  { %2146 = vmatprep.subr.bf16.mxu0 %v9855_v19 }
 0x4b9   :  { %2147 = vmatpush1.bf16.msra.mxu0 %v9856_v34 }
 0x4ba   :  { %2148 = vmatprep.subr.bf16.mxu0 %v9857_v55 }
 0x4bd   :  { %2149 = vmatpush1.bf16.msra.mxu0 %v9858_v45 }
 0x4be   :  { %2150 = vmatprep.subr.bf16.mxu0 %v9859_v9 }
 0x4c1   :  { %2151 = vmatpush1.bf16.msra.mxu0 %v9860_v27 }
 0x4c2   :  { %2152 = vmatprep.subr.bf16.mxu0 %v9861_v23 }
 0x4c5   :  { %2153 = vmatpush1.bf16.msra.mxu0 %v9862_v63 }
 0x4c6   :  { %2154 = vmatprep.subr.bf16.mxu0 %v9863_v56 }
 0x4c9   :  { %2155 = vmatpush1.bf16.msra.mxu0 %v9864_v18 }
 0x4ca   :  { %3200 = vmatprep.subr.bf16.mxu0 %v9865_v42 }
 0x517   :  { %v11199_v46 = vpop.xlane.xlu1 %2387 }
 0x518   :  { %v2438_v58 = vrot.slane %v11199_v46, %v13129_v40 }
 0x519   :  { %v11197_v5 = vpop.xlane.xlu0 %2389 }
 0x51a   :  { %v2442_v3 = vrot.slane %v11197_v5, %v13129_v40 }
 0x51c   :  { %v2499_v39 = vsel %vm924_vm0, %v2442_v3, %v2438_v58 }
 0x51d   :  { %v11201_v26 = vpop.xlane.xlu0 %2391 }
 0x51e   :  { %v11203_v7 = vpop.xlane.xlu1 %2405  ;;  %v2446_v33 = vrot.slane %v11201_v26, %v13129_v40 }
 0x51f   :  { %v2474_v24 = vrot.slane %v11203_v7, %v13129_v40 }
 0x520   :  { %v2500_v61 = vsel %vm926_vm1, %v2446_v33, %v2499_v39 }
 0x521   :  { %v11205_v48 = vpop.xlane.xlu0 %2395 }
 0x522   :  { %v11207_v13 = vpop.xlane.xlu1 %2407  ;;  %v2454_v27 = vrot.slane %v11205_v48, %v13129_v40 }
 0x523   :  { %v2478_v16 = vrot.slane %v11207_v13, %v13129_v40 }
 0x525   :  { %v11209_v25 = vpop.xlane.xlu0 %2403 }
 0x526   :  { %v11211_v49 = vpop.xlane.xlu1 %2411  ;;  %v2470_v8 = vrot.slane %v11209_v25, %v13129_v40 }
 0x527   :  { %v2486_v18 = vrot.slane %v11211_v49, %v13129_v40 }
 0x528   :  { %v2506_v30 = vsel %vm924_vm0, %v2474_v24, %v2470_v8 }
 0x529   :  { %v11213_v53 = vpop.xlane.xlu0 %2393  ;;  %v2507_v55 = vsel %vm926_vm1, %v2478_v16, %v2506_v30 }
 0x52a   :  { %v11215_v54 = vpop.xlane.xlu1 %2409  ;;  %v2450_v0 = vrot.slane %v11213_v53, %v13129_v40 }
 0x52b   :  { %v2482_v47 = vrot.slane %v11215_v54, %v13129_v40 }
 0x52c   :  { %v2501_v34 = vsel %vm928_vm2, %v2450_v0, %v2500_v61 }
 0x52d   :  { %v11225_v10 = vpop.xlane.xlu0 %2397  ;;  %v2508_v23 = vsel %vm928_vm2, %v2482_v47, %v2507_v55  ;;  %v2502_v3 = vsel %vm930_vm3, %v2454_v27, %v2501_v34 }
 0x52e   :  { %v11231_v28 = vpop.xlane.xlu1 %2413  ;;  %v2458_v45 = vrot.slane %v11225_v10, %v13129_v40  ;;  %v2509_v0 = vsel %vm930_vm3, %v2486_v18, %v2508_v23  ;;  %v8812_v23 = vld [vmem:[%s13018_s7] ss:$0 sm:$0xff] }
 0x52f   :  { %v2490_v63 = vrot.slane %v11231_v28, %v13129_v40 }
 0x530   :  { %v2503_v58 = vsel %vm932_vm4, %v2458_v45, %v2502_v3 }
 0x531   :  { %v11240_v19 = vpop.xlane.xlu0 %2399  ;;  %v2510_v39 = vsel %vm932_vm4, %v2490_v63, %v2509_v0 }
 0x532   :  { %v11246_v9 = vpop.xlane.xlu1 %2415  ;;  %v2462_v56 = vrot.slane %v11240_v19, %v13129_v40 }
 0x533   :  { %v2494_v42 = vrot.slane %v11246_v9, %v13129_v40 }
 0x534   :  { %v2504_v47 = vsel %vm934_vm5, %v2462_v56, %v2503_v58 }
 0x535   :  { %v11259_v8 = vpop.xlane.xlu0 %2401  ;;  %v2511_v61 = vsel %vm934_vm5, %v2494_v42, %v2510_v39 }
 0x536   :  { %v2466_v33 = vrot.slane %v11259_v8, %v13129_v40  ;;  %v11264_v24 = vpop.xlane.xlu1 %2417 }
 0x537   :  { %v2498_v30 = vrot.slane %v11264_v24, %v13129_v40 }
 0x538   :  { %v2505_v16 = vsel %vm936_vm6, %v2466_v33, %v2504_v47 }
 0x539   :  { %v2515_v34 = vsel %vm947_vm7, %v2505_v16, -inf  ;;  %v2512_v55 = vsel %vm936_vm6, %v2498_v30, %v2511_v61 }
 0x53a   :  { %2516 = vmax.xlane.f32.xlu0 %v2515_v34  ;;  %v2518_v45 = vsel %vm947_vm7, %v2512_v55, -inf }
 0x53b   :  { %2519 = vmax.xlane.f32.xlu1 %v2518_v45 }
 0x54c   :  { %v1975_v27 = vpop.f32.mrf.mxu0 }
 0x54d   :  { %v11280_v63 = vadd.f32 %v8812_v23, %v1975_v27 }
 0x54e   :  { %v9080_v56 = vpop.f32.mrf.mxu0 }
 0x54f   :  { %v13130_v56 = vld [vmem:[#allocation38_spill] sm:$0xff] }
 0x550   :  { %v1978_v18 = vpop.f32.mrf.mxu0 }
 0x551   :  { %v11282_v3 = vadd.f32 %v8812_v23, %v1978_v18 }
 0x552   :  { %v9081_v42 = vpop.f32.mrf.mxu0 }
 0x553   :  { %v8981_v33 = vpack.c.bf16 %v11282_v3, %v11280_v63 }
 0x555   :  { %8982 = vst [vmem:[#allocation13] sm:$0xff] %v8981_v33  }
 0x5c3   :  { %v2517_v58 = vpop.xlane.xlu0 %2516 }
 0x5c4   :  { %v2526_v0 = vrot.slane %v2517_v58, %v10785_v6  ;;  %v2530_v30 = vrot.slane %v2517_v58, %v13109_v11  ;;  %v2534_v47 = vrot.slane %v2517_v58, %v13111_v50  ;;  %v2538_v39 = vrot.slane %v2517_v58, %v13110_v43  ;;  %v11292_v34 = vpop.xlane.xlu1 %2519 }
 0x5c5   :  { %v2562_v23 = vrot.slane %v11292_v34, %v13109_v11  ;;  %v2542_v18 = vrot.slane %v2517_v58, %v13130_v56 }
 0x5c6   :  { %v2603_v16 = vsub.f32 %v11199_v46, %v2526_v0  ;;  %v2604_v61 = vsub.f32 %v11197_v5, %v2530_v30  ;;  %v2605_v55 = vsub.f32 %v11201_v26, %v2534_v47  ;;  %v2606_v42 = vsub.f32 %v11213_v53, %v2538_v39  ;;  %v13131_v0 = vld [vmem:[#allocation39_spill] sm:$0xff] }
 0x5c7   :  { %v2566_v46 = vrot.slane %v11292_v34, %v13111_v50  ;;  %v2612_v5 = vsub.f32 %v11203_v7, %v2562_v23  ;;  %v2546_v30 = vrot.slane %v2517_v58, %v13131_v0  ;;  %v2607_v26 = vsub.f32 %v11205_v48, %v2542_v18  ;;  %v13132_v23 = vld [vmem:[#allocation41_spill] sm:$0xff] }
 0x5c8   :  { %v2619_v45 = vmul.f32 1.442695, %v2603_v16  ;;  %v2621_v27 = vmul.f32 1.442695, %v2604_v61  ;;  %v2623_v33 = vmul.f32 1.442695, %v2605_v55  ;;  %v2570_v16 = vrot.slane %v11292_v34, %v13110_v43 }
 0x5c9   :  { %v2625_v47 = vmul.f32 1.442695, %v2606_v42  ;;  %v2613_v61 = vsub.f32 %v11207_v13, %v2566_v46  ;;  %v2637_v53 = vmul.f32 1.442695, %v2612_v5  ;;  %v2608_v39 = vsub.f32 %v11225_v10, %v2546_v30 }
 0x5ca   :  { %9422 = vpow2.f32 %v2619_v45  ;;  %v2627_v55 = vmul.f32 1.442695, %v2607_v26  ;;  %v2558_v45 = vrot.slane %v11292_v34, %v10785_v6  ;;  %v2574_v7 = vrot.slane %v11292_v34, %v13130_v56 }
 0x5cb   :  { %9424 = vpow2.f32 %v2621_v27  ;;  %v2614_v48 = vsub.f32 %v11215_v54, %v2570_v16  ;;  %v2639_v27 = vmul.f32 1.442695, %v2613_v61  ;;  %v2550_v18 = vrot.slane %v2517_v58, %v13132_v23  ;;  %v13133_v54 = vld [vmem:[#allocation42_spill] sm:$0xff] }
 0x5cc   :  { %9426 = vpow2.f32 %v2623_v33  ;;  %v2629_v42 = vmul.f32 1.442695, %v2608_v39  ;;  %v2611_v13 = vsub.f32 %v11209_v25, %v2558_v45  ;;  %v2578_v10 = vrot.slane %v11292_v34, %v13131_v0 }
 0x5cd   :  { %9428 = vpow2.f32 %v2625_v47  ;;  %v2615_v46 = vsub.f32 %v11211_v49, %v2574_v7  ;;  %v2641_v5 = vmul.f32 1.442695, %v2614_v48  ;;  %v2554_v26 = vrot.slane %v2517_v58, %v13133_v54 }
 0x5ce   :  { %9430 = vpow2.f32 %v2637_v53  ;;  %v2609_v47 = vsub.f32 %v11240_v19, %v2550_v18  ;;  %v2635_v25 = vmul.f32 1.442695, %v2611_v13  ;;  %v2582_v16 = vrot.slane %v11292_v34, %v13132_v23 }
 0x5cf   :  { %9432 = vpow2.f32 %v2627_v55  ;;  %v2616_v61 = vsub.f32 %v11231_v28, %v2578_v10  ;;  %v2643_v49 = vmul.f32 1.442695, %v2615_v46  ;;  %v2610_v39 = vsub.f32 %v11259_v8, %v2554_v26 }
 0x5d0   :  { %9434 = vpow2.f32 %v2639_v27  ;;  %v2631_v55 = vmul.f32 1.442695, %v2609_v47  ;;  %v2586_v19 = vrot.slane %v11292_v34, %v13133_v54  ;;  %v2617_v45 = vsub.f32 %v11246_v9, %v2582_v16 }
 0x5d1   :  { %9436 = vpow2.f32 %v2629_v42  ;;  %v2645_v7 = vmul.f32 1.442695, %v2616_v61  ;;  %v2633_v48 = vmul.f32 1.442695, %v2610_v39 }
 0x5d2   :  { %9438 = vpow2.f32 %v2641_v5  ;;  %v2618_v27 = vsub.f32 %v11264_v24, %v2586_v19  ;;  %v2647_v18 = vmul.f32 1.442695, %v2617_v45 }
 0x5d3   :  { %9440 = vpow2.f32 %v2635_v25 }
 0x5d4   :  { %9442 = vpow2.f32 %v2643_v49  ;;  %v2649_v34 = vmul.f32 1.442695, %v2618_v27 }
 0x5d5   :  { %9444 = vpow2.f32 %v2631_v55 }
 0x5d6   :  { %9446 = vpow2.f32 %v2645_v7 }
 0x5d7   :  { %v11315_v33 = vpop.eup %9422  ;;  %9448 = vpow2.f32 %v2633_v48 }
 0x5d8   :  { %v11320_v30 = vpop.eup %9424  ;;  %2668 = vperm.xlu0 %9199, %v11315_v33   ;;  %9450 = vpow2.f32 %v2647_v18 }
 0x5d9   :  { %2671 = vperm.xlu1 %9200, %v11320_v30   ;;  %v11329_v53 = vpop.eup %9426  ;;  %9452 = vpow2.f32 %v2649_v34 }
 0x5da   :  { %v11333_v58 = vpop.eup %9428 }
 0x5db   :  { %v11338_v28 = vpop.eup %9430 }
 0x5dc   :  { %2695 = vperm.xlu0 %9199, %v11338_v28   ;;  %v11342_v8 = vpop.eup %9432 }
 0x5dd   :  { %2674 = vperm.xlu1 %9200, %v11329_v53   ;;  %v11345_v42 = vpop.eup %9434 }
 0x5de   :  { %v11349_v9 = vpop.eup %9436 }
 0x5df   :  { %v11351_v13 = vpop.eup %9438 }
 0x5e0   :  { %2698 = vperm.xlu0 %9199, %v11345_v42   ;;  %v11355_v24 = vpop.eup %9440 }
 0x5e1   :  { %2677 = vperm.xlu1 %9200, %v11333_v58   ;;  %v11357_v10 = vpop.eup %9442 }
 0x5e2   :  { %v11361_v46 = vpop.eup %9444 }
 0x5e3   :  { %v11363_v5 = vpop.eup %9446 }
 0x5e4   :  { %2701 = vperm.xlu0 %9199, %v11351_v13   ;;  %v11367_v26 = vpop.eup %9448 }
 0x5e5   :  { %2680 = vperm.xlu1 %9200, %v11342_v8   ;;  %v11369_v47 = vpop.eup %9450 }
 0x5e6   :  { %v11373_v25 = vpop.eup %9452 }
 0x5e8   :  { %2704 = vperm.xlu0 %9199, %v11357_v10  }
 0x5e9   :  { %2683 = vperm.xlu1 %9200, %v11349_v9  }
 0x5ec   :  { %2707 = vperm.xlu0 %9199, %v11363_v5  }
 0x5ed   :  { %2692 = vperm.xlu1 %9200, %v11355_v24  }
 0x5f0   :  { %2710 = vperm.xlu0 %9199, %v11369_v47  }
 0x5f1   :  { %2686 = vperm.xlu1 %9200, %v11361_v46  }
 0x5f4   :  { %2713 = vperm.xlu0 %9199, %v11373_v25  }
 0x5f5   :  { %2689 = vperm.xlu1 %9200, %v11367_v26  }
 0x613   :  { %1994 = vmax.xlane.f32.xlu0 %v11282_v3 }
 0x619   :  { %1992 = vmax.xlane.f32.xlu1 %v11280_v63 }
 0x653   :  { %v2669_v61 = vpop.permute.xlu0 %2668 }
 0x654   :  { %v2672_v16 = vpop.permute.xlu1 %2671  ;;  %v2718_v34 = vrot.slane %v2669_v61, %v13129_v40 }
 0x655   :  { %v2722_v44 = vrot.slane %v2672_v16, %v13129_v40 }
 0x657   :  { %v2696_v39 = vpop.permute.xlu0 %2695 }
 0x658   :  { %v2675_v49 = vpop.permute.xlu1 %2674  ;;  %v2754_v1 = vrot.slane %v2696_v39, %v13129_v40  ;;  %v2779_v39 = vsel %vm924_vm0, %v2722_v44, %v2718_v34 }
 0x659   :  { %v2726_v31 = vrot.slane %v2675_v49, %v13129_v40 }
 0x65b   :  { %v2699_v19 = vpop.permute.xlu0 %2698 }
 0x65c   :  { %v2678_v55 = vpop.permute.xlu1 %2677  ;;  %v2758_v12 = vrot.slane %v2699_v19, %v13129_v40  ;;  %v2780_v19 = vsel %vm926_vm1, %v2726_v31, %v2779_v39 }
 0x65d   :  { %v2730_v59 = vrot.slane %v2678_v55, %v13129_v40 }
 0x65f   :  { %v2702_v7 = vpop.permute.xlu0 %2701 }
 0x660   :  { %v2681_v45 = vpop.permute.xlu1 %2680  ;;  %v2762_v14 = vrot.slane %v2702_v7, %v13129_v40 }
 0x661   :  { %v2734_v22 = vrot.slane %v2681_v45, %v13129_v40 }
 0x663   :  { %v2705_v27 = vpop.permute.xlu0 %2704 }
 0x664   :  { %v2684_v48 = vpop.permute.xlu1 %2683  ;;  %v2766_v55 = vrot.slane %v2705_v27, %v13129_v40 }
 0x667   :  { %v2708_v37 = vpop.permute.xlu0 %2707 }
 0x668   :  { %v2693_v18 = vpop.permute.xlu1 %2692  ;;  %v2770_v44 = vrot.slane %v2708_v37, %v13129_v40 }
 0x669   :  { %v2750_v35 = vrot.slane %v2693_v18, %v13129_v40  ;;  %v2738_v18 = vrot.slane %v2684_v48, %v13129_v40 }
 0x66b   :  { %v2786_v20 = vsel %vm924_vm0, %v2754_v1, %v2750_v35  ;;  %v2781_v1 = vsel %vm928_vm2, %v2730_v59, %v2780_v19  ;;  %v2711_v45 = vpop.permute.xlu0 %2710 }
 0x66c   :  { %v2787_v61 = vsel %vm926_vm1, %v2758_v12, %v2786_v20  ;;  %v2687_v16 = vpop.permute.xlu1 %2686  ;;  %v2782_v35 = vsel %vm930_vm3, %v2734_v22, %v2781_v1  ;;  %v2774_v31 = vrot.slane %v2711_v45, %v13129_v40 }
 0x66d   :  { %v2788_v49 = vsel %vm928_vm2, %v2762_v14, %v2787_v61  ;;  %v2742_v7 = vrot.slane %v2687_v16, %v13129_v40  ;;  %v2783_v14 = vsel %vm932_vm4, %v2738_v18, %v2782_v35 }
 0x66e   :  { %v2789_v20 = vsel %vm930_vm3, %v2766_v55, %v2788_v49 }
 0x66f   :  { %v2784_v48 = vsel %vm934_vm5, %v2742_v7, %v2783_v14  ;;  %v2790_v27 = vsel %vm932_vm4, %v2770_v44, %v2789_v20  ;;  %v2714_v34 = vpop.permute.xlu0 %2713 }
 0x670   :  { %v2690_v41 = vpop.permute.xlu1 %2689  ;;  %v2778_v61 = vrot.slane %v2714_v34, %v13129_v40  ;;  %v2791_v37 = vsel %vm934_vm5, %v2774_v31, %v2790_v27 }
 0x671   :  { %v2746_v12 = vrot.slane %v2690_v41, %v13129_v40 }
 0x672   :  { %v2792_v41 = vsel %vm936_vm6, %v2778_v61, %v2791_v37 }
 0x673   :  { %v2785_v59 = vsel %vm936_vm6, %v2746_v12, %v2784_v48  ;;  %v2798_v16 = vsel %vm947_vm7, %v2792_v41, 0.0 }
 0x674   :  { %v2795_v22 = vsel %vm947_vm7, %v2785_v59, 0.0  ;;  %2799 = vadd.xlane.f32.xlu1 %v2798_v16 }
 0x675   :  { %2796 = vadd.xlane.f32.xlu0 %v2795_v22 }
 0x69c   :  { %v1995_v39 = vpop.xlane.xlu0 %1994 }
 0x69d   :  { %v1997_v18 = vsub.f32 %v11282_v3, %v1995_v39 }
 0x69f   :  { %v2000_v55 = vmul.f32 1.442695, %v1997_v18 }
 0x6a1   :  { %9454 = vpow2.f32 %v2000_v55 }
 0x6a2   :  { %v1993_v49 = vpop.xlane.xlu1 %1992 }
 0x6a3   :  { %v1996_v19 = vsub.f32 %v11280_v63, %v1993_v49 }
 0x6a5   :  { %v1998_v7 = vmul.f32 1.442695, %v1996_v19 }
 0x6a7   :  { %9456 = vpow2.f32 %v1998_v7 }
 0x6ae   :  { %v11412_v1 = vpop.eup %9454 }
 0x6af   :  { %2004 = vadd.xlane.f32.xlu1 %v11412_v1 }
 0x6b4   :  { %v11414_v35 = vpop.eup %9456 }
 0x6b5   :  { %2002 = vadd.xlane.f32.xlu0 %v11414_v35 }
 0x6fd   :  { %v2800_v20 = vpop.xlane.xlu1 %2799 }
 0x6fe   :  { %v2797_v45 = vpop.xlane.xlu0 %2796 }
 0x6ff   :  { %9458 = vrcp.f32 %v2797_v45 }
 0x700   :  { %9460 = vrcp.f32 %v2800_v20 }
 0x70c   :  { %v9459_v3 = vpop.eup %9458 }
 0x70d   :  { %v2812_v44 = vrot.slane %v9459_v3, %v13109_v11  ;;  %v2808_v63 = vrot.slane %v9459_v3, %v10785_v6  ;;  %v2816_v31 = vrot.slane %v9459_v3, %v13111_v50  ;;  %v9461_v48 = vpop.eup %9460  ;;  %v2820_v22 = vrot.slane %v9459_v3, %v13110_v43 }
 0x70e   :  { %v2844_v27 = vrot.slane %v9461_v48, %v13109_v11  ;;  %v2848_v61 = vrot.slane %v9461_v48, %v13111_v50  ;;  %v2824_v37 = vrot.slane %v9459_v3, %v13130_v56  ;;  %v2852_v41 = vrot.slane %v9461_v48, %v13110_v43 }
 0x70f   :  { %v2886_v12 = vmul.f32 %v11320_v30, %v2812_v44  ;;  %v2885_v14 = vmul.f32 %v11315_v33, %v2808_v63  ;;  %v2887_v59 = vmul.f32 %v11329_v53, %v2816_v31  ;;  %v2888_v30 = vmul.f32 %v11333_v58, %v2820_v22  ;;  %v9869_v31 = vld [vmem:[#allocation7 + $0xcc] ss:$16 sps:$4 sm:$0xff]   ;;  %v9876_v22 = vld [vmem:[#allocation7 + $0x84] ss:$16 sps:$4 sm:$0xff]  }
 0x710   :  { %v2894_v34 = vmul.f32 %v11338_v28, %v2844_v27  ;;  %v2895_v33 = vmul.f32 %v11345_v42, %v2848_v61  ;;  %v2889_v53 = vmul.f32 %v11342_v8, %v2824_v37  ;;  %v2896_v28 = vmul.f32 %v11351_v13, %v2852_v41  ;;  %v9873_v27 = vld [vmem:[#allocation7 + $0xac] ss:$16 sps:$4 sm:$0xff]   ;;  %v9880_v37 = vld [vmem:[#allocation7 + $0x64] ss:$16 sps:$4 sm:$0xff]  }
 0x711   :  { %2908 = vperm.xlu1 %9200, %v2886_v12   ;;  %2903 = vperm.xlu0 %9199, %v2885_v14   ;;  %v2828_v16 = vrot.slane %v9459_v3, %v13131_v0  ;;  %v2856_v39 = vrot.slane %v9461_v48, %v13130_v56  ;;  %v2840_v18 = vrot.slane %v9461_v48, %v10785_v6  ;;  %v9866_v14 = vld [vmem:[#allocation7 + $0xe0] ss:$16 sps:$4 sm:$0xff]   ;;  %v9877_v61 = vld [vmem:[#allocation7 + $0x8c] ss:$16 sps:$4 sm:$0xff]  }
 0x712   :  { %v2860_v49 = vrot.slane %v9461_v48, %v13131_v0  ;;  %v2832_v19 = vrot.slane %v9459_v3, %v13132_v23  ;;  %v2864_v55 = vrot.slane %v9461_v48, %v13132_v23  ;;  %v2836_v7 = vrot.slane %v9459_v3, %v13133_v54  ;;  %v9881_v41 = vld [vmem:[#allocation7 + $0x6c] ss:$16 sps:$4 sm:$0xff]  }
 0x713   :  { %v2890_v58 = vmul.f32 %v11349_v9, %v2828_v16  ;;  %v2897_v42 = vmul.f32 %v11357_v10, %v2856_v39  ;;  %v2893_v8 = vmul.f32 %v11355_v24, %v2840_v18  ;;  %v2868_v45 = vrot.slane %v9461_v48, %v13133_v54  ;;  %v9870_v48 = vld [vmem:[#allocation7 + $0xc0] ss:$16 sps:$4 sm:$0xff]   ;;  %v9884_v16 = vld [vmem:[#allocation7 + $0x44] ss:$16 sps:$4 sm:$0xff]   ;;  %v9885_v39 = vld [vmem:[#allocation7 + $0x4c] ss:$16 sps:$4 sm:$0xff]  }
 0x714   :  { %v2898_v13 = vmul.f32 %v11363_v5, %v2860_v49  ;;  %v2891_v9 = vmul.f32 %v11361_v46, %v2832_v19  ;;  %v2899_v10 = vmul.f32 %v11369_v47, %v2864_v55  ;;  %v2892_v24 = vmul.f32 %v11367_v26, %v2836_v7  ;;  %v9867_v26 = vld [vmem:[#allocation7 + $0xe8] ss:$16 sps:$4 sm:$0xff]   ;;  %v9888_v18 = vld [vmem:[#allocation7 + $0x24] ss:$16 sps:$4 sm:$0xff]   ;;  %v9889_v49 = vld [vmem:[#allocation7 + $0x2c] ss:$16 sps:$4 sm:$0xff]  }
 0x715   :  { %2913 = vperm.xlu1 %9200, %v2887_v59   ;;  %2948 = vperm.xlu0 %9199, %v2894_v34   ;;  %v2900_v5 = vmul.f32 %v11373_v25, %v2868_v45  ;;  %v9868_v25 = vld [vmem:[#allocation7 + $0xc4] ss:$16 sps:$4 sm:$0xff]   ;;  %v9874_v59 = vld [vmem:[#allocation7 + $0xa0] ss:$16 sps:$4 sm:$0xff]   ;;  %v9875_v34 = vld [vmem:[#allocation7 + $0xa8] ss:$16 sps:$4 sm:$0xff]  }
 0x716   :  { %v9892_v19 = vld [vmem:[#allocation7 + $0x4] ss:$16 sps:$4 sm:$0xff]   ;;  %v9893_v55 = vld [vmem:[#allocation7 + $0xc] ss:$16 sps:$4 sm:$0xff]   ;;  %v13134_v7 = vmov 0.0  }
 0x717   :  { %v9896_v45 = vld [vmem:[#allocation10 + $0xe4] ss:$16 sps:$4 sm:$0xff]  }
 0x719   :  { %2918 = vperm.xlu1 %9200, %v2888_v30   ;;  %2953 = vperm.xlu0 %9199, %v2895_v33   ;;  %v9878_v30 = vld [vmem:[#allocation7 + $0x80] ss:$16 sps:$4 sm:$0xff]   ;;  %v9879_v33 = vld [vmem:[#allocation7 + $0x88] ss:$16 sps:$4 sm:$0xff]  }
 0x71d   :  { %2923 = vperm.xlu1 %9200, %v2889_v53   ;;  %2958 = vperm.xlu0 %9199, %v2896_v28   ;;  %v9882_v53 = vld [vmem:[#allocation7 + $0x60] ss:$16 sps:$4 sm:$0xff]   ;;  %v9883_v28 = vld [vmem:[#allocation7 + $0x68] ss:$16 sps:$4 sm:$0xff]  }
 0x721   :  { %2928 = vperm.xlu1 %9200, %v2890_v58   ;;  %2963 = vperm.xlu0 %9199, %v2897_v42   ;;  %v9886_v58 = vld [vmem:[#allocation7 + $0x40] ss:$16 sps:$4 sm:$0xff]   ;;  %v9887_v42 = vld [vmem:[#allocation7 + $0x48] ss:$16 sps:$4 sm:$0xff]  }
 0x725   :  { %2943 = vperm.xlu1 %9200, %v2893_v8   ;;  %2968 = vperm.xlu0 %9199, %v2898_v13   ;;  %v9890_v8 = vld [vmem:[#allocation7 + $0x20] ss:$16 sps:$4 sm:$0xff]   ;;  %v9891_v13 = vld [vmem:[#allocation7 + $0x28] ss:$16 sps:$4 sm:$0xff]  }
 0x729   :  { %2933 = vperm.xlu1 %9200, %v2891_v9   ;;  %2973 = vperm.xlu0 %9199, %v2899_v10   ;;  %v9894_v9 = vld [vmem:[#allocation7] ss:$16 sps:$4 sm:$0xff]   ;;  %v9895_v10 = vld [vmem:[#allocation7 + $0x8] ss:$16 sps:$4 sm:$0xff]  }
 0x72d   :  { %2938 = vperm.xlu1 %9200, %v2892_v24   ;;  %2978 = vperm.xlu0 %9199, %v2900_v5  }
 0x738   :  { %v2005_v20 = vpop.xlane.xlu1 %2004 }
 0x739   :  { %9462 = vrcp.f32 %v2005_v20  ;;  %v9897_v20 = vld [vmem:[#allocation2 + $0x8] sm:$0xff] }
 0x73e   :  { %v2003_v44 = vpop.xlane.xlu0 %2002 }
 0x73f   :  { %9464 = vrcp.f32 %v2003_v44 }
 0x746   :  { %v9463_v63 = vpop.eup %9462 }
 0x747   :  { %v2009_v3 = vmul.f32 %v9463_v63, %v11412_v1  ;;  %v9872_v1 = vld [vmem:[#allocation7 + $0xa4] ss:$16 sps:$4 sm:$0xff]   ;;  %v9898_v63 = vld [vmem:[#allocation2] sm:$0xff] }
 0x74c   :  { %v9465_v46 = vpop.eup %9464 }
 0x74d   :  { %v2007_v47 = vmul.f32 %v9465_v46, %v11414_v35  ;;  %v9871_v35 = vld [vmem:[#allocation7 + $0xc8] ss:$16 sps:$4 sm:$0xff]  }
 0x74f   :  { %v2010_v12 = vpack.c.bf16 %v2009_v3, %v2007_v47 }
 0x751   :  { %2130 = vmatmul.mubr.bf16.vlgmr.msra.gmra.mxu1 %v2010_v12  ;;  %2173 = vmatmul.mubr.bf16.vlgmr.msra.gmra.mxu0 %v2010_v12 }
 0x752   :  { %3158 = vmatpush1.bf16.msra.mxu1 %v9866_v14  ;;  %3201 = vmatpush1.bf16.msra.mxu0 %v9867_v26 }
 0x753   :  { %3159 = vmatprep.subr.bf16.mxu1 %v9868_v25  ;;  %3202 = vmatprep.subr.bf16.mxu0 %v9869_v31  ;;  %v9899_v31 = vld [vmem:[#allocation2 + $0x10] sm:$0xff] }
 0x754   :  { %3189 = vmatprep.mubr.bf16.mxu1 %v13108_v38  ;;  %3232 = vmatprep.mubr.bf16.mxu0 %v13108_v38 }
 0x756   :  { %3160 = vmatpush1.bf16.msra.mxu1 %v9870_v48  ;;  %3203 = vmatpush1.bf16.msra.mxu0 %v9871_v35  ;;  %v9900_v35 = vld [vmem:[#allocation2 + $0x48] sm:$0xff] }
 0x757   :  { %3161 = vmatprep.subr.bf16.mxu1 %v9872_v1  ;;  %3204 = vmatprep.subr.bf16.mxu0 %v9873_v27 }
 0x75a   :  { %3162 = vmatpush1.bf16.msra.mxu1 %v9874_v59  ;;  %3205 = vmatpush1.bf16.msra.mxu0 %v9875_v34 }
 0x75b   :  { %3163 = vmatprep.subr.bf16.mxu1 %v9876_v22  ;;  %3206 = vmatprep.subr.bf16.mxu0 %v9877_v61 }
 0x75e   :  { %3164 = vmatpush1.bf16.msra.mxu1 %v9878_v30  ;;  %3207 = vmatpush1.bf16.msra.mxu0 %v9879_v33 }
 0x75f   :  { %3165 = vmatprep.subr.bf16.mxu1 %v9880_v37  ;;  %3208 = vmatprep.subr.bf16.mxu0 %v9881_v41 }
 0x762   :  { %3166 = vmatpush1.bf16.msra.mxu1 %v9882_v53  ;;  %3209 = vmatpush1.bf16.msra.mxu0 %v9883_v28  ;;  %v9901_v28 = vld [vmem:[#allocation2 + $0x18] sm:$0xff] }
 0x763   :  { %3167 = vmatprep.subr.bf16.mxu1 %v9884_v16  ;;  %3210 = vmatprep.subr.bf16.mxu0 %v9885_v39  ;;  %v9902_v39 = vld [vmem:[#allocation2 + $0x50] sm:$0xff] }
 0x766   :  { %3168 = vmatpush1.bf16.msra.mxu1 %v9886_v58  ;;  %3211 = vmatpush1.bf16.msra.mxu0 %v9887_v42 }
 0x767   :  { %3169 = vmatprep.subr.bf16.mxu1 %v9888_v18  ;;  %3212 = vmatprep.subr.bf16.mxu0 %v9889_v49 }
 0x76a   :  { %3170 = vmatpush1.bf16.msra.mxu1 %v9890_v8  ;;  %3213 = vmatpush1.bf16.msra.mxu0 %v9891_v13 }
 0x76b   :  { %3171 = vmatprep.subr.bf16.mxu1 %v9892_v19  ;;  %3214 = vmatprep.subr.bf16.mxu0 %v9893_v55 }
 0x76e   :  { %3172 = vmatpush1.bf16.msra.mxu1 %v9894_v9  ;;  %3215 = vmatpush1.bf16.msra.mxu0 %v9895_v10 }
 0x76f   :  { %9082 = vmatprep.subr.bf16.mxu1 %v13134_v7  ;;  %3371 = vmatprep.subr.bf16.mxu0 %v9896_v45 }
 0x78c   :  { %v2909_v24 = vpop.permute.xlu1 %2908  ;;  %v2904_v5 = vpop.permute.xlu0 %2903 }
 0x78d   :  { %v2982_v44 = vmul.f32 %v9897_v20, %v2909_v24  ;;  %v2981_v46 = vmul.f32 %v9898_v63, %v2904_v5  ;;  %v9903_v5 = vld [vmem:[#allocation2 + $0x20] sm:$0xff] }
 0x78f   :  { %v3003_v47 = vrot.slane %v2982_v44, 4  ;;  %v2997_v3 = vrot.slane %v2981_v46, 4 }
 0x790   :  { %v2914_v12 = vpop.permute.xlu1 %2913  ;;  %v2949_v14 = vpop.permute.xlu0 %2948 }
 0x791   :  { %v3004_v26 = vadd.f32 %v3003_v47, %v2982_v44  ;;  %v2998_v25 = vadd.f32 %v2997_v3, %v2981_v46  ;;  %v2983_v48 = vmul.f32 %v9899_v31, %v2914_v12  ;;  %v2990_v1 = vmul.f32 %v9900_v35, %v2949_v14  ;;  %v9904_v44 = vld [vmem:[#allocation2 + $0x58] sm:$0xff] }
 0x793   :  { %v3005_v27 = vrot.slane %v3004_v26, 2  ;;  %v2999_v59 = vrot.slane %v2998_v25, 2  ;;  %v3009_v34 = vrot.slane %v2983_v48, 4  ;;  %v3051_v22 = vrot.slane %v2990_v1, 4 }
 0x794   :  { %v2919_v61 = vpop.permute.xlu1 %2918  ;;  %v2954_v30 = vpop.permute.xlu0 %2953 }
 0x795   :  { %v3006_v33 = vadd.f32 %v3005_v27, %v3004_v26  ;;  %v3000_v37 = vadd.f32 %v2999_v59, %v2998_v25  ;;  %v3010_v41 = vadd.f32 %v3009_v34, %v2983_v48  ;;  %v3052_v53 = vadd.f32 %v3051_v22, %v2990_v1  ;;  %v9905_v34 = vld [vmem:[#allocation2 + $0x28] sm:$0xff] }
 0x796   :  { %v2984_v16 = vmul.f32 %v9901_v28, %v2919_v61  ;;  %v2991_v58 = vmul.f32 %v9902_v39, %v2954_v30  ;;  %v9906_v39 = vld [vmem:[#allocation2 + $0x60] sm:$0xff] }
 0x797   :  { %v3011_v42 = vrot.slane %v3010_v41, 2  ;;  %v3053_v18 = vrot.slane %v3052_v53, 2  ;;  %v3007_v55 = vrot.slane %v3006_v33, 1  ;;  %v3001_v9 = vrot.slane %v3000_v37, 1 }
 0x798   :  { %v3015_v49 = vrot.slane %v2984_v16, 4  ;;  %v3057_v8 = vrot.slane %v2991_v58, 4  ;;  %v2924_v13 = vpop.permute.xlu1 %2923  ;;  %v2959_v19 = vpop.permute.xlu0 %2958 }
 0x799   :  { %v3054_v10 = vadd.f32 %v3053_v18, %v3052_v53  ;;  %v2985_v20 = vmul.f32 %v9903_v5, %v2924_v13  ;;  %v2992_v63 = vmul.f32 %v9904_v44, %v2959_v19  ;;  %v3012_v46 = vadd.f32 %v3011_v42, %v3010_v41  ;;  %v9907_v19 = vld [vmem:[#allocation2 + $0x40] sm:$0xff] }
 0x79a   :  { %v3016_v45 = vadd.f32 %v3015_v49, %v2984_v16  ;;  %v3058_v24 = vadd.f32 %v3057_v8, %v2991_v58  ;;  %v3008_v31 = vadd.f32 %v3007_v55, %v3006_v33  ;;  %v3002_v48 = vadd.f32 %v3001_v9, %v3000_v37 }
 0x79b   :  { %v3021_v12 = vrot.slane %v2985_v20, 4  ;;  %v3063_v14 = vrot.slane %v2992_v63, 4  ;;  %v3055_v35 = vrot.slane %v3054_v10, 1  ;;  %v3013_v61 = vrot.slane %v3012_v46, 1 }
 0x79c   :  { %v3017_v47 = vrot.slane %v3016_v45, 2  ;;  %v3059_v3 = vrot.slane %v3058_v24, 2  ;;  %v2929_v26 = vpop.permute.xlu1 %2928  ;;  %v2964_v25 = vpop.permute.xlu0 %2963  ;;  %v3094_v42 = vpack.c.bf16 %v3008_v31, %v3008_v31  ;;  %v3093_v18 = vpack.c.bf16 %v3002_v48, %v3002_v48 }
 0x79d   :  { %v3064_v27 = vadd.f32 %v3063_v14, %v2992_v63  ;;  %v3022_v59 = vadd.f32 %v3021_v12, %v2985_v20  ;;  %v2986_v22 = vmul.f32 %v9905_v34, %v2929_v26  ;;  %v2993_v58 = vmul.f32 %v9906_v39, %v2964_v25 }
 0x79e   :  { %v3018_v1 = vadd.f32 %v3017_v47, %v3016_v45  ;;  %v3060_v30 = vadd.f32 %v3059_v3, %v3058_v24  ;;  %v3056_v49 = vadd.f32 %v3055_v35, %v3054_v10  ;;  %v11455_v9 = vadd.f32 %v3013_v61, %v3012_v46  ;;  %v9908_v47 = vld [vmem:[#allocation2 + $0x68] sm:$0xff]  ;;  %v9909_v61 = vld [vmem:[#allocation2 + $0x30] sm:$0xff] }
 0x79f   :  { %v3065_v53 = vrot.slane %v3064_v27, 2  ;;  %v3027_v41 = vrot.slane %v2986_v22, 4  ;;  %v3023_v33 = vrot.slane %v3022_v59, 2  ;;  %v3069_v13 = vrot.slane %v2993_v58, 4 }
 0x7a0   :  { %v2944_v28 = vpop.permute.xlu1 %2943  ;;  %v2969_v16 = vpop.permute.xlu0 %2968  ;;  %v3019_v8 = vrot.slane %v3018_v1, 1  ;;  %v3061_v45 = vrot.slane %v3060_v30, 1  ;;  %v11457_v14 = vunpack.c.l.b16 %v3094_v42  ;;  %v11459_v10 = vunpack.c.l.b16 %v3093_v18  ;;  %v9910_v18 = vld [vmem:[#allocation2 + $0x70] sm:$0xff] }
 0x7a1   :  { %v3028_v37 = vadd.f32 %v3027_v41, %v2986_v22  ;;  %v2989_v55 = vmul.f32 %v9907_v19, %v2944_v28  ;;  %v3066_v5 = vadd.f32 %v3065_v53, %v3064_v27  ;;  %v3070_v44 = vadd.f32 %v3069_v13, %v2993_v58 }
 0x7a2   :  { %v2994_v3 = vmul.f32 %v9908_v47, %v2969_v16  ;;  %v3102_v26 = vpack.c.bf16 %v3056_v49, %v3056_v49  ;;  %v11461_v25 = vadd.f32 %v3019_v8, %v3018_v1  ;;  %v3024_v31 = vadd.f32 %v3023_v33, %v3022_v59 }
 0x7a3   :  { %v3029_v20 = vrot.slane %v3028_v37, 2  ;;  %v3045_v63 = vrot.slane %v2989_v55, 4  ;;  %v3071_v48 = vrot.slane %v3070_v44, 2  ;;  %v3095_v27 = vpack.c.bf16 %v11455_v9, %v11455_v9 }
 0x7a4   :  { %v2934_v24 = vpop.permute.xlu1 %2933  ;;  %v2974_v12 = vpop.permute.xlu0 %2973  ;;  %v3075_v35 = vrot.slane %v2994_v3, 4  ;;  %v3062_v34 = vadd.f32 %v3061_v45, %v3060_v30  ;;  %v3067_v22 = vrot.slane %v3066_v5, 1  ;;  %v3134_v42 = vunpack.c.l.b16 %v3102_v26 }
 0x7a5   :  { %v3046_v46 = vadd.f32 %v3045_v63, %v2989_v55  ;;  %v2987_v53 = vmul.f32 %v9909_v61, %v2934_v24  ;;  %v3030_v28 = vadd.f32 %v3029_v20, %v3028_v37  ;;  %v3072_v16 = vadd.f32 %v3071_v48, %v3070_v44  ;;  %v9911_v37 = vld [vmem:[#allocation2 + $0x38] sm:$0xff] }
 0x7a6   :  { %v3076_v39 = vadd.f32 %v3075_v35, %v2994_v3  ;;  %v3096_v1 = vpack.c.bf16 %v11461_v25, %v11461_v25  ;;  %v2995_v49 = vmul.f32 %v9910_v18, %v2974_v12  ;;  %v3025_v8 = vrot.slane %v3024_v31, 1  ;;  %v9912_v48 = vld [vmem:[#allocation2 + $0x78] sm:$0xff] }
 0x7a7   :  { %v3047_v41 = vrot.slane %v3046_v46, 2  ;;  %v3033_v59 = vrot.slane %v2987_v53, 4  ;;  %v3073_v33 = vrot.slane %v3072_v16, 1  ;;  %v3103_v55 = vpack.c.bf16 %v3062_v34, %v3062_v34 }
 0x7a8   :  { %v2939_v58 = vpop.permute.xlu1 %2938  ;;  %v3077_v19 = vrot.slane %v3076_v39, 2  ;;  %v2979_v30 = vpop.permute.xlu0 %2978  ;;  %v3081_v45 = vrot.slane %v2995_v49, 4  ;;  %v3068_v20 = vadd.f32 %v3067_v22, %v3066_v5  ;;  %v3031_v44 = vrot.slane %v3030_v28, 1 }
 0x7a9   :  { %v3048_v13 = vadd.f32 %v3047_v41, %v3046_v46  ;;  %v3034_v9 = vadd.f32 %v3033_v59, %v2987_v53  ;;  %v2988_v24 = vmul.f32 %v9911_v37, %v2939_v58  ;;  %v2996_v35 = vmul.f32 %v9912_v48, %v2979_v30 }
 0x7aa   :  { %v3078_v47 = vadd.f32 %v3077_v19, %v3076_v39  ;;  %v3082_v26 = vadd.f32 %v3081_v45, %v2995_v49  ;;  %v3026_v12 = vadd.f32 %v3025_v8, %v3024_v31  ;;  %v3074_v61 = vadd.f32 %v3073_v33, %v3072_v16 }
 0x7ab   :  { %v3049_v63 = vrot.slane %v3048_v13, 1  ;;  %v3035_v3 = vrot.slane %v3034_v9, 2  ;;  %v3039_v25 = vrot.slane %v2988_v24, 4  ;;  %v3087_v53 = vrot.slane %v2996_v35, 4 }
 0x7ac   :  { %v3079_v46 = vrot.slane %v3078_v47, 1  ;;  %v3083_v54 = vrot.slane %v3082_v26, 2  ;;  %v3135_v59 = vunpack.c.l.b16 %v3103_v55  ;;  %v3104_v23 = vpack.c.bf16 %v3068_v20, %v3068_v20 }
 0x7ad   :  { %v3050_v18 = vadd.f32 %v3049_v63, %v3048_v13  ;;  %v3036_v41 = vadd.f32 %v3035_v3, %v3034_v9  ;;  %v3040_v34 = vadd.f32 %v3039_v25, %v2988_v24  ;;  %v3032_v58 = vadd.f32 %v3031_v44, %v3030_v28 }
 0x7ae   :  { %v3084_v37 = vadd.f32 %v3083_v54, %v3082_v26  ;;  %v3088_v19 = vadd.f32 %v3087_v53, %v2996_v35  ;;  %v3097_v49 = vpack.c.bf16 %v3026_v12, %v3026_v12  ;;  %v3105_v45 = vpack.c.bf16 %v3074_v61, %v3074_v61 }
 0x7af   :  { %v3101_v5 = vpack.c.bf16 %v3050_v18, %v3050_v18  ;;  %v3037_v22 = vrot.slane %v3036_v41, 1  ;;  %v3041_v39 = vrot.slane %v3040_v34, 2  ;;  %v3080_v30 = vadd.f32 %v3079_v46, %v3078_v47 }
 0x7b0   :  { %v3085_v16 = vrot.slane %v3084_v37, 1  ;;  %v3089_v33 = vrot.slane %v3088_v19, 2  ;;  %v3127_v13 = vunpack.c.l.b16 %v3095_v27  ;;  %v3136_v9 = vunpack.c.l.b16 %v3104_v23 }
 0x7b1   :  { %v3133_v0 = vunpack.c.l.b16 %v3101_v5  ;;  %v3038_v31 = vadd.f32 %v3037_v22, %v3036_v41  ;;  %v3042_v8 = vadd.f32 %v3041_v39, %v3040_v34  ;;  %v3098_v24 = vpack.c.bf16 %v3032_v58, %v3032_v58 }
 0x7b2   :  { %v3086_v44 = vadd.f32 %v3085_v16, %v3084_v37  ;;  %v3128_v63 = vunpack.c.l.b16 %v3096_v1  ;;  %v3106_v3 = vpack.c.bf16 %v3080_v30, %v3080_v30  ;;  %v3090_v26 = vadd.f32 %v3089_v33, %v3088_v19  ;;  %v9913_v30 = vld [vmem:[#allocation11 + $0x38] sm:$0xff]   ;;  %v9915_v16 = vld [vmem:[#allocation10 + $0xc4] ss:$16 sps:$4 sm:$0xff]   ;;  %v9917_v33 = vld [vmem:[#allocation10 + $0xc0] ss:$16 sps:$4 sm:$0xff]  }
 0x7b3   :  { %v3148_v55 = vsel %vm924_vm0, %v3134_v42, %v3133_v0  ;;  %v3099_v20 = vpack.c.bf16 %v3038_v31, %v3038_v31  ;;  %v3043_v54 = vrot.slane %v3042_v8, 1  ;;  %v3129_v47 = vunpack.c.l.b16 %v3097_v49  ;;  %v9914_v31 = vld [vmem:[#allocation10 + $0xe0] ss:$16 sps:$4 sm:$0xff]  }
 0x7b4   :  { %v3149_v28 = vsel %vm926_vm1, %v3135_v59, %v3148_v55  ;;  %v3137_v48 = vunpack.c.l.b16 %v3105_v45  ;;  %v3107_v35 = vpack.c.bf16 %v3086_v44, %v3086_v44  ;;  %v3141_v23 = vsel %vm924_vm0, %v11457_v14, %v11459_v10  ;;  %v9921_v55 = vld [vmem:[#allocation10 + $0x84] ss:$16 sps:$4 sm:$0xff]  }
 0x7b5   :  { %v3150_v25 = vsel %vm928_vm2, %v3136_v9, %v3149_v28  ;;  %v3044_v12 = vadd.f32 %v3043_v54, %v3042_v8  ;;  %v3130_v27 = vunpack.c.l.b16 %v3098_v24  ;;  %v3091_v0 = vrot.slane %v3090_v26, 1  ;;  %v9916_v8 = vld [vmem:[#allocation11 + $0x30] sm:$0xff]   ;;  %v9919_v9 = vld [vmem:[#allocation11 + $0x28] sm:$0xff]   ;;  %v9922_v28 = vld [vmem:[#allocation11 + $0x20] sm:$0xff]  }
 0x7b6   :  { %v3142_v42 = vsel %vm926_vm1, %v3127_v13, %v3141_v23  ;;  %v3131_v61 = vunpack.c.l.b16 %v3099_v20  ;;  %v3151_v1 = vsel %vm930_vm3, %v3137_v48, %v3150_v25  ;;  %v3138_v41 = vunpack.c.l.b16 %v3106_v3  ;;  %v9918_v13 = vld [vmem:[#allocation10 + $0xa4] ss:$16 sps:$4 sm:$0xff]   ;;  %v9920_v24 = vld [vmem:[#allocation10 + $0xa0] ss:$16 sps:$4 sm:$0xff]   ;;  %v9925_v54 = vld [vmem:[#allocation11 + $0x18] sm:$0xff]  }
 0x7b7   :  { %v3100_v18 = vpack.c.bf16 %v3044_v12, %v3044_v12  ;;  %v3143_v46 = vsel %vm928_vm2, %v3128_v63, %v3142_v42  ;;  %v3092_v34 = vadd.f32 %v3091_v0, %v3090_v26  ;;  %v3139_v59 = vunpack.c.l.b16 %v3107_v35  ;;  %v9923_v20 = vld [vmem:[#allocation10 + $0x80] ss:$16 sps:$4 sm:$0xff]   ;;  %v9924_v44 = vld [vmem:[#allocation10 + $0x64] ss:$16 sps:$4 sm:$0xff]   ;;  %v9931_v48 = vld [vmem:[#allocation11 + $0x8] sm:$0xff]  }
 0x7b8   :  { %v3144_v53 = vsel %vm930_vm3, %v3129_v47, %v3143_v46  ;;  %v3152_v14 = vsel %vm932_vm4, %v3138_v41, %v3151_v1  ;;  %v9926_v63 = vld [vmem:[#allocation10 + $0x60] ss:$16 sps:$4 sm:$0xff]   ;;  %v9927_v3 = vld [vmem:[#allocation10 + $0x44] ss:$16 sps:$4 sm:$0xff]   ;;  %v9936_v0 = vld [vmem:[#allocation10 + $0xec] ss:$16 sps:$4 sm:$0xff]  }
 0x7b9   :  { %v3132_v58 = vunpack.c.l.b16 %v3100_v18  ;;  %v3108_v5 = vpack.c.bf16 %v3092_v34, %v3092_v34  ;;  %v3145_v22 = vsel %vm932_vm4, %v3130_v27, %v3144_v53  ;;  %v3153_v19 = vsel %vm934_vm5, %v3139_v59, %v3152_v14  ;;  %v9928_v26 = vld [vmem:[#allocation11 + $0x10] sm:$0xff]   ;;  %v9934_v23 = vld [vmem:[#allocation11] sm:$0xff]   ;;  %v2088_v18 = vpop.f32.mrf.mxu0 }
 0x7ba   :  { %v3146_v10 = vsel %vm934_vm5, %v3131_v61, %v3145_v22  ;;  %v9929_v25 = vld [vmem:[#allocation10 + $0x40] ss:$16 sps:$4 sm:$0xff]   ;;  %v9930_v47 = vld [vmem:[#allocation10 + $0x24] ss:$16 sps:$4 sm:$0xff]   ;;  %v2045_v61 = vpop.f32.mrf.mxu1 }
 0x7bb   :  { %v3140_v37 = vunpack.c.l.b16 %v3108_v5  ;;  %v3147_v39 = vsel %vm936_vm6, %v3132_v58, %v3146_v10  ;;  %v9932_v35 = vld [vmem:[#allocation10 + $0x20] ss:$16 sps:$4 sm:$0xff]   ;;  %v9933_v12 = vld [vmem:[#allocation10 + $0x4] ss:$16 sps:$4 sm:$0xff]   ;;  %v2090_v46 = vpop.f32.mrf.mxu0 }
 0x7bc   :  { %v9935_v27 = vld [vmem:[#allocation10] ss:$16 sps:$4 sm:$0xff]   ;;  %v9937_v42 = vld [vmem:[#allocation8 + $0xe4] ss:$16 sps:$4 sm:$0xff]   ;;  %v2047_v1 = vpop.f32.mrf.mxu1 }
 0x7bd   :  { %v3154_v49 = vsel %vm936_vm6, %v3140_v37, %v3153_v19  ;;  %v2092_v34 = vpop.f32.mrf.mxu0 }
 0x7be   :  { %v3155_v45 = vpack.c.b16 %v3154_v49, %v3147_v39  ;;  %v2049_v41 = vpop.f32.mrf.mxu1 }
 0x7bf   :  { %v2094_v59 = vpop.f32.mrf.mxu0 }
 0x7c0   :  { %3190 = vmatmul.mubr.bf16.vlgmr.msra.gmra.mxu1 %v3155_v45  ;;  %3233 = vmatmul.mubr.bf16.vlgmr.msra.gmra.mxu0 %v3155_v45  ;;  %v2051_v53 = vpop.f32.mrf.mxu1 }
 0x7c1   :  { %9083 = vmatpush3.bf16.msra.mxu1 %v9913_v30  ;;  %3372 = vmatpush1.bf16.msra.mxu0 %v9914_v31 }
 0x7c2   :  { %9084 = vmatprep.subr.bf16.mxu1 %v13134_v7  ;;  %3373 = vmatprep.subr.bf16.mxu0 %v9915_v16 }
 0x7c3   :  { %9098 = vmatprep.mubr.msk.bf16.mxu1 %vm10569_vm8, %v13134_v7  ;;  %3403 = vmatprep.mubr.bf16.mxu0 %v13108_v38 }
 0x7c5   :  { %9085 = vmatpush3.bf16.msra.mxu1 %v9916_v8  ;;  %3374 = vmatpush1.bf16.msra.mxu0 %v9917_v33 }
 0x7c6   :  { %9086 = vmatprep.subr.bf16.mxu1 %v13134_v7  ;;  %3375 = vmatprep.subr.bf16.mxu0 %v9918_v13 }
 0x7c9   :  { %9087 = vmatpush3.bf16.msra.mxu1 %v9919_v9  ;;  %3376 = vmatpush1.bf16.msra.mxu0 %v9920_v24 }
 0x7ca   :  { %9088 = vmatprep.subr.bf16.mxu1 %v13134_v7  ;;  %3377 = vmatprep.subr.bf16.mxu0 %v9921_v55 }
 0x7cd   :  { %9089 = vmatpush3.bf16.msra.mxu1 %v9922_v28  ;;  %3378 = vmatpush1.bf16.msra.mxu0 %v9923_v20 }
 0x7ce   :  { %9090 = vmatprep.subr.bf16.mxu1 %v13134_v7  ;;  %3379 = vmatprep.subr.bf16.mxu0 %v9924_v44 }
 0x7d1   :  { %9091 = vmatpush3.bf16.msra.mxu1 %v9925_v54  ;;  %3380 = vmatpush1.bf16.msra.mxu0 %v9926_v63 }
 0x7d2   :  { %9092 = vmatprep.subr.bf16.mxu1 %v13134_v7  ;;  %3381 = vmatprep.subr.bf16.mxu0 %v9927_v3 }
 0x7d5   :  { %9093 = vmatpush3.bf16.msra.mxu1 %v9928_v26  ;;  %3382 = vmatpush1.bf16.msra.mxu0 %v9929_v25 }
 0x7d6   :  { %9094 = vmatprep.subr.bf16.mxu1 %v13134_v7  ;;  %3383 = vmatprep.subr.bf16.mxu0 %v9930_v47 }
 0x7d9   :  { %9095 = vmatpush3.bf16.msra.mxu1 %v9931_v48  ;;  %3384 = vmatpush1.bf16.msra.mxu0 %v9932_v35 }
 0x7da   :  { %9096 = vmatprep.subr.bf16.mxu1 %v13134_v7  ;;  %3385 = vmatprep.subr.bf16.mxu0 %v9933_v12 }
 0x7dd   :  { %9097 = vmatpush3.bf16.msra.mxu1 %v9934_v23  ;;  %3386 = vmatpush1.bf16.msra.mxu0 %v9935_v27 }
 0x7de   :  { %3414 = vmatprep.subr.bf16.mxu1 %v9936_v0  ;;  %3457 = vmatprep.subr.bf16.mxu0 %v9937_v42 }
 0x811   :  { %v2131_v58 = vpop.f32.mrf.mxu1  ;;  %v2174_v5 = vpop.f32.mrf.mxu0 }
 0x812   :  { %v2132_v37 = vadd.f32 %v2131_v58, %v2045_v61  ;;  %v2175_v42 = vadd.f32 %v2174_v5, %v2088_v18 }
 0x813   :  { %v2133_v22 = vpop.f32.mrf.mxu1  ;;  %v2176_v14 = vpop.f32.mrf.mxu0 }
 0x814   :  { %v2134_v19 = vadd.f32 %v2133_v22, %v2047_v1  ;;  %v2183_v31 = vadd.f32 %v2132_v37, %v11097_v36  ;;  %v2177_v25 = vadd.f32 %v2176_v14, %v2090_v46  ;;  %v2185_v58 = vadd.f32 %v2175_v42, %v11111_v32 }
 0x815   :  { %v2135_v10 = vpop.f32.mrf.mxu1  ;;  %v2178_v39 = vpop.f32.mrf.mxu0 }
 0x816   :  { %v2136_v45 = vadd.f32 %v2135_v10, %v2049_v41  ;;  %v2184_v9 = vadd.f32 %v2134_v19, %v11100_v4  ;;  %v2186_v0 = vadd.f32 %v2177_v25, %v11107_v15 }
 0x817   :  { %v2137_v49 = vpop.f32.mrf.mxu1  ;;  %v2180_v30 = vpop.f32.mrf.mxu0 }
 0x818   :  { %v2138_v8 = vadd.f32 %v2137_v49, %v2051_v53  ;;  %v2187_v20 = vadd.f32 %v2136_v45, %v11097_v36  ;;  %v2181_v27 = vadd.f32 %v2180_v30, %v2094_v59  ;;  %v2179_v53 = vadd.f32 %v2178_v39, %v2092_v34 }
 0x81a   :  { %v2188_v26 = vadd.f32 %v2138_v8, %v11100_v4  ;;  %v2190_v41 = vadd.f32 %v2181_v27, %v11107_v15  ;;  %v2189_v59 = vadd.f32 %v2179_v53, %v11111_v32 }
 0x880   :  { %v3191_v16 = vpop.f32.mrf.mxu1  ;;  %v3234_v13 = vpop.f32.mrf.mxu0 }
 0x881   :  { %v3243_v33 = vadd.f32 %v3191_v16, %v2183_v31  ;;  %v3245_v10 = vadd.f32 %v3234_v13, %v2185_v58 }
 0x882   :  { %v3193_v24 = vpop.f32.mrf.mxu1  ;;  %v3236_v63 = vpop.f32.mrf.mxu0 }
 0x883   :  { %v8926_v55 = vmul.f32 -1.442695, %v3243_v33  ;;  %v3244_v28 = vadd.f32 %v3193_v24, %v2184_v9  ;;  %v3246_v61 = vadd.f32 %v3236_v63, %v2186_v0 }
 0x884   :  { %v3195_v44 = vpop.f32.mrf.mxu1  ;;  %v3238_v12 = vpop.f32.mrf.mxu0 }
 0x885   :  { %9466 = vpow2.f32 %v8926_v55  ;;  %v8928_v54 = vmul.f32 -1.442695, %v3244_v28  ;;  %v3247_v3 = vadd.f32 %v3195_v44, %v2187_v20  ;;  %v8930_v46 = vmul.f32 -1.442695, %v3246_v61 }
 0x886   :  { %v3197_v47 = vpop.f32.mrf.mxu1  ;;  %v3240_v1 = vpop.f32.mrf.mxu0  ;;  %v3249_v5 = vadd.f32 %v3238_v12, %v2189_v59 }
 0x887   :  { %9468 = vpow2.f32 %v8928_v54  ;;  %v8927_v48 = vmul.f32 -1.442695, %v3247_v3  ;;  %v3248_v35 = vadd.f32 %v3197_v47, %v2188_v26  ;;  %v3250_v22 = vadd.f32 %v3240_v1, %v2190_v41 }
 0x889   :  { %9470 = vpow2.f32 %v8927_v48  ;;  %v8929_v23 = vmul.f32 -1.442695, %v3248_v35  ;;  %v8931_v49 = vmul.f32 -1.442695, %v3250_v22 }
 0x88b   :  { %9472 = vpow2.f32 %v8929_v23 }
 0x88c   :  { %9474 = vpow2.f32 %v8930_v46 }
 0x892   :  { %v9467_v14 = vpop.eup %9466 }
 0x893   :  { %v3257_v37 = vadd.f32 1.0, %v9467_v14 }
 0x894   :  { %v9469_v19 = vpop.eup %9468 }
 0x895   :  { %9476 = vrcp.f32 %v3257_v37  ;;  %v3269_v45 = vadd.f32 1.0, %v9469_v19  ;;  %v9938_v19 = vld [vmem:[#allocation10 + $0xe8] ss:$16 sps:$4 sm:$0xff]  }
 0x896   :  { %v9471_v18 = vpop.eup %9470  ;;  %9478 = vtanh.f32 %v3245_v10 }
 0x897   :  { %9480 = vrcp.f32 %v3269_v45  ;;  %v3258_v30 = vadd.f32 1.0, %v9471_v18  ;;  %v9939_v18 = vld [vmem:[#allocation10 + $0xcc] ss:$16 sps:$4 sm:$0xff]  }
 0x898   :  { %v9473_v34 = vpop.eup %9472  ;;  %9482 = vpow2.f32 %v8931_v49 }
 0x899   :  { %9484 = vrcp.f32 %v3258_v30  ;;  %v3270_v39 = vadd.f32 1.0, %v9473_v34  ;;  %v9475_v31 = vpop.eup %9474 }
 0x89a   :  { %9486 = vtanh.f32 %v3249_v5  ;;  %v3283_v13 = vadd.f32 1.0, %v9475_v31 }
 0x89b   :  { %9488 = vrcp.f32 %v3270_v39 }
 0x89c   :  { %9490 = vrcp.f32 %v3283_v13 }
 0x8a2   :  { %v9477_v16 = vpop.eup %9476 }
 0x8a3   :  { %v9479_v8 = vpop.eup %9478 }
 0x8a4   :  { %v9481_v33 = vpop.eup %9480  ;;  %v3291_v24 = vmul.f32 %v9479_v8, %v9477_v16  ;;  %v9940_v16 = vld [vmem:[#allocation10 + $0xc8] ss:$16 sps:$4 sm:$0xff]  }
 0x8a5   :  { %v9483_v9 = vpop.eup %9482  ;;  %v3289_v55 = vmul.f32 %v9481_v33, %v11116_v62  ;;  %v9941_v33 = vld [vmem:[#allocation10 + $0xac] ss:$16 sps:$4 sm:$0xff]  }
 0x8a6   :  { %v9485_v28 = vpop.eup %9484  ;;  %v3284_v63 = vadd.f32 1.0, %v9483_v9 }
 0x8a7   :  { %v9487_v20 = vpop.eup %9486  ;;  %v11502_v44 = vadd.f32 %v3291_v24, %v3289_v55 }
 0x8a8   :  { %v9489_v54 = vpop.eup %9488  ;;  %v3292_v3 = vmul.f32 %v9487_v20, %v9485_v28  ;;  %v9942_v28 = vld [vmem:[#allocation8 + $0xe0] ss:$16 sps:$4 sm:$0xff]  }
 0x8a9   :  { %9492 = vtanh.f32 %v11502_v44  ;;  %v3290_v26 = vmul.f32 %v9489_v54, %v11119_v57  ;;  %v9491_v47 = vpop.eup %9490  ;;  %v9943_v54 = vld [vmem:[#allocation10 + $0xa8] ss:$16 sps:$4 sm:$0xff]  }
 0x8aa   :  { %9494 = vrcp.f32 %v3284_v63 }
 0x8ab   :  { %v11506_v25 = vadd.f32 %v3292_v3, %v3290_v26 }
 0x8ad   :  { %9496 = vtanh.f32 %v11506_v25 }
 0x8b6   :  { %v9493_v48 = vpop.eup %9492 }
 0x8b7   :  { %v3297_v62 = vmul.f32 %v9493_v48, %v9491_v47  ;;  %v9495_v35 = vpop.eup %9494  ;;  %v9944_v48 = vld [vmem:[#allocation10 + $0x8c] ss:$16 sps:$4 sm:$0xff]  }
 0x8b9   :  { %v3560_v12 = vrot.slane %v3297_v62, %v11123_v21  ;;  %v3553_v23 = vcombine.high %v3297_v62, %v3297_v62 }
 0x8ba   :  { %v9497_v27 = vpop.eup %9496 }
 0x8bb   :  { %v3298_v0 = vmul.f32 %v9497_v27, %v9495_v35  ;;  %v3576_v42 = vrot.slane %v3560_v12, %v11123_v21  ;;  %v3568_v61 = vcombine.high %v3560_v12, %v3560_v12  ;;  %v11512_v1 = vrot.slane %v3553_v23, %v11123_v21  ;;  %v9945_v23 = vld [vmem:[#allocation8 + $0xc4] ss:$16 sps:$4 sm:$0xff]   ;;  %v9946_v27 = vld [vmem:[#allocation8 + $0xc0] ss:$16 sps:$4 sm:$0xff]  }
 0x8bd   :  { %v11514_v57 = vpack.c.bf16 %v3298_v0, %v3297_v62  ;;  %v3654_v41 = vrot.slane %v3576_v42, %v10785_v6  ;;  %v3590_v53 = vrot.slane %v3568_v61, %v11123_v21  ;;  %v3609_v58 = vrot.slane %v3298_v0, %v11123_v21 }
 0x8be   :  { %v3598_v46 = vcombine.high %v3576_v42, %v3576_v42  ;;  %v3602_v22 = vcombine.high %v3298_v0, %v3298_v0  ;;  %v11527_v45 = vrot.slane %v11512_v1, %v11123_v21  ;;  %v3569_v20 = vcombine.high %v11512_v1, %v11512_v1  ;;  %v9947_v0 = vld [vmem:[#allocation10 + $0x88] ss:$16 sps:$4 sm:$0xff]   ;;  %v9948_v1 = vld [vmem:[#allocation8 + $0xa4] ss:$16 sps:$4 sm:$0xff]  }
 0x8bf   :  { %9099 = vmatmul.mubr.bf16.vlgmr.msra.gmra.mxu1 %v11514_v57  ;;  %3404 = vmatmul.mubr.bf16.vlgmr.msra.gmra.mxu0 %v11514_v57  ;;  %v3731_v14 = vmul.f32 %v3654_v41, %v13113_v51  ;;  %v3658_v10 = vrot.slane %v3590_v53, %v10785_v6  ;;  %v3617_v37 = vcombine.high %v3609_v58, %v3609_v58  ;;  %v9949_v41 = vld [vmem:[#allocation10 + $0x6c] ss:$16 sps:$4 sm:$0xff]  }
 0x8c0   :  { %3415 = vmatpush1.bf16.msra.mxu1 %v9938_v19  ;;  %v3662_v59 = vrot.slane %v3598_v46, %v10785_v6  ;;  %v3625_v49 = vrot.slane %v3609_v58, %v11123_v21  ;;  %v3616_v34 = vrot.slane %v3602_v22, %v11123_v21  ;;  %3446 = vmatprep.mubr.bf16.mxu1 %v13108_v38  ;;  %v13136_v46 = vld [vmem:[#allocation19_spill] sm:$0xff]  ;;  %v9951_v19 = vld [vmem:[#allocation10 + $0x68] ss:$16 sps:$4 sm:$0xff]  }
 0x8c1   :  { %3747 = vadd.xlane.f32.xlu1 %v3731_v14  ;;  %3416 = vmatprep.subr.bf16.mxu1 %v9939_v18  ;;  %v3732_v5 = vmul.f32 %v3658_v10, %v13114_v2  ;;  %v3639_v30 = vrot.slane %v3617_v37, %v11123_v21  ;;  %v3670_v8 = vrot.slane %v11527_v45, %v10785_v6  ;;  %v9950_v37 = vld [vmem:[#allocation8 + $0xa0] ss:$16 sps:$4 sm:$0xff]  }
 0x8c2   :  { %v3647_v39 = vcombine.high %v3625_v49, %v3625_v49  ;;  %v3733_v9 = vmul.f32 %v3662_v59, %v13115_v17  ;;  %v11540_v55 = vrot.slane %v3616_v34, %v11123_v21  ;;  %3458 = vmatpush1.bf16.msra.mxu0 %v9942_v28  ;;  %v3686_v3 = vrot.slane %v3625_v49, %v10785_v6  ;;  %v13137_v59 = vld [vmem:[#allocation26_spill] sm:$0xff]  ;;  %v9956_v28 = vld [vmem:[#allocation8 + $0x64] ss:$16 sps:$4 sm:$0xff]  }
 0x8c3   :  { %3749 = vadd.xlane.f32.xlu0 %v3732_v5  ;;  %v3690_v31 = vrot.slane %v3639_v30, %v10785_v6  ;;  %v3735_v63 = vmul.f32 %v3670_v8, %v13117_v52  ;;  %v3649_v26 = vcombine.high %v3639_v30, %v3639_v30  ;;  %v3600_v47 = vcombine.high %v3590_v53, %v3590_v53  ;;  %v13135_v53 = vld [vmem:[#allocation27_spill] sm:$0xff]  ;;  %v9953_v30 = vld [vmem:[#allocation10 + $0x4c] ss:$16 sps:$4 sm:$0xff]  }
 0x8c4   :  { %3417 = vmatpush1.bf16.msra.mxu1 %v9940_v16  ;;  %v3694_v24 = vrot.slane %v3647_v39, %v10785_v6  ;;  %v3702_v35 = vrot.slane %v11540_v55, %v10785_v6  ;;  %v3618_v12 = vcombine.high %v3616_v34, %v3616_v34  ;;  %3459 = vmatprep.subr.bf16.mxu0 %v9945_v23  ;;  %v9952_v5 = vld [vmem:[#allocation8 + $0x84] ss:$16 sps:$4 sm:$0xff]  }
 0x8c5   :  { %3418 = vmatprep.subr.bf16.mxu1 %v9941_v33  ;;  %v3740_v13 = vmul.f32 %v3690_v31, %v13116_v60  ;;  %3489 = vmatprep.mubr.bf16.mxu0 %v13108_v38  ;;  %v3666_v42 = vrot.slane %v3600_v47, %v10785_v6  ;;  %v3597_v61 = vrot.slane %v3569_v20, %v11123_v21  ;;  %v13138_v34 = vld [vmem:[#allocation25_spill] sm:$0xff]  ;;  %v9957_v20 = vld [vmem:[#allocation10 + $0x2c] ss:$16 sps:$4 sm:$0xff]  }
 0x8c6   :  { %v3741_v62 = vmul.f32 %v3694_v24, %v13118_v29  ;;  %3460 = vmatpush1.bf16.msra.mxu0 %v9946_v27  ;;  %v3743_v58 = vmul.f32 %v3702_v35, %v13135_v53  ;;  %v3739_v22 = vmul.f32 %v3686_v3, %v13136_v46  ;;  %v3698_v14 = vrot.slane %v3649_v26, %v10785_v6  ;;  %v9954_v33 = vld [vmem:[#allocation8 + $0x80] ss:$16 sps:$4 sm:$0xff]   ;;  %v9961_v35 = vld [vmem:[#allocation10 + $0xc] ss:$16 sps:$4 sm:$0xff]  }
 0x8c7   :  { %3765 = vadd.xlane.f32.xlu1 %v3740_v13  ;;  %3751 = vadd.xlane.f32.xlu0 %v3733_v9  ;;  %v3646_v10 = vrot.slane %v3618_v12, %v11123_v21  ;;  %v3734_v49 = vmul.f32 %v3666_v42, %v13137_v59  ;;  %v3674_v18 = vrot.slane %v3597_v61, %v10785_v6  ;;  %v9955_v13 = vld [vmem:[#allocation10 + $0x48] ss:$16 sps:$4 sm:$0xff]   ;;  %v9958_v47 = vld [vmem:[#allocation8 + $0x60] ss:$16 sps:$4 sm:$0xff]  }
 0x8c8   :  { %3419 = vmatpush1.bf16.msra.mxu1 %v9943_v54  ;;  %3461 = vmatprep.subr.bf16.mxu0 %v9948_v1  ;;  %v3742_v39 = vmul.f32 %v3698_v14, %v13138_v34  ;;  %v3648_v16 = vcombine.high %v11540_v55, %v11540_v55  ;;  %v3599_v8 = vcombine.high %v11527_v45, %v11527_v45  ;;  %v13139_v9 = vld [vmem:[#allocation30_spill] sm:$0xff]  ;;  %v13140_v54 = vld [vmem:[#allocation29_spill] sm:$0xff]  ;;  %v13141_v12 = vld [vmem:[#allocation31_spill] sm:$0xff] }
 0x8c9   :  { %3420 = vmatprep.subr.bf16.mxu1 %v9944_v48  ;;  %v3706_v31 = vrot.slane %v3646_v10, %v10785_v6  ;;  %v3736_v24 = vmul.f32 %v3674_v18, %v13139_v9  ;;  %v3650_v26 = vcombine.high %v3646_v10, %v3646_v10  ;;  %v3601_v45 = vcombine.high %v3597_v61, %v3597_v61  ;;  %v9959_v48 = vld [vmem:[#allocation10 + $0x28] ss:$16 sps:$4 sm:$0xff]   ;;  %v9965_v10 = vld [vmem:[#allocation8 + $0xec] ss:$16 sps:$4 sm:$0xff]  }
 0x8ca   :  { %3462 = vmatpush1.bf16.msra.mxu0 %v9950_v37  ;;  %v3710_v3 = vrot.slane %v3648_v16, %v10785_v6  ;;  %v3678_v55 = vrot.slane %v3599_v8, %v10785_v6  ;;  %v13142_v27 = vld [vmem:[#allocation32_spill] sm:$0xff]  ;;  %v13144_v37 = vld [vmem:[#allocation34_spill] sm:$0xff] }
 0x8cb   :  { %3767 = vadd.xlane.f32.xlu1 %v3741_v62  ;;  %3755 = vadd.xlane.f32.xlu0 %v3735_v63  ;;  %v3744_v63 = vmul.f32 %v3706_v31, %v13140_v54  ;;  %v9960_v62 = vld [vmem:[#allocation8 + $0x44] ss:$16 sps:$4 sm:$0xff]   ;;  %v3714_v42 = vrot.slane %v3650_v26, %v10785_v6  ;;  %v3682_v1 = vrot.slane %v3601_v45, %v10785_v6  ;;  %v9963_v61 = vld [vmem:[#allocation10 + $0x8] ss:$16 sps:$4 sm:$0xff]   ;;  %v9973_v8 = vld [vmem:[#allocation8 + $0xac] ss:$16 sps:$4 sm:$0xff]  }
 0x8cc   :  { %3421 = vmatpush1.bf16.msra.mxu1 %v9947_v0  ;;  %3463 = vmatprep.subr.bf16.mxu0 %v9952_v5  ;;  %v3745_v23 = vmul.f32 %v3710_v3, %v13141_v12  ;;  %v3737_v0 = vmul.f32 %v3678_v55, %v13142_v27  ;;  %v9967_v18 = vld [vmem:[#allocation8 + $0xe8] ss:$16 sps:$4 sm:$0xff]   ;;  %v9968_v5 = vld [vmem:[#allocation8 + $0xcc] ss:$16 sps:$4 sm:$0xff]   ;;  %v9971_v31 = vld [vmem:[#allocation7 + $0xe4] ss:$16 sps:$4 sm:$0xff]  }
 0x8cd   :  { %3422 = vmatprep.subr.bf16.mxu1 %v9949_v41  ;;  %v9962_v41 = vld [vmem:[#allocation8 + $0x40] ss:$16 sps:$4 sm:$0xff]   ;;  %v9972_v16 = vld [vmem:[#allocation8 + $0xc8] ss:$16 sps:$4 sm:$0xff]   ;;  %v9981_v3 = vld [vmem:[#allocation8 + $0x2c] ss:$16 sps:$4 sm:$0xff]  }
 0x8ce   :  { %3464 = vmatpush1.bf16.msra.mxu0 %v9954_v33  ;;  %v9974_v33 = vld [vmem:[#allocation8 + $0xa8] ss:$16 sps:$4 sm:$0xff]   ;;  %v9983_v26 = vld [vmem:[#allocation8 + $0xc] ss:$16 sps:$4 sm:$0xff]  }
 0x8cf   :  { %3771 = vadd.xlane.f32.xlu1 %v3743_v58  ;;  %3763 = vadd.xlane.f32.xlu0 %v3739_v22  ;;  %v9964_v58 = vld [vmem:[#allocation8 + $0x24] ss:$16 sps:$4 sm:$0xff]   ;;  %v9982_v55 = vld [vmem:[#allocation8 + $0x28] ss:$16 sps:$4 sm:$0xff]  }
 0x8d0   :  { %3423 = vmatpush1.bf16.msra.mxu1 %v9951_v19  ;;  %3465 = vmatprep.subr.bf16.mxu0 %v9956_v28  ;;  %v13143_v22 = vld [vmem:[#allocation33_spill] sm:$0xff]  ;;  %v3738_v19 = vmul.f32 %v3682_v1, %v13144_v37  ;;  %v9978_v28 = vld [vmem:[#allocation8 + $0x68] ss:$16 sps:$4 sm:$0xff]  }
 0x8d1   :  { %3424 = vmatprep.subr.bf16.mxu1 %v9953_v30  ;;  %v3746_v14 = vmul.f32 %v3714_v42, %v13143_v22  ;;  %v9969_v30 = vld [vmem:[#allocation8 + $0x4] ss:$16 sps:$4 sm:$0xff]   ;;  %v9984_v45 = vld [vmem:[#allocation8 + $0x8] ss:$16 sps:$4 sm:$0xff]  }
 0x8d2   :  { %3466 = vmatpush1.bf16.msra.mxu0 %v9958_v47  ;;  %v9985_v47 = vld [vmem:[#allocation7 + $0xec] ss:$16 sps:$4 sm:$0xff]  }
 0x8d3   :  { %3769 = vadd.xlane.f32.xlu1 %v3742_v39  ;;  %3753 = vadd.xlane.f32.xlu0 %v3734_v49  ;;  %v9966_v49 = vld [vmem:[#allocation8 + $0x20] ss:$16 sps:$4 sm:$0xff]  }
 0x8d4   :  { %3425 = vmatpush1.bf16.msra.mxu1 %v9955_v13  ;;  %3467 = vmatprep.subr.bf16.mxu0 %v9960_v62  ;;  %v9970_v39 = vld [vmem:[#allocation8] ss:$16 sps:$4 sm:$0xff]   ;;  %v9976_v13 = vld [vmem:[#allocation8 + $0x88] ss:$16 sps:$4 sm:$0xff]  }
 0x8d5   :  { %3426 = vmatprep.subr.bf16.mxu1 %v9957_v20  ;;  %v9979_v20 = vld [vmem:[#allocation8 + $0x4c] ss:$16 sps:$4 sm:$0xff]  }
 0x8d6   :  { %3468 = vmatpush1.bf16.msra.mxu0 %v9962_v41 }
 0x8d7   :  { %3773 = vadd.xlane.f32.xlu1 %v3744_v63  ;;  %3757 = vadd.xlane.f32.xlu0 %v3736_v24  ;;  %v9977_v24 = vld [vmem:[#allocation8 + $0x6c] ss:$16 sps:$4 sm:$0xff]   ;;  %v9980_v63 = vld [vmem:[#allocation8 + $0x48] ss:$16 sps:$4 sm:$0xff]  }
 0x8d8   :  { %3427 = vmatpush1.bf16.msra.mxu1 %v9959_v48  ;;  %3469 = vmatprep.subr.bf16.mxu0 %v9964_v58 }
 0x8d9   :  { %3428 = vmatprep.subr.bf16.mxu1 %v9961_v35 }
 0x8da   :  { %3470 = vmatpush1.bf16.msra.mxu0 %v9966_v49 }
 0x8db   :  { %3775 = vadd.xlane.f32.xlu1 %v3745_v23  ;;  %3759 = vadd.xlane.f32.xlu0 %v3737_v0 }
 0x8dc   :  { %3429 = vmatpush1.bf16.msra.mxu1 %v9963_v61  ;;  %3471 = vmatprep.subr.bf16.mxu0 %v9969_v30 }
 0x8dd   :  { %3500 = vmatprep.subr.bf16.mxu1 %v9965_v10 }
 0x8de   :  { %3472 = vmatpush1.bf16.msra.mxu0 %v9970_v39 }
 0x8df   :  { %3447 = vmatmul.mubr.bf16.vlgmr.msra.gmra.mxu1 %v11514_v57  ;;  %3777 = vadd.xlane.f32.xlu1 %v3746_v14  ;;  %v9975_v57 = vld [vmem:[#allocation8 + $0x8c] ss:$16 sps:$4 sm:$0xff]  }
 0x8e0   :  { %3761 = vadd.xlane.f32.xlu0 %v3738_v19  ;;  %3501 = vmatpush1.bf16.msra.mxu1 %v9967_v18 }
 0x8e1   :  { %3502 = vmatprep.subr.bf16.mxu1 %v9968_v5  ;;  %3532 = vmatprep.mubr.bf16.mxu1 %v13108_v38 }
 0x8e2   :  { %4517 = vmatprep.subr.bf16.mxu0 %v9971_v31 }
 0x8e4   :  { %3503 = vmatpush1.bf16.msra.mxu1 %v9972_v16 }
 0x8e5   :  { %3504 = vmatprep.subr.bf16.mxu1 %v9973_v8 }
 0x8e8   :  { %3505 = vmatpush1.bf16.msra.mxu1 %v9974_v33 }
 0x8e9   :  { %3506 = vmatprep.subr.bf16.mxu1 %v9975_v57 }
 0x8ec   :  { %3507 = vmatpush1.bf16.msra.mxu1 %v9976_v13 }
 0x8ed   :  { %3508 = vmatprep.subr.bf16.mxu1 %v9977_v24 }
 0x8f0   :  { %3509 = vmatpush1.bf16.msra.mxu1 %v9978_v28 }
 0x8f1   :  { %3510 = vmatprep.subr.bf16.mxu1 %v9979_v20 }
 0x8f4   :  { %3511 = vmatpush1.bf16.msra.mxu1 %v9980_v63 }
 0x8f5   :  { %3512 = vmatprep.subr.bf16.mxu1 %v9981_v3 }
 0x8f8   :  { %3513 = vmatpush1.bf16.msra.mxu1 %v9982_v55 }
 0x8f9   :  { %3514 = vmatprep.subr.bf16.mxu1 %v9983_v26 }
 0x8fc   :  { %3515 = vmatpush1.bf16.msra.mxu1 %v9984_v45 }
 0x8fd   :  { %4560 = vmatprep.subr.bf16.mxu1 %v9985_v47 }
 0x94a   :  { %v11576_v48 = vpop.xlane.xlu1 %3747 }
 0x94b   :  { %v3798_v31 = vrot.slane %v11576_v48, %v13129_v40 }
 0x94c   :  { %v11578_v62 = vpop.xlane.xlu0 %3749 }
 0x94d   :  { %v3802_v19 = vrot.slane %v11578_v62, %v13129_v40 }
 0x94f   :  { %v3859_v33 = vsel %vm924_vm0, %v3802_v19, %v3798_v31 }
 0x950   :  { %v11580_v35 = vpop.xlane.xlu1 %3765  ;;  %v11582_v23 = vpop.xlane.xlu0 %3751 }
 0x951   :  { %v3834_v10 = vrot.slane %v11580_v35, %v13129_v40  ;;  %v3806_v5 = vrot.slane %v11582_v23, %v13129_v40 }
 0x953   :  { %v3860_v28 = vsel %vm926_vm1, %v3806_v5, %v3859_v33 }
 0x954   :  { %v11584_v0 = vpop.xlane.xlu1 %3767  ;;  %v11586_v42 = vpop.xlane.xlu0 %3755 }
 0x955   :  { %v3838_v16 = vrot.slane %v11584_v0, %v13129_v40  ;;  %v3814_v47 = vrot.slane %v11586_v42, %v13129_v40 }
 0x958   :  { %v11588_v1 = vpop.xlane.xlu1 %3771  ;;  %v11590_v41 = vpop.xlane.xlu0 %3763 }
 0x959   :  { %v3830_v14 = vrot.slane %v11590_v41, %v13129_v40  ;;  %v3846_v3 = vrot.slane %v11588_v1, %v13129_v40 }
 0x95b   :  { %v3866_v30 = vsel %vm924_vm0, %v3834_v10, %v3830_v14 }
 0x95c   :  { %v11592_v61 = vpop.xlane.xlu1 %3769  ;;  %v11594_v58 = vpop.xlane.xlu0 %3753  ;;  %v3867_v57 = vsel %vm926_vm1, %v3838_v16, %v3866_v30 }
 0x95d   :  { %v3842_v39 = vrot.slane %v11592_v61, %v13129_v40  ;;  %v3810_v8 = vrot.slane %v11594_v58, %v13129_v40 }
 0x95f   :  { %v3868_v20 = vsel %vm928_vm2, %v3842_v39, %v3867_v57  ;;  %v3861_v55 = vsel %vm928_vm2, %v3810_v8, %v3860_v28 }
 0x960   :  { %v11602_v49 = vpop.xlane.xlu1 %3773  ;;  %v11604_v18 = vpop.xlane.xlu0 %3757  ;;  %v3869_v19 = vsel %vm930_vm3, %v3846_v3, %v3868_v20  ;;  %v3862_v31 = vsel %vm930_vm3, %v3814_v47, %v3861_v55 }
 0x961   :  { %v3850_v63 = vrot.slane %v11602_v49, %v13129_v40  ;;  %v3818_v26 = vrot.slane %v11604_v18, %v13129_v40 }
 0x963   :  { %v3870_v39 = vsel %vm932_vm4, %v3850_v63, %v3869_v19  ;;  %v3863_v33 = vsel %vm932_vm4, %v3818_v26, %v3862_v31 }
 0x964   :  { %v11619_v13 = vpop.xlane.xlu1 %3775  ;;  %v11621_v24 = vpop.xlane.xlu0 %3759 }
 0x965   :  { %v3854_v45 = vrot.slane %v11619_v13, %v13129_v40  ;;  %v3822_v14 = vrot.slane %v11621_v24, %v13129_v40 }
 0x967   :  { %v3871_v8 = vsel %vm934_vm5, %v3854_v45, %v3870_v39  ;;  %v3864_v28 = vsel %vm934_vm5, %v3822_v14, %v3863_v33  ;;  %v9986_v45 = vld [vmem:[%s13018_s7] ss:$0 sm:$0xff] }
 0x968   :  { %v11638_v10 = vpop.xlane.xlu1 %3777 }
 0x969   :  { %v3858_v5 = vrot.slane %v11638_v10, %v13129_v40  ;;  %v11643_v30 = vpop.xlane.xlu0 %3761 }
 0x96a   :  { %v3826_v16 = vrot.slane %v11643_v30, %v13129_v40 }
 0x96b   :  { %v3872_v57 = vsel %vm936_vm6, %v3858_v5, %v3871_v8 }
 0x96c   :  { %v3878_v20 = vsel %vm947_vm7, %v3872_v57, -inf  ;;  %v3865_v3 = vsel %vm936_vm6, %v3826_v16, %v3864_v28 }
 0x96d   :  { %3879 = vmax.xlane.f32.xlu1 %v3878_v20  ;;  %v3875_v63 = vsel %vm947_vm7, %v3865_v3, -inf }
 0x96e   :  { %3876 = vmax.xlane.f32.xlu0 %v3875_v63 }
 0x97f   :  { %v3334_v55 = vpop.f32.mrf.mxu1 }
 0x980   :  { %v11659_v26 = vadd.f32 %v9986_v45, %v3334_v55 }
 0x981   :  { %v9100_v47 = vpop.f32.mrf.mxu1 }
 0x983   :  { %v3337_v19 = vpop.f32.mrf.mxu1 }
 0x984   :  { %v11661_v5 = vadd.f32 %v9986_v45, %v3337_v19 }
 0x985   :  { %v9101_v14 = vpop.f32.mrf.mxu1 }
 0x986   :  { %v8986_v39 = vpack.c.bf16 %v11661_v5, %v11659_v26 }
 0x988   :  { %8987 = vst [vmem:[#allocation13 + $0x8] sm:$0xff] %v8986_v39  }
 0x9f6   :  { %v3880_v16 = vpop.xlane.xlu1 %3879 }
 0x9f7   :  { %v11665_v31 = vpop.xlane.xlu0 %3876  ;;  %v3922_v57 = vrot.slane %v3880_v16, %v13109_v11  ;;  %v3926_v63 = vrot.slane %v3880_v16, %v13111_v50  ;;  %v3930_v39 = vrot.slane %v3880_v16, %v13110_v43 }
 0x9f8   :  { %v3886_v8 = vrot.slane %v11665_v31, %v10785_v6  ;;  %v3890_v33 = vrot.slane %v11665_v31, %v13109_v11  ;;  %v3894_v28 = vrot.slane %v11665_v31, %v13111_v50  ;;  %v3898_v47 = vrot.slane %v11665_v31, %v13110_v43 }
 0x9f9   :  { %v3972_v55 = vsub.f32 %v11580_v35, %v3922_v57  ;;  %v3973_v37 = vsub.f32 %v11584_v0, %v3926_v63  ;;  %v13145_v57 = vld [vmem:[#allocation39_spill] sm:$0xff] }
 0x9fa   :  { %v3963_v20 = vsub.f32 %v11576_v48, %v3886_v8  ;;  %v3964_v3 = vsub.f32 %v11578_v62, %v3890_v33  ;;  %v3965_v19 = vsub.f32 %v11582_v23, %v3894_v28  ;;  %v3902_v48 = vrot.slane %v11665_v31, %v13130_v56 }
 0x9fb   :  { %v3997_v22 = vmul.f32 1.442695, %v3972_v55  ;;  %v3966_v62 = vsub.f32 %v11594_v58, %v3898_v47  ;;  %v3934_v8 = vrot.slane %v3880_v16, %v13130_v56  ;;  %v3974_v33 = vsub.f32 %v11592_v61, %v3930_v39 }
 0x9fc   :  { %v3979_v45 = vmul.f32 1.442695, %v3963_v20  ;;  %v3981_v14 = vmul.f32 1.442695, %v3964_v3  ;;  %v3983_v35 = vmul.f32 1.442695, %v3965_v19  ;;  %v3906_v28 = vrot.slane %v11665_v31, %v13145_v57 }
 0x9fd   :  { %v3999_v23 = vmul.f32 1.442695, %v3973_v37  ;;  %v3967_v0 = vsub.f32 %v11586_v42, %v3902_v48  ;;  %v3985_v20 = vmul.f32 1.442695, %v3966_v62  ;;  %v3938_v3 = vrot.slane %v3880_v16, %v13145_v57  ;;  %v13146_v37 = vld [vmem:[#allocation41_spill] sm:$0xff] }
 0x9fe   :  { %9498 = vpow2.f32 %v3979_v45  ;;  %v3975_v63 = vsub.f32 %v11588_v1, %v3934_v8  ;;  %v4001_v58 = vmul.f32 1.442695, %v3974_v33  ;;  %v3918_v55 = vrot.slane %v3880_v16, %v10785_v6 }
 0x9ff   :  { %9500 = vpow2.f32 %v3981_v14  ;;  %v3968_v47 = vsub.f32 %v11604_v18, %v3906_v28  ;;  %v3942_v61 = vrot.slane %v3880_v16, %v13146_v37  ;;  %v3976_v19 = vsub.f32 %v11602_v49, %v3938_v3  ;;  %v13147_v18 = vld [vmem:[#allocation42_spill] sm:$0xff] }
 0xa00   :  { %9502 = vpow2.f32 %v3997_v22  ;;  %v3987_v22 = vmul.f32 1.442695, %v3967_v0  ;;  %v4003_v42 = vmul.f32 1.442695, %v3975_v63  ;;  %v3971_v14 = vsub.f32 %v11590_v41, %v3918_v55 }
 0xa01   :  { %9504 = vpow2.f32 %v3983_v35  ;;  %v3910_v1 = vrot.slane %v11665_v31, %v13146_v37  ;;  %v3989_v39 = vmul.f32 1.442695, %v3968_v47  ;;  %v3946_v62 = vrot.slane %v3880_v16, %v13147_v18 }
 0xa02   :  { %9506 = vpow2.f32 %v3999_v23  ;;  %v3977_v49 = vsub.f32 %v11619_v13, %v3942_v61  ;;  %v4005_v35 = vmul.f32 1.442695, %v3976_v19  ;;  %v3995_v41 = vmul.f32 1.442695, %v3971_v14 }
 0xa03   :  { %9508 = vpow2.f32 %v3985_v20  ;;  %v3914_v33 = vrot.slane %v11665_v31, %v13147_v18  ;;  %v3969_v23 = vsub.f32 %v11621_v24, %v3910_v1  ;;  %v3978_v16 = vsub.f32 %v11638_v10, %v3946_v62 }
 0xa04   :  { %9510 = vpow2.f32 %v4001_v58  ;;  %v4007_v13 = vmul.f32 1.442695, %v3977_v49 }
 0xa05   :  { %9512 = vpow2.f32 %v3987_v22  ;;  %v3970_v20 = vsub.f32 %v11643_v30, %v3914_v33  ;;  %v3991_v3 = vmul.f32 1.442695, %v3969_v23  ;;  %v4009_v24 = vmul.f32 1.442695, %v3978_v16 }
 0xa06   :  { %9514 = vpow2.f32 %v4003_v42 }
 0xa07   :  { %9516 = vpow2.f32 %v3989_v39  ;;  %v3993_v10 = vmul.f32 1.442695, %v3970_v20 }
 0xa08   :  { %9518 = vpow2.f32 %v4005_v35 }
 0xa09   :  { %9520 = vpow2.f32 %v3995_v41 }
 0xa0a   :  { %9522 = vpow2.f32 %v4007_v13 }
 0xa0b   :  { %v11697_v45 = vpop.eup %9498  ;;  %9524 = vpow2.f32 %v3991_v3 }
 0xa0c   :  { %v11702_v48 = vpop.eup %9500  ;;  %4028 = vperm.xlu0 %9199, %v11697_v45   ;;  %9526 = vpow2.f32 %v4009_v24 }
 0xa0d   :  { %4031 = vperm.xlu1 %9200, %v11702_v48   ;;  %v11708_v8 = vpop.eup %9502  ;;  %9528 = vpow2.f32 %v3993_v10 }
 0xa0e   :  { %v11713_v28 = vpop.eup %9504 }
 0xa0f   :  { %v11718_v0 = vpop.eup %9506 }
 0xa10   :  { %4055 = vperm.xlu0 %9199, %v11708_v8   ;;  %v11721_v31 = vpop.eup %9508 }
 0xa11   :  { %4034 = vperm.xlu1 %9200, %v11713_v28   ;;  %v11725_v63 = vpop.eup %9510 }
 0xa12   :  { %v11727_v58 = vpop.eup %9512 }
 0xa13   :  { %v11731_v30 = vpop.eup %9514 }
 0xa14   :  { %4058 = vperm.xlu0 %9199, %v11718_v0   ;;  %v11733_v55 = vpop.eup %9516 }
 0xa15   :  { %4037 = vperm.xlu1 %9200, %v11721_v31   ;;  %v11737_v47 = vpop.eup %9518 }
 0xa16   :  { %v11739_v22 = vpop.eup %9520 }
 0xa17   :  { %v11743_v61 = vpop.eup %9522 }
 0xa18   :  { %4061 = vperm.xlu0 %9199, %v11725_v63   ;;  %v11745_v19 = vpop.eup %9524 }
 0xa19   :  { %4040 = vperm.xlu1 %9200, %v11727_v58   ;;  %v11749_v42 = vpop.eup %9526 }
 0xa1a   :  { %v11751_v14 = vpop.eup %9528 }
 0xa1c   :  { %4064 = vperm.xlu0 %9199, %v11731_v30  }
 0xa1d   :  { %4043 = vperm.xlu1 %9200, %v11733_v55  }
 0xa20   :  { %4067 = vperm.xlu0 %9199, %v11737_v47  }
 0xa21   :  { %4052 = vperm.xlu1 %9200, %v11739_v22  }
 0xa24   :  { %4070 = vperm.xlu0 %9199, %v11743_v61  }
 0xa25   :  { %4046 = vperm.xlu1 %9200, %v11745_v19  }
 0xa28   :  { %4073 = vperm.xlu0 %9199, %v11749_v42  }
 0xa29   :  { %4049 = vperm.xlu1 %9200, %v11751_v14  }
 0xa47   :  { %3354 = vmax.xlane.f32.xlu0 %v11661_v5 }
 0xa4d   :  { %3352 = vmax.xlane.f32.xlu1 %v11659_v26 }
 0xa87   :  { %v4029_v1 = vpop.permute.xlu0 %4028 }
 0xa88   :  { %v4032_v39 = vpop.permute.xlu1 %4031  ;;  %v4078_v24 = vrot.slane %v4029_v1, %v13129_v40 }
 0xa89   :  { %v4082_v3 = vrot.slane %v4032_v39, %v13129_v40 }
 0xa8b   :  { %v4056_v62 = vpop.permute.xlu0 %4055  ;;  %v4139_v39 = vsel %vm924_vm0, %v4082_v3, %v4078_v24 }
 0xa8c   :  { %v4035_v49 = vpop.permute.xlu1 %4034  ;;  %v4114_v27 = vrot.slane %v4056_v62, %v13129_v40 }
 0xa8d   :  { %v4086_v54 = vrot.slane %v4035_v49, %v13129_v40 }
 0xa8f   :  { %v4059_v35 = vpop.permute.xlu0 %4058 }
 0xa90   :  { %v4038_v41 = vpop.permute.xlu1 %4037  ;;  %v4118_v9 = vrot.slane %v4059_v35, %v13129_v40 }
 0xa91   :  { %v4090_v34 = vrot.slane %v4038_v41, %v13129_v40 }
 0xa93   :  { %v4062_v33 = vpop.permute.xlu0 %4061 }
 0xa94   :  { %v4041_v23 = vpop.permute.xlu1 %4040  ;;  %v4122_v59 = vrot.slane %v4062_v33, %v13129_v40 }
 0xa95   :  { %v4094_v1 = vrot.slane %v4041_v23, %v13129_v40 }
 0xa97   :  { %v4065_v16 = vpop.permute.xlu0 %4064 }
 0xa98   :  { %v4044_v13 = vpop.permute.xlu1 %4043  ;;  %v4126_v29 = vrot.slane %v4065_v16, %v13129_v40 }
 0xa99   :  { %v4098_v49 = vrot.slane %v4044_v13, %v13129_v40 }
 0xa9b   :  { %v4068_v20 = vpop.permute.xlu0 %4067 }
 0xa9c   :  { %v4053_v10 = vpop.permute.xlu1 %4052  ;;  %v4130_v41 = vrot.slane %v4068_v20, %v13129_v40 }
 0xa9d   :  { %v4110_v12 = vrot.slane %v4053_v10, %v13129_v40 }
 0xa9f   :  { %v4146_v46 = vsel %vm924_vm0, %v4114_v27, %v4110_v12  ;;  %v4071_v53 = vpop.permute.xlu0 %4070  ;;  %v4140_v12 = vsel %vm926_vm1, %v4086_v54, %v4139_v39 }
 0xaa0   :  { %v4147_v62 = vsel %vm926_vm1, %v4118_v9, %v4146_v46  ;;  %v4047_v10 = vpop.permute.xlu1 %4046  ;;  %v4134_v33 = vrot.slane %v4071_v53, %v13129_v40  ;;  %v4141_v23 = vsel %vm928_vm2, %v4090_v34, %v4140_v12 }
 0xaa1   :  { %v4148_v35 = vsel %vm928_vm2, %v4122_v59, %v4147_v62  ;;  %v4102_v3 = vrot.slane %v4047_v10, %v13129_v40  ;;  %v4142_v9 = vsel %vm930_vm3, %v4094_v1, %v4141_v23 }
 0xaa2   :  { %v4149_v27 = vsel %vm930_vm3, %v4126_v29, %v4148_v35  ;;  %v4143_v20 = vsel %vm932_vm4, %v4098_v49, %v4142_v9 }
 0xaa3   :  { %v4150_v16 = vsel %vm932_vm4, %v4130_v41, %v4149_v27  ;;  %v4074_v46 = vpop.permute.xlu0 %4073  ;;  %v4144_v24 = vsel %vm934_vm5, %v4102_v3, %v4143_v20 }
 0xaa4   :  { %v4050_v13 = vpop.permute.xlu1 %4049  ;;  %v4138_v59 = vrot.slane %v4074_v46, %v13129_v40  ;;  %v4151_v54 = vsel %vm934_vm5, %v4134_v33, %v4150_v16 }
 0xaa5   :  { %v4106_v53 = vrot.slane %v4050_v13, %v13129_v40 }
 0xaa6   :  { %v4152_v29 = vsel %vm936_vm6, %v4138_v59, %v4151_v54 }
 0xaa7   :  { %v4158_v34 = vsel %vm947_vm7, %v4152_v29, 0.0  ;;  %v4145_v39 = vsel %vm936_vm6, %v4106_v53, %v4144_v24 }
 0xaa8   :  { %4159 = vadd.xlane.f32.xlu1 %v4158_v34  ;;  %v4155_v1 = vsel %vm947_vm7, %v4145_v39, 0.0 }
 0xaa9   :  { %4156 = vadd.xlane.f32.xlu0 %v4155_v1 }
 0xad0   :  { %v3355_v62 = vpop.xlane.xlu0 %3354 }
 0xad1   :  { %v3357_v10 = vsub.f32 %v11661_v5, %v3355_v62 }
 0xad3   :  { %v3360_v49 = vmul.f32 1.442695, %v3357_v10 }
 0xad5   :  { %9530 = vpow2.f32 %v3360_v49 }
 0xad6   :  { %v3353_v35 = vpop.xlane.xlu1 %3352 }
 0xad7   :  { %v3356_v41 = vsub.f32 %v11659_v26, %v3353_v35 }
 0xad9   :  { %v3358_v33 = vmul.f32 1.442695, %v3356_v41 }
 0xadb   :  { %9532 = vpow2.f32 %v3358_v33 }
 0xae2   :  { %v11791_v12 = vpop.eup %9530 }
 0xae3   :  { %3364 = vadd.xlane.f32.xlu1 %v11791_v12 }
 0xae8   :  { %v9533_v27 = vpop.eup %9532 }
 0xae9   :  { %3362 = vadd.xlane.f32.xlu0 %v9533_v27 }
 0xb31   :  { %v4160_v3 = vpop.xlane.xlu1 %4159 }
 0xb32   :  { %9534 = vrcp.f32 %v4160_v3  ;;  %v4157_v23 = vpop.xlane.xlu0 %4156 }
 0xb33   :  { %9536 = vrcp.f32 %v4157_v23 }
 0xb3f   :  { %v9535_v16 = vpop.eup %9534 }
 0xb40   :  { %v9537_v46 = vpop.eup %9536  ;;  %v4204_v20 = vrot.slane %v9535_v16, %v13109_v11  ;;  %v4208_v24 = vrot.slane %v9535_v16, %v13111_v50  ;;  %v4212_v39 = vrot.slane %v9535_v16, %v13110_v43  ;;  %v4216_v62 = vrot.slane %v9535_v16, %v13130_v56 }
 0xb41   :  { %v4172_v5 = vrot.slane %v9537_v46, %v13109_v11  ;;  %v4168_v9 = vrot.slane %v9537_v46, %v10785_v6  ;;  %v4176_v59 = vrot.slane %v9537_v46, %v13111_v50  ;;  %v4180_v29 = vrot.slane %v9537_v46, %v13110_v43 }
 0xb42   :  { %v4254_v54 = vmul.f32 %v11708_v8, %v4204_v20  ;;  %v4184_v34 = vrot.slane %v9537_v46, %v13130_v56  ;;  %v4256_v8 = vmul.f32 %v11725_v63, %v4212_v39  ;;  %v4188_v1 = vrot.slane %v9537_v46, %v13145_v57  ;;  %v9994_v20 = vld [vmem:[#allocation7 + $0xac] ss:$16 sps:$4 sm:$0xff]  }
 0xb43   :  { %v4246_v26 = vmul.f32 %v11702_v48, %v4172_v5  ;;  %v4245_v13 = vmul.f32 %v11697_v45, %v4168_v9  ;;  %v4247_v53 = vmul.f32 %v11713_v28, %v4176_v59  ;;  %v4248_v48 = vmul.f32 %v11721_v31, %v4180_v29  ;;  %v9991_v59 = vld [vmem:[#allocation7 + $0xc0] ss:$16 sps:$4 sm:$0xff]   ;;  %v9997_v29 = vld [vmem:[#allocation7 + $0x84] ss:$16 sps:$4 sm:$0xff]   ;;  %v10002_v39 = vld [vmem:[#allocation7 + $0x6c] ss:$16 sps:$4 sm:$0xff]  }
 0xb44   :  { %v4255_v45 = vmul.f32 %v11718_v0, %v4208_v24  ;;  %v4249_v28 = vmul.f32 %v11727_v58, %v4184_v34  ;;  %v4250_v31 = vmul.f32 %v11733_v55, %v4188_v1  ;;  %v4257_v0 = vmul.f32 %v11731_v30, %v4216_v62  ;;  %v9998_v24 = vld [vmem:[#allocation7 + $0x8c] ss:$16 sps:$4 sm:$0xff]   ;;  %v10001_v34 = vld [vmem:[#allocation7 + $0x64] ss:$16 sps:$4 sm:$0xff]  }
 0xb45   :  { %4268 = vperm.xlu1 %9200, %v4246_v26   ;;  %4263 = vperm.xlu0 %9199, %v4245_v13   ;;  %v4200_v10 = vrot.slane %v9535_v16, %v10785_v6  ;;  %v4220_v49 = vrot.slane %v9535_v16, %v13145_v57  ;;  %v4192_v35 = vrot.slane %v9537_v46, %v13146_v37  ;;  %v9988_v13 = vld [vmem:[#allocation7 + $0xe8] ss:$16 sps:$4 sm:$0xff]   ;;  %v10005_v1 = vld [vmem:[#allocation7 + $0x44] ss:$16 sps:$4 sm:$0xff]   ;;  %v10006_v62 = vld [vmem:[#allocation7 + $0x4c] ss:$16 sps:$4 sm:$0xff]  }
 0xb46   :  { %v4224_v41 = vrot.slane %v9535_v16, %v13146_v37  ;;  %v4196_v33 = vrot.slane %v9537_v46, %v13147_v18  ;;  %v4228_v3 = vrot.slane %v9535_v16, %v13147_v18  ;;  %v9987_v16 = vld [vmem:[#allocation7 + $0xe0] ss:$16 sps:$4 sm:$0xff]  }
 0xb47   :  { %v4253_v58 = vmul.f32 %v11739_v22, %v4200_v10  ;;  %v4258_v63 = vmul.f32 %v11737_v47, %v4220_v49  ;;  %v4251_v55 = vmul.f32 %v11745_v19, %v4192_v35  ;;  %v10009_v10 = vld [vmem:[#allocation7 + $0x24] ss:$16 sps:$4 sm:$0xff]   ;;  %v10010_v49 = vld [vmem:[#allocation7 + $0x2c] ss:$16 sps:$4 sm:$0xff]  }
 0xb48   :  { %v4259_v30 = vmul.f32 %v11743_v61, %v4224_v41  ;;  %v4252_v22 = vmul.f32 %v11751_v14, %v4196_v33  ;;  %v4260_v47 = vmul.f32 %v11749_v42, %v4228_v3  ;;  %v9989_v14 = vld [vmem:[#allocation7 + $0xc4] ss:$16 sps:$4 sm:$0xff]   ;;  %v9990_v42 = vld [vmem:[#allocation7 + $0xcc] ss:$16 sps:$4 sm:$0xff]  }
 0xb49   :  { %4273 = vperm.xlu1 %9200, %v4247_v53   ;;  %4308 = vperm.xlu0 %9199, %v4254_v54   ;;  %v9995_v53 = vld [vmem:[#allocation7 + $0xa0] ss:$16 sps:$4 sm:$0xff]   ;;  %v9996_v54 = vld [vmem:[#allocation7 + $0xa8] ss:$16 sps:$4 sm:$0xff]   ;;  %v10013_v35 = vld [vmem:[#allocation7 + $0x4] ss:$16 sps:$4 sm:$0xff]  }
 0xb4a   :  { %v10014_v41 = vld [vmem:[#allocation7 + $0xc] ss:$16 sps:$4 sm:$0xff]   ;;  %v10017_v33 = vld [vmem:[#allocation10 + $0xe4] ss:$16 sps:$4 sm:$0xff]  }
 0xb4d   :  { %4278 = vperm.xlu1 %9200, %v4248_v48   ;;  %4313 = vperm.xlu0 %9199, %v4255_v45   ;;  %v9999_v48 = vld [vmem:[#allocation7 + $0x80] ss:$16 sps:$4 sm:$0xff]   ;;  %v10000_v45 = vld [vmem:[#allocation7 + $0x88] ss:$16 sps:$4 sm:$0xff]  }
 0xb51   :  { %4283 = vperm.xlu1 %9200, %v4249_v28   ;;  %4318 = vperm.xlu0 %9199, %v4256_v8   ;;  %v10003_v28 = vld [vmem:[#allocation7 + $0x60] ss:$16 sps:$4 sm:$0xff]   ;;  %v10004_v8 = vld [vmem:[#allocation7 + $0x68] ss:$16 sps:$4 sm:$0xff]  }
 0xb55   :  { %4288 = vperm.xlu1 %9200, %v4250_v31   ;;  %4323 = vperm.xlu0 %9199, %v4257_v0   ;;  %v10007_v31 = vld [vmem:[#allocation7 + $0x40] ss:$16 sps:$4 sm:$0xff]   ;;  %v10008_v0 = vld [vmem:[#allocation7 + $0x48] ss:$16 sps:$4 sm:$0xff]  }
 0xb59   :  { %4303 = vperm.xlu1 %9200, %v4253_v58   ;;  %4328 = vperm.xlu0 %9199, %v4258_v63   ;;  %v10011_v58 = vld [vmem:[#allocation7 + $0x20] ss:$16 sps:$4 sm:$0xff]   ;;  %v10012_v63 = vld [vmem:[#allocation7 + $0x28] ss:$16 sps:$4 sm:$0xff]  }
 0xb5d   :  { %4293 = vperm.xlu1 %9200, %v4251_v55   ;;  %4333 = vperm.xlu0 %9199, %v4259_v30   ;;  %v10015_v55 = vld [vmem:[#allocation7] ss:$16 sps:$4 sm:$0xff]   ;;  %v10016_v30 = vld [vmem:[#allocation7 + $0x8] ss:$16 sps:$4 sm:$0xff]  }
 0xb61   :  { %4298 = vperm.xlu1 %9200, %v4252_v22   ;;  %4338 = vperm.xlu0 %9199, %v4260_v47   ;;  %v10018_v47 = vld [vmem:[#allocation2 + $0x8] sm:$0xff] }
 0xb6c   :  { %v3365_v23 = vpop.xlane.xlu1 %3364 }
 0xb6d   :  { %9538 = vrcp.f32 %v3365_v23 }
 0xb72   :  { %v3363_v5 = vpop.xlane.xlu0 %3362 }
 0xb73   :  { %9540 = vrcp.f32 %v3363_v5  ;;  %v10019_v5 = vld [vmem:[#allocation2] sm:$0xff] }
 0xb7a   :  { %v9539_v9 = vpop.eup %9538 }
 0xb7b   :  { %v3369_v61 = vmul.f32 %v9539_v9, %v11791_v12  ;;  %v9993_v12 = vld [vmem:[#allocation7 + $0xa4] ss:$16 sps:$4 sm:$0xff]  }
 0xb80   :  { %v9541_v19 = vpop.eup %9540 }
 0xb81   :  { %v3367_v26 = vmul.f32 %v9541_v19, %v9533_v27  ;;  %v9992_v27 = vld [vmem:[#allocation7 + $0xc8] ss:$16 sps:$4 sm:$0xff]  }
 0xb83   :  { %v3370_v46 = vpack.c.bf16 %v3369_v61, %v3367_v26 }
 0xb85   :  { %3490 = vmatmul.mubr.bf16.vlgmr.msra.gmra.mxu0 %v3370_v46  ;;  %3533 = vmatmul.mubr.bf16.vlgmr.msra.gmra.mxu1 %v3370_v46 }
 0xb86   :  { %4518 = vmatpush1.bf16.msra.mxu0 %v9987_v16  ;;  %4561 = vmatpush1.bf16.msra.mxu1 %v9988_v13 }
 0xb87   :  { %4519 = vmatprep.subr.bf16.mxu0 %v9989_v14  ;;  %4562 = vmatprep.subr.bf16.mxu1 %v9990_v42  ;;  %v10020_v14 = vld [vmem:[#allocation2 + $0x10] sm:$0xff] }
 0xb88   :  { %4549 = vmatprep.mubr.bf16.mxu0 %v13108_v38  ;;  %4592 = vmatprep.mubr.bf16.mxu1 %v13108_v38 }
 0xb8a   :  { %4520 = vmatpush1.bf16.msra.mxu0 %v9991_v59  ;;  %4563 = vmatpush1.bf16.msra.mxu1 %v9992_v27  ;;  %v10021_v59 = vld [vmem:[#allocation2 + $0x48] sm:$0xff] }
 0xb8b   :  { %4521 = vmatprep.subr.bf16.mxu0 %v9993_v12  ;;  %4564 = vmatprep.subr.bf16.mxu1 %v9994_v20 }
 0xb8e   :  { %4522 = vmatpush1.bf16.msra.mxu0 %v9995_v53  ;;  %4565 = vmatpush1.bf16.msra.mxu1 %v9996_v54 }
 0xb8f   :  { %4523 = vmatprep.subr.bf16.mxu0 %v9997_v29  ;;  %4566 = vmatprep.subr.bf16.mxu1 %v9998_v24 }
 0xb92   :  { %4524 = vmatpush1.bf16.msra.mxu0 %v9999_v48  ;;  %4567 = vmatpush1.bf16.msra.mxu1 %v10000_v45 }
 0xb93   :  { %4525 = vmatprep.subr.bf16.mxu0 %v10001_v34  ;;  %4568 = vmatprep.subr.bf16.mxu1 %v10002_v39 }
 0xb96   :  { %4526 = vmatpush1.bf16.msra.mxu0 %v10003_v28  ;;  %4569 = vmatpush1.bf16.msra.mxu1 %v10004_v8  ;;  %v10022_v28 = vld [vmem:[#allocation2 + $0x18] sm:$0xff] }
 0xb97   :  { %4527 = vmatprep.subr.bf16.mxu0 %v10005_v1  ;;  %4570 = vmatprep.subr.bf16.mxu1 %v10006_v62  ;;  %v10023_v1 = vld [vmem:[#allocation2 + $0x50] sm:$0xff] }
 0xb9a   :  { %4528 = vmatpush1.bf16.msra.mxu0 %v10007_v31  ;;  %4571 = vmatpush1.bf16.msra.mxu1 %v10008_v0 }
 0xb9b   :  { %4529 = vmatprep.subr.bf16.mxu0 %v10009_v10  ;;  %4572 = vmatprep.subr.bf16.mxu1 %v10010_v49 }
 0xb9e   :  { %4530 = vmatpush1.bf16.msra.mxu0 %v10011_v58  ;;  %4573 = vmatpush1.bf16.msra.mxu1 %v10012_v63 }
 0xb9f   :  { %4531 = vmatprep.subr.bf16.mxu0 %v10013_v35  ;;  %4574 = vmatprep.subr.bf16.mxu1 %v10014_v41 }
 0xba2   :  { %4532 = vmatpush1.bf16.msra.mxu0 %v10015_v55  ;;  %4575 = vmatpush1.bf16.msra.mxu1 %v10016_v30 }
 0xba3   :  { %9102 = vmatprep.subr.bf16.mxu0 %v13134_v7  ;;  %4731 = vmatprep.subr.bf16.mxu1 %v10017_v33 }
 0xbc0   :  { %v4269_v3 = vpop.permute.xlu1 %4268  ;;  %v4264_v22 = vpop.permute.xlu0 %4263 }
 0xbc1   :  { %v4342_v23 = vmul.f32 %v10018_v47, %v4269_v3  ;;  %v4341_v9 = vmul.f32 %v10019_v5, %v4264_v22  ;;  %v10024_v3 = vld [vmem:[#allocation2 + $0x20] sm:$0xff]  ;;  %v10025_v47 = vld [vmem:[#allocation2 + $0x58] sm:$0xff] }
 0xbc3   :  { %v4363_v19 = vrot.slane %v4342_v23, 4  ;;  %v4357_v26 = vrot.slane %v4341_v9, 4 }
 0xbc4   :  { %v4274_v61 = vpop.permute.xlu1 %4273  ;;  %v4309_v46 = vpop.permute.xlu0 %4308 }
 0xbc5   :  { %v4364_v16 = vadd.f32 %v4363_v19, %v4342_v23  ;;  %v4358_v13 = vadd.f32 %v4357_v26, %v4341_v9  ;;  %v4343_v42 = vmul.f32 %v10020_v14, %v4274_v61  ;;  %v4350_v27 = vmul.f32 %v10021_v59, %v4309_v46 }
 0xbc7   :  { %v4365_v12 = vrot.slane %v4364_v16, 2  ;;  %v4359_v20 = vrot.slane %v4358_v13, 2  ;;  %v4369_v53 = vrot.slane %v4343_v42, 4  ;;  %v4411_v54 = vrot.slane %v4350_v27, 4 }
 0xbc8   :  { %v4279_v29 = vpop.permute.xlu1 %4278  ;;  %v4314_v24 = vpop.permute.xlu0 %4313 }
 0xbc9   :  { %v4366_v48 = vadd.f32 %v4365_v12, %v4364_v16  ;;  %v4360_v45 = vadd.f32 %v4359_v20, %v4358_v13  ;;  %v4370_v34 = vadd.f32 %v4369_v53, %v4343_v42  ;;  %v4412_v39 = vadd.f32 %v4411_v54, %v4350_v27  ;;  %v10026_v20 = vld [vmem:[#allocation2 + $0x28] sm:$0xff] }
 0xbca   :  { %v4344_v8 = vmul.f32 %v10022_v28, %v4279_v29  ;;  %v4351_v62 = vmul.f32 %v10023_v1, %v4314_v24 }
 0xbcb   :  { %v4371_v31 = vrot.slane %v4370_v34, 2  ;;  %v4413_v0 = vrot.slane %v4412_v39, 2  ;;  %v4367_v35 = vrot.slane %v4366_v48, 1  ;;  %v4361_v41 = vrot.slane %v4360_v45, 1 }
 0xbcc   :  { %v4375_v10 = vrot.slane %v4344_v8, 4  ;;  %v4417_v49 = vrot.slane %v4351_v62, 4  ;;  %v4284_v58 = vpop.permute.xlu1 %4283  ;;  %v4319_v63 = vpop.permute.xlu0 %4318 }
 0xbcd   :  { %v4414_v55 = vadd.f32 %v4413_v0, %v4412_v39  ;;  %v4345_v22 = vmul.f32 %v10024_v3, %v4284_v58  ;;  %v4352_v23 = vmul.f32 %v10025_v47, %v4319_v63  ;;  %v4372_v5 = vadd.f32 %v4371_v31, %v4370_v34  ;;  %v10028_v58 = vld [vmem:[#allocation2 + $0x40] sm:$0xff] }
 0xbce   :  { %v4376_v30 = vadd.f32 %v4375_v10, %v4344_v8  ;;  %v4418_v33 = vadd.f32 %v4417_v49, %v4351_v62  ;;  %v4368_v13 = vadd.f32 %v4367_v35, %v4366_v48  ;;  %v4362_v14 = vadd.f32 %v4361_v41, %v4360_v45  ;;  %v10027_v8 = vld [vmem:[#allocation2 + $0x60] sm:$0xff] }
 0xbcf   :  { %v4381_v26 = vrot.slane %v4345_v22, 4  ;;  %v4423_v61 = vrot.slane %v4352_v23, 4  ;;  %v4415_v42 = vrot.slane %v4414_v55, 1  ;;  %v4373_v54 = vrot.slane %v4372_v5, 1 }
 0xbd0   :  { %v4377_v9 = vrot.slane %v4376_v30, 2  ;;  %v4419_v19 = vrot.slane %v4418_v33, 2  ;;  %v4289_v46 = vpop.permute.xlu1 %4288  ;;  %v4324_v16 = vpop.permute.xlu0 %4323  ;;  %v4454_v62 = vpack.c.bf16 %v4368_v13, %v4368_v13  ;;  %v4453_v31 = vpack.c.bf16 %v4362_v14, %v4362_v14 }
 0xbd1   :  { %v4424_v27 = vadd.f32 %v4423_v61, %v4352_v23  ;;  %v4382_v12 = vadd.f32 %v4381_v26, %v4345_v22  ;;  %v4346_v53 = vmul.f32 %v10026_v20, %v4289_v46  ;;  %v4353_v1 = vmul.f32 %v10027_v8, %v4324_v16  ;;  %v10029_v23 = vld [vmem:[#allocation2 + $0x68] sm:$0xff] }
 0xbd2   :  { %v4378_v59 = vadd.f32 %v4377_v9, %v4376_v30  ;;  %v4420_v29 = vadd.f32 %v4419_v19, %v4418_v33  ;;  %v4416_v0 = vadd.f32 %v4415_v42, %v4414_v55  ;;  %v11830_v35 = vadd.f32 %v4373_v54, %v4372_v5 }
 0xbd3   :  { %v4425_v24 = vrot.slane %v4424_v27, 2  ;;  %v4387_v34 = vrot.slane %v4346_v53, 4  ;;  %v4383_v48 = vrot.slane %v4382_v12, 2  ;;  %v4429_v49 = vrot.slane %v4353_v1, 4 }
 0xbd4   :  { %v4304_v39 = vpop.permute.xlu1 %4303  ;;  %v4329_v28 = vpop.permute.xlu0 %4328  ;;  %v4379_v10 = vrot.slane %v4378_v59, 1  ;;  %v4421_v41 = vrot.slane %v4420_v29, 1  ;;  %v11832_v26 = vunpack.c.l.b16 %v4454_v62  ;;  %v11834_v55 = vunpack.c.l.b16 %v4453_v31  ;;  %v10031_v62 = vld [vmem:[#allocation2 + $0x70] sm:$0xff] }
 0xbd5   :  { %v4388_v45 = vadd.f32 %v4387_v34, %v4346_v53  ;;  %v4349_v63 = vmul.f32 %v10028_v58, %v4304_v39  ;;  %v4426_v30 = vadd.f32 %v4425_v24, %v4424_v27  ;;  %v4430_v22 = vadd.f32 %v4429_v49, %v4353_v1  ;;  %v10030_v53 = vld [vmem:[#allocation2 + $0x30] sm:$0xff] }
 0xbd6   :  { %v4354_v9 = vmul.f32 %v10029_v23, %v4329_v28  ;;  %v4462_v61 = vpack.c.bf16 %v4416_v0, %v4416_v0  ;;  %v11836_v46 = vadd.f32 %v4379_v10, %v4378_v59  ;;  %v4384_v16 = vadd.f32 %v4383_v48, %v4382_v12 }
 0xbd7   :  { %v4389_v3 = vrot.slane %v4388_v45, 2  ;;  %v4405_v47 = vrot.slane %v4349_v63, 4  ;;  %v4431_v13 = vrot.slane %v4430_v22, 2  ;;  %v4455_v42 = vpack.c.bf16 %v11830_v35, %v11830_v35 }
 0xbd8   :  { %v4294_v33 = vpop.permute.xlu1 %4293  ;;  %v4334_v19 = vpop.permute.xlu0 %4333  ;;  %v4435_v14 = vrot.slane %v4354_v9, 4  ;;  %v4422_v27 = vadd.f32 %v4421_v41, %v4420_v29  ;;  %v4427_v20 = vrot.slane %v4426_v30, 1  ;;  %v4494_v1 = vunpack.c.l.b16 %v4462_v61 }
 0xbd9   :  { %v4406_v5 = vadd.f32 %v4405_v47, %v4349_v63  ;;  %v4347_v54 = vmul.f32 %v10030_v53, %v4294_v33  ;;  %v4390_v24 = vadd.f32 %v4389_v3, %v4388_v45  ;;  %v4432_v39 = vadd.f32 %v4431_v13, %v4430_v22  ;;  %v10032_v45 = vld [vmem:[#allocation2 + $0x38] sm:$0xff] }
 0xbda   :  { %v4436_v34 = vadd.f32 %v4435_v14, %v4354_v9  ;;  %v4456_v59 = vpack.c.bf16 %v11836_v46, %v11836_v46  ;;  %v4355_v31 = vmul.f32 %v10031_v62, %v4334_v19  ;;  %v4385_v0 = vrot.slane %v4384_v16, 1  ;;  %v10033_v46 = vld [vmem:[#allocation2 + $0x78] sm:$0xff] }
 0xbdb   :  { %v4407_v28 = vrot.slane %v4406_v5, 2  ;;  %v4393_v12 = vrot.slane %v4347_v54, 4  ;;  %v4433_v10 = vrot.slane %v4432_v39, 1  ;;  %v4463_v58 = vpack.c.bf16 %v4422_v27, %v4422_v27 }
 0xbdc   :  { %v4299_v8 = vpop.permute.xlu1 %4298  ;;  %v4437_v49 = vrot.slane %v4436_v34, 2  ;;  %v4339_v29 = vpop.permute.xlu0 %4338  ;;  %v4441_v35 = vrot.slane %v4355_v31, 4  ;;  %v4428_v33 = vadd.f32 %v4427_v20, %v4426_v30  ;;  %v4391_v3 = vrot.slane %v4390_v24, 1 }
 0xbdd   :  { %v4408_v48 = vadd.f32 %v4407_v28, %v4406_v5  ;;  %v4394_v63 = vadd.f32 %v4393_v12, %v4347_v54  ;;  %v4348_v41 = vmul.f32 %v10032_v45, %v4299_v8  ;;  %v4356_v13 = vmul.f32 %v10033_v46, %v4339_v29 }
 0xbde   :  { %v4438_v47 = vadd.f32 %v4437_v49, %v4436_v34  ;;  %v4442_v9 = vadd.f32 %v4441_v35, %v4355_v31  ;;  %v4386_v19 = vadd.f32 %v4385_v0, %v4384_v16  ;;  %v4434_v14 = vadd.f32 %v4433_v10, %v4432_v39 }
 0xbdf   :  { %v4409_v22 = vrot.slane %v4408_v48, 1  ;;  %v4395_v23 = vrot.slane %v4394_v63, 2  ;;  %v4399_v61 = vrot.slane %v4348_v41, 4  ;;  %v4447_v54 = vrot.slane %v4356_v13, 4 }
 0xbe0   :  { %v4439_v5 = vrot.slane %v4438_v47, 1  ;;  %v4443_v62 = vrot.slane %v4442_v9, 2  ;;  %v4495_v12 = vunpack.c.l.b16 %v4463_v58  ;;  %v4464_v18 = vpack.c.bf16 %v4428_v33, %v4428_v33 }
 0xbe1   :  { %v4410_v53 = vadd.f32 %v4409_v22, %v4408_v48  ;;  %v4396_v28 = vadd.f32 %v4395_v23, %v4394_v63  ;;  %v4400_v27 = vadd.f32 %v4399_v61, %v4348_v41  ;;  %v4392_v8 = vadd.f32 %v4391_v3, %v4390_v24 }
 0xbe2   :  { %v4444_v45 = vadd.f32 %v4443_v62, %v4442_v9  ;;  %v4448_v49 = vadd.f32 %v4447_v54, %v4356_v13  ;;  %v4457_v31 = vpack.c.bf16 %v4386_v19, %v4386_v19  ;;  %v4465_v35 = vpack.c.bf16 %v4434_v14, %v4434_v14 }
 0xbe3   :  { %v4461_v30 = vpack.c.bf16 %v4410_v53, %v4410_v53  ;;  %v4397_v20 = vrot.slane %v4396_v28, 1  ;;  %v4401_v34 = vrot.slane %v4400_v27, 2  ;;  %v4440_v29 = vadd.f32 %v4439_v5, %v4438_v47 }
 0xbe4   :  { %v4445_v39 = vrot.slane %v4444_v45, 1  ;;  %v4449_v10 = vrot.slane %v4448_v49, 2  ;;  %v4487_v48 = vunpack.c.l.b16 %v4455_v42  ;;  %v4496_v63 = vunpack.c.l.b16 %v4464_v18 }
 0xbe5   :  { %v4493_v37 = vunpack.c.l.b16 %v4461_v30  ;;  %v4398_v16 = vadd.f32 %v4397_v20, %v4396_v28  ;;  %v4402_v0 = vadd.f32 %v4401_v34, %v4400_v27  ;;  %v4458_v41 = vpack.c.bf16 %v4392_v8, %v4392_v8 }
 0xbe6   :  { %v4446_v3 = vadd.f32 %v4445_v39, %v4444_v45  ;;  %v4488_v23 = vunpack.c.l.b16 %v4456_v59  ;;  %v4466_v9 = vpack.c.bf16 %v4440_v29, %v4440_v29  ;;  %v4450_v61 = vadd.f32 %v4449_v10, %v4448_v49  ;;  %v10034_v29 = vld [vmem:[#allocation11 + $0x38] sm:$0xff]   ;;  %v10036_v39 = vld [vmem:[#allocation10 + $0xc4] ss:$16 sps:$4 sm:$0xff]   ;;  %v10038_v10 = vld [vmem:[#allocation10 + $0xc0] ss:$16 sps:$4 sm:$0xff]  }
 0xbe7   :  { %v4508_v58 = vsel %vm924_vm0, %v4494_v1, %v4493_v37  ;;  %v4459_v33 = vpack.c.bf16 %v4398_v16, %v4398_v16  ;;  %v4403_v22 = vrot.slane %v4402_v0, 1  ;;  %v4489_v47 = vunpack.c.l.b16 %v4457_v31  ;;  %v10035_v16 = vld [vmem:[#allocation10 + $0xe0] ss:$16 sps:$4 sm:$0xff]  }
 0xbe8   :  { %v4509_v24 = vsel %vm926_vm1, %v4495_v12, %v4508_v58  ;;  %v4497_v13 = vunpack.c.l.b16 %v4465_v35  ;;  %v4467_v19 = vpack.c.bf16 %v4446_v3, %v4446_v3  ;;  %v4501_v18 = vsel %vm924_vm0, %v11832_v26, %v11834_v55  ;;  %v10042_v58 = vld [vmem:[#allocation10 + $0x84] ss:$16 sps:$4 sm:$0xff]  }
 0xbe9   :  { %v4510_v46 = vsel %vm928_vm2, %v4496_v63, %v4509_v24  ;;  %v4404_v14 = vadd.f32 %v4403_v22, %v4402_v0  ;;  %v4490_v42 = vunpack.c.l.b16 %v4458_v41  ;;  %v4451_v37 = vrot.slane %v4450_v61, 1  ;;  %v10037_v0 = vld [vmem:[#allocation11 + $0x30] sm:$0xff]   ;;  %v10040_v63 = vld [vmem:[#allocation11 + $0x28] sm:$0xff]   ;;  %v10043_v24 = vld [vmem:[#allocation11 + $0x20] sm:$0xff]  }
 0xbea   :  { %v4502_v1 = vsel %vm926_vm1, %v4487_v48, %v4501_v18  ;;  %v4491_v53 = vunpack.c.l.b16 %v4459_v33  ;;  %v4511_v59 = vsel %vm930_vm3, %v4497_v13, %v4510_v46  ;;  %v4498_v62 = vunpack.c.l.b16 %v4466_v9  ;;  %v10039_v48 = vld [vmem:[#allocation10 + $0xa4] ss:$16 sps:$4 sm:$0xff]   ;;  %v10041_v41 = vld [vmem:[#allocation10 + $0xa0] ss:$16 sps:$4 sm:$0xff]   ;;  %v10046_v22 = vld [vmem:[#allocation11 + $0x18] sm:$0xff]  }
 0xbeb   :  { %v4460_v5 = vpack.c.bf16 %v4404_v14, %v4404_v14  ;;  %v4503_v28 = vsel %vm928_vm2, %v4488_v23, %v4502_v1  ;;  %v4452_v27 = vadd.f32 %v4451_v37, %v4450_v61  ;;  %v4499_v12 = vunpack.c.l.b16 %v4467_v19  ;;  %v10044_v33 = vld [vmem:[#allocation10 + $0x80] ss:$16 sps:$4 sm:$0xff]   ;;  %v10045_v3 = vld [vmem:[#allocation10 + $0x64] ss:$16 sps:$4 sm:$0xff]   ;;  %v10052_v13 = vld [vmem:[#allocation11 + $0x8] sm:$0xff]  }
 0xbec   :  { %v4504_v54 = vsel %vm930_vm3, %v4489_v47, %v4503_v28  ;;  %v4512_v26 = vsel %vm932_vm4, %v4498_v62, %v4511_v59  ;;  %v10047_v23 = vld [vmem:[#allocation10 + $0x60] ss:$16 sps:$4 sm:$0xff]   ;;  %v10048_v9 = vld [vmem:[#allocation10 + $0x44] ss:$16 sps:$4 sm:$0xff]   ;;  %v10057_v37 = vld [vmem:[#allocation10 + $0xec] ss:$16 sps:$4 sm:$0xff]  }
 0xbed   :  { %v4492_v8 = vunpack.c.l.b16 %v4460_v5  ;;  %v4468_v30 = vpack.c.bf16 %v4452_v27, %v4452_v27  ;;  %v4505_v20 = vsel %vm932_vm4, %v4490_v42, %v4504_v54  ;;  %v4513_v49 = vsel %vm934_vm5, %v4499_v12, %v4512_v26  ;;  %v10049_v61 = vld [vmem:[#allocation11 + $0x10] sm:$0xff]   ;;  %v10055_v18 = vld [vmem:[#allocation11] sm:$0xff]   ;;  %v3448_v5 = vpop.f32.mrf.mxu1 }
 0xbee   :  { %v4506_v55 = vsel %vm934_vm5, %v4491_v53, %v4505_v20  ;;  %v10050_v46 = vld [vmem:[#allocation10 + $0x40] ss:$16 sps:$4 sm:$0xff]   ;;  %v10051_v47 = vld [vmem:[#allocation10 + $0x24] ss:$16 sps:$4 sm:$0xff]   ;;  %v3405_v53 = vpop.f32.mrf.mxu0 }
 0xbef   :  { %v4500_v45 = vunpack.c.l.b16 %v4468_v30  ;;  %v4507_v34 = vsel %vm936_vm6, %v4492_v8, %v4506_v55  ;;  %v10053_v19 = vld [vmem:[#allocation10 + $0x20] ss:$16 sps:$4 sm:$0xff]   ;;  %v10054_v14 = vld [vmem:[#allocation10 + $0x4] ss:$16 sps:$4 sm:$0xff]   ;;  %v3450_v28 = vpop.f32.mrf.mxu1 }
 0xbf0   :  { %v10056_v42 = vld [vmem:[#allocation10] ss:$16 sps:$4 sm:$0xff]   ;;  %v10058_v1 = vld [vmem:[#allocation8 + $0xe4] ss:$16 sps:$4 sm:$0xff]   ;;  %v3407_v59 = vpop.f32.mrf.mxu0 }
 0xbf1   :  { %v4514_v31 = vsel %vm936_vm6, %v4500_v45, %v4513_v49  ;;  %v3452_v27 = vpop.f32.mrf.mxu1 }
 0xbf2   :  { %v4515_v35 = vpack.c.b16 %v4514_v31, %v4507_v34  ;;  %v3409_v62 = vpop.f32.mrf.mxu0 }
 0xbf3   :  { %v3454_v12 = vpop.f32.mrf.mxu1 }
 0xbf4   :  { %4550 = vmatmul.mubr.bf16.vlgmr.msra.gmra.mxu0 %v4515_v35  ;;  %4593 = vmatmul.mubr.bf16.vlgmr.msra.gmra.mxu1 %v4515_v35  ;;  %v3411_v54 = vpop.f32.mrf.mxu0 }
 0xbf5   :  { %9103 = vmatpush3.bf16.msra.mxu0 %v10034_v29  ;;  %4732 = vmatpush1.bf16.msra.mxu1 %v10035_v16 }
 0xbf6   :  { %9104 = vmatprep.subr.bf16.mxu0 %v13134_v7  ;;  %4733 = vmatprep.subr.bf16.mxu1 %v10036_v39 }
 0xbf7   :  { %9118 = vmatprep.mubr.msk.bf16.mxu0 %vm10569_vm8, %v13134_v7  ;;  %4763 = vmatprep.mubr.bf16.mxu1 %v13108_v38 }
 0xbf9   :  { %9105 = vmatpush3.bf16.msra.mxu0 %v10037_v0  ;;  %4734 = vmatpush1.bf16.msra.mxu1 %v10038_v10 }
 0xbfa   :  { %9106 = vmatprep.subr.bf16.mxu0 %v13134_v7  ;;  %4735 = vmatprep.subr.bf16.mxu1 %v10039_v48 }
 0xbfd   :  { %9107 = vmatpush3.bf16.msra.mxu0 %v10040_v63  ;;  %4736 = vmatpush1.bf16.msra.mxu1 %v10041_v41 }
 0xbfe   :  { %9108 = vmatprep.subr.bf16.mxu0 %v13134_v7  ;;  %4737 = vmatprep.subr.bf16.mxu1 %v10042_v58 }
 0xc01   :  { %9109 = vmatpush3.bf16.msra.mxu0 %v10043_v24  ;;  %4738 = vmatpush1.bf16.msra.mxu1 %v10044_v33 }
 0xc02   :  { %9110 = vmatprep.subr.bf16.mxu0 %v13134_v7  ;;  %4739 = vmatprep.subr.bf16.mxu1 %v10045_v3 }
 0xc05   :  { %9111 = vmatpush3.bf16.msra.mxu0 %v10046_v22  ;;  %4740 = vmatpush1.bf16.msra.mxu1 %v10047_v23 }
 0xc06   :  { %9112 = vmatprep.subr.bf16.mxu0 %v13134_v7  ;;  %4741 = vmatprep.subr.bf16.mxu1 %v10048_v9 }
 0xc09   :  { %9113 = vmatpush3.bf16.msra.mxu0 %v10049_v61  ;;  %4742 = vmatpush1.bf16.msra.mxu1 %v10050_v46 }
 0xc0a   :  { %9114 = vmatprep.subr.bf16.mxu0 %v13134_v7  ;;  %4743 = vmatprep.subr.bf16.mxu1 %v10051_v47 }
 0xc0d   :  { %9115 = vmatpush3.bf16.msra.mxu0 %v10052_v13  ;;  %4744 = vmatpush1.bf16.msra.mxu1 %v10053_v19 }
 0xc0e   :  { %9116 = vmatprep.subr.bf16.mxu0 %v13134_v7  ;;  %4745 = vmatprep.subr.bf16.mxu1 %v10054_v14 }
 0xc11   :  { %9117 = vmatpush3.bf16.msra.mxu0 %v10055_v18  ;;  %4746 = vmatpush1.bf16.msra.mxu1 %v10056_v42 }
 0xc12   :  { %4774 = vmatprep.subr.bf16.mxu0 %v10057_v37  ;;  %4817 = vmatprep.subr.bf16.mxu1 %v10058_v1 }
 0xc45   :  { %v3491_v8 = vpop.f32.mrf.mxu0  ;;  %v3534_v30 = vpop.f32.mrf.mxu1 }
 0xc46   :  { %v3492_v45 = vadd.f32 %v3491_v8, %v3405_v53  ;;  %v3535_v1 = vadd.f32 %v3534_v30, %v3448_v5 }
 0xc47   :  { %v3493_v20 = vpop.f32.mrf.mxu0  ;;  %v3536_v26 = vpop.f32.mrf.mxu1 }
 0xc48   :  { %v3494_v49 = vadd.f32 %v3493_v20, %v3407_v59  ;;  %v3543_v16 = vadd.f32 %v3492_v45, %v11097_v36  ;;  %v3537_v46 = vadd.f32 %v3536_v26, %v3450_v28  ;;  %v3545_v8 = vadd.f32 %v3535_v1, %v11111_v32 }
 0xc49   :  { %v3495_v55 = vpop.f32.mrf.mxu0  ;;  %v3538_v34 = vpop.f32.mrf.mxu1 }
 0xc4a   :  { %v3496_v35 = vadd.f32 %v3495_v55, %v3409_v62  ;;  %v3544_v63 = vadd.f32 %v3494_v49, %v11100_v4  ;;  %v3546_v37 = vadd.f32 %v3537_v46, %v11107_v15 }
 0xc4b   :  { %v3497_v31 = vpop.f32.mrf.mxu0  ;;  %v3540_v29 = vpop.f32.mrf.mxu1 }
 0xc4c   :  { %v3498_v0 = vadd.f32 %v3497_v31, %v3411_v54  ;;  %v3547_v33 = vadd.f32 %v3496_v35, %v11097_v36  ;;  %v3541_v42 = vadd.f32 %v3540_v29, %v3454_v12  ;;  %v3539_v54 = vadd.f32 %v3538_v34, %v3452_v27 }
 0xc4e   :  { %v3548_v61 = vadd.f32 %v3498_v0, %v11100_v4  ;;  %v3550_v62 = vadd.f32 %v3541_v42, %v11107_v15  ;;  %v3549_v12 = vadd.f32 %v3539_v54, %v11111_v32 }
 0xcb4   :  { %v4551_v39 = vpop.f32.mrf.mxu0  ;;  %v4594_v48 = vpop.f32.mrf.mxu1 }
 0xcb5   :  { %v4603_v10 = vadd.f32 %v4551_v39, %v3543_v16  ;;  %v4605_v55 = vadd.f32 %v4594_v48, %v3545_v8 }
 0xcb6   :  { %v4553_v41 = vpop.f32.mrf.mxu0  ;;  %v4596_v23 = vpop.f32.mrf.mxu1 }
 0xcb7   :  { %v8934_v58 = vmul.f32 -1.442695, %v4603_v10  ;;  %v4604_v24 = vadd.f32 %v4553_v41, %v3544_v63  ;;  %v4606_v53 = vadd.f32 %v4596_v23, %v3546_v37 }
 0xcb8   :  { %v4555_v3 = vpop.f32.mrf.mxu0  ;;  %v4598_v14 = vpop.f32.mrf.mxu1 }
 0xcb9   :  { %9542 = vpow2.f32 %v8934_v58  ;;  %v8936_v22 = vmul.f32 -1.442695, %v4604_v24  ;;  %v4607_v9 = vadd.f32 %v4555_v3, %v3547_v33  ;;  %v8938_v28 = vmul.f32 -1.442695, %v4606_v53 }
 0xcba   :  { %v4557_v47 = vpop.f32.mrf.mxu0  ;;  %v4600_v59 = vpop.f32.mrf.mxu1  ;;  %v4609_v30 = vadd.f32 %v4598_v14, %v3549_v12 }
 0xcbb   :  { %9544 = vpow2.f32 %v8936_v22  ;;  %v8935_v13 = vmul.f32 -1.442695, %v4607_v9  ;;  %v4608_v19 = vadd.f32 %v4557_v47, %v3548_v61  ;;  %v4610_v20 = vadd.f32 %v4600_v59, %v3550_v62 }
 0xcbd   :  { %9546 = vpow2.f32 %v8935_v13  ;;  %v8937_v18 = vmul.f32 -1.442695, %v4608_v19  ;;  %v8939_v31 = vmul.f32 -1.442695, %v4610_v20 }
 0xcbf   :  { %9548 = vpow2.f32 %v8937_v18 }
 0xcc0   :  { %9550 = vpow2.f32 %v8938_v28 }
 0xcc6   :  { %v9543_v26 = vpop.eup %9542 }
 0xcc7   :  { %v4617_v45 = vadd.f32 1.0, %v9543_v26 }
 0xcc8   :  { %v9545_v49 = vpop.eup %9544 }
 0xcc9   :  { %9552 = vrcp.f32 %v4617_v45  ;;  %v4629_v35 = vadd.f32 1.0, %v9545_v49  ;;  %v10059_v49 = vld [vmem:[#allocation10 + $0xe8] ss:$16 sps:$4 sm:$0xff]  }
 0xcca   :  { %v9547_v5 = vpop.eup %9546  ;;  %9554 = vtanh.f32 %v4605_v55 }
 0xccb   :  { %9556 = vrcp.f32 %v4629_v35  ;;  %v4618_v29 = vadd.f32 1.0, %v9547_v5  ;;  %v10060_v5 = vld [vmem:[#allocation10 + $0xcc] ss:$16 sps:$4 sm:$0xff]  }
 0xccc   :  { %v9549_v27 = vpop.eup %9548  ;;  %9558 = vpow2.f32 %v8939_v31 }
 0xccd   :  { %9560 = vrcp.f32 %v4618_v29  ;;  %v4630_v34 = vadd.f32 1.0, %v9549_v27  ;;  %v9551_v16 = vpop.eup %9550 }
 0xcce   :  { %9562 = vtanh.f32 %v4609_v30  ;;  %v4643_v48 = vadd.f32 1.0, %v9551_v16 }
 0xccf   :  { %9564 = vrcp.f32 %v4630_v34 }
 0xcd0   :  { %9566 = vrcp.f32 %v4643_v48 }
 0xcd6   :  { %v9553_v39 = vpop.eup %9552 }
 0xcd7   :  { %v9555_v0 = vpop.eup %9554 }
 0xcd8   :  { %v9557_v10 = vpop.eup %9556  ;;  %v4651_v41 = vmul.f32 %v9555_v0, %v9553_v39  ;;  %v10061_v39 = vld [vmem:[#allocation10 + $0xc8] ss:$16 sps:$4 sm:$0xff]  }
 0xcd9   :  { %v9559_v63 = vpop.eup %9558  ;;  %v4649_v58 = vmul.f32 %v9557_v10, %v11502_v44  ;;  %v10062_v10 = vld [vmem:[#allocation10 + $0xac] ss:$16 sps:$4 sm:$0xff]  }
 0xcda   :  { %v9561_v24 = vpop.eup %9560  ;;  %v4644_v23 = vadd.f32 1.0, %v9559_v63 }
 0xcdb   :  { %v9563_v33 = vpop.eup %9562  ;;  %v11877_v3 = vadd.f32 %v4651_v41, %v4649_v58 }
 0xcdc   :  { %v9565_v22 = vpop.eup %9564  ;;  %v4652_v9 = vmul.f32 %v9563_v33, %v9561_v24  ;;  %v10063_v24 = vld [vmem:[#allocation8 + $0xe0] ss:$16 sps:$4 sm:$0xff]  }
 0xcdd   :  { %9568 = vtanh.f32 %v11877_v3  ;;  %v4650_v61 = vmul.f32 %v9565_v22, %v11506_v25  ;;  %v9567_v47 = vpop.eup %9566  ;;  %v10064_v22 = vld [vmem:[#allocation10 + $0xa8] ss:$16 sps:$4 sm:$0xff]  }
 0xcde   :  { %9570 = vrcp.f32 %v4644_v23 }
 0xcdf   :  { %v11881_v46 = vadd.f32 %v4652_v9, %v4650_v61 }
 0xce1   :  { %9572 = vtanh.f32 %v11881_v46 }
 0xcea   :  { %v9569_v13 = vpop.eup %9568 }
 0xceb   :  { %v4657_v44 = vmul.f32 %v9569_v13, %v9567_v47  ;;  %v9571_v19 = vpop.eup %9570  ;;  %v10065_v13 = vld [vmem:[#allocation10 + $0x8c] ss:$16 sps:$4 sm:$0xff]  }
 0xced   :  { %v4920_v14 = vrot.slane %v4657_v44, %v11123_v21  ;;  %v4913_v18 = vcombine.high %v4657_v44, %v4657_v44 }
 0xcee   :  { %v9573_v42 = vpop.eup %9572 }
 0xcef   :  { %v4658_v37 = vmul.f32 %v9573_v42, %v9571_v19  ;;  %v4936_v1 = vrot.slane %v4920_v14, %v11123_v21  ;;  %v4928_v53 = vcombine.high %v4920_v14, %v4920_v14  ;;  %v11887_v59 = vrot.slane %v4913_v18, %v11123_v21  ;;  %v10066_v42 = vld [vmem:[#allocation8 + $0xc4] ss:$16 sps:$4 sm:$0xff]  }
 0xcf1   :  { %v11889_v25 = vpack.c.bf16 %v4658_v37, %v4657_v44  ;;  %v5014_v62 = vrot.slane %v4936_v1, %v10785_v6  ;;  %v4950_v54 = vrot.slane %v4928_v53, %v11123_v21  ;;  %v4969_v8 = vrot.slane %v4658_v37, %v11123_v21  ;;  %v13148_v44 = vld [vmem:[#allocation23_spill] sm:$0xff] }
 0xcf2   :  { %v4958_v28 = vcombine.high %v4936_v1, %v4936_v1  ;;  %v4962_v20 = vcombine.high %v4658_v37, %v4658_v37  ;;  %v11902_v35 = vrot.slane %v11887_v59, %v11123_v21  ;;  %v4929_v33 = vcombine.high %v11887_v59, %v11887_v59  ;;  %v10067_v37 = vld [vmem:[#allocation8 + $0xc0] ss:$16 sps:$4 sm:$0xff]   ;;  %v10068_v1 = vld [vmem:[#allocation10 + $0x88] ss:$16 sps:$4 sm:$0xff]  }
 0xcf3   :  { %9119 = vmatmul.mubr.bf16.vlgmr.msra.gmra.mxu0 %v11889_v25  ;;  %4764 = vmatmul.mubr.bf16.vlgmr.msra.gmra.mxu1 %v11889_v25  ;;  %v5091_v26 = vmul.f32 %v5014_v62, %v13113_v51  ;;  %v5018_v55 = vrot.slane %v4950_v54, %v10785_v6  ;;  %v4977_v45 = vcombine.high %v4969_v8, %v4969_v8  ;;  %v10069_v62 = vld [vmem:[#allocation8 + $0xa4] ss:$16 sps:$4 sm:$0xff]  }
 0xcf4   :  { %4775 = vmatpush1.bf16.msra.mxu0 %v10059_v49  ;;  %v5022_v12 = vrot.slane %v4958_v28, %v10785_v6  ;;  %v4985_v31 = vrot.slane %v4969_v8, %v11123_v21  ;;  %v4976_v27 = vrot.slane %v4962_v20, %v11123_v21  ;;  %4806 = vmatprep.mubr.bf16.mxu0 %v13108_v38  ;;  %v13149_v8 = vld [vmem:[#allocation27_spill] sm:$0xff] }
 0xcf5   :  { %5107 = vadd.xlane.f32.xlu1 %v5091_v26  ;;  %4776 = vmatprep.subr.bf16.mxu0 %v10060_v5  ;;  %v5092_v30 = vmul.f32 %v5018_v55, %v13114_v2  ;;  %v4999_v29 = vrot.slane %v4977_v45, %v11123_v21  ;;  %v5030_v0 = vrot.slane %v11902_v35, %v10785_v6  ;;  %v13150_v20 = vld [vmem:[#allocation19_spill] sm:$0xff] }
 0xcf6   :  { %v5007_v34 = vcombine.high %v4985_v31, %v4985_v31  ;;  %v5093_v63 = vmul.f32 %v5022_v12, %v13115_v17  ;;  %v11915_v58 = vrot.slane %v4976_v27, %v11123_v21  ;;  %4818 = vmatpush1.bf16.msra.mxu1 %v10063_v24  ;;  %v5046_v9 = vrot.slane %v4985_v31, %v10785_v6  ;;  %v10071_v49 = vld [vmem:[#allocation8 + $0xa0] ss:$16 sps:$4 sm:$0xff]   ;;  %v10072_v12 = vld [vmem:[#allocation10 + $0x68] ss:$16 sps:$4 sm:$0xff]  }
 0xcf7   :  { %5109 = vadd.xlane.f32.xlu0 %v5092_v30  ;;  %v5050_v16 = vrot.slane %v4999_v29, %v10785_v6  ;;  %v5095_v23 = vmul.f32 %v5030_v0, %v13117_v52  ;;  %v5009_v61 = vcombine.high %v4999_v29, %v4999_v29  ;;  %v4960_v47 = vcombine.high %v4950_v54, %v4950_v54  ;;  %v10070_v54 = vld [vmem:[#allocation10 + $0x6c] ss:$16 sps:$4 sm:$0xff]   ;;  %v10073_v29 = vld [vmem:[#allocation8 + $0x84] ss:$16 sps:$4 sm:$0xff]  }
 0xcf8   :  { %4777 = vmatpush1.bf16.msra.mxu0 %v10061_v39  ;;  %v5054_v41 = vrot.slane %v5007_v34, %v10785_v6  ;;  %v5062_v14 = vrot.slane %v11915_v58, %v10785_v6  ;;  %v4978_v18 = vcombine.high %v4976_v27, %v4976_v27  ;;  %4819 = vmatprep.subr.bf16.mxu1 %v10066_v42  ;;  %v13151_v31 = vld [vmem:[#allocation26_spill] sm:$0xff]  ;;  %v13152_v34 = vld [vmem:[#allocation25_spill] sm:$0xff]  ;;  %v13155_v42 = vld [vmem:[#allocation31_spill] sm:$0xff] }
 0xcf9   :  { %4778 = vmatprep.subr.bf16.mxu0 %v10062_v10  ;;  %v5100_v48 = vmul.f32 %v5050_v16, %v13116_v60  ;;  %4849 = vmatprep.mubr.bf16.mxu1 %v13108_v38  ;;  %v5026_v53 = vrot.slane %v4960_v47, %v10785_v6  ;;  %v4957_v59 = vrot.slane %v4929_v33, %v11123_v21  ;;  %v10074_v27 = vld [vmem:[#allocation10 + $0x4c] ss:$16 sps:$4 sm:$0xff]   ;;  %v10077_v33 = vld [vmem:[#allocation8 + $0x64] ss:$16 sps:$4 sm:$0xff]  }
 0xcfa   :  { %v5101_v19 = vmul.f32 %v5054_v41, %v13148_v44  ;;  %4820 = vmatpush1.bf16.msra.mxu1 %v10067_v37  ;;  %v5103_v28 = vmul.f32 %v5062_v14, %v13149_v8  ;;  %v5099_v26 = vmul.f32 %v5046_v9, %v13150_v20  ;;  %v5058_v55 = vrot.slane %v5009_v61, %v10785_v6  ;;  %v13153_v41 = vld [vmem:[#allocation30_spill] sm:$0xff]  ;;  %v10081_v14 = vld [vmem:[#allocation8 + $0x44] ss:$16 sps:$4 sm:$0xff]  }
 0xcfb   :  { %5125 = vadd.xlane.f32.xlu1 %v5100_v48  ;;  %5111 = vadd.xlane.f32.xlu0 %v5093_v63  ;;  %v5006_v45 = vrot.slane %v4978_v18, %v11123_v21  ;;  %v5094_v5 = vmul.f32 %v5026_v53, %v13151_v31  ;;  %v5034_v30 = vrot.slane %v4957_v59, %v10785_v6  ;;  %v10075_v48 = vld [vmem:[#allocation8 + $0x80] ss:$16 sps:$4 sm:$0xff]   ;;  %v10076_v63 = vld [vmem:[#allocation10 + $0x48] ss:$16 sps:$4 sm:$0xff]   ;;  %v10082_v18 = vld [vmem:[#allocation10 + $0xc] ss:$16 sps:$4 sm:$0xff]  }
 0xcfc   :  { %4779 = vmatpush1.bf16.msra.mxu0 %v10064_v22  ;;  %4821 = vmatprep.subr.bf16.mxu1 %v10069_v62  ;;  %v5102_v16 = vmul.f32 %v5058_v55, %v13152_v34  ;;  %v5008_v0 = vcombine.high %v11915_v58, %v11915_v58  ;;  %v4959_v10 = vcombine.high %v11902_v35, %v11902_v35  ;;  %v10078_v22 = vld [vmem:[#allocation10 + $0x2c] ss:$16 sps:$4 sm:$0xff]   ;;  %v13157_v55 = vld [vmem:[#allocation33_spill] sm:$0xff] }
 0xcfd   :  { %4780 = vmatprep.subr.bf16.mxu0 %v10065_v13  ;;  %v5066_v39 = vrot.slane %v5006_v45, %v10785_v6  ;;  %v5096_v24 = vmul.f32 %v5034_v30, %v13153_v41  ;;  %v5010_v47 = vcombine.high %v5006_v45, %v5006_v45  ;;  %v4961_v35 = vcombine.high %v4957_v59, %v4957_v59  ;;  %v10079_v13 = vld [vmem:[#allocation8 + $0x60] ss:$16 sps:$4 sm:$0xff]   ;;  %v10084_v59 = vld [vmem:[#allocation10 + $0x8] ss:$16 sps:$4 sm:$0xff]  }
 0xcfe   :  { %4822 = vmatpush1.bf16.msra.mxu1 %v10071_v49  ;;  %v5070_v61 = vrot.slane %v5008_v0, %v10785_v6  ;;  %v5038_v58 = vrot.slane %v4959_v10, %v10785_v6  ;;  %v10086_v49 = vld [vmem:[#allocation8 + $0xec] ss:$16 sps:$4 sm:$0xff]   ;;  %v10087_v30 = vld [vmem:[#allocation8 + $0x20] ss:$16 sps:$4 sm:$0xff]   ;;  %v10092_v0 = vld [vmem:[#allocation7 + $0xe4] ss:$16 sps:$4 sm:$0xff]  }
 0xcff   :  { %5127 = vadd.xlane.f32.xlu1 %v5101_v19  ;;  %5115 = vadd.xlane.f32.xlu0 %v5095_v23  ;;  %v13154_v23 = vld [vmem:[#allocation29_spill] sm:$0xff]  ;;  %v10080_v19 = vld [vmem:[#allocation10 + $0x28] ss:$16 sps:$4 sm:$0xff]   ;;  %v5074_v62 = vrot.slane %v5010_v47, %v10785_v6 }
 0xd00   :  { %4781 = vmatpush1.bf16.msra.mxu0 %v10068_v1  ;;  %4823 = vmatprep.subr.bf16.mxu1 %v10073_v29  ;;  %v5104_v9 = vmul.f32 %v5066_v39, %v13154_v23  ;;  %v5105_v37 = vmul.f32 %v5070_v61, %v13155_v42  ;;  %v13156_v1 = vld [vmem:[#allocation32_spill] sm:$0xff]  ;;  %v10091_v39 = vld [vmem:[#allocation8] ss:$16 sps:$4 sm:$0xff]  }
 0xd01   :  { %4782 = vmatprep.subr.bf16.mxu0 %v10070_v54  ;;  %v5097_v53 = vmul.f32 %v5038_v58, %v13156_v1  ;;  %v5042_v54 = vrot.slane %v4961_v35, %v10785_v6  ;;  %v5106_v45 = vmul.f32 %v5074_v62, %v13157_v55  ;;  %v10088_v29 = vld [vmem:[#allocation8 + $0xe8] ss:$16 sps:$4 sm:$0xff]   ;;  %v10102_v58 = vld [vmem:[#allocation8 + $0x2c] ss:$16 sps:$4 sm:$0xff]  }
 0xd02   :  { %4824 = vmatpush1.bf16.msra.mxu1 %v10075_v48  ;;  %v10093_v10 = vld [vmem:[#allocation8 + $0xc8] ss:$16 sps:$4 sm:$0xff]   ;;  %v10094_v48 = vld [vmem:[#allocation8 + $0xac] ss:$16 sps:$4 sm:$0xff]  }
 0xd03   :  { %5131 = vadd.xlane.f32.xlu1 %v5103_v28  ;;  %5123 = vadd.xlane.f32.xlu0 %v5099_v26  ;;  %v10083_v28 = vld [vmem:[#allocation8 + $0x40] ss:$16 sps:$4 sm:$0xff]   ;;  %v10085_v26 = vld [vmem:[#allocation8 + $0x24] ss:$16 sps:$4 sm:$0xff]   ;;  %v10101_v61 = vld [vmem:[#allocation8 + $0x48] ss:$16 sps:$4 sm:$0xff]  }
 0xd04   :  { %4783 = vmatpush1.bf16.msra.mxu0 %v10072_v12  ;;  %4825 = vmatprep.subr.bf16.mxu1 %v10077_v33  ;;  %v13158_v12 = vld [vmem:[#allocation34_spill] sm:$0xff] }
 0xd05   :  { %4784 = vmatprep.subr.bf16.mxu0 %v10074_v27  ;;  %v10089_v27 = vld [vmem:[#allocation8 + $0xcc] ss:$16 sps:$4 sm:$0xff]   ;;  %v10103_v47 = vld [vmem:[#allocation8 + $0x28] ss:$16 sps:$4 sm:$0xff]  }
 0xd06   :  { %4826 = vmatpush1.bf16.msra.mxu1 %v10079_v13  ;;  %v10098_v33 = vld [vmem:[#allocation8 + $0x6c] ss:$16 sps:$4 sm:$0xff]   ;;  %v10105_v13 = vld [vmem:[#allocation8 + $0x8] ss:$16 sps:$4 sm:$0xff]  }
 0xd07   :  { %5129 = vadd.xlane.f32.xlu1 %v5102_v16  ;;  %5113 = vadd.xlane.f32.xlu0 %v5094_v5  ;;  %v5098_v5 = vmul.f32 %v5042_v54, %v13158_v12  ;;  %v10090_v16 = vld [vmem:[#allocation8 + $0x4] ss:$16 sps:$4 sm:$0xff]   ;;  %v10104_v35 = vld [vmem:[#allocation8 + $0xc] ss:$16 sps:$4 sm:$0xff]  }
 0xd08   :  { %4785 = vmatpush1.bf16.msra.mxu0 %v10076_v63  ;;  %4827 = vmatprep.subr.bf16.mxu1 %v10081_v14  ;;  %v10095_v63 = vld [vmem:[#allocation8 + $0xa8] ss:$16 sps:$4 sm:$0xff]  }
 0xd09   :  { %4786 = vmatprep.subr.bf16.mxu0 %v10078_v22  ;;  %v10099_v22 = vld [vmem:[#allocation8 + $0x68] ss:$16 sps:$4 sm:$0xff]  }
 0xd0a   :  { %4828 = vmatpush1.bf16.msra.mxu1 %v10083_v28 }
 0xd0b   :  { %5133 = vadd.xlane.f32.xlu1 %v5104_v9  ;;  %5117 = vadd.xlane.f32.xlu0 %v5096_v24  ;;  %v10097_v24 = vld [vmem:[#allocation8 + $0x88] ss:$16 sps:$4 sm:$0xff]   ;;  %v10100_v9 = vld [vmem:[#allocation8 + $0x4c] ss:$16 sps:$4 sm:$0xff]  }
 0xd0c   :  { %4787 = vmatpush1.bf16.msra.mxu0 %v10080_v19  ;;  %4829 = vmatprep.subr.bf16.mxu1 %v10085_v26  ;;  %v10106_v19 = vld [vmem:[#allocation7 + $0xec] ss:$16 sps:$4 sm:$0xff]  }
 0xd0d   :  { %4788 = vmatprep.subr.bf16.mxu0 %v10082_v18 }
 0xd0e   :  { %4830 = vmatpush1.bf16.msra.mxu1 %v10087_v30 }
 0xd0f   :  { %5135 = vadd.xlane.f32.xlu1 %v5105_v37  ;;  %5119 = vadd.xlane.f32.xlu0 %v5097_v53 }
 0xd10   :  { %4789 = vmatpush1.bf16.msra.mxu0 %v10084_v59  ;;  %4831 = vmatprep.subr.bf16.mxu1 %v10090_v16 }
 0xd11   :  { %4860 = vmatprep.subr.bf16.mxu0 %v10086_v49 }
 0xd12   :  { %4832 = vmatpush1.bf16.msra.mxu1 %v10091_v39 }
 0xd13   :  { %4807 = vmatmul.mubr.bf16.vlgmr.msra.gmra.mxu0 %v11889_v25  ;;  %5137 = vadd.xlane.f32.xlu1 %v5106_v45  ;;  %v10096_v25 = vld [vmem:[#allocation8 + $0x8c] ss:$16 sps:$4 sm:$0xff]  }
 0xd14   :  { %5121 = vadd.xlane.f32.xlu0 %v5098_v5  ;;  %4861 = vmatpush1.bf16.msra.mxu0 %v10088_v29 }
 0xd15   :  { %4862 = vmatprep.subr.bf16.mxu0 %v10089_v27  ;;  %4892 = vmatprep.mubr.bf16.mxu0 %v13108_v38 }
 0xd16   :  { %5877 = vmatprep.subr.bf16.mxu1 %v10092_v0 }
 0xd18   :  { %4863 = vmatpush1.bf16.msra.mxu0 %v10093_v10 }
 0xd19   :  { %4864 = vmatprep.subr.bf16.mxu0 %v10094_v48 }
 0xd1c   :  { %4865 = vmatpush1.bf16.msra.mxu0 %v10095_v63 }
 0xd1d   :  { %4866 = vmatprep.subr.bf16.mxu0 %v10096_v25 }
 0xd20   :  { %4867 = vmatpush1.bf16.msra.mxu0 %v10097_v24 }
 0xd21   :  { %4868 = vmatprep.subr.bf16.mxu0 %v10098_v33 }
 0xd24   :  { %4869 = vmatpush1.bf16.msra.mxu0 %v10099_v22 }
 0xd25   :  { %4870 = vmatprep.subr.bf16.mxu0 %v10100_v9 }
 0xd28   :  { %4871 = vmatpush1.bf16.msra.mxu0 %v10101_v61 }
 0xd29   :  { %4872 = vmatprep.subr.bf16.mxu0 %v10102_v58 }
 0xd2c   :  { %4873 = vmatpush1.bf16.msra.mxu0 %v10103_v47 }
 0xd2d   :  { %4874 = vmatprep.subr.bf16.mxu0 %v10104_v35 }
 0xd30   :  { %4875 = vmatpush1.bf16.msra.mxu0 %v10105_v13 }
 0xd31   :  { %5920 = vmatprep.subr.bf16.mxu0 %v10106_v19 }
 0xd7e   :  { %v11951_v14 = vpop.xlane.xlu1 %5107 }
 0xd7f   :  { %v5158_v10 = vrot.slane %v11951_v14, %v13129_v40 }
 0xd80   :  { %v11953_v18 = vpop.xlane.xlu0 %5109 }
 0xd81   :  { %v5162_v30 = vrot.slane %v11953_v18, %v13129_v40 }
 0xd83   :  { %v5219_v25 = vsel %vm924_vm0, %v5162_v30, %v5158_v10 }
 0xd84   :  { %v11955_v37 = vpop.xlane.xlu1 %5125  ;;  %v11957_v53 = vpop.xlane.xlu0 %5111 }
 0xd85   :  { %v5194_v5 = vrot.slane %v11955_v37, %v13129_v40  ;;  %v5166_v16 = vrot.slane %v11957_v53, %v13129_v40 }
 0xd87   :  { %v5220_v9 = vsel %vm926_vm1, %v5166_v16, %v5219_v25 }
 0xd88   :  { %v11959_v62 = vpop.xlane.xlu1 %5127  ;;  %v11961_v54 = vpop.xlane.xlu0 %5115 }
 0xd89   :  { %v5198_v48 = vrot.slane %v11959_v62, %v13129_v40 }
 0xd8c   :  { %v11963_v28 = vpop.xlane.xlu1 %5131  ;;  %v11965_v59 = vpop.xlane.xlu0 %5123 }
 0xd8d   :  { %v5190_v49 = vrot.slane %v11965_v59, %v13129_v40  ;;  %v5206_v47 = vrot.slane %v11963_v28, %v13129_v40 }
 0xd8f   :  { %v5226_v39 = vsel %vm924_vm0, %v5194_v5, %v5190_v49  ;;  %v5174_v49 = vrot.slane %v11961_v54, %v13129_v40 }
 0xd90   :  { %v11967_v26 = vpop.xlane.xlu1 %5129  ;;  %v11969_v45 = vpop.xlane.xlu0 %5113  ;;  %v5227_v24 = vsel %vm926_vm1, %v5198_v48, %v5226_v39 }
 0xd91   :  { %v5202_v0 = vrot.slane %v11967_v26, %v13129_v40  ;;  %v5170_v63 = vrot.slane %v11969_v45, %v13129_v40 }
 0xd93   :  { %v5228_v61 = vsel %vm928_vm2, %v5202_v0, %v5227_v24  ;;  %v5221_v35 = vsel %vm928_vm2, %v5170_v63, %v5220_v9 }
 0xd94   :  { %v11977_v29 = vpop.xlane.xlu1 %5133  ;;  %v11979_v27 = vpop.xlane.xlu0 %5117  ;;  %v5229_v16 = vsel %vm930_vm3, %v5206_v47, %v5228_v61  ;;  %v5222_v48 = vsel %vm930_vm3, %v5174_v49, %v5221_v35 }
 0xd95   :  { %v5210_v58 = vrot.slane %v11977_v29, %v13129_v40  ;;  %v5178_v13 = vrot.slane %v11979_v27, %v13129_v40 }
 0xd97   :  { %v5230_v10 = vsel %vm932_vm4, %v5210_v58, %v5229_v16  ;;  %v5223_v24 = vsel %vm932_vm4, %v5178_v13, %v5222_v48 }
 0xd98   :  { %v11994_v33 = vpop.xlane.xlu1 %5135  ;;  %v11996_v22 = vpop.xlane.xlu0 %5119 }
 0xd99   :  { %v5214_v19 = vrot.slane %v11994_v33, %v13129_v40  ;;  %v5182_v5 = vrot.slane %v11996_v22, %v13129_v40 }
 0xd9b   :  { %v5231_v25 = vsel %vm934_vm5, %v5214_v19, %v5230_v10  ;;  %v5224_v61 = vsel %vm934_vm5, %v5182_v5, %v5223_v24  ;;  %v10107_v19 = vld [vmem:[%s13018_s7] ss:$0 sm:$0xff] }
 0xd9c   :  { %v12013_v30 = vpop.xlane.xlu1 %5137 }
 0xd9d   :  { %v5218_v39 = vrot.slane %v12013_v30, %v13129_v40  ;;  %v12018_v0 = vpop.xlane.xlu0 %5121 }
 0xd9e   :  { %v5186_v63 = vrot.slane %v12018_v0, %v13129_v40 }
 0xd9f   :  { %v5232_v9 = vsel %vm936_vm6, %v5218_v39, %v5231_v25 }
 0xda0   :  { %v5238_v47 = vsel %vm947_vm7, %v5232_v9, -inf  ;;  %v5225_v12 = vsel %vm936_vm6, %v5186_v63, %v5224_v61 }
 0xda1   :  { %5239 = vmax.xlane.f32.xlu1 %v5238_v47  ;;  %v5235_v58 = vsel %vm947_vm7, %v5225_v12, -inf }
 0xda2   :  { %5236 = vmax.xlane.f32.xlu0 %v5235_v58 }
 0xdb3   :  { %v4694_v35 = vpop.f32.mrf.mxu0 }
 0xdb4   :  { %v12034_v13 = vadd.f32 %v10107_v19, %v4694_v35 }
 0xdb5   :  { %v9120_v49 = vpop.f32.mrf.mxu0 }
 0xdb7   :  { %v4697_v16 = vpop.f32.mrf.mxu0 }
 0xdb8   :  { %v12036_v39 = vadd.f32 %v10107_v19, %v4697_v16 }
 0xdb9   :  { %v9121_v5 = vpop.f32.mrf.mxu0 }
 0xdba   :  { %v8991_v10 = vpack.c.bf16 %v12036_v39, %v12034_v13 }
 0xdbc   :  { %8992 = vst [vmem:[#allocation13 + $0x10] sm:$0xff] %v8991_v10  }
 0xe2a   :  { %v5240_v12 = vpop.xlane.xlu1 %5239 }
 0xe2b   :  { %v12040_v48 = vpop.xlane.xlu0 %5236  ;;  %v5282_v24 = vrot.slane %v5240_v12, %v13109_v11  ;;  %v5286_v58 = vrot.slane %v5240_v12, %v13111_v50  ;;  %v5290_v10 = vrot.slane %v5240_v12, %v13110_v43 }
 0xe2c   :  { %v5246_v63 = vrot.slane %v12040_v48, %v10785_v6  ;;  %v5250_v25 = vrot.slane %v12040_v48, %v13109_v11  ;;  %v5254_v9 = vrot.slane %v12040_v48, %v13111_v50  ;;  %v5258_v49 = vrot.slane %v12040_v48, %v13110_v43 }
 0xe2d   :  { %v5332_v35 = vsub.f32 %v11955_v37, %v5282_v24  ;;  %v5333_v55 = vsub.f32 %v11959_v62, %v5286_v58  ;;  %v5266_v24 = vrot.slane %v12040_v48, %v13145_v57  ;;  %v5278_v58 = vrot.slane %v5240_v12, %v10785_v6 }
 0xe2e   :  { %v5323_v61 = vsub.f32 %v11951_v14, %v5246_v63  ;;  %v5324_v47 = vsub.f32 %v11953_v18, %v5250_v25  ;;  %v5325_v16 = vsub.f32 %v11957_v53, %v5254_v9  ;;  %v5262_v14 = vrot.slane %v12040_v48, %v13130_v56 }
 0xe2f   :  { %v5357_v1 = vmul.f32 1.442695, %v5332_v35  ;;  %v5326_v18 = vsub.f32 %v11969_v45, %v5258_v49  ;;  %v5294_v63 = vrot.slane %v5240_v12, %v13130_v56  ;;  %v5334_v25 = vsub.f32 %v11967_v26, %v5290_v10 }
 0xe30   :  { %v5339_v19 = vmul.f32 1.442695, %v5323_v61  ;;  %v5341_v5 = vmul.f32 1.442695, %v5324_v47  ;;  %v5343_v37 = vmul.f32 1.442695, %v5325_v16  ;;  %v5327_v62 = vsub.f32 %v11961_v54, %v5262_v14 }
 0xe31   :  { %v5359_v53 = vmul.f32 1.442695, %v5333_v55  ;;  %v5345_v9 = vmul.f32 1.442695, %v5326_v18  ;;  %v5298_v61 = vrot.slane %v5240_v12, %v13145_v57  ;;  %v5335_v47 = vsub.f32 %v11963_v28, %v5294_v63  ;;  %v13159_v55 = vld [vmem:[#allocation41_spill] sm:$0xff] }
 0xe32   :  { %9574 = vpow2.f32 %v5339_v19  ;;  %v5361_v45 = vmul.f32 1.442695, %v5334_v25  ;;  %v5328_v35 = vsub.f32 %v11979_v27, %v5266_v24  ;;  %v5302_v26 = vrot.slane %v5240_v12, %v13159_v55  ;;  %v13160_v27 = vld [vmem:[#allocation42_spill] sm:$0xff] }
 0xe33   :  { %9576 = vpow2.f32 %v5341_v5  ;;  %v5336_v49 = vsub.f32 %v11977_v29, %v5298_v61  ;;  %v5363_v54 = vmul.f32 1.442695, %v5335_v47  ;;  %v5331_v19 = vsub.f32 %v11965_v59, %v5278_v58 }
 0xe34   :  { %9578 = vpow2.f32 %v5357_v1  ;;  %v5347_v1 = vmul.f32 1.442695, %v5327_v62  ;;  %v5270_v28 = vrot.slane %v12040_v48, %v13159_v55  ;;  %v5349_v5 = vmul.f32 1.442695, %v5328_v35 }
 0xe35   :  { %9580 = vpow2.f32 %v5343_v37  ;;  %v5306_v14 = vrot.slane %v5240_v12, %v13160_v27  ;;  %v5337_v29 = vsub.f32 %v11994_v33, %v5302_v26  ;;  %v5365_v18 = vmul.f32 1.442695, %v5336_v49 }
 0xe36   :  { %9582 = vpow2.f32 %v5359_v53  ;;  %v5355_v59 = vmul.f32 1.442695, %v5331_v19  ;;  %v5274_v63 = vrot.slane %v12040_v48, %v13160_v27  ;;  %v5329_v25 = vsub.f32 %v11996_v22, %v5270_v28 }
 0xe37   :  { %9584 = vpow2.f32 %v5345_v9  ;;  %v5338_v12 = vsub.f32 %v12013_v30, %v5306_v14  ;;  %v5367_v33 = vmul.f32 1.442695, %v5337_v29 }
 0xe38   :  { %9586 = vpow2.f32 %v5361_v45  ;;  %v5330_v62 = vsub.f32 %v12018_v0, %v5274_v63  ;;  %v5351_v9 = vmul.f32 1.442695, %v5329_v25 }
 0xe39   :  { %9588 = vpow2.f32 %v5347_v1  ;;  %v5369_v22 = vmul.f32 1.442695, %v5338_v12 }
 0xe3a   :  { %9590 = vpow2.f32 %v5363_v54  ;;  %v5353_v30 = vmul.f32 1.442695, %v5330_v62 }
 0xe3b   :  { %9592 = vpow2.f32 %v5349_v5 }
 0xe3c   :  { %9594 = vpow2.f32 %v5365_v18 }
 0xe3d   :  { %9596 = vpow2.f32 %v5355_v59 }
 0xe3e   :  { %9598 = vpow2.f32 %v5367_v33 }
 0xe3f   :  { %v12072_v16 = vpop.eup %9574  ;;  %9600 = vpow2.f32 %v5351_v9 }
 0xe40   :  { %v12077_v10 = vpop.eup %9576  ;;  %5388 = vperm.xlu0 %9199, %v12072_v16   ;;  %9602 = vpow2.f32 %v5369_v22 }
 0xe41   :  { %5391 = vperm.xlu1 %9200, %v12077_v10   ;;  %v12083_v37 = vpop.eup %9578  ;;  %9604 = vpow2.f32 %v5353_v30 }
 0xe42   :  { %v12088_v53 = vpop.eup %9580 }
 0xe43   :  { %v12093_v24 = vpop.eup %9582 }
 0xe44   :  { %5415 = vperm.xlu0 %9199, %v12083_v37   ;;  %v12096_v48 = vpop.eup %9584 }
 0xe45   :  { %5394 = vperm.xlu1 %9200, %v12088_v53   ;;  %v12100_v61 = vpop.eup %9586 }
 0xe46   :  { %v12102_v47 = vpop.eup %9588 }
 0xe47   :  { %v12106_v0 = vpop.eup %9590 }
 0xe48   :  { %5418 = vperm.xlu0 %9199, %v12093_v24   ;;  %v12108_v45 = vpop.eup %9592 }
 0xe49   :  { %5397 = vperm.xlu1 %9200, %v12096_v48   ;;  %v12112_v58 = vpop.eup %9594 }
 0xe4a   :  { %v12114_v35 = vpop.eup %9596 }
 0xe4b   :  { %v12118_v1 = vpop.eup %9598 }
 0xe4c   :  { %5421 = vperm.xlu0 %9199, %v12100_v61   ;;  %v12120_v26 = vpop.eup %9600 }
 0xe4d   :  { %5400 = vperm.xlu1 %9200, %v12102_v47   ;;  %v12124_v49 = vpop.eup %9602 }
 0xe4e   :  { %v12126_v54 = vpop.eup %9604 }
 0xe50   :  { %5424 = vperm.xlu0 %9199, %v12106_v0  }
 0xe51   :  { %5403 = vperm.xlu1 %9200, %v12108_v45  }
 0xe54   :  { %5427 = vperm.xlu0 %9199, %v12112_v58  }
 0xe55   :  { %5412 = vperm.xlu1 %9200, %v12114_v35  }
 0xe58   :  { %5430 = vperm.xlu0 %9199, %v12118_v1  }
 0xe59   :  { %5406 = vperm.xlu1 %9200, %v12120_v26  }
 0xe5c   :  { %5433 = vperm.xlu0 %9199, %v12124_v49  }
 0xe5d   :  { %5409 = vperm.xlu1 %9200, %v12126_v54  }
 0xe7b   :  { %4714 = vmax.xlane.f32.xlu0 %v12036_v39 }
 0xe81   :  { %4712 = vmax.xlane.f32.xlu1 %v12034_v13 }
 0xebb   :  { %v5389_v19 = vpop.permute.xlu0 %5388 }
 0xebc   :  { %v5392_v28 = vpop.permute.xlu1 %5391  ;;  %v5438_v9 = vrot.slane %v5389_v19, %v13129_v40 }
 0xebd   :  { %v5442_v62 = vrot.slane %v5392_v28, %v13129_v40 }
 0xebf   :  { %v5416_v5 = vpop.permute.xlu0 %5415  ;;  %v5499_v28 = vsel %vm924_vm0, %v5442_v62, %v5438_v9 }
 0xec0   :  { %v5395_v14 = vpop.permute.xlu1 %5394  ;;  %v5474_v30 = vrot.slane %v5416_v5, %v13129_v40 }
 0xec1   :  { %v5446_v23 = vrot.slane %v5395_v14, %v13129_v40 }
 0xec3   :  { %v5419_v29 = vpop.permute.xlu0 %5418 }
 0xec4   :  { %v5398_v18 = vpop.permute.xlu1 %5397  ;;  %v5478_v41 = vrot.slane %v5419_v29, %v13129_v40 }
 0xec5   :  { %v5450_v34 = vrot.slane %v5398_v18, %v13129_v40 }
 0xec7   :  { %v5422_v59 = vpop.permute.xlu0 %5421 }
 0xec8   :  { %v5401_v63 = vpop.permute.xlu1 %5400  ;;  %v5482_v31 = vrot.slane %v5422_v59, %v13129_v40 }
 0xec9   :  { %v5454_v19 = vrot.slane %v5401_v63, %v13129_v40 }
 0xecb   :  { %v5425_v25 = vpop.permute.xlu0 %5424 }
 0xecc   :  { %v5404_v12 = vpop.permute.xlu1 %5403  ;;  %v5486_v44 = vrot.slane %v5425_v25, %v13129_v40 }
 0xecd   :  { %v5458_v14 = vrot.slane %v5404_v12, %v13129_v40 }
 0xecf   :  { %v5428_v33 = vpop.permute.xlu0 %5427 }
 0xed0   :  { %v5413_v22 = vpop.permute.xlu1 %5412  ;;  %v5490_v18 = vrot.slane %v5428_v33, %v13129_v40 }
 0xed1   :  { %v5470_v42 = vrot.slane %v5413_v22, %v13129_v40 }
 0xed3   :  { %v5506_v20 = vsel %vm924_vm0, %v5474_v30, %v5470_v42  ;;  %v5431_v8 = vpop.permute.xlu0 %5430  ;;  %v5500_v42 = vsel %vm926_vm1, %v5446_v23, %v5499_v28 }
 0xed4   :  { %v5507_v5 = vsel %vm926_vm1, %v5478_v41, %v5506_v20  ;;  %v5407_v22 = vpop.permute.xlu1 %5406  ;;  %v5494_v59 = vrot.slane %v5431_v8, %v13129_v40  ;;  %v5501_v63 = vsel %vm928_vm2, %v5450_v34, %v5500_v42 }
 0xed5   :  { %v5508_v29 = vsel %vm928_vm2, %v5482_v31, %v5507_v5  ;;  %v5462_v62 = vrot.slane %v5407_v22, %v13129_v40  ;;  %v5502_v41 = vsel %vm930_vm3, %v5454_v19, %v5501_v63 }
 0xed6   :  { %v5509_v30 = vsel %vm930_vm3, %v5486_v44, %v5508_v29  ;;  %v5503_v33 = vsel %vm932_vm4, %v5458_v14, %v5502_v41 }
 0xed7   :  { %v5510_v25 = vsel %vm932_vm4, %v5490_v18, %v5509_v30  ;;  %v5434_v20 = vpop.permute.xlu0 %5433  ;;  %v5504_v9 = vsel %vm934_vm5, %v5462_v62, %v5503_v33 }
 0xed8   :  { %v5410_v12 = vpop.permute.xlu1 %5409  ;;  %v5498_v31 = vrot.slane %v5434_v20, %v13129_v40  ;;  %v5511_v23 = vsel %vm934_vm5, %v5494_v59, %v5510_v25 }
 0xed9   :  { %v5466_v8 = vrot.slane %v5410_v12, %v13129_v40 }
 0xeda   :  { %v5512_v44 = vsel %vm936_vm6, %v5498_v31, %v5511_v23 }
 0xedb   :  { %v5518_v34 = vsel %vm947_vm7, %v5512_v44, 0.0  ;;  %v5505_v28 = vsel %vm936_vm6, %v5466_v8, %v5504_v9 }
 0xedc   :  { %5519 = vadd.xlane.f32.xlu1 %v5518_v34  ;;  %v5515_v19 = vsel %vm947_vm7, %v5505_v28, 0.0 }
 0xedd   :  { %5516 = vadd.xlane.f32.xlu0 %v5515_v19 }
 0xf04   :  { %v4715_v5 = vpop.xlane.xlu0 %4714 }
 0xf05   :  { %v4717_v22 = vsub.f32 %v12036_v39, %v4715_v5 }
 0xf07   :  { %v4720_v14 = vmul.f32 1.442695, %v4717_v22 }
 0xf09   :  { %9606 = vpow2.f32 %v4720_v14 }
 0xf0a   :  { %v4713_v29 = vpop.xlane.xlu1 %4712 }
 0xf0b   :  { %v4716_v18 = vsub.f32 %v12034_v13, %v4713_v29 }
 0xf0d   :  { %v4718_v59 = vmul.f32 1.442695, %v4716_v18 }
 0xf0f   :  { %9608 = vpow2.f32 %v4718_v59 }
 0xf16   :  { %v12166_v42 = vpop.eup %9606 }
 0xf17   :  { %4724 = vadd.xlane.f32.xlu1 %v12166_v42 }
 0xf1c   :  { %v9609_v30 = vpop.eup %9608 }
 0xf1d   :  { %4722 = vadd.xlane.f32.xlu0 %v9609_v30 }
 0xf65   :  { %v5520_v62 = vpop.xlane.xlu1 %5519 }
 0xf66   :  { %9610 = vrcp.f32 %v5520_v62  ;;  %v5517_v63 = vpop.xlane.xlu0 %5516 }
 0xf67   :  { %9612 = vrcp.f32 %v5517_v63 }
 0xf73   :  { %v9611_v25 = vpop.eup %9610 }
 0xf74   :  { %v9613_v20 = vpop.eup %9612  ;;  %v5564_v33 = vrot.slane %v9611_v25, %v13109_v11  ;;  %v5568_v9 = vrot.slane %v9611_v25, %v13111_v50  ;;  %v5572_v28 = vrot.slane %v9611_v25, %v13110_v43  ;;  %v5576_v5 = vrot.slane %v9611_v25, %v13130_v56 }
 0xf75   :  { %v5532_v39 = vrot.slane %v9613_v20, %v13109_v11  ;;  %v5528_v41 = vrot.slane %v9613_v20, %v10785_v6  ;;  %v5536_v31 = vrot.slane %v9613_v20, %v13111_v50  ;;  %v5540_v44 = vrot.slane %v9613_v20, %v13110_v43 }
 0xf76   :  { %v5614_v23 = vmul.f32 %v12083_v37, %v5564_v33  ;;  %v5544_v34 = vrot.slane %v9613_v20, %v13130_v56  ;;  %v5616_v37 = vmul.f32 %v12100_v61, %v5572_v28  ;;  %v5548_v19 = vrot.slane %v9613_v20, %v13145_v57  ;;  %v10115_v33 = vld [vmem:[#allocation7 + $0xac] ss:$16 sps:$4 sm:$0xff]  }
 0xf77   :  { %v5606_v13 = vmul.f32 %v12077_v10, %v5532_v39  ;;  %v5605_v12 = vmul.f32 %v12072_v16, %v5528_v41  ;;  %v5607_v8 = vmul.f32 %v12088_v53, %v5536_v31  ;;  %v5608_v10 = vmul.f32 %v12096_v48, %v5540_v44  ;;  %v10112_v31 = vld [vmem:[#allocation7 + $0xc0] ss:$16 sps:$4 sm:$0xff]   ;;  %v10118_v44 = vld [vmem:[#allocation7 + $0x84] ss:$16 sps:$4 sm:$0xff]   ;;  %v10123_v28 = vld [vmem:[#allocation7 + $0x6c] ss:$16 sps:$4 sm:$0xff]  }
 0xf78   :  { %v5615_v16 = vmul.f32 %v12093_v24, %v5568_v9  ;;  %v5609_v53 = vmul.f32 %v12102_v47, %v5544_v34  ;;  %v5610_v48 = vmul.f32 %v12108_v45, %v5548_v19  ;;  %v5617_v24 = vmul.f32 %v12106_v0, %v5576_v5  ;;  %v10119_v9 = vld [vmem:[#allocation7 + $0x8c] ss:$16 sps:$4 sm:$0xff]   ;;  %v10122_v34 = vld [vmem:[#allocation7 + $0x64] ss:$16 sps:$4 sm:$0xff]  }
 0xf79   :  { %5628 = vperm.xlu1 %9200, %v5606_v13   ;;  %5623 = vperm.xlu0 %9199, %v5605_v12   ;;  %v5560_v22 = vrot.slane %v9611_v25, %v10785_v6  ;;  %v5580_v14 = vrot.slane %v9611_v25, %v13145_v57  ;;  %v5552_v29 = vrot.slane %v9613_v20, %v13159_v55  ;;  %v10109_v12 = vld [vmem:[#allocation7 + $0xe8] ss:$16 sps:$4 sm:$0xff]   ;;  %v10126_v19 = vld [vmem:[#allocation7 + $0x44] ss:$16 sps:$4 sm:$0xff]   ;;  %v10127_v5 = vld [vmem:[#allocation7 + $0x4c] ss:$16 sps:$4 sm:$0xff]  }
 0xf7a   :  { %v5584_v18 = vrot.slane %v9611_v25, %v13159_v55  ;;  %v5556_v59 = vrot.slane %v9613_v20, %v13160_v27  ;;  %v5588_v62 = vrot.slane %v9611_v25, %v13160_v27  ;;  %v10108_v25 = vld [vmem:[#allocation7 + $0xe0] ss:$16 sps:$4 sm:$0xff]  }
 0xf7b   :  { %v5613_v47 = vmul.f32 %v12114_v35, %v5560_v22  ;;  %v5618_v61 = vmul.f32 %v12112_v58, %v5580_v14  ;;  %v5611_v45 = vmul.f32 %v12120_v26, %v5552_v29  ;;  %v10130_v22 = vld [vmem:[#allocation7 + $0x24] ss:$16 sps:$4 sm:$0xff]   ;;  %v10131_v14 = vld [vmem:[#allocation7 + $0x2c] ss:$16 sps:$4 sm:$0xff]  }
 0xf7c   :  { %v5619_v0 = vmul.f32 %v12118_v1, %v5584_v18  ;;  %v5612_v35 = vmul.f32 %v12126_v54, %v5556_v59  ;;  %v5620_v58 = vmul.f32 %v12124_v49, %v5588_v62  ;;  %v10110_v54 = vld [vmem:[#allocation7 + $0xc4] ss:$16 sps:$4 sm:$0xff]   ;;  %v10111_v49 = vld [vmem:[#allocation7 + $0xcc] ss:$16 sps:$4 sm:$0xff]  }
 0xf7d   :  { %5633 = vperm.xlu1 %9200, %v5607_v8   ;;  %5668 = vperm.xlu0 %9199, %v5614_v23   ;;  %v10116_v8 = vld [vmem:[#allocation7 + $0xa0] ss:$16 sps:$4 sm:$0xff]   ;;  %v10117_v23 = vld [vmem:[#allocation7 + $0xa8] ss:$16 sps:$4 sm:$0xff]   ;;  %v10134_v29 = vld [vmem:[#allocation7 + $0x4] ss:$16 sps:$4 sm:$0xff]  }
 0xf7e   :  { %v10135_v18 = vld [vmem:[#allocation7 + $0xc] ss:$16 sps:$4 sm:$0xff]   ;;  %v10138_v59 = vld [vmem:[#allocation10 + $0xe4] ss:$16 sps:$4 sm:$0xff]  }
 0xf81   :  { %5638 = vperm.xlu1 %9200, %v5608_v10   ;;  %5673 = vperm.xlu0 %9199, %v5615_v16   ;;  %v10120_v10 = vld [vmem:[#allocation7 + $0x80] ss:$16 sps:$4 sm:$0xff]   ;;  %v10121_v16 = vld [vmem:[#allocation7 + $0x88] ss:$16 sps:$4 sm:$0xff]  }
 0xf85   :  { %5643 = vperm.xlu1 %9200, %v5609_v53   ;;  %5678 = vperm.xlu0 %9199, %v5616_v37   ;;  %v10124_v53 = vld [vmem:[#allocation7 + $0x60] ss:$16 sps:$4 sm:$0xff]   ;;  %v10125_v37 = vld [vmem:[#allocation7 + $0x68] ss:$16 sps:$4 sm:$0xff]  }
 0xf89   :  { %5648 = vperm.xlu1 %9200, %v5610_v48   ;;  %5683 = vperm.xlu0 %9199, %v5617_v24   ;;  %v10128_v48 = vld [vmem:[#allocation7 + $0x40] ss:$16 sps:$4 sm:$0xff]   ;;  %v10129_v24 = vld [vmem:[#allocation7 + $0x48] ss:$16 sps:$4 sm:$0xff]  }
 0xf8d   :  { %5663 = vperm.xlu1 %9200, %v5613_v47   ;;  %5688 = vperm.xlu0 %9199, %v5618_v61   ;;  %v10132_v47 = vld [vmem:[#allocation7 + $0x20] ss:$16 sps:$4 sm:$0xff]   ;;  %v10133_v61 = vld [vmem:[#allocation7 + $0x28] ss:$16 sps:$4 sm:$0xff]  }
 0xf91   :  { %5653 = vperm.xlu1 %9200, %v5611_v45   ;;  %5693 = vperm.xlu0 %9199, %v5619_v0   ;;  %v10136_v45 = vld [vmem:[#allocation7] ss:$16 sps:$4 sm:$0xff]   ;;  %v10137_v0 = vld [vmem:[#allocation7 + $0x8] ss:$16 sps:$4 sm:$0xff]  }
 0xf95   :  { %5658 = vperm.xlu1 %9200, %v5612_v35   ;;  %5698 = vperm.xlu0 %9199, %v5620_v58   ;;  %v10139_v58 = vld [vmem:[#allocation2 + $0x8] sm:$0xff] }
 0xfa0   :  { %v4725_v63 = vpop.xlane.xlu1 %4724 }
 0xfa1   :  { %9614 = vrcp.f32 %v4725_v63 }
 0xfa6   :  { %v4723_v39 = vpop.xlane.xlu0 %4722 }
 0xfa7   :  { %9616 = vrcp.f32 %v4723_v39  ;;  %v10140_v39 = vld [vmem:[#allocation2] sm:$0xff] }
 0xfae   :  { %v9615_v41 = vpop.eup %9614 }
 0xfaf   :  { %v4729_v1 = vmul.f32 %v9615_v41, %v12166_v42  ;;  %v10114_v42 = vld [vmem:[#allocation7 + $0xa4] ss:$16 sps:$4 sm:$0xff]  }
 0xfb4   :  { %v9617_v26 = vpop.eup %9616 }
 0xfb5   :  { %v4727_v13 = vmul.f32 %v9617_v26, %v9609_v30  ;;  %v10113_v30 = vld [vmem:[#allocation7 + $0xc8] ss:$16 sps:$4 sm:$0xff]  }
 0xfb7   :  { %v4730_v20 = vpack.c.bf16 %v4729_v1, %v4727_v13 }
 0xfb9   :  { %4850 = vmatmul.mubr.bf16.vlgmr.msra.gmra.mxu1 %v4730_v20  ;;  %4893 = vmatmul.mubr.bf16.vlgmr.msra.gmra.mxu0 %v4730_v20 }
 0xfba   :  { %5878 = vmatpush1.bf16.msra.mxu1 %v10108_v25  ;;  %5921 = vmatpush1.bf16.msra.mxu0 %v10109_v12 }
 0xfbb   :  { %5879 = vmatprep.subr.bf16.mxu1 %v10110_v54  ;;  %5922 = vmatprep.subr.bf16.mxu0 %v10111_v49  ;;  %v10141_v54 = vld [vmem:[#allocation2 + $0x10] sm:$0xff] }
 0xfbc   :  { %5909 = vmatprep.mubr.bf16.mxu1 %v13108_v38  ;;  %5952 = vmatprep.mubr.bf16.mxu0 %v13108_v38 }
 0xfbe   :  { %5880 = vmatpush1.bf16.msra.mxu1 %v10112_v31  ;;  %5923 = vmatpush1.bf16.msra.mxu0 %v10113_v30  ;;  %v10142_v31 = vld [vmem:[#allocation2 + $0x48] sm:$0xff] }
 0xfbf   :  { %5881 = vmatprep.subr.bf16.mxu1 %v10114_v42  ;;  %5924 = vmatprep.subr.bf16.mxu0 %v10115_v33 }
 0xfc2   :  { %5882 = vmatpush1.bf16.msra.mxu1 %v10116_v8  ;;  %5925 = vmatpush1.bf16.msra.mxu0 %v10117_v23 }
 0xfc3   :  { %5883 = vmatprep.subr.bf16.mxu1 %v10118_v44  ;;  %5926 = vmatprep.subr.bf16.mxu0 %v10119_v9 }
 0xfc6   :  { %5884 = vmatpush1.bf16.msra.mxu1 %v10120_v10  ;;  %5927 = vmatpush1.bf16.msra.mxu0 %v10121_v16 }
 0xfc7   :  { %5885 = vmatprep.subr.bf16.mxu1 %v10122_v34  ;;  %5928 = vmatprep.subr.bf16.mxu0 %v10123_v28 }
 0xfca   :  { %5886 = vmatpush1.bf16.msra.mxu1 %v10124_v53  ;;  %5929 = vmatpush1.bf16.msra.mxu0 %v10125_v37  ;;  %v10143_v53 = vld [vmem:[#allocation2 + $0x18] sm:$0xff] }
 0xfcb   :  { %5887 = vmatprep.subr.bf16.mxu1 %v10126_v19  ;;  %5930 = vmatprep.subr.bf16.mxu0 %v10127_v5  ;;  %v10144_v19 = vld [vmem:[#allocation2 + $0x50] sm:$0xff] }
 0xfce   :  { %5888 = vmatpush1.bf16.msra.mxu1 %v10128_v48  ;;  %5931 = vmatpush1.bf16.msra.mxu0 %v10129_v24 }
 0xfcf   :  { %5889 = vmatprep.subr.bf16.mxu1 %v10130_v22  ;;  %5932 = vmatprep.subr.bf16.mxu0 %v10131_v14 }
 0xfd2   :  { %5890 = vmatpush1.bf16.msra.mxu1 %v10132_v47  ;;  %5933 = vmatpush1.bf16.msra.mxu0 %v10133_v61 }
 0xfd3   :  { %5891 = vmatprep.subr.bf16.mxu1 %v10134_v29  ;;  %5934 = vmatprep.subr.bf16.mxu0 %v10135_v18 }
 0xfd6   :  { %5892 = vmatpush1.bf16.msra.mxu1 %v10136_v45  ;;  %5935 = vmatpush1.bf16.msra.mxu0 %v10137_v0 }
 0xfd7   :  { %9122 = vmatprep.subr.bf16.mxu1 %v13134_v7  ;;  %6091 = vmatprep.subr.bf16.mxu0 %v10138_v59 }
 0xff4   :  { %v5629_v62 = vpop.permute.xlu1 %5628  ;;  %v5624_v35 = vpop.permute.xlu0 %5623 }
 0xff5   :  { %v5702_v63 = vmul.f32 %v10139_v58, %v5629_v62  ;;  %v5701_v41 = vmul.f32 %v10140_v39, %v5624_v35  ;;  %v10145_v62 = vld [vmem:[#allocation2 + $0x20] sm:$0xff]  ;;  %v10146_v58 = vld [vmem:[#allocation2 + $0x58] sm:$0xff] }
 0xff7   :  { %v5723_v26 = vrot.slane %v5702_v63, 4  ;;  %v5717_v13 = vrot.slane %v5701_v41, 4 }
 0xff8   :  { %v5634_v1 = vpop.permute.xlu1 %5633  ;;  %v5669_v20 = vpop.permute.xlu0 %5668 }
 0xff9   :  { %v5724_v25 = vadd.f32 %v5723_v26, %v5702_v63  ;;  %v5718_v12 = vadd.f32 %v5717_v13, %v5701_v41  ;;  %v5703_v49 = vmul.f32 %v10141_v54, %v5634_v1  ;;  %v5710_v30 = vmul.f32 %v10142_v31, %v5669_v20 }
 0xffb   :  { %v5725_v42 = vrot.slane %v5724_v25, 2  ;;  %v5719_v33 = vrot.slane %v5718_v12, 2  ;;  %v5729_v8 = vrot.slane %v5703_v49, 4  ;;  %v5771_v23 = vrot.slane %v5710_v30, 4 }
 0xffc   :  { %v5639_v44 = vpop.permute.xlu1 %5638  ;;  %v5674_v9 = vpop.permute.xlu0 %5673 }
 0xffd   :  { %v5726_v10 = vadd.f32 %v5725_v42, %v5724_v25  ;;  %v5720_v16 = vadd.f32 %v5719_v33, %v5718_v12  ;;  %v5730_v34 = vadd.f32 %v5729_v8, %v5703_v49  ;;  %v5772_v28 = vadd.f32 %v5771_v23, %v5710_v30  ;;  %v10147_v33 = vld [vmem:[#allocation2 + $0x28] sm:$0xff] }
 0xffe   :  { %v5704_v37 = vmul.f32 %v10143_v53, %v5639_v44  ;;  %v5711_v5 = vmul.f32 %v10144_v19, %v5674_v9 }
 0xfff   :  { %v5731_v48 = vrot.slane %v5730_v34, 2  ;;  %v5773_v24 = vrot.slane %v5772_v28, 2  ;;  %v5727_v29 = vrot.slane %v5726_v10, 1  ;;  %v5721_v18 = vrot.slane %v5720_v16, 1 }
0x1000   :  { %v5735_v22 = vrot.slane %v5704_v37, 4  ;;  %v5777_v14 = vrot.slane %v5711_v5, 4  ;;  %v5644_v47 = vpop.permute.xlu1 %5643  ;;  %v5679_v61 = vpop.permute.xlu0 %5678 }
0x1001   :  { %v5774_v45 = vadd.f32 %v5773_v24, %v5772_v28  ;;  %v5705_v35 = vmul.f32 %v10145_v62, %v5644_v47  ;;  %v5712_v63 = vmul.f32 %v10146_v58, %v5679_v61  ;;  %v5732_v39 = vadd.f32 %v5731_v48, %v5730_v34  ;;  %v10149_v47 = vld [vmem:[#allocation2 + $0x40] sm:$0xff] }
0x1002   :  { %v5736_v0 = vadd.f32 %v5735_v22, %v5704_v37  ;;  %v5778_v59 = vadd.f32 %v5777_v14, %v5711_v5  ;;  %v5728_v12 = vadd.f32 %v5727_v29, %v5726_v10  ;;  %v5722_v54 = vadd.f32 %v5721_v18, %v5720_v16  ;;  %v10148_v37 = vld [vmem:[#allocation2 + $0x60] sm:$0xff] }
0x1003   :  { %v5741_v13 = vrot.slane %v5705_v35, 4  ;;  %v5783_v1 = vrot.slane %v5712_v63, 4  ;;  %v5775_v49 = vrot.slane %v5774_v45, 1  ;;  %v5733_v23 = vrot.slane %v5732_v39, 1 }
0x1004   :  { %v5737_v41 = vrot.slane %v5736_v0, 2  ;;  %v5779_v26 = vrot.slane %v5778_v59, 2  ;;  %v5649_v20 = vpop.permute.xlu1 %5648  ;;  %v5684_v25 = vpop.permute.xlu0 %5683  ;;  %v5814_v5 = vpack.c.bf16 %v5728_v12, %v5728_v12  ;;  %v5813_v48 = vpack.c.bf16 %v5722_v54, %v5722_v54 }
0x1005   :  { %v5784_v30 = vadd.f32 %v5783_v1, %v5712_v63  ;;  %v5742_v42 = vadd.f32 %v5741_v13, %v5705_v35  ;;  %v5706_v8 = vmul.f32 %v10147_v33, %v5649_v20  ;;  %v5713_v19 = vmul.f32 %v10148_v37, %v5684_v25  ;;  %v10150_v63 = vld [vmem:[#allocation2 + $0x68] sm:$0xff] }
0x1006   :  { %v5738_v31 = vadd.f32 %v5737_v41, %v5736_v0  ;;  %v5780_v44 = vadd.f32 %v5779_v26, %v5778_v59  ;;  %v5776_v24 = vadd.f32 %v5775_v49, %v5774_v45  ;;  %v12205_v29 = vadd.f32 %v5733_v23, %v5732_v39 }
0x1007   :  { %v5785_v9 = vrot.slane %v5784_v30, 2  ;;  %v5747_v34 = vrot.slane %v5706_v8, 4  ;;  %v5743_v10 = vrot.slane %v5742_v42, 2  ;;  %v5789_v14 = vrot.slane %v5713_v19, 4 }
0x1008   :  { %v5664_v28 = vpop.permute.xlu1 %5663  ;;  %v5689_v53 = vpop.permute.xlu0 %5688  ;;  %v5739_v22 = vrot.slane %v5738_v31, 1  ;;  %v5781_v18 = vrot.slane %v5780_v44, 1  ;;  %v12207_v13 = vunpack.c.l.b16 %v5814_v5  ;;  %v12209_v45 = vunpack.c.l.b16 %v5813_v48  ;;  %v10152_v5 = vld [vmem:[#allocation2 + $0x70] sm:$0xff] }
0x1009   :  { %v5748_v16 = vadd.f32 %v5747_v34, %v5706_v8  ;;  %v5709_v61 = vmul.f32 %v10149_v47, %v5664_v28  ;;  %v5786_v0 = vadd.f32 %v5785_v9, %v5784_v30  ;;  %v5790_v35 = vadd.f32 %v5789_v14, %v5713_v19  ;;  %v10151_v8 = vld [vmem:[#allocation2 + $0x30] sm:$0xff] }
0x100a   :  { %v5714_v41 = vmul.f32 %v10150_v63, %v5689_v53  ;;  %v5822_v1 = vpack.c.bf16 %v5776_v24, %v5776_v24  ;;  %v12211_v20 = vadd.f32 %v5739_v22, %v5738_v31  ;;  %v5744_v25 = vadd.f32 %v5743_v10, %v5742_v42 }
0x100b   :  { %v5749_v62 = vrot.slane %v5748_v16, 2  ;;  %v5765_v58 = vrot.slane %v5709_v61, 4  ;;  %v5791_v12 = vrot.slane %v5790_v35, 2  ;;  %v5815_v49 = vpack.c.bf16 %v12205_v29, %v12205_v29 }
0x100c   :  { %v5654_v59 = vpop.permute.xlu1 %5653  ;;  %v5694_v26 = vpop.permute.xlu0 %5693  ;;  %v5795_v54 = vrot.slane %v5714_v41, 4  ;;  %v5782_v30 = vadd.f32 %v5781_v18, %v5780_v44  ;;  %v5787_v33 = vrot.slane %v5786_v0, 1  ;;  %v5854_v19 = vunpack.c.l.b16 %v5822_v1 }
0x100d   :  { %v5766_v39 = vadd.f32 %v5765_v58, %v5709_v61  ;;  %v5707_v23 = vmul.f32 %v10151_v8, %v5654_v59  ;;  %v5750_v9 = vadd.f32 %v5749_v62, %v5748_v16  ;;  %v5792_v28 = vadd.f32 %v5791_v12, %v5790_v35  ;;  %v10153_v16 = vld [vmem:[#allocation2 + $0x38] sm:$0xff] }
0x100e   :  { %v5796_v34 = vadd.f32 %v5795_v54, %v5714_v41  ;;  %v5816_v31 = vpack.c.bf16 %v12211_v20, %v12211_v20  ;;  %v5715_v48 = vmul.f32 %v10152_v5, %v5694_v26  ;;  %v5745_v24 = vrot.slane %v5744_v25, 1  ;;  %v10154_v20 = vld [vmem:[#allocation2 + $0x78] sm:$0xff] }
0x100f   :  { %v5767_v53 = vrot.slane %v5766_v39, 2  ;;  %v5753_v42 = vrot.slane %v5707_v23, 4  ;;  %v5793_v22 = vrot.slane %v5792_v28, 1  ;;  %v5823_v47 = vpack.c.bf16 %v5782_v30, %v5782_v30 }
0x1010   :  { %v5659_v37 = vpop.permute.xlu1 %5658  ;;  %v5797_v14 = vrot.slane %v5796_v34, 2  ;;  %v5699_v44 = vpop.permute.xlu0 %5698  ;;  %v5801_v29 = vrot.slane %v5715_v48, 4  ;;  %v5788_v59 = vadd.f32 %v5787_v33, %v5786_v0  ;;  %v5751_v62 = vrot.slane %v5750_v9, 1 }
0x1011   :  { %v5768_v10 = vadd.f32 %v5767_v53, %v5766_v39  ;;  %v5754_v61 = vadd.f32 %v5753_v42, %v5707_v23  ;;  %v5708_v18 = vmul.f32 %v10153_v16, %v5659_v37  ;;  %v5716_v12 = vmul.f32 %v10154_v20, %v5699_v44 }
0x1012   :  { %v5798_v58 = vadd.f32 %v5797_v14, %v5796_v34  ;;  %v5802_v41 = vadd.f32 %v5801_v29, %v5715_v48  ;;  %v5746_v26 = vadd.f32 %v5745_v24, %v5744_v25  ;;  %v5794_v54 = vadd.f32 %v5793_v22, %v5792_v28 }
0x1013   :  { %v5769_v35 = vrot.slane %v5768_v10, 1  ;;  %v5755_v63 = vrot.slane %v5754_v61, 2  ;;  %v5759_v1 = vrot.slane %v5708_v18, 4  ;;  %v5807_v23 = vrot.slane %v5716_v12, 4 }
0x1014   :  { %v5799_v39 = vrot.slane %v5798_v58, 1  ;;  %v5803_v5 = vrot.slane %v5802_v41, 2  ;;  %v5855_v42 = vunpack.c.l.b16 %v5823_v47  ;;  %v5824_v27 = vpack.c.bf16 %v5788_v59, %v5788_v59 }
0x1015   :  { %v5770_v8 = vadd.f32 %v5769_v35, %v5768_v10  ;;  %v5756_v53 = vadd.f32 %v5755_v63, %v5754_v61  ;;  %v5760_v30 = vadd.f32 %v5759_v1, %v5708_v18  ;;  %v5752_v37 = vadd.f32 %v5751_v62, %v5750_v9 }
0x1016   :  { %v5804_v16 = vadd.f32 %v5803_v5, %v5802_v41  ;;  %v5808_v14 = vadd.f32 %v5807_v23, %v5716_v12  ;;  %v5817_v48 = vpack.c.bf16 %v5746_v26, %v5746_v26  ;;  %v5825_v29 = vpack.c.bf16 %v5794_v54, %v5794_v54 }
0x1017   :  { %v5821_v0 = vpack.c.bf16 %v5770_v8, %v5770_v8  ;;  %v5757_v33 = vrot.slane %v5756_v53, 1  ;;  %v5761_v34 = vrot.slane %v5760_v30, 2  ;;  %v5800_v44 = vadd.f32 %v5799_v39, %v5798_v58 }
0x1018   :  { %v5805_v28 = vrot.slane %v5804_v16, 1  ;;  %v5809_v22 = vrot.slane %v5808_v14, 2  ;;  %v5847_v10 = vunpack.c.l.b16 %v5815_v49  ;;  %v5856_v61 = vunpack.c.l.b16 %v5824_v27 }
0x1019   :  { %v5853_v55 = vunpack.c.l.b16 %v5821_v0  ;;  %v5758_v25 = vadd.f32 %v5757_v33, %v5756_v53  ;;  %v5762_v24 = vadd.f32 %v5761_v34, %v5760_v30  ;;  %v5818_v18 = vpack.c.bf16 %v5752_v37, %v5752_v37 }
0x101a   :  { %v5806_v62 = vadd.f32 %v5805_v28, %v5804_v16  ;;  %v5848_v63 = vunpack.c.l.b16 %v5816_v31  ;;  %v5826_v41 = vpack.c.bf16 %v5800_v44, %v5800_v44  ;;  %v5810_v1 = vadd.f32 %v5809_v22, %v5808_v14  ;;  %v10155_v44 = vld [vmem:[#allocation11 + $0x38] sm:$0xff]   ;;  %v10157_v28 = vld [vmem:[#allocation10 + $0xc4] ss:$16 sps:$4 sm:$0xff]   ;;  %v10159_v22 = vld [vmem:[#allocation10 + $0xc0] ss:$16 sps:$4 sm:$0xff]  }
0x101b   :  { %v5868_v47 = vsel %vm924_vm0, %v5854_v19, %v5853_v55  ;;  %v5819_v59 = vpack.c.bf16 %v5758_v25, %v5758_v25  ;;  %v5763_v35 = vrot.slane %v5762_v24, 1  ;;  %v5849_v58 = vunpack.c.l.b16 %v5817_v48  ;;  %v10156_v25 = vld [vmem:[#allocation10 + $0xe0] ss:$16 sps:$4 sm:$0xff]  }
0x101c   :  { %v5869_v9 = vsel %vm926_vm1, %v5855_v42, %v5868_v47  ;;  %v5857_v12 = vunpack.c.l.b16 %v5825_v29  ;;  %v5827_v26 = vpack.c.bf16 %v5806_v62, %v5806_v62  ;;  %v5861_v27 = vsel %vm924_vm0, %v12207_v13, %v12209_v45  ;;  %v10163_v47 = vld [vmem:[#allocation10 + $0x84] ss:$16 sps:$4 sm:$0xff]  }
0x101d   :  { %v5870_v20 = vsel %vm928_vm2, %v5856_v61, %v5869_v9  ;;  %v5764_v54 = vadd.f32 %v5763_v35, %v5762_v24  ;;  %v5850_v49 = vunpack.c.l.b16 %v5818_v18  ;;  %v5811_v55 = vrot.slane %v5810_v1, 1  ;;  %v10158_v24 = vld [vmem:[#allocation11 + $0x30] sm:$0xff]   ;;  %v10161_v61 = vld [vmem:[#allocation11 + $0x28] sm:$0xff]   ;;  %v10164_v9 = vld [vmem:[#allocation11 + $0x20] sm:$0xff]  }
0x101e   :  { %v5862_v19 = vsel %vm926_vm1, %v5847_v10, %v5861_v27  ;;  %v5851_v8 = vunpack.c.l.b16 %v5819_v59  ;;  %v5871_v31 = vsel %vm930_vm3, %v5857_v12, %v5870_v20  ;;  %v5858_v5 = vunpack.c.l.b16 %v5826_v41  ;;  %v10160_v10 = vld [vmem:[#allocation10 + $0xa4] ss:$16 sps:$4 sm:$0xff]   ;;  %v10162_v18 = vld [vmem:[#allocation10 + $0xa0] ss:$16 sps:$4 sm:$0xff]   ;;  %v10167_v35 = vld [vmem:[#allocation11 + $0x18] sm:$0xff]  }
0x101f   :  { %v5820_v39 = vpack.c.bf16 %v5764_v54, %v5764_v54  ;;  %v5863_v53 = vsel %vm928_vm2, %v5848_v63, %v5862_v19  ;;  %v5812_v30 = vadd.f32 %v5811_v55, %v5810_v1  ;;  %v5859_v42 = vunpack.c.l.b16 %v5827_v26  ;;  %v10165_v59 = vld [vmem:[#allocation10 + $0x80] ss:$16 sps:$4 sm:$0xff]   ;;  %v10166_v62 = vld [vmem:[#allocation10 + $0x64] ss:$16 sps:$4 sm:$0xff]   ;;  %v10173_v12 = vld [vmem:[#allocation11 + $0x8] sm:$0xff]  }
0x1020   :  { %v5864_v23 = vsel %vm930_vm3, %v5849_v58, %v5863_v53  ;;  %v5872_v13 = vsel %vm932_vm4, %v5858_v5, %v5871_v31  ;;  %v10168_v63 = vld [vmem:[#allocation10 + $0x60] ss:$16 sps:$4 sm:$0xff]   ;;  %v10169_v41 = vld [vmem:[#allocation10 + $0x44] ss:$16 sps:$4 sm:$0xff]   ;;  %v10178_v55 = vld [vmem:[#allocation10 + $0xec] ss:$16 sps:$4 sm:$0xff]  }
0x1021   :  { %v5852_v37 = vunpack.c.l.b16 %v5820_v39  ;;  %v5828_v0 = vpack.c.bf16 %v5812_v30, %v5812_v30  ;;  %v5865_v33 = vsel %vm932_vm4, %v5850_v49, %v5864_v23  ;;  %v5873_v14 = vsel %vm934_vm5, %v5859_v42, %v5872_v13  ;;  %v10170_v1 = vld [vmem:[#allocation11 + $0x10] sm:$0xff]   ;;  %v10176_v27 = vld [vmem:[#allocation11] sm:$0xff]   ;;  %v4808_v39 = vpop.f32.mrf.mxu0 }
0x1022   :  { %v5866_v45 = vsel %vm934_vm5, %v5851_v8, %v5865_v33  ;;  %v10171_v20 = vld [vmem:[#allocation10 + $0x40] ss:$16 sps:$4 sm:$0xff]   ;;  %v10172_v58 = vld [vmem:[#allocation10 + $0x24] ss:$16 sps:$4 sm:$0xff]   ;;  %v4765_v8 = vpop.f32.mrf.mxu1 }
0x1023   :  { %v5860_v16 = vunpack.c.l.b16 %v5828_v0  ;;  %v5867_v34 = vsel %vm936_vm6, %v5852_v37, %v5866_v45  ;;  %v10174_v26 = vld [vmem:[#allocation10 + $0x20] ss:$16 sps:$4 sm:$0xff]   ;;  %v10175_v54 = vld [vmem:[#allocation10 + $0x4] ss:$16 sps:$4 sm:$0xff]   ;;  %v4810_v53 = vpop.f32.mrf.mxu0 }
0x1024   :  { %v10177_v49 = vld [vmem:[#allocation10] ss:$16 sps:$4 sm:$0xff]   ;;  %v10179_v19 = vld [vmem:[#allocation8 + $0xe4] ss:$16 sps:$4 sm:$0xff]   ;;  %v4767_v31 = vpop.f32.mrf.mxu1 }
0x1025   :  { %v5874_v48 = vsel %vm936_vm6, %v5860_v16, %v5873_v14  ;;  %v4812_v30 = vpop.f32.mrf.mxu0 }
0x1026   :  { %v5875_v29 = vpack.c.b16 %v5874_v48, %v5867_v34  ;;  %v4769_v5 = vpop.f32.mrf.mxu1 }
0x1027   :  { %v4814_v42 = vpop.f32.mrf.mxu0 }
0x1028   :  { %5910 = vmatmul.mubr.bf16.vlgmr.msra.gmra.mxu1 %v5875_v29  ;;  %5953 = vmatmul.mubr.bf16.vlgmr.msra.gmra.mxu0 %v5875_v29  ;;  %v4771_v23 = vpop.f32.mrf.mxu1 }
0x1029   :  { %9123 = vmatpush3.bf16.msra.mxu1 %v10155_v44  ;;  %6092 = vmatpush1.bf16.msra.mxu0 %v10156_v25 }
0x102a   :  { %9124 = vmatprep.subr.bf16.mxu1 %v13134_v7  ;;  %6093 = vmatprep.subr.bf16.mxu0 %v10157_v28 }
0x102b   :  { %9138 = vmatprep.mubr.msk.bf16.mxu1 %vm10569_vm8, %v13134_v7  ;;  %6123 = vmatprep.mubr.bf16.mxu0 %v13108_v38 }
0x102d   :  { %9125 = vmatpush3.bf16.msra.mxu1 %v10158_v24  ;;  %6094 = vmatpush1.bf16.msra.mxu0 %v10159_v22 }
0x102e   :  { %9126 = vmatprep.subr.bf16.mxu1 %v13134_v7  ;;  %6095 = vmatprep.subr.bf16.mxu0 %v10160_v10 }
0x1031   :  { %9127 = vmatpush3.bf16.msra.mxu1 %v10161_v61  ;;  %6096 = vmatpush1.bf16.msra.mxu0 %v10162_v18 }
0x1032   :  { %9128 = vmatprep.subr.bf16.mxu1 %v13134_v7  ;;  %6097 = vmatprep.subr.bf16.mxu0 %v10163_v47 }
0x1035   :  { %9129 = vmatpush3.bf16.msra.mxu1 %v10164_v9  ;;  %6098 = vmatpush1.bf16.msra.mxu0 %v10165_v59 }
0x1036   :  { %9130 = vmatprep.subr.bf16.mxu1 %v13134_v7  ;;  %6099 = vmatprep.subr.bf16.mxu0 %v10166_v62 }
0x1039   :  { %9131 = vmatpush3.bf16.msra.mxu1 %v10167_v35  ;;  %6100 = vmatpush1.bf16.msra.mxu0 %v10168_v63 }
0x103a   :  { %9132 = vmatprep.subr.bf16.mxu1 %v13134_v7  ;;  %6101 = vmatprep.subr.bf16.mxu0 %v10169_v41 }
0x103d   :  { %9133 = vmatpush3.bf16.msra.mxu1 %v10170_v1  ;;  %6102 = vmatpush1.bf16.msra.mxu0 %v10171_v20 }
0x103e   :  { %9134 = vmatprep.subr.bf16.mxu1 %v13134_v7  ;;  %6103 = vmatprep.subr.bf16.mxu0 %v10172_v58 }
0x1041   :  { %9135 = vmatpush3.bf16.msra.mxu1 %v10173_v12  ;;  %6104 = vmatpush1.bf16.msra.mxu0 %v10174_v26 }
0x1042   :  { %9136 = vmatprep.subr.bf16.mxu1 %v13134_v7  ;;  %6105 = vmatprep.subr.bf16.mxu0 %v10175_v54 }
0x1045   :  { %9137 = vmatpush3.bf16.msra.mxu1 %v10176_v27  ;;  %6106 = vmatpush1.bf16.msra.mxu0 %v10177_v49 }
0x1046   :  { %6134 = vmatprep.subr.bf16.mxu1 %v10178_v55  ;;  %6177 = vmatprep.subr.bf16.mxu0 %v10179_v19 }
0x1079   :  { %v4851_v37 = vpop.f32.mrf.mxu1  ;;  %v4894_v0 = vpop.f32.mrf.mxu0 }
0x107a   :  { %v4852_v16 = vadd.f32 %v4851_v37, %v4765_v8  ;;  %v4895_v19 = vadd.f32 %v4894_v0, %v4808_v39 }
0x107b   :  { %v4853_v33 = vpop.f32.mrf.mxu1  ;;  %v4896_v13 = vpop.f32.mrf.mxu0 }
0x107c   :  { %v4854_v14 = vadd.f32 %v4853_v33, %v4767_v31  ;;  %v4903_v25 = vadd.f32 %v4852_v16, %v11097_v36  ;;  %v4897_v20 = vadd.f32 %v4896_v13, %v4810_v53  ;;  %v4905_v37 = vadd.f32 %v4895_v19, %v11111_v32 }
0x107d   :  { %v4855_v45 = vpop.f32.mrf.mxu1  ;;  %v4898_v34 = vpop.f32.mrf.mxu0 }
0x107e   :  { %v4856_v29 = vadd.f32 %v4855_v45, %v4769_v5  ;;  %v4904_v61 = vadd.f32 %v4854_v14, %v11100_v4  ;;  %v4906_v55 = vadd.f32 %v4897_v20, %v11107_v15 }
0x107f   :  { %v4857_v48 = vpop.f32.mrf.mxu1  ;;  %v4900_v44 = vpop.f32.mrf.mxu0 }
0x1080   :  { %v4858_v24 = vadd.f32 %v4857_v48, %v4771_v23  ;;  %v4907_v59 = vadd.f32 %v4856_v29, %v11097_v36  ;;  %v4901_v49 = vadd.f32 %v4900_v44, %v4814_v42  ;;  %v4899_v23 = vadd.f32 %v4898_v34, %v4812_v30 }
0x1082   :  { %v4908_v1 = vadd.f32 %v4858_v24, %v11100_v4  ;;  %v4910_v5 = vadd.f32 %v4901_v49, %v11107_v15  ;;  %v4909_v42 = vadd.f32 %v4899_v23, %v11111_v32 }
0x10e8   :  { %v5911_v28 = vpop.f32.mrf.mxu1  ;;  %v5954_v10 = vpop.f32.mrf.mxu0 }
0x10e9   :  { %v5963_v22 = vadd.f32 %v5911_v28, %v4903_v25  ;;  %v5965_v45 = vadd.f32 %v5954_v10, %v4905_v37 }
0x10ea   :  { %v5913_v18 = vpop.f32.mrf.mxu1  ;;  %v5956_v63 = vpop.f32.mrf.mxu0 }
0x10eb   :  { %v8942_v47 = vmul.f32 -1.442695, %v5963_v22  ;;  %v5964_v9 = vadd.f32 %v5913_v18, %v4904_v61  ;;  %v5966_v8 = vadd.f32 %v5956_v63, %v4906_v55 }
0x10ec   :  { %v5915_v62 = vpop.f32.mrf.mxu1  ;;  %v5958_v54 = vpop.f32.mrf.mxu0 }
0x10ed   :  { %9618 = vpow2.f32 %v8942_v47  ;;  %v8944_v35 = vmul.f32 -1.442695, %v5964_v9  ;;  %v5967_v41 = vadd.f32 %v5915_v62, %v4907_v59  ;;  %v8946_v53 = vmul.f32 -1.442695, %v5966_v8 }
0x10ee   :  { %v5917_v58 = vpop.f32.mrf.mxu1  ;;  %v5960_v31 = vpop.f32.mrf.mxu0  ;;  %v5969_v0 = vadd.f32 %v5958_v54, %v4909_v42 }
0x10ef   :  { %9620 = vpow2.f32 %v8944_v35  ;;  %v8943_v12 = vmul.f32 -1.442695, %v5967_v41  ;;  %v5968_v26 = vadd.f32 %v5917_v58, %v4908_v1  ;;  %v5970_v33 = vadd.f32 %v5960_v31, %v4910_v5 }
0x10f1   :  { %9622 = vpow2.f32 %v8943_v12  ;;  %v8945_v27 = vmul.f32 -1.442695, %v5968_v26  ;;  %v8947_v48 = vmul.f32 -1.442695, %v5970_v33 }
0x10f3   :  { %9624 = vpow2.f32 %v8945_v27 }
0x10f4   :  { %9626 = vpow2.f32 %v8946_v53 }
0x10fa   :  { %v9619_v13 = vpop.eup %9618 }
0x10fb   :  { %v5977_v16 = vadd.f32 1.0, %v9619_v13 }
0x10fc   :  { %v9621_v14 = vpop.eup %9620 }
0x10fd   :  { %9628 = vrcp.f32 %v5977_v16  ;;  %v5989_v29 = vadd.f32 1.0, %v9621_v14  ;;  %v10180_v14 = vld [vmem:[#allocation10 + $0xe8] ss:$16 sps:$4 sm:$0xff]  }
0x10fe   :  { %v9623_v39 = vpop.eup %9622  ;;  %9630 = vtanh.f32 %v5965_v45 }
0x10ff   :  { %9632 = vrcp.f32 %v5989_v29  ;;  %v5978_v44 = vadd.f32 1.0, %v9623_v39  ;;  %v10181_v39 = vld [vmem:[#allocation10 + $0xcc] ss:$16 sps:$4 sm:$0xff]  }
0x1100   :  { %v9625_v30 = vpop.eup %9624  ;;  %9634 = vpow2.f32 %v8947_v48 }
0x1101   :  { %9636 = vrcp.f32 %v5978_v44  ;;  %v5990_v34 = vadd.f32 1.0, %v9625_v30  ;;  %v9627_v25 = vpop.eup %9626 }
0x1102   :  { %9638 = vtanh.f32 %v5969_v0  ;;  %v6003_v10 = vadd.f32 1.0, %v9627_v25 }
0x1103   :  { %9640 = vrcp.f32 %v5990_v34 }
0x1104   :  { %9642 = vrcp.f32 %v6003_v10 }
0x110a   :  { %v9629_v28 = vpop.eup %9628 }
0x110b   :  { %v9631_v24 = vpop.eup %9630 }
0x110c   :  { %v9633_v22 = vpop.eup %9632  ;;  %v6011_v18 = vmul.f32 %v9631_v24, %v9629_v28  ;;  %v10182_v28 = vld [vmem:[#allocation10 + $0xc8] ss:$16 sps:$4 sm:$0xff]  }
0x110d   :  { %v9635_v61 = vpop.eup %9634  ;;  %v6009_v47 = vmul.f32 %v9633_v22, %v11877_v3  ;;  %v10183_v22 = vld [vmem:[#allocation10 + $0xac] ss:$16 sps:$4 sm:$0xff]  }
0x110e   :  { %v9637_v9 = vpop.eup %9636  ;;  %v6004_v63 = vadd.f32 1.0, %v9635_v61 }
0x110f   :  { %v9639_v59 = vpop.eup %9638  ;;  %v12252_v62 = vadd.f32 %v6011_v18, %v6009_v47 }
0x1110   :  { %v9641_v35 = vpop.eup %9640  ;;  %v6012_v41 = vmul.f32 %v9639_v59, %v9637_v9  ;;  %v10184_v9 = vld [vmem:[#allocation8 + $0xe0] ss:$16 sps:$4 sm:$0xff]  }
0x1111   :  { %9644 = vtanh.f32 %v12252_v62  ;;  %v6010_v1 = vmul.f32 %v9641_v35, %v11881_v46  ;;  %v9643_v58 = vpop.eup %9642  ;;  %v10185_v35 = vld [vmem:[#allocation10 + $0xa8] ss:$16 sps:$4 sm:$0xff]  }
0x1112   :  { %9646 = vrcp.f32 %v6004_v63 }
0x1113   :  { %v12256_v20 = vadd.f32 %v6012_v41, %v6010_v1 }
0x1115   :  { %9648 = vtanh.f32 %v12256_v20 }
0x111e   :  { %v9645_v12 = vpop.eup %9644 }
0x111f   :  { %v6017_v3 = vmul.f32 %v9645_v12, %v9643_v58  ;;  %v9647_v26 = vpop.eup %9646  ;;  %v10186_v12 = vld [vmem:[#allocation10 + $0x8c] ss:$16 sps:$4 sm:$0xff]  }
0x1121   :  { %v6280_v54 = vrot.slane %v6017_v3, %v11123_v21  ;;  %v6273_v27 = vcombine.high %v6017_v3, %v6017_v3 }
0x1122   :  { %v9649_v49 = vpop.eup %9648 }
0x1123   :  { %v6018_v55 = vmul.f32 %v9649_v49, %v9647_v26  ;;  %v6296_v19 = vrot.slane %v6280_v54, %v11123_v21  ;;  %v6288_v8 = vcombine.high %v6280_v54, %v6280_v54  ;;  %v12262_v31 = vrot.slane %v6273_v27, %v11123_v21  ;;  %v10187_v49 = vld [vmem:[#allocation8 + $0xc4] ss:$16 sps:$4 sm:$0xff]  }
0x1125   :  { %v12264_v46 = vpack.c.bf16 %v6018_v55, %v6017_v3  ;;  %v6374_v5 = vrot.slane %v6296_v19, %v10785_v6  ;;  %v6310_v23 = vrot.slane %v6288_v8, %v11123_v21  ;;  %v6329_v37 = vrot.slane %v6018_v55, %v11123_v21  ;;  %v13161_v3 = vld [vmem:[#allocation23_spill] sm:$0xff] }
0x1126   :  { %v6318_v53 = vcombine.high %v6296_v19, %v6296_v19  ;;  %v6322_v33 = vcombine.high %v6018_v55, %v6018_v55  ;;  %v12277_v29 = vrot.slane %v12262_v31, %v11123_v21  ;;  %v6289_v59 = vcombine.high %v12262_v31, %v12262_v31  ;;  %v10188_v55 = vld [vmem:[#allocation8 + $0xc0] ss:$16 sps:$4 sm:$0xff]   ;;  %v10189_v19 = vld [vmem:[#allocation10 + $0x88] ss:$16 sps:$4 sm:$0xff]  }
0x1127   :  { %9139 = vmatmul.mubr.bf16.vlgmr.msra.gmra.mxu1 %v12264_v46  ;;  %6124 = vmatmul.mubr.bf16.vlgmr.msra.gmra.mxu0 %v12264_v46  ;;  %v6451_v13 = vmul.f32 %v6374_v5, %v13113_v51  ;;  %v6378_v45 = vrot.slane %v6310_v23, %v10785_v6  ;;  %v6337_v16 = vcombine.high %v6329_v37, %v6329_v37  ;;  %v10190_v5 = vld [vmem:[#allocation8 + $0xa4] ss:$16 sps:$4 sm:$0xff]  }
0x1128   :  { %6135 = vmatpush1.bf16.msra.mxu1 %v10180_v14  ;;  %v6382_v42 = vrot.slane %v6318_v53, %v10785_v6  ;;  %v6345_v48 = vrot.slane %v6329_v37, %v11123_v21  ;;  %v6336_v30 = vrot.slane %v6322_v33, %v11123_v21  ;;  %6166 = vmatprep.mubr.bf16.mxu1 %v13108_v38  ;;  %v13162_v37 = vld [vmem:[#allocation27_spill] sm:$0xff] }
0x1129   :  { %6467 = vadd.xlane.f32.xlu1 %v6451_v13  ;;  %6136 = vmatprep.subr.bf16.mxu1 %v10181_v39  ;;  %v6452_v0 = vmul.f32 %v6378_v45, %v13114_v2  ;;  %v6359_v44 = vrot.slane %v6337_v16, %v11123_v21  ;;  %v6390_v24 = vrot.slane %v12277_v29, %v10785_v6  ;;  %v13163_v33 = vld [vmem:[#allocation19_spill] sm:$0xff] }
0x112a   :  { %v6367_v34 = vcombine.high %v6345_v48, %v6345_v48  ;;  %v6453_v61 = vmul.f32 %v6382_v42, %v13115_v17  ;;  %v12290_v47 = vrot.slane %v6336_v30, %v11123_v21  ;;  %6178 = vmatpush1.bf16.msra.mxu0 %v10184_v9  ;;  %v6406_v41 = vrot.slane %v6345_v48, %v10785_v6  ;;  %v10192_v14 = vld [vmem:[#allocation8 + $0xa0] ss:$16 sps:$4 sm:$0xff]   ;;  %v10193_v42 = vld [vmem:[#allocation10 + $0x68] ss:$16 sps:$4 sm:$0xff]  }
0x112b   :  { %6469 = vadd.xlane.f32.xlu0 %v6452_v0  ;;  %v6410_v25 = vrot.slane %v6359_v44, %v10785_v6  ;;  %v6455_v63 = vmul.f32 %v6390_v24, %v13117_v52  ;;  %v6369_v1 = vcombine.high %v6359_v44, %v6359_v44  ;;  %v6320_v58 = vcombine.high %v6310_v23, %v6310_v23  ;;  %v10191_v23 = vld [vmem:[#allocation10 + $0x6c] ss:$16 sps:$4 sm:$0xff]   ;;  %v10194_v44 = vld [vmem:[#allocation8 + $0x84] ss:$16 sps:$4 sm:$0xff]  }
0x112c   :  { %6137 = vmatpush1.bf16.msra.mxu1 %v10182_v28  ;;  %v6414_v18 = vrot.slane %v6367_v34, %v10785_v6  ;;  %v6422_v54 = vrot.slane %v12290_v47, %v10785_v6  ;;  %v6338_v27 = vcombine.high %v6336_v30, %v6336_v30  ;;  %6179 = vmatprep.subr.bf16.mxu0 %v10187_v49  ;;  %v13164_v48 = vld [vmem:[#allocation26_spill] sm:$0xff]  ;;  %v13165_v34 = vld [vmem:[#allocation25_spill] sm:$0xff]  ;;  %v13168_v49 = vld [vmem:[#allocation31_spill] sm:$0xff] }
0x112d   :  { %6138 = vmatprep.subr.bf16.mxu1 %v10183_v22  ;;  %v6460_v10 = vmul.f32 %v6410_v25, %v13116_v60  ;;  %6209 = vmatprep.mubr.bf16.mxu0 %v13108_v38  ;;  %v6386_v8 = vrot.slane %v6320_v58, %v10785_v6  ;;  %v6317_v31 = vrot.slane %v6289_v59, %v11123_v21  ;;  %v10195_v30 = vld [vmem:[#allocation10 + $0x4c] ss:$16 sps:$4 sm:$0xff]   ;;  %v10198_v59 = vld [vmem:[#allocation8 + $0x64] ss:$16 sps:$4 sm:$0xff]  }
0x112e   :  { %v6461_v26 = vmul.f32 %v6414_v18, %v13161_v3  ;;  %6180 = vmatpush1.bf16.msra.mxu0 %v10188_v55  ;;  %v6463_v53 = vmul.f32 %v6422_v54, %v13162_v37  ;;  %v6459_v13 = vmul.f32 %v6406_v41, %v13163_v33  ;;  %v6418_v45 = vrot.slane %v6369_v1, %v10785_v6  ;;  %v13166_v18 = vld [vmem:[#allocation30_spill] sm:$0xff]  ;;  %v10202_v54 = vld [vmem:[#allocation8 + $0x44] ss:$16 sps:$4 sm:$0xff]  }
0x112f   :  { %6485 = vadd.xlane.f32.xlu1 %v6460_v10  ;;  %6471 = vadd.xlane.f32.xlu0 %v6453_v61  ;;  %v6366_v16 = vrot.slane %v6338_v27, %v11123_v21  ;;  %v6454_v39 = vmul.f32 %v6386_v8, %v13164_v48  ;;  %v6394_v0 = vrot.slane %v6317_v31, %v10785_v6  ;;  %v10196_v10 = vld [vmem:[#allocation8 + $0x80] ss:$16 sps:$4 sm:$0xff]   ;;  %v10197_v61 = vld [vmem:[#allocation10 + $0x48] ss:$16 sps:$4 sm:$0xff]   ;;  %v10203_v27 = vld [vmem:[#allocation10 + $0xc] ss:$16 sps:$4 sm:$0xff]  }
0x1130   :  { %6139 = vmatpush1.bf16.msra.mxu1 %v10185_v35  ;;  %6181 = vmatprep.subr.bf16.mxu0 %v10190_v5  ;;  %v6462_v25 = vmul.f32 %v6418_v45, %v13165_v34  ;;  %v6368_v24 = vcombine.high %v12290_v47, %v12290_v47  ;;  %v6319_v22 = vcombine.high %v12277_v29, %v12277_v29  ;;  %v10199_v35 = vld [vmem:[#allocation10 + $0x2c] ss:$16 sps:$4 sm:$0xff]   ;;  %v13170_v45 = vld [vmem:[#allocation33_spill] sm:$0xff] }
0x1131   :  { %6140 = vmatprep.subr.bf16.mxu1 %v10186_v12  ;;  %v6426_v28 = vrot.slane %v6366_v16, %v10785_v6  ;;  %v6456_v9 = vmul.f32 %v6394_v0, %v13166_v18  ;;  %v6370_v58 = vcombine.high %v6366_v16, %v6366_v16  ;;  %v6321_v29 = vcombine.high %v6317_v31, %v6317_v31  ;;  %v10200_v12 = vld [vmem:[#allocation8 + $0x60] ss:$16 sps:$4 sm:$0xff]   ;;  %v10205_v31 = vld [vmem:[#allocation10 + $0x8] ss:$16 sps:$4 sm:$0xff]  }
0x1132   :  { %6182 = vmatpush1.bf16.msra.mxu0 %v10192_v14  ;;  %v6430_v1 = vrot.slane %v6368_v24, %v10785_v6  ;;  %v6398_v47 = vrot.slane %v6319_v22, %v10785_v6  ;;  %v10207_v14 = vld [vmem:[#allocation8 + $0xec] ss:$16 sps:$4 sm:$0xff]   ;;  %v10208_v0 = vld [vmem:[#allocation8 + $0x20] ss:$16 sps:$4 sm:$0xff]   ;;  %v10213_v24 = vld [vmem:[#allocation7 + $0xe4] ss:$16 sps:$4 sm:$0xff]  }
0x1133   :  { %6487 = vadd.xlane.f32.xlu1 %v6461_v26  ;;  %6475 = vadd.xlane.f32.xlu0 %v6455_v63  ;;  %v13167_v63 = vld [vmem:[#allocation29_spill] sm:$0xff]  ;;  %v10201_v26 = vld [vmem:[#allocation10 + $0x28] ss:$16 sps:$4 sm:$0xff]   ;;  %v6434_v5 = vrot.slane %v6370_v58, %v10785_v6 }
0x1134   :  { %6141 = vmatpush1.bf16.msra.mxu1 %v10189_v19  ;;  %6183 = vmatprep.subr.bf16.mxu0 %v10194_v44  ;;  %v6464_v41 = vmul.f32 %v6426_v28, %v13167_v63  ;;  %v6465_v55 = vmul.f32 %v6430_v1, %v13168_v49  ;;  %v13169_v19 = vld [vmem:[#allocation32_spill] sm:$0xff]  ;;  %v10212_v28 = vld [vmem:[#allocation8] ss:$16 sps:$4 sm:$0xff]  }
0x1135   :  { %6142 = vmatprep.subr.bf16.mxu1 %v10191_v23  ;;  %v6457_v8 = vmul.f32 %v6398_v47, %v13169_v19  ;;  %v6402_v23 = vrot.slane %v6321_v29, %v10785_v6  ;;  %v6466_v16 = vmul.f32 %v6434_v5, %v13170_v45  ;;  %v10209_v44 = vld [vmem:[#allocation8 + $0xe8] ss:$16 sps:$4 sm:$0xff]   ;;  %v10223_v47 = vld [vmem:[#allocation8 + $0x2c] ss:$16 sps:$4 sm:$0xff]  }
0x1136   :  { %6184 = vmatpush1.bf16.msra.mxu0 %v10196_v10  ;;  %v10214_v22 = vld [vmem:[#allocation8 + $0xc8] ss:$16 sps:$4 sm:$0xff]   ;;  %v10215_v10 = vld [vmem:[#allocation8 + $0xac] ss:$16 sps:$4 sm:$0xff]  }
0x1137   :  { %6491 = vadd.xlane.f32.xlu1 %v6463_v53  ;;  %6483 = vadd.xlane.f32.xlu0 %v6459_v13  ;;  %v10204_v53 = vld [vmem:[#allocation8 + $0x40] ss:$16 sps:$4 sm:$0xff]   ;;  %v10206_v13 = vld [vmem:[#allocation8 + $0x24] ss:$16 sps:$4 sm:$0xff]   ;;  %v10222_v1 = vld [vmem:[#allocation8 + $0x48] ss:$16 sps:$4 sm:$0xff]  }
0x1138   :  { %6143 = vmatpush1.bf16.msra.mxu1 %v10193_v42  ;;  %6185 = vmatprep.subr.bf16.mxu0 %v10198_v59  ;;  %v13171_v42 = vld [vmem:[#allocation34_spill] sm:$0xff] }
0x1139   :  { %6144 = vmatprep.subr.bf16.mxu1 %v10195_v30  ;;  %v10210_v30 = vld [vmem:[#allocation8 + $0xcc] ss:$16 sps:$4 sm:$0xff]   ;;  %v10224_v58 = vld [vmem:[#allocation8 + $0x28] ss:$16 sps:$4 sm:$0xff]  }
0x113a   :  { %6186 = vmatpush1.bf16.msra.mxu0 %v10200_v12  ;;  %v10219_v59 = vld [vmem:[#allocation8 + $0x6c] ss:$16 sps:$4 sm:$0xff]   ;;  %v10226_v12 = vld [vmem:[#allocation8 + $0x8] ss:$16 sps:$4 sm:$0xff]  }
0x113b   :  { %6489 = vadd.xlane.f32.xlu1 %v6462_v25  ;;  %6473 = vadd.xlane.f32.xlu0 %v6454_v39  ;;  %v6458_v39 = vmul.f32 %v6402_v23, %v13171_v42  ;;  %v10211_v25 = vld [vmem:[#allocation8 + $0x4] ss:$16 sps:$4 sm:$0xff]   ;;  %v10225_v29 = vld [vmem:[#allocation8 + $0xc] ss:$16 sps:$4 sm:$0xff]  }
0x113c   :  { %6145 = vmatpush1.bf16.msra.mxu1 %v10197_v61  ;;  %6187 = vmatprep.subr.bf16.mxu0 %v10202_v54  ;;  %v10216_v61 = vld [vmem:[#allocation8 + $0xa8] ss:$16 sps:$4 sm:$0xff]  }
0x113d   :  { %6146 = vmatprep.subr.bf16.mxu1 %v10199_v35  ;;  %v10220_v35 = vld [vmem:[#allocation8 + $0x68] ss:$16 sps:$4 sm:$0xff]  }
0x113e   :  { %6188 = vmatpush1.bf16.msra.mxu0 %v10204_v53 }
0x113f   :  { %6493 = vadd.xlane.f32.xlu1 %v6464_v41  ;;  %6477 = vadd.xlane.f32.xlu0 %v6456_v9  ;;  %v10218_v9 = vld [vmem:[#allocation8 + $0x88] ss:$16 sps:$4 sm:$0xff]   ;;  %v10221_v41 = vld [vmem:[#allocation8 + $0x4c] ss:$16 sps:$4 sm:$0xff]  }
0x1140   :  { %6147 = vmatpush1.bf16.msra.mxu1 %v10201_v26  ;;  %6189 = vmatprep.subr.bf16.mxu0 %v10206_v13  ;;  %v10227_v26 = vld [vmem:[#allocation7 + $0xec] ss:$16 sps:$4 sm:$0xff]  }
0x1141   :  { %6148 = vmatprep.subr.bf16.mxu1 %v10203_v27 }
0x1142   :  { %6190 = vmatpush1.bf16.msra.mxu0 %v10208_v0 }
0x1143   :  { %6495 = vadd.xlane.f32.xlu1 %v6465_v55  ;;  %6479 = vadd.xlane.f32.xlu0 %v6457_v8 }
0x1144   :  { %6149 = vmatpush1.bf16.msra.mxu1 %v10205_v31  ;;  %6191 = vmatprep.subr.bf16.mxu0 %v10211_v25 }
0x1145   :  { %6220 = vmatprep.subr.bf16.mxu1 %v10207_v14 }
0x1146   :  { %6192 = vmatpush1.bf16.msra.mxu0 %v10212_v28 }
0x1147   :  { %6167 = vmatmul.mubr.bf16.vlgmr.msra.gmra.mxu1 %v12264_v46  ;;  %6497 = vadd.xlane.f32.xlu1 %v6466_v16  ;;  %v10217_v46 = vld [vmem:[#allocation8 + $0x8c] ss:$16 sps:$4 sm:$0xff]  }
0x1148   :  { %6481 = vadd.xlane.f32.xlu0 %v6458_v39  ;;  %6221 = vmatpush1.bf16.msra.mxu1 %v10209_v44 }
0x1149   :  { %6222 = vmatprep.subr.bf16.mxu1 %v10210_v30  ;;  %6252 = vmatprep.mubr.bf16.mxu1 %v13108_v38 }
0x114a   :  { %7237 = vmatprep.subr.bf16.mxu0 %v10213_v24 }
0x114c   :  { %6223 = vmatpush1.bf16.msra.mxu1 %v10214_v22 }
0x114d   :  { %6224 = vmatprep.subr.bf16.mxu1 %v10215_v10 }
0x1150   :  { %6225 = vmatpush1.bf16.msra.mxu1 %v10216_v61 }
0x1151   :  { %6226 = vmatprep.subr.bf16.mxu1 %v10217_v46 }
0x1154   :  { %6227 = vmatpush1.bf16.msra.mxu1 %v10218_v9 }
0x1155   :  { %6228 = vmatprep.subr.bf16.mxu1 %v10219_v59 }
0x1158   :  { %6229 = vmatpush1.bf16.msra.mxu1 %v10220_v35 }
0x1159   :  { %6230 = vmatprep.subr.bf16.mxu1 %v10221_v41 }
0x115c   :  { %6231 = vmatpush1.bf16.msra.mxu1 %v10222_v1 }
0x115d   :  { %6232 = vmatprep.subr.bf16.mxu1 %v10223_v47 }
0x1160   :  { %6233 = vmatpush1.bf16.msra.mxu1 %v10224_v58 }
0x1161   :  { %6234 = vmatprep.subr.bf16.mxu1 %v10225_v29 }
0x1164   :  { %6235 = vmatpush1.bf16.msra.mxu1 %v10226_v12 }
0x1165   :  { %7280 = vmatprep.subr.bf16.mxu1 %v10227_v26 }
0x11b2   :  { %v12326_v54 = vpop.xlane.xlu1 %6467 }
0x11b3   :  { %v6518_v22 = vrot.slane %v12326_v54, %v13129_v40 }
0x11b4   :  { %v12328_v27 = vpop.xlane.xlu0 %6469 }
0x11b5   :  { %v6522_v0 = vrot.slane %v12328_v27, %v13129_v40 }
0x11b7   :  { %v6579_v46 = vsel %vm924_vm0, %v6522_v0, %v6518_v22 }
0x11b8   :  { %v12330_v55 = vpop.xlane.xlu1 %6485  ;;  %v12332_v8 = vpop.xlane.xlu0 %6471 }
0x11b9   :  { %v6554_v39 = vrot.slane %v12330_v55, %v13129_v40  ;;  %v6526_v25 = vrot.slane %v12332_v8, %v13129_v40 }
0x11bb   :  { %v6580_v41 = vsel %vm926_vm1, %v6526_v25, %v6579_v46 }
0x11bc   :  { %v12334_v5 = vpop.xlane.xlu1 %6487  ;;  %v12336_v23 = vpop.xlane.xlu0 %6475 }
0x11bd   :  { %v6558_v10 = vrot.slane %v12334_v5, %v13129_v40 }
0x11c0   :  { %v12338_v53 = vpop.xlane.xlu1 %6491  ;;  %v12340_v31 = vpop.xlane.xlu0 %6483 }
0x11c1   :  { %v6550_v14 = vrot.slane %v12340_v31, %v13129_v40  ;;  %v6566_v58 = vrot.slane %v12338_v53, %v13129_v40 }
0x11c3   :  { %v6586_v28 = vsel %vm924_vm0, %v6554_v39, %v6550_v14  ;;  %v6534_v14 = vrot.slane %v12336_v23, %v13129_v40 }
0x11c4   :  { %v12342_v13 = vpop.xlane.xlu1 %6489  ;;  %v12344_v16 = vpop.xlane.xlu0 %6473  ;;  %v6587_v9 = vsel %vm926_vm1, %v6558_v10, %v6586_v28 }
0x11c5   :  { %v6562_v24 = vrot.slane %v12342_v13, %v13129_v40  ;;  %v6530_v61 = vrot.slane %v12344_v16, %v13129_v40 }
0x11c7   :  { %v6588_v1 = vsel %vm928_vm2, %v6562_v24, %v6587_v9  ;;  %v6581_v29 = vsel %vm928_vm2, %v6530_v61, %v6580_v41 }
0x11c8   :  { %v12352_v44 = vpop.xlane.xlu1 %6493  ;;  %v12354_v30 = vpop.xlane.xlu0 %6477  ;;  %v6589_v25 = vsel %vm930_vm3, %v6566_v58, %v6588_v1  ;;  %v6582_v10 = vsel %vm930_vm3, %v6534_v14, %v6581_v29 }
0x11c9   :  { %v6570_v47 = vrot.slane %v12352_v44, %v13129_v40  ;;  %v6538_v12 = vrot.slane %v12354_v30, %v13129_v40 }
0x11cb   :  { %v6590_v22 = vsel %vm932_vm4, %v6570_v47, %v6589_v25  ;;  %v6583_v9 = vsel %vm932_vm4, %v6538_v12, %v6582_v10 }
0x11cc   :  { %v12369_v59 = vpop.xlane.xlu1 %6495  ;;  %v12371_v35 = vpop.xlane.xlu0 %6479 }
0x11cd   :  { %v6574_v26 = vrot.slane %v12369_v59, %v13129_v40  ;;  %v6542_v39 = vrot.slane %v12371_v35, %v13129_v40 }
0x11cf   :  { %v6591_v46 = vsel %vm934_vm5, %v6574_v26, %v6590_v22  ;;  %v6584_v1 = vsel %vm934_vm5, %v6542_v39, %v6583_v9  ;;  %v10228_v26 = vld [vmem:[%s13018_s7] ss:$0 sm:$0xff] }
0x11d0   :  { %v12388_v0 = vpop.xlane.xlu1 %6497 }
0x11d1   :  { %v6578_v28 = vrot.slane %v12388_v0, %v13129_v40  ;;  %v12393_v24 = vpop.xlane.xlu0 %6481 }
0x11d2   :  { %v6546_v61 = vrot.slane %v12393_v24, %v13129_v40 }
0x11d3   :  { %v6592_v41 = vsel %vm936_vm6, %v6578_v28, %v6591_v46 }
0x11d4   :  { %v6598_v58 = vsel %vm947_vm7, %v6592_v41, -inf  ;;  %v6585_v42 = vsel %vm936_vm6, %v6546_v61, %v6584_v1 }
0x11d5   :  { %6599 = vmax.xlane.f32.xlu1 %v6598_v58  ;;  %v6595_v47 = vsel %vm947_vm7, %v6585_v42, -inf }
0x11d6   :  { %6596 = vmax.xlane.f32.xlu0 %v6595_v47 }
0x11e7   :  { %v6054_v29 = vpop.f32.mrf.mxu1 }
0x11e8   :  { %v12409_v12 = vadd.f32 %v10228_v26, %v6054_v29 }
0x11e9   :  { %v9140_v14 = vpop.f32.mrf.mxu1 }
0x11eb   :  { %v6057_v25 = vpop.f32.mrf.mxu1 }
0x11ec   :  { %v12411_v28 = vadd.f32 %v10228_v26, %v6057_v25 }
0x11ed   :  { %v9141_v39 = vpop.f32.mrf.mxu1 }
0x11ee   :  { %v8996_v22 = vpack.c.bf16 %v12411_v28, %v12409_v12 }
0x11f0   :  { %8997 = vst [vmem:[#allocation13 + $0x18] sm:$0xff] %v8996_v22  }
0x125e   :  { %v6600_v42 = vpop.xlane.xlu1 %6599 }
0x125f   :  { %v12415_v10 = vpop.xlane.xlu0 %6596  ;;  %v6642_v9 = vrot.slane %v6600_v42, %v13109_v11  ;;  %v6646_v47 = vrot.slane %v6600_v42, %v13111_v50  ;;  %v6650_v22 = vrot.slane %v6600_v42, %v13110_v43 }
0x1260   :  { %v6606_v61 = vrot.slane %v12415_v10, %v10785_v6  ;;  %v6610_v46 = vrot.slane %v12415_v10, %v13109_v11  ;;  %v6614_v41 = vrot.slane %v12415_v10, %v13111_v50  ;;  %v6618_v14 = vrot.slane %v12415_v10, %v13110_v43 }
0x1261   :  { %v6692_v29 = vsub.f32 %v12330_v55, %v6642_v9  ;;  %v6693_v45 = vsub.f32 %v12334_v5, %v6646_v47  ;;  %v6626_v9 = vrot.slane %v12415_v10, %v13145_v57  ;;  %v6638_v47 = vrot.slane %v6600_v42, %v10785_v6 }
0x1262   :  { %v6683_v1 = vsub.f32 %v12326_v54, %v6606_v61  ;;  %v6684_v58 = vsub.f32 %v12328_v27, %v6610_v46  ;;  %v6685_v25 = vsub.f32 %v12332_v8, %v6614_v41  ;;  %v6622_v54 = vrot.slane %v12415_v10, %v13130_v56 }
0x1263   :  { %v6717_v19 = vmul.f32 1.442695, %v6692_v29  ;;  %v6686_v27 = vsub.f32 %v12344_v16, %v6618_v14  ;;  %v6654_v61 = vrot.slane %v6600_v42, %v13130_v56  ;;  %v6694_v46 = vsub.f32 %v12342_v13, %v6650_v22 }
0x1264   :  { %v6699_v26 = vmul.f32 1.442695, %v6683_v1  ;;  %v6701_v39 = vmul.f32 1.442695, %v6684_v58  ;;  %v6703_v55 = vmul.f32 1.442695, %v6685_v25  ;;  %v6687_v5 = vsub.f32 %v12336_v23, %v6622_v54 }
0x1265   :  { %v6719_v8 = vmul.f32 1.442695, %v6693_v45  ;;  %v6705_v41 = vmul.f32 1.442695, %v6686_v27  ;;  %v6658_v1 = vrot.slane %v6600_v42, %v13145_v57  ;;  %v6695_v58 = vsub.f32 %v12338_v53, %v6654_v61  ;;  %v13172_v45 = vld [vmem:[#allocation41_spill] sm:$0xff] }
0x1266   :  { %9650 = vpow2.f32 %v6699_v26  ;;  %v6721_v16 = vmul.f32 1.442695, %v6694_v46  ;;  %v6688_v29 = vsub.f32 %v12354_v30, %v6626_v9  ;;  %v6662_v13 = vrot.slane %v6600_v42, %v13172_v45  ;;  %v13173_v30 = vld [vmem:[#allocation42_spill] sm:$0xff] }
0x1267   :  { %9652 = vpow2.f32 %v6701_v39  ;;  %v6696_v14 = vsub.f32 %v12352_v44, %v6658_v1  ;;  %v6723_v23 = vmul.f32 1.442695, %v6695_v58  ;;  %v6691_v26 = vsub.f32 %v12340_v31, %v6638_v47 }
0x1268   :  { %9654 = vpow2.f32 %v6717_v19  ;;  %v6707_v19 = vmul.f32 1.442695, %v6687_v5  ;;  %v6630_v53 = vrot.slane %v12415_v10, %v13172_v45  ;;  %v6709_v39 = vmul.f32 1.442695, %v6688_v29 }
0x1269   :  { %9656 = vpow2.f32 %v6703_v55  ;;  %v6666_v54 = vrot.slane %v6600_v42, %v13173_v30  ;;  %v6697_v44 = vsub.f32 %v12369_v59, %v6662_v13  ;;  %v6725_v27 = vmul.f32 1.442695, %v6696_v14 }
0x126a   :  { %9658 = vpow2.f32 %v6719_v8  ;;  %v6715_v31 = vmul.f32 1.442695, %v6691_v26  ;;  %v6634_v61 = vrot.slane %v12415_v10, %v13173_v30  ;;  %v6689_v46 = vsub.f32 %v12371_v35, %v6630_v53 }
0x126b   :  { %9660 = vpow2.f32 %v6705_v41  ;;  %v6698_v42 = vsub.f32 %v12388_v0, %v6666_v54  ;;  %v6727_v59 = vmul.f32 1.442695, %v6697_v44 }
0x126c   :  { %9662 = vpow2.f32 %v6721_v16  ;;  %v6690_v5 = vsub.f32 %v12393_v24, %v6634_v61  ;;  %v6711_v41 = vmul.f32 1.442695, %v6689_v46 }
0x126d   :  { %9664 = vpow2.f32 %v6707_v19  ;;  %v6729_v35 = vmul.f32 1.442695, %v6698_v42 }
0x126e   :  { %9666 = vpow2.f32 %v6723_v23  ;;  %v6713_v0 = vmul.f32 1.442695, %v6690_v5 }
0x126f   :  { %9668 = vpow2.f32 %v6709_v39 }
0x1270   :  { %9670 = vpow2.f32 %v6725_v27 }
0x1271   :  { %9672 = vpow2.f32 %v6715_v31 }
0x1272   :  { %9674 = vpow2.f32 %v6727_v59 }
0x1273   :  { %v12447_v25 = vpop.eup %9650  ;;  %9676 = vpow2.f32 %v6711_v41 }
0x1274   :  { %v12452_v22 = vpop.eup %9652  ;;  %6748 = vperm.xlu0 %9199, %v12447_v25   ;;  %9678 = vpow2.f32 %v6729_v35 }
0x1275   :  { %6751 = vperm.xlu1 %9200, %v12452_v22   ;;  %v12458_v55 = vpop.eup %9654  ;;  %9680 = vpow2.f32 %v6713_v0 }
0x1276   :  { %v12463_v8 = vpop.eup %9656 }
0x1277   :  { %v12468_v9 = vpop.eup %9658 }
0x1278   :  { %6775 = vperm.xlu0 %9199, %v12458_v55   ;;  %v12471_v10 = vpop.eup %9660 }
0x1279   :  { %6754 = vperm.xlu1 %9200, %v12463_v8   ;;  %v12475_v1 = vpop.eup %9662 }
0x127a   :  { %v12477_v58 = vpop.eup %9664 }
0x127b   :  { %v12481_v24 = vpop.eup %9666 }
0x127c   :  { %6778 = vperm.xlu0 %9199, %v12468_v9   ;;  %v12483_v16 = vpop.eup %9668 }
0x127d   :  { %6757 = vperm.xlu1 %9200, %v12471_v10   ;;  %v12487_v47 = vpop.eup %9670 }
0x127e   :  { %v12489_v29 = vpop.eup %9672 }
0x127f   :  { %v12493_v19 = vpop.eup %9674 }
0x1280   :  { %6781 = vperm.xlu0 %9199, %v12475_v1   ;;  %v12495_v13 = vpop.eup %9676 }
0x1281   :  { %6760 = vperm.xlu1 %9200, %v12477_v58   ;;  %v12499_v14 = vpop.eup %9678 }
0x1282   :  { %v12501_v23 = vpop.eup %9680 }
0x1284   :  { %6784 = vperm.xlu0 %9199, %v12481_v24  }
0x1285   :  { %6763 = vperm.xlu1 %9200, %v12483_v16  }
0x1288   :  { %6787 = vperm.xlu0 %9199, %v12487_v47  }
0x1289   :  { %6772 = vperm.xlu1 %9200, %v12489_v29  }
0x128c   :  { %6790 = vperm.xlu0 %9199, %v12493_v19  }
0x128d   :  { %6766 = vperm.xlu1 %9200, %v12495_v13  }
0x1290   :  { %6793 = vperm.xlu0 %9199, %v12499_v14  }
0x1291   :  { %6769 = vperm.xlu1 %9200, %v12501_v23  }
0x12af   :  { %6074 = vmax.xlane.f32.xlu0 %v12411_v28 }
0x12b5   :  { %6072 = vmax.xlane.f32.xlu1 %v12409_v12 }
0x12ef   :  { %v6749_v26 = vpop.permute.xlu0 %6748 }
0x12f0   :  { %v6752_v53 = vpop.permute.xlu1 %6751  ;;  %v6798_v41 = vrot.slane %v6749_v26, %v13129_v40 }
0x12f1   :  { %v6802_v5 = vrot.slane %v6752_v53, %v13129_v40 }
0x12f3   :  { %v6776_v39 = vpop.permute.xlu0 %6775  ;;  %v6859_v53 = vsel %vm924_vm0, %v6802_v5, %v6798_v41 }
0x12f4   :  { %v6755_v54 = vpop.permute.xlu1 %6754  ;;  %v6834_v0 = vrot.slane %v6776_v39, %v13129_v40 }
0x12f5   :  { %v6806_v63 = vrot.slane %v6755_v54, %v13129_v40 }
0x12f7   :  { %v6779_v44 = vpop.permute.xlu0 %6778 }
0x12f8   :  { %v6758_v27 = vpop.permute.xlu1 %6757  ;;  %v6838_v18 = vrot.slane %v6779_v44, %v13129_v40 }
0x12f9   :  { %v6810_v34 = vrot.slane %v6758_v27, %v13129_v40 }
0x12fb   :  { %v6782_v31 = vpop.permute.xlu0 %6781 }
0x12fc   :  { %v6761_v61 = vpop.permute.xlu1 %6760  ;;  %v6842_v48 = vrot.slane %v6782_v31, %v13129_v40 }
0x12fd   :  { %v6814_v26 = vrot.slane %v6761_v61, %v13129_v40 }
0x12ff   :  { %v6785_v46 = vpop.permute.xlu0 %6784 }
0x1300   :  { %v6764_v42 = vpop.permute.xlu1 %6763  ;;  %v6846_v3 = vrot.slane %v6785_v46, %v13129_v40 }
0x1301   :  { %v6818_v54 = vrot.slane %v6764_v42, %v13129_v40 }
0x1303   :  { %v6788_v59 = vpop.permute.xlu0 %6787 }
0x1304   :  { %v6773_v35 = vpop.permute.xlu1 %6772  ;;  %v6850_v27 = vrot.slane %v6788_v59, %v13129_v40 }
0x1305   :  { %v6830_v49 = vrot.slane %v6773_v35, %v13129_v40 }
0x1307   :  { %v6866_v33 = vsel %vm924_vm0, %v6834_v0, %v6830_v49  ;;  %v6791_v37 = vpop.permute.xlu0 %6790  ;;  %v6860_v49 = vsel %vm926_vm1, %v6806_v63, %v6859_v53 }
0x1308   :  { %v6867_v39 = vsel %vm926_vm1, %v6838_v18, %v6866_v33  ;;  %v6767_v35 = vpop.permute.xlu1 %6766  ;;  %v6854_v31 = vrot.slane %v6791_v37, %v13129_v40  ;;  %v6861_v61 = vsel %vm928_vm2, %v6810_v34, %v6860_v49 }
0x1309   :  { %v6868_v44 = vsel %vm928_vm2, %v6842_v48, %v6867_v39  ;;  %v6822_v5 = vrot.slane %v6767_v35, %v13129_v40  ;;  %v6862_v18 = vsel %vm930_vm3, %v6814_v26, %v6861_v61 }
0x130a   :  { %v6869_v0 = vsel %vm930_vm3, %v6846_v3, %v6868_v44  ;;  %v6863_v59 = vsel %vm932_vm4, %v6818_v54, %v6862_v18 }
0x130b   :  { %v6870_v46 = vsel %vm932_vm4, %v6850_v27, %v6869_v0  ;;  %v6794_v33 = vpop.permute.xlu0 %6793  ;;  %v6864_v41 = vsel %vm934_vm5, %v6822_v5, %v6863_v59 }
0x130c   :  { %v6770_v42 = vpop.permute.xlu1 %6769  ;;  %v6858_v48 = vrot.slane %v6794_v33, %v13129_v40  ;;  %v6871_v63 = vsel %vm934_vm5, %v6854_v31, %v6870_v46 }
0x130d   :  { %v6826_v37 = vrot.slane %v6770_v42, %v13129_v40 }
0x130e   :  { %v6872_v3 = vsel %vm936_vm6, %v6858_v48, %v6871_v63 }
0x130f   :  { %v6878_v34 = vsel %vm947_vm7, %v6872_v3, 0.0  ;;  %v6865_v53 = vsel %vm936_vm6, %v6826_v37, %v6864_v41 }
0x1310   :  { %6879 = vadd.xlane.f32.xlu1 %v6878_v34  ;;  %v6875_v26 = vsel %vm947_vm7, %v6865_v53, 0.0 }
0x1311   :  { %6876 = vadd.xlane.f32.xlu0 %v6875_v26 }
0x1338   :  { %v6075_v39 = vpop.xlane.xlu0 %6074 }
0x1339   :  { %v6077_v35 = vsub.f32 %v12411_v28, %v6075_v39 }
0x133b   :  { %v6080_v54 = vmul.f32 1.442695, %v6077_v35 }
0x133d   :  { %9682 = vpow2.f32 %v6080_v54 }
0x133e   :  { %v6073_v44 = vpop.xlane.xlu1 %6072 }
0x133f   :  { %v6076_v27 = vsub.f32 %v12409_v12, %v6073_v44 }
0x1341   :  { %v6078_v31 = vmul.f32 1.442695, %v6076_v27 }
0x1343   :  { %9684 = vpow2.f32 %v6078_v31 }
0x134a   :  { %v12541_v49 = vpop.eup %9682 }
0x134b   :  { %6084 = vadd.xlane.f32.xlu1 %v12541_v49 }
0x1350   :  { %v9685_v0 = vpop.eup %9684 }
0x1351   :  { %6082 = vadd.xlane.f32.xlu0 %v9685_v0 }
0x1399   :  { %v6880_v5 = vpop.xlane.xlu1 %6879 }
0x139a   :  { %9686 = vrcp.f32 %v6880_v5  ;;  %v6877_v61 = vpop.xlane.xlu0 %6876 }
0x139b   :  { %9688 = vrcp.f32 %v6877_v61 }
0x13a7   :  { %v9687_v46 = vpop.eup %9686 }
0x13a8   :  { %v9689_v33 = vpop.eup %9688  ;;  %v6924_v59 = vrot.slane %v9687_v46, %v13109_v11  ;;  %v6928_v41 = vrot.slane %v9687_v46, %v13111_v50  ;;  %v6932_v53 = vrot.slane %v9687_v46, %v13110_v43  ;;  %v6936_v39 = vrot.slane %v9687_v46, %v13130_v56 }
0x13a9   :  { %v6892_v28 = vrot.slane %v9689_v33, %v13109_v11  ;;  %v6888_v18 = vrot.slane %v9689_v33, %v10785_v6  ;;  %v6896_v48 = vrot.slane %v9689_v33, %v13111_v50  ;;  %v6900_v3 = vrot.slane %v9689_v33, %v13110_v43 }
0x13aa   :  { %v6974_v63 = vmul.f32 %v12458_v55, %v6924_v59  ;;  %v6904_v34 = vrot.slane %v9689_v33, %v13130_v56  ;;  %v6976_v55 = vmul.f32 %v12475_v1, %v6932_v53  ;;  %v6908_v26 = vrot.slane %v9689_v33, %v13145_v57  ;;  %v10236_v59 = vld [vmem:[#allocation7 + $0xac] ss:$16 sps:$4 sm:$0xff]  }
0x13ab   :  { %v6966_v12 = vmul.f32 %v12452_v22, %v6892_v28  ;;  %v6965_v42 = vmul.f32 %v12447_v25, %v6888_v18  ;;  %v6967_v37 = vmul.f32 %v12463_v8, %v6896_v48  ;;  %v6968_v22 = vmul.f32 %v12471_v10, %v6900_v3  ;;  %v10233_v48 = vld [vmem:[#allocation7 + $0xc0] ss:$16 sps:$4 sm:$0xff]   ;;  %v10239_v3 = vld [vmem:[#allocation7 + $0x84] ss:$16 sps:$4 sm:$0xff]   ;;  %v10244_v53 = vld [vmem:[#allocation7 + $0x6c] ss:$16 sps:$4 sm:$0xff]  }
0x13ac   :  { %v6975_v25 = vmul.f32 %v12468_v9, %v6928_v41  ;;  %v6969_v8 = vmul.f32 %v12477_v58, %v6904_v34  ;;  %v6970_v10 = vmul.f32 %v12483_v16, %v6908_v26  ;;  %v6977_v9 = vmul.f32 %v12481_v24, %v6936_v39  ;;  %v10240_v41 = vld [vmem:[#allocation7 + $0x8c] ss:$16 sps:$4 sm:$0xff]   ;;  %v10243_v34 = vld [vmem:[#allocation7 + $0x64] ss:$16 sps:$4 sm:$0xff]  }
0x13ad   :  { %6988 = vperm.xlu1 %9200, %v6966_v12   ;;  %6983 = vperm.xlu0 %9199, %v6965_v42   ;;  %v6920_v35 = vrot.slane %v9687_v46, %v10785_v6  ;;  %v6940_v54 = vrot.slane %v9687_v46, %v13145_v57  ;;  %v6912_v44 = vrot.slane %v9689_v33, %v13172_v45  ;;  %v10230_v42 = vld [vmem:[#allocation7 + $0xe8] ss:$16 sps:$4 sm:$0xff]   ;;  %v10247_v26 = vld [vmem:[#allocation7 + $0x44] ss:$16 sps:$4 sm:$0xff]   ;;  %v10248_v39 = vld [vmem:[#allocation7 + $0x4c] ss:$16 sps:$4 sm:$0xff]  }
0x13ae   :  { %v6944_v27 = vrot.slane %v9687_v46, %v13172_v45  ;;  %v6916_v31 = vrot.slane %v9689_v33, %v13173_v30  ;;  %v6948_v5 = vrot.slane %v9687_v46, %v13173_v30  ;;  %v10229_v46 = vld [vmem:[#allocation7 + $0xe0] ss:$16 sps:$4 sm:$0xff]  }
0x13af   :  { %v6973_v58 = vmul.f32 %v12489_v29, %v6920_v35  ;;  %v6978_v1 = vmul.f32 %v12487_v47, %v6940_v54  ;;  %v6971_v16 = vmul.f32 %v12495_v13, %v6912_v44  ;;  %v10251_v35 = vld [vmem:[#allocation7 + $0x24] ss:$16 sps:$4 sm:$0xff]   ;;  %v10252_v54 = vld [vmem:[#allocation7 + $0x2c] ss:$16 sps:$4 sm:$0xff]  }
0x13b0   :  { %v6979_v24 = vmul.f32 %v12493_v19, %v6944_v27  ;;  %v6972_v29 = vmul.f32 %v12501_v23, %v6916_v31  ;;  %v6980_v47 = vmul.f32 %v12499_v14, %v6948_v5  ;;  %v10231_v23 = vld [vmem:[#allocation7 + $0xc4] ss:$16 sps:$4 sm:$0xff]   ;;  %v10232_v14 = vld [vmem:[#allocation7 + $0xcc] ss:$16 sps:$4 sm:$0xff]  }
0x13b1   :  { %6993 = vperm.xlu1 %9200, %v6967_v37   ;;  %7028 = vperm.xlu0 %9199, %v6974_v63   ;;  %v10237_v37 = vld [vmem:[#allocation7 + $0xa0] ss:$16 sps:$4 sm:$0xff]   ;;  %v10238_v63 = vld [vmem:[#allocation7 + $0xa8] ss:$16 sps:$4 sm:$0xff]   ;;  %v10255_v44 = vld [vmem:[#allocation7 + $0x4] ss:$16 sps:$4 sm:$0xff]  }
0x13b2   :  { %v10256_v27 = vld [vmem:[#allocation7 + $0xc] ss:$16 sps:$4 sm:$0xff]   ;;  %v10259_v31 = vld [vmem:[#allocation10 + $0xe4] ss:$16 sps:$4 sm:$0xff]  }
0x13b5   :  { %6998 = vperm.xlu1 %9200, %v6968_v22   ;;  %7033 = vperm.xlu0 %9199, %v6975_v25   ;;  %v10241_v22 = vld [vmem:[#allocation7 + $0x80] ss:$16 sps:$4 sm:$0xff]   ;;  %v10242_v25 = vld [vmem:[#allocation7 + $0x88] ss:$16 sps:$4 sm:$0xff]  }
0x13b9   :  { %7003 = vperm.xlu1 %9200, %v6969_v8   ;;  %7038 = vperm.xlu0 %9199, %v6976_v55   ;;  %v10245_v8 = vld [vmem:[#allocation7 + $0x60] ss:$16 sps:$4 sm:$0xff]   ;;  %v10246_v55 = vld [vmem:[#allocation7 + $0x68] ss:$16 sps:$4 sm:$0xff]  }
0x13bd   :  { %7008 = vperm.xlu1 %9200, %v6970_v10   ;;  %7043 = vperm.xlu0 %9199, %v6977_v9   ;;  %v10249_v10 = vld [vmem:[#allocation7 + $0x40] ss:$16 sps:$4 sm:$0xff]   ;;  %v10250_v9 = vld [vmem:[#allocation7 + $0x48] ss:$16 sps:$4 sm:$0xff]  }
0x13c1   :  { %7023 = vperm.xlu1 %9200, %v6973_v58   ;;  %7048 = vperm.xlu0 %9199, %v6978_v1   ;;  %v10253_v58 = vld [vmem:[#allocation7 + $0x20] ss:$16 sps:$4 sm:$0xff]   ;;  %v10254_v1 = vld [vmem:[#allocation7 + $0x28] ss:$16 sps:$4 sm:$0xff]  }
0x13c5   :  { %7013 = vperm.xlu1 %9200, %v6971_v16   ;;  %7053 = vperm.xlu0 %9199, %v6979_v24   ;;  %v10257_v16 = vld [vmem:[#allocation7] ss:$16 sps:$4 sm:$0xff]   ;;  %v10258_v24 = vld [vmem:[#allocation7 + $0x8] ss:$16 sps:$4 sm:$0xff]  }
0x13c9   :  { %7018 = vperm.xlu1 %9200, %v6972_v29   ;;  %7058 = vperm.xlu0 %9199, %v6980_v47   ;;  %v10260_v47 = vld [vmem:[#allocation2 + $0x8] sm:$0xff] }
0x13d4   :  { %v6085_v61 = vpop.xlane.xlu1 %6084 }
0x13d5   :  { %9690 = vrcp.f32 %v6085_v61 }
0x13da   :  { %v6083_v28 = vpop.xlane.xlu0 %6082 }
0x13db   :  { %9692 = vrcp.f32 %v6083_v28  ;;  %v10261_v28 = vld [vmem:[#allocation2] sm:$0xff] }
0x13e2   :  { %v9691_v18 = vpop.eup %9690 }
0x13e3   :  { %v6089_v19 = vmul.f32 %v9691_v18, %v12541_v49  ;;  %v10235_v49 = vld [vmem:[#allocation7 + $0xa4] ss:$16 sps:$4 sm:$0xff]  }
0x13e8   :  { %v9693_v13 = vpop.eup %9692 }
0x13e9   :  { %v6087_v12 = vmul.f32 %v9693_v13, %v9685_v0  ;;  %v10234_v0 = vld [vmem:[#allocation7 + $0xc8] ss:$16 sps:$4 sm:$0xff]  }
0x13eb   :  { %v6090_v33 = vpack.c.bf16 %v6089_v19, %v6087_v12 }
0x13ed   :  { %6210 = vmatmul.mubr.bf16.vlgmr.msra.gmra.mxu0 %v6090_v33  ;;  %6253 = vmatmul.mubr.bf16.vlgmr.msra.gmra.mxu1 %v6090_v33 }
0x13ee   :  { %7238 = vmatpush1.bf16.msra.mxu0 %v10229_v46  ;;  %7281 = vmatpush1.bf16.msra.mxu1 %v10230_v42 }
0x13ef   :  { %7239 = vmatprep.subr.bf16.mxu0 %v10231_v23  ;;  %7282 = vmatprep.subr.bf16.mxu1 %v10232_v14  ;;  %v10262_v23 = vld [vmem:[#allocation2 + $0x10] sm:$0xff] }
0x13f0   :  { %7269 = vmatprep.mubr.bf16.mxu0 %v13108_v38  ;;  %7312 = vmatprep.mubr.bf16.mxu1 %v13108_v38 }
0x13f2   :  { %7240 = vmatpush1.bf16.msra.mxu0 %v10233_v48  ;;  %7283 = vmatpush1.bf16.msra.mxu1 %v10234_v0  ;;  %v10263_v48 = vld [vmem:[#allocation2 + $0x48] sm:$0xff] }
0x13f3   :  { %7241 = vmatprep.subr.bf16.mxu0 %v10235_v49  ;;  %7284 = vmatprep.subr.bf16.mxu1 %v10236_v59 }
0x13f6   :  { %7242 = vmatpush1.bf16.msra.mxu0 %v10237_v37  ;;  %7285 = vmatpush1.bf16.msra.mxu1 %v10238_v63 }
0x13f7   :  { %7243 = vmatprep.subr.bf16.mxu0 %v10239_v3  ;;  %7286 = vmatprep.subr.bf16.mxu1 %v10240_v41 }
0x13fa   :  { %7244 = vmatpush1.bf16.msra.mxu0 %v10241_v22  ;;  %7287 = vmatpush1.bf16.msra.mxu1 %v10242_v25 }
0x13fb   :  { %7245 = vmatprep.subr.bf16.mxu0 %v10243_v34  ;;  %7288 = vmatprep.subr.bf16.mxu1 %v10244_v53 }
0x13fe   :  { %7246 = vmatpush1.bf16.msra.mxu0 %v10245_v8  ;;  %7289 = vmatpush1.bf16.msra.mxu1 %v10246_v55  ;;  %v10264_v8 = vld [vmem:[#allocation2 + $0x18] sm:$0xff] }
0x13ff   :  { %7247 = vmatprep.subr.bf16.mxu0 %v10247_v26  ;;  %7290 = vmatprep.subr.bf16.mxu1 %v10248_v39  ;;  %v10265_v26 = vld [vmem:[#allocation2 + $0x50] sm:$0xff] }
0x1402   :  { %7248 = vmatpush1.bf16.msra.mxu0 %v10249_v10  ;;  %7291 = vmatpush1.bf16.msra.mxu1 %v10250_v9 }
0x1403   :  { %7249 = vmatprep.subr.bf16.mxu0 %v10251_v35  ;;  %7292 = vmatprep.subr.bf16.mxu1 %v10252_v54 }
0x1406   :  { %7250 = vmatpush1.bf16.msra.mxu0 %v10253_v58  ;;  %7293 = vmatpush1.bf16.msra.mxu1 %v10254_v1 }
0x1407   :  { %7251 = vmatprep.subr.bf16.mxu0 %v10255_v44  ;;  %7294 = vmatprep.subr.bf16.mxu1 %v10256_v27 }
0x140a   :  { %7252 = vmatpush1.bf16.msra.mxu0 %v10257_v16  ;;  %7295 = vmatpush1.bf16.msra.mxu1 %v10258_v24 }
0x140b   :  { %9142 = vmatprep.subr.bf16.mxu0 %v13134_v7  ;;  %7451 = vmatprep.subr.bf16.mxu1 %v10259_v31 }
0x1428   :  { %v6989_v5 = vpop.permute.xlu1 %6988  ;;  %v6984_v29 = vpop.permute.xlu0 %6983 }
0x1429   :  { %v7062_v61 = vmul.f32 %v10260_v47, %v6989_v5  ;;  %v7061_v18 = vmul.f32 %v10261_v28, %v6984_v29  ;;  %v10266_v5 = vld [vmem:[#allocation2 + $0x20] sm:$0xff]  ;;  %v10267_v47 = vld [vmem:[#allocation2 + $0x58] sm:$0xff] }
0x142b   :  { %v7083_v13 = vrot.slane %v7062_v61, 4  ;;  %v7077_v12 = vrot.slane %v7061_v18, 4 }
0x142c   :  { %v6994_v19 = vpop.permute.xlu1 %6993  ;;  %v7029_v33 = vpop.permute.xlu0 %7028 }
0x142d   :  { %v7084_v46 = vadd.f32 %v7083_v13, %v7062_v61  ;;  %v7078_v42 = vadd.f32 %v7077_v12, %v7061_v18  ;;  %v7063_v14 = vmul.f32 %v10262_v23, %v6994_v19  ;;  %v7070_v0 = vmul.f32 %v10263_v48, %v7029_v33 }
0x142f   :  { %v7085_v49 = vrot.slane %v7084_v46, 2  ;;  %v7079_v59 = vrot.slane %v7078_v42, 2  ;;  %v7089_v37 = vrot.slane %v7063_v14, 4  ;;  %v7131_v63 = vrot.slane %v7070_v0, 4 }
0x1430   :  { %v6999_v3 = vpop.permute.xlu1 %6998  ;;  %v7034_v41 = vpop.permute.xlu0 %7033 }
0x1431   :  { %v7086_v22 = vadd.f32 %v7085_v49, %v7084_v46  ;;  %v7080_v25 = vadd.f32 %v7079_v59, %v7078_v42  ;;  %v7090_v34 = vadd.f32 %v7089_v37, %v7063_v14  ;;  %v7132_v53 = vadd.f32 %v7131_v63, %v7070_v0  ;;  %v10268_v59 = vld [vmem:[#allocation2 + $0x28] sm:$0xff] }
0x1432   :  { %v7064_v55 = vmul.f32 %v10264_v8, %v6999_v3  ;;  %v7071_v39 = vmul.f32 %v10265_v26, %v7034_v41 }
0x1433   :  { %v7091_v10 = vrot.slane %v7090_v34, 2  ;;  %v7133_v9 = vrot.slane %v7132_v53, 2  ;;  %v7087_v44 = vrot.slane %v7086_v22, 1  ;;  %v7081_v27 = vrot.slane %v7080_v25, 1 }
0x1434   :  { %v7095_v35 = vrot.slane %v7064_v55, 4  ;;  %v7137_v54 = vrot.slane %v7071_v39, 4  ;;  %v7004_v58 = vpop.permute.xlu1 %7003  ;;  %v7039_v1 = vpop.permute.xlu0 %7038 }
0x1435   :  { %v7134_v16 = vadd.f32 %v7133_v9, %v7132_v53  ;;  %v7065_v29 = vmul.f32 %v10266_v5, %v7004_v58  ;;  %v7072_v61 = vmul.f32 %v10267_v47, %v7039_v1  ;;  %v7092_v28 = vadd.f32 %v7091_v10, %v7090_v34  ;;  %v10270_v58 = vld [vmem:[#allocation2 + $0x40] sm:$0xff] }
0x1436   :  { %v7096_v24 = vadd.f32 %v7095_v35, %v7064_v55  ;;  %v7138_v31 = vadd.f32 %v7137_v54, %v7071_v39  ;;  %v7088_v42 = vadd.f32 %v7087_v44, %v7086_v22  ;;  %v7082_v23 = vadd.f32 %v7081_v27, %v7080_v25  ;;  %v10269_v55 = vld [vmem:[#allocation2 + $0x60] sm:$0xff] }
0x1437   :  { %v7101_v12 = vrot.slane %v7065_v29, 4  ;;  %v7143_v19 = vrot.slane %v7072_v61, 4  ;;  %v7135_v14 = vrot.slane %v7134_v16, 1  ;;  %v7093_v63 = vrot.slane %v7092_v28, 1 }
0x1438   :  { %v7097_v18 = vrot.slane %v7096_v24, 2  ;;  %v7139_v13 = vrot.slane %v7138_v31, 2  ;;  %v7009_v33 = vpop.permute.xlu1 %7008  ;;  %v7044_v46 = vpop.permute.xlu0 %7043  ;;  %v7174_v39 = vpack.c.bf16 %v7088_v42, %v7088_v42  ;;  %v7173_v10 = vpack.c.bf16 %v7082_v23, %v7082_v23 }
0x1439   :  { %v7144_v0 = vadd.f32 %v7143_v19, %v7072_v61  ;;  %v7102_v49 = vadd.f32 %v7101_v12, %v7065_v29  ;;  %v7066_v37 = vmul.f32 %v10268_v59, %v7009_v33  ;;  %v7073_v26 = vmul.f32 %v10269_v55, %v7044_v46  ;;  %v10271_v61 = vld [vmem:[#allocation2 + $0x68] sm:$0xff] }
0x143a   :  { %v7098_v48 = vadd.f32 %v7097_v18, %v7096_v24  ;;  %v7140_v3 = vadd.f32 %v7139_v13, %v7138_v31  ;;  %v7136_v9 = vadd.f32 %v7135_v14, %v7134_v16  ;;  %v12580_v44 = vadd.f32 %v7093_v63, %v7092_v28 }
0x143b   :  { %v7145_v41 = vrot.slane %v7144_v0, 2  ;;  %v7107_v34 = vrot.slane %v7066_v37, 4  ;;  %v7103_v22 = vrot.slane %v7102_v49, 2  ;;  %v7149_v54 = vrot.slane %v7073_v26, 4 }
0x143c   :  { %v7024_v53 = vpop.permute.xlu1 %7023  ;;  %v7049_v8 = vpop.permute.xlu0 %7048  ;;  %v7099_v35 = vrot.slane %v7098_v48, 1  ;;  %v7141_v27 = vrot.slane %v7140_v3, 1  ;;  %v12582_v12 = vunpack.c.l.b16 %v7174_v39  ;;  %v12584_v16 = vunpack.c.l.b16 %v7173_v10  ;;  %v10273_v39 = vld [vmem:[#allocation2 + $0x70] sm:$0xff] }
0x143d   :  { %v7108_v25 = vadd.f32 %v7107_v34, %v7066_v37  ;;  %v7069_v1 = vmul.f32 %v10270_v58, %v7024_v53  ;;  %v7146_v24 = vadd.f32 %v7145_v41, %v7144_v0  ;;  %v7150_v29 = vadd.f32 %v7149_v54, %v7073_v26  ;;  %v10272_v37 = vld [vmem:[#allocation2 + $0x30] sm:$0xff] }
0x143e   :  { %v7074_v18 = vmul.f32 %v10271_v61, %v7049_v8  ;;  %v7182_v19 = vpack.c.bf16 %v7136_v9, %v7136_v9  ;;  %v12586_v33 = vadd.f32 %v7099_v35, %v7098_v48  ;;  %v7104_v46 = vadd.f32 %v7103_v22, %v7102_v49 }
0x143f   :  { %v7109_v5 = vrot.slane %v7108_v25, 2  ;;  %v7125_v47 = vrot.slane %v7069_v1, 4  ;;  %v7151_v42 = vrot.slane %v7150_v29, 2  ;;  %v7175_v14 = vpack.c.bf16 %v12580_v44, %v12580_v44 }
0x1440   :  { %v7014_v31 = vpop.permute.xlu1 %7013  ;;  %v7054_v13 = vpop.permute.xlu0 %7053  ;;  %v7155_v23 = vrot.slane %v7074_v18, 4  ;;  %v7142_v0 = vadd.f32 %v7141_v27, %v7140_v3  ;;  %v7147_v59 = vrot.slane %v7146_v24, 1  ;;  %v7214_v26 = vunpack.c.l.b16 %v7182_v19 }
0x1441   :  { %v7126_v28 = vadd.f32 %v7125_v47, %v7069_v1  ;;  %v7067_v63 = vmul.f32 %v10272_v37, %v7014_v31  ;;  %v7110_v41 = vadd.f32 %v7109_v5, %v7108_v25  ;;  %v7152_v53 = vadd.f32 %v7151_v42, %v7150_v29  ;;  %v10274_v25 = vld [vmem:[#allocation2 + $0x38] sm:$0xff] }
0x1442   :  { %v7156_v34 = vadd.f32 %v7155_v23, %v7074_v18  ;;  %v7176_v48 = vpack.c.bf16 %v12586_v33, %v12586_v33  ;;  %v7075_v10 = vmul.f32 %v10273_v39, %v7054_v13  ;;  %v7105_v9 = vrot.slane %v7104_v46, 1  ;;  %v10275_v33 = vld [vmem:[#allocation2 + $0x78] sm:$0xff] }
0x1443   :  { %v7127_v8 = vrot.slane %v7126_v28, 2  ;;  %v7113_v49 = vrot.slane %v7067_v63, 4  ;;  %v7153_v35 = vrot.slane %v7152_v53, 1  ;;  %v7183_v58 = vpack.c.bf16 %v7142_v0, %v7142_v0 }
0x1444   :  { %v7019_v55 = vpop.permute.xlu1 %7018  ;;  %v7157_v54 = vrot.slane %v7156_v34, 2  ;;  %v7059_v3 = vpop.permute.xlu0 %7058  ;;  %v7161_v44 = vrot.slane %v7075_v10, 4  ;;  %v7148_v31 = vadd.f32 %v7147_v59, %v7146_v24  ;;  %v7111_v5 = vrot.slane %v7110_v41, 1 }
0x1445   :  { %v7128_v22 = vadd.f32 %v7127_v8, %v7126_v28  ;;  %v7114_v1 = vadd.f32 %v7113_v49, %v7067_v63  ;;  %v7068_v27 = vmul.f32 %v10274_v25, %v7019_v55  ;;  %v7076_v42 = vmul.f32 %v10275_v33, %v7059_v3 }
0x1446   :  { %v7158_v47 = vadd.f32 %v7157_v54, %v7156_v34  ;;  %v7162_v18 = vadd.f32 %v7161_v44, %v7075_v10  ;;  %v7106_v13 = vadd.f32 %v7105_v9, %v7104_v46  ;;  %v7154_v23 = vadd.f32 %v7153_v35, %v7152_v53 }
0x1447   :  { %v7129_v29 = vrot.slane %v7128_v22, 1  ;;  %v7115_v61 = vrot.slane %v7114_v1, 2  ;;  %v7119_v19 = vrot.slane %v7068_v27, 4  ;;  %v7167_v63 = vrot.slane %v7076_v42, 4 }
0x1448   :  { %v7159_v28 = vrot.slane %v7158_v47, 1  ;;  %v7163_v39 = vrot.slane %v7162_v18, 2  ;;  %v7215_v49 = vunpack.c.l.b16 %v7183_v58  ;;  %v7184_v30 = vpack.c.bf16 %v7148_v31, %v7148_v31 }
0x1449   :  { %v7130_v37 = vadd.f32 %v7129_v29, %v7128_v22  ;;  %v7116_v8 = vadd.f32 %v7115_v61, %v7114_v1  ;;  %v7120_v0 = vadd.f32 %v7119_v19, %v7068_v27  ;;  %v7112_v55 = vadd.f32 %v7111_v5, %v7110_v41 }
0x144a   :  { %v7164_v25 = vadd.f32 %v7163_v39, %v7162_v18  ;;  %v7168_v54 = vadd.f32 %v7167_v63, %v7076_v42  ;;  %v7177_v10 = vpack.c.bf16 %v7106_v13, %v7106_v13  ;;  %v7185_v44 = vpack.c.bf16 %v7154_v23, %v7154_v23 }
0x144b   :  { %v7181_v24 = vpack.c.bf16 %v7130_v37, %v7130_v37  ;;  %v7117_v59 = vrot.slane %v7116_v8, 1  ;;  %v7121_v34 = vrot.slane %v7120_v0, 2  ;;  %v7160_v3 = vadd.f32 %v7159_v28, %v7158_v47 }
0x144c   :  { %v7165_v53 = vrot.slane %v7164_v25, 1  ;;  %v7169_v35 = vrot.slane %v7168_v54, 2  ;;  %v7207_v22 = vunpack.c.l.b16 %v7175_v14  ;;  %v7216_v1 = vunpack.c.l.b16 %v7184_v30 }
0x144d   :  { %v7213_v45 = vunpack.c.l.b16 %v7181_v24  ;;  %v7118_v46 = vadd.f32 %v7117_v59, %v7116_v8  ;;  %v7122_v9 = vadd.f32 %v7121_v34, %v7120_v0  ;;  %v7178_v27 = vpack.c.bf16 %v7112_v55, %v7112_v55 }
0x144e   :  { %v7166_v5 = vadd.f32 %v7165_v53, %v7164_v25  ;;  %v7208_v61 = vunpack.c.l.b16 %v7176_v48  ;;  %v7186_v19 = vpack.c.bf16 %v7160_v3, %v7160_v3  ;;  %v7170_v33 = vadd.f32 %v7169_v35, %v7168_v54  ;;  %v10276_v3 = vld [vmem:[#allocation11 + $0x38] sm:$0xff]   ;;  %v10278_v53 = vld [vmem:[#allocation10 + $0xc4] ss:$16 sps:$4 sm:$0xff]   ;;  %v10280_v35 = vld [vmem:[#allocation10 + $0xc0] ss:$16 sps:$4 sm:$0xff]  }
0x144f   :  { %v7228_v58 = vsel %vm924_vm0, %v7214_v26, %v7213_v45  ;;  %v7179_v31 = vpack.c.bf16 %v7118_v46, %v7118_v46  ;;  %v7123_v29 = vrot.slane %v7122_v9, 1  ;;  %v7209_v47 = vunpack.c.l.b16 %v7177_v10  ;;  %v10277_v46 = vld [vmem:[#allocation10 + $0xe0] ss:$16 sps:$4 sm:$0xff]  }
0x1450   :  { %v7229_v41 = vsel %vm926_vm1, %v7215_v49, %v7228_v58  ;;  %v7217_v42 = vunpack.c.l.b16 %v7185_v44  ;;  %v7187_v13 = vpack.c.bf16 %v7166_v5, %v7166_v5  ;;  %v7221_v30 = vsel %vm924_vm0, %v12582_v12, %v12584_v16  ;;  %v10284_v58 = vld [vmem:[#allocation10 + $0x84] ss:$16 sps:$4 sm:$0xff]  }
0x1451   :  { %v7230_v18 = vsel %vm928_vm2, %v7216_v1, %v7229_v41  ;;  %v7124_v23 = vadd.f32 %v7123_v29, %v7122_v9  ;;  %v7210_v14 = vunpack.c.l.b16 %v7178_v27  ;;  %v7171_v45 = vrot.slane %v7170_v33, 1  ;;  %v10279_v9 = vld [vmem:[#allocation11 + $0x30] sm:$0xff]   ;;  %v10282_v1 = vld [vmem:[#allocation11 + $0x28] sm:$0xff]   ;;  %v10285_v41 = vld [vmem:[#allocation11 + $0x20] sm:$0xff]  }
0x1452   :  { %v7222_v26 = vsel %vm926_vm1, %v7207_v22, %v7221_v30  ;;  %v7231_v37 = vsel %vm930_vm3, %v7217_v42, %v7230_v18  ;;  %v7211_v28 = vunpack.c.l.b16 %v7179_v31  ;;  %v7218_v39 = vunpack.c.l.b16 %v7186_v19  ;;  %v10281_v22 = vld [vmem:[#allocation10 + $0xa4] ss:$16 sps:$4 sm:$0xff]   ;;  %v10283_v27 = vld [vmem:[#allocation10 + $0xa0] ss:$16 sps:$4 sm:$0xff]   ;;  %v10288_v29 = vld [vmem:[#allocation11 + $0x18] sm:$0xff]  }
0x1453   :  { %v7180_v48 = vpack.c.bf16 %v7124_v23, %v7124_v23  ;;  %v7223_v8 = vsel %vm928_vm2, %v7208_v61, %v7222_v26  ;;  %v7172_v0 = vadd.f32 %v7171_v45, %v7170_v33  ;;  %v7219_v49 = vunpack.c.l.b16 %v7187_v13  ;;  %v10286_v31 = vld [vmem:[#allocation10 + $0x80] ss:$16 sps:$4 sm:$0xff]   ;;  %v10287_v5 = vld [vmem:[#allocation10 + $0x64] ss:$16 sps:$4 sm:$0xff]   ;;  %v10294_v42 = vld [vmem:[#allocation11 + $0x8] sm:$0xff]  }
0x1454   :  { %v7224_v63 = vsel %vm930_vm3, %v7209_v47, %v7223_v8  ;;  %v7232_v12 = vsel %vm932_vm4, %v7218_v39, %v7231_v37  ;;  %v10289_v61 = vld [vmem:[#allocation10 + $0x60] ss:$16 sps:$4 sm:$0xff]   ;;  %v10290_v18 = vld [vmem:[#allocation10 + $0x44] ss:$16 sps:$4 sm:$0xff]   ;;  %v10299_v45 = vld [vmem:[#allocation10 + $0xec] ss:$16 sps:$4 sm:$0xff]   ;;  %v6125_v37 = vpop.f32.mrf.mxu0 }
0x1455   :  { %v7212_v55 = vunpack.c.l.b16 %v7180_v48  ;;  %v7225_v24 = vsel %vm932_vm4, %v7210_v14, %v7224_v63  ;;  %v7188_v16 = vpack.c.bf16 %v7172_v0, %v7172_v0  ;;  %v7233_v54 = vsel %vm934_vm5, %v7219_v49, %v7232_v12  ;;  %v10291_v19 = vld [vmem:[#allocation11 + $0x10] sm:$0xff]   ;;  %v10297_v30 = vld [vmem:[#allocation11] sm:$0xff]  }
0x1456   :  { %v7226_v59 = vsel %vm934_vm5, %v7211_v28, %v7225_v24  ;;  %v10292_v33 = vld [vmem:[#allocation10 + $0x40] ss:$16 sps:$4 sm:$0xff]   ;;  %v10293_v47 = vld [vmem:[#allocation10 + $0x24] ss:$16 sps:$4 sm:$0xff]   ;;  %v6168_v28 = vpop.f32.mrf.mxu1  ;;  %v6127_v48 = vpop.f32.mrf.mxu0 }
0x1457   :  { %v7220_v25 = vunpack.c.l.b16 %v7188_v16  ;;  %v7227_v34 = vsel %vm936_vm6, %v7212_v55, %v7226_v59  ;;  %v10295_v13 = vld [vmem:[#allocation10 + $0x20] ss:$16 sps:$4 sm:$0xff]   ;;  %v10296_v23 = vld [vmem:[#allocation10 + $0x4] ss:$16 sps:$4 sm:$0xff]  }
0x1458   :  { %v10298_v14 = vld [vmem:[#allocation10] ss:$16 sps:$4 sm:$0xff]   ;;  %v10300_v26 = vld [vmem:[#allocation8 + $0xe4] ss:$16 sps:$4 sm:$0xff]   ;;  %v6170_v8 = vpop.f32.mrf.mxu1  ;;  %v6129_v39 = vpop.f32.mrf.mxu0 }
0x1459   :  { %v7234_v10 = vsel %vm936_vm6, %v7220_v25, %v7233_v54 }
0x145a   :  { %v7235_v44 = vpack.c.b16 %v7234_v10, %v7227_v34  ;;  %v6172_v0 = vpop.f32.mrf.mxu1  ;;  %v6131_v63 = vpop.f32.mrf.mxu0 }
0x145c   :  { %7270 = vmatmul.mubr.bf16.vlgmr.msra.gmra.mxu0 %v7235_v44  ;;  %7313 = vmatmul.mubr.bf16.vlgmr.msra.gmra.mxu1 %v7235_v44  ;;  %v6174_v49 = vpop.f32.mrf.mxu1 }
0x145d   :  { %9143 = vmatpush3.bf16.msra.mxu0 %v10276_v3  ;;  %7452 = vmatpush1.bf16.msra.mxu1 %v10277_v46 }
0x145e   :  { %9144 = vmatprep.subr.bf16.mxu0 %v13134_v7  ;;  %7453 = vmatprep.subr.bf16.mxu1 %v10278_v53 }
0x145f   :  { %9158 = vmatprep.mubr.msk.bf16.mxu0 %vm10569_vm8, %v13134_v7  ;;  %7483 = vmatprep.mubr.bf16.mxu1 %v13108_v38 }
0x1461   :  { %9145 = vmatpush3.bf16.msra.mxu0 %v10279_v9  ;;  %7454 = vmatpush1.bf16.msra.mxu1 %v10280_v35 }
0x1462   :  { %9146 = vmatprep.subr.bf16.mxu0 %v13134_v7  ;;  %7455 = vmatprep.subr.bf16.mxu1 %v10281_v22 }
0x1465   :  { %9147 = vmatpush3.bf16.msra.mxu0 %v10282_v1  ;;  %7456 = vmatpush1.bf16.msra.mxu1 %v10283_v27 }
0x1466   :  { %9148 = vmatprep.subr.bf16.mxu0 %v13134_v7  ;;  %7457 = vmatprep.subr.bf16.mxu1 %v10284_v58 }
0x1469   :  { %9149 = vmatpush3.bf16.msra.mxu0 %v10285_v41  ;;  %7458 = vmatpush1.bf16.msra.mxu1 %v10286_v31 }
0x146a   :  { %9150 = vmatprep.subr.bf16.mxu0 %v13134_v7  ;;  %7459 = vmatprep.subr.bf16.mxu1 %v10287_v5 }
0x146d   :  { %9151 = vmatpush3.bf16.msra.mxu0 %v10288_v29  ;;  %7460 = vmatpush1.bf16.msra.mxu1 %v10289_v61 }
0x146e   :  { %9152 = vmatprep.subr.bf16.mxu0 %v13134_v7  ;;  %7461 = vmatprep.subr.bf16.mxu1 %v10290_v18 }
0x1471   :  { %9153 = vmatpush3.bf16.msra.mxu0 %v10291_v19  ;;  %7462 = vmatpush1.bf16.msra.mxu1 %v10292_v33 }
0x1472   :  { %9154 = vmatprep.subr.bf16.mxu0 %v13134_v7  ;;  %7463 = vmatprep.subr.bf16.mxu1 %v10293_v47 }
0x1475   :  { %9155 = vmatpush3.bf16.msra.mxu0 %v10294_v42  ;;  %7464 = vmatpush1.bf16.msra.mxu1 %v10295_v13 }
0x1476   :  { %9156 = vmatprep.subr.bf16.mxu0 %v13134_v7  ;;  %7465 = vmatprep.subr.bf16.mxu1 %v10296_v23 }
0x1479   :  { %9157 = vmatpush3.bf16.msra.mxu0 %v10297_v30  ;;  %7466 = vmatpush1.bf16.msra.mxu1 %v10298_v14 }
0x147a   :  { %7494 = vmatprep.subr.bf16.mxu0 %v10299_v45  ;;  %7537 = vmatprep.subr.bf16.mxu1 %v10300_v26 }
0x14ad   :  { %v6211_v55 = vpop.f32.mrf.mxu0  ;;  %v6254_v24 = vpop.f32.mrf.mxu1 }
0x14ae   :  { %v6212_v25 = vadd.f32 %v6211_v55, %v6125_v37  ;;  %v6255_v26 = vadd.f32 %v6254_v24, %v6168_v28 }
0x14af   :  { %v6213_v12 = vpop.f32.mrf.mxu0  ;;  %v6256_v16 = vpop.f32.mrf.mxu1 }
0x14b0   :  { %v6214_v54 = vadd.f32 %v6213_v12, %v6127_v48  ;;  %v6263_v46 = vadd.f32 %v6212_v25, %v11097_v36  ;;  %v6257_v33 = vadd.f32 %v6256_v16, %v6170_v8  ;;  %v6265_v55 = vadd.f32 %v6255_v26, %v11111_v32 }
0x14b1   :  { %v6215_v59 = vpop.f32.mrf.mxu0  ;;  %v6258_v34 = vpop.f32.mrf.mxu1 }
0x14b2   :  { %v6216_v44 = vadd.f32 %v6215_v59, %v6129_v39  ;;  %v6264_v1 = vadd.f32 %v6214_v54, %v11100_v4  ;;  %v6266_v45 = vadd.f32 %v6257_v33, %v11107_v15 }
0x14b3   :  { %v6217_v10 = vpop.f32.mrf.mxu0  ;;  %v6260_v3 = vpop.f32.mrf.mxu1 }
0x14b4   :  { %v6218_v9 = vadd.f32 %v6217_v10, %v6131_v63  ;;  %v6267_v31 = vadd.f32 %v6216_v44, %v11097_v36  ;;  %v6261_v14 = vadd.f32 %v6260_v3, %v6174_v49  ;;  %v6259_v63 = vadd.f32 %v6258_v34, %v6172_v0 }
0x14b6   :  { %v6268_v19 = vadd.f32 %v6218_v9, %v11100_v4  ;;  %v6270_v39 = vadd.f32 %v6261_v14, %v11107_v15  ;;  %v6269_v49 = vadd.f32 %v6259_v63, %v11111_v32 }
0x151c   :  { %v7271_v53 = vpop.f32.mrf.mxu0  ;;  %v7314_v22 = vpop.f32.mrf.mxu1 }
0x151d   :  { %v7323_v35 = vadd.f32 %v7271_v53, %v6263_v46  ;;  %v7325_v59 = vadd.f32 %v7314_v22, %v6265_v55 }
0x151e   :  { %v7273_v27 = vpop.f32.mrf.mxu0  ;;  %v7316_v61 = vpop.f32.mrf.mxu1 }
0x151f   :  { %v8950_v58 = vmul.f32 -1.442695, %v7323_v35  ;;  %v7324_v41 = vadd.f32 %v7273_v27, %v6264_v1  ;;  %v7326_v37 = vadd.f32 %v7316_v61, %v6266_v45 }
0x1520   :  { %v7275_v5 = vpop.f32.mrf.mxu0  ;;  %v7318_v23 = vpop.f32.mrf.mxu1 }
0x1521   :  { %9694 = vpow2.f32 %v8950_v58  ;;  %v8952_v29 = vmul.f32 -1.442695, %v7324_v41  ;;  %v7327_v18 = vadd.f32 %v7275_v5, %v6267_v31  ;;  %v8954_v8 = vmul.f32 -1.442695, %v7326_v37 }
0x1522   :  { %v7277_v47 = vpop.f32.mrf.mxu0  ;;  %v7320_v48 = vpop.f32.mrf.mxu1  ;;  %v7329_v24 = vadd.f32 %v7318_v23, %v6269_v49 }
0x1523   :  { %9696 = vpow2.f32 %v8952_v29  ;;  %v8951_v42 = vmul.f32 -1.442695, %v7327_v18  ;;  %v7328_v13 = vadd.f32 %v7277_v47, %v6268_v19  ;;  %v7330_v12 = vadd.f32 %v7320_v48, %v6270_v39 }
0x1525   :  { %9698 = vpow2.f32 %v8951_v42  ;;  %v8953_v30 = vmul.f32 -1.442695, %v7328_v13  ;;  %v8955_v10 = vmul.f32 -1.442695, %v7330_v12 }
0x1527   :  { %9700 = vpow2.f32 %v8953_v30 }
0x1528   :  { %9702 = vpow2.f32 %v8954_v8 }
0x152e   :  { %v9695_v16 = vpop.eup %9694 }
0x152f   :  { %v7337_v25 = vadd.f32 1.0, %v9695_v16 }
0x1530   :  { %v9697_v54 = vpop.eup %9696 }
0x1531   :  { %9704 = vrcp.f32 %v7337_v25  ;;  %v7349_v44 = vadd.f32 1.0, %v9697_v54  ;;  %v10301_v54 = vld [vmem:[#allocation10 + $0xe8] ss:$16 sps:$4 sm:$0xff]  }
0x1532   :  { %v9699_v28 = vpop.eup %9698  ;;  %9706 = vtanh.f32 %v7325_v59 }
0x1533   :  { %9708 = vrcp.f32 %v7349_v44  ;;  %v7338_v3 = vadd.f32 1.0, %v9699_v28  ;;  %v10302_v28 = vld [vmem:[#allocation10 + $0xcc] ss:$16 sps:$4 sm:$0xff]  }
0x1534   :  { %v9701_v0 = vpop.eup %9700  ;;  %9710 = vpow2.f32 %v8955_v10 }
0x1535   :  { %9712 = vrcp.f32 %v7338_v3  ;;  %v7350_v34 = vadd.f32 1.0, %v9701_v0  ;;  %v9703_v46 = vpop.eup %9702 }
0x1536   :  { %9714 = vtanh.f32 %v7329_v24  ;;  %v7363_v22 = vadd.f32 1.0, %v9703_v46  ;;  %v10303_v46 = vld [vmem:[#allocation10 + $0xc8] ss:$16 sps:$4 sm:$0xff]  }
0x1537   :  { %9716 = vrcp.f32 %v7350_v34 }
0x1538   :  { %9718 = vrcp.f32 %v7363_v22 }
0x153e   :  { %v9705_v53 = vpop.eup %9704 }
0x153f   :  { %v9707_v9 = vpop.eup %9706 }
0x1540   :  { %v9709_v35 = vpop.eup %9708  ;;  %v7371_v27 = vmul.f32 %v9707_v9, %v9705_v53  ;;  %v10304_v9 = vld [vmem:[#allocation10 + $0xac] ss:$16 sps:$4 sm:$0xff]  }
0x1541   :  { %v9711_v1 = vpop.eup %9710  ;;  %v7369_v58 = vmul.f32 %v9709_v35, %v12252_v62 }
0x1542   :  { %v9713_v41 = vpop.eup %9712  ;;  %v7364_v61 = vadd.f32 1.0, %v9711_v1 }
0x1543   :  { %v9715_v31 = vpop.eup %9714  ;;  %v12627_v5 = vadd.f32 %v7371_v27, %v7369_v58  ;;  %v10305_v27 = vld [vmem:[#allocation8 + $0xe0] ss:$16 sps:$4 sm:$0xff]  }
0x1544   :  { %v9717_v29 = vpop.eup %9716  ;;  %v7372_v18 = vmul.f32 %v9715_v31, %v9713_v41  ;;  %v10306_v41 = vld [vmem:[#allocation10 + $0xa8] ss:$16 sps:$4 sm:$0xff]  }
0x1545   :  { %9720 = vtanh.f32 %v12627_v5  ;;  %v7370_v19 = vmul.f32 %v9717_v29, %v12256_v20  ;;  %v9719_v47 = vpop.eup %9718 }
0x1546   :  { %9722 = vrcp.f32 %v7364_v61  ;;  %v10307_v61 = vld [vmem:[#allocation10 + $0x8c] ss:$16 sps:$4 sm:$0xff]  }
0x1547   :  { %v12631_v33 = vadd.f32 %v7372_v18, %v7370_v19  ;;  %v13174_v18 = vld [vmem:[#allocation23_spill] sm:$0xff] }
0x1549   :  { %9724 = vtanh.f32 %v12631_v33 }
0x1552   :  { %v9721_v42 = vpop.eup %9720 }
0x1553   :  { %v7377_v62 = vmul.f32 %v9721_v42, %v9719_v47  ;;  %v9723_v13 = vpop.eup %9722 }
0x1555   :  { %v7640_v23 = vrot.slane %v7377_v62, %v11123_v21  ;;  %v7633_v30 = vcombine.high %v7377_v62, %v7377_v62 }
0x1556   :  { %v9725_v14 = vpop.eup %9724 }
0x1557   :  { %v7378_v45 = vmul.f32 %v9725_v14, %v9723_v13  ;;  %v7656_v26 = vrot.slane %v7640_v23, %v11123_v21  ;;  %v7648_v37 = vcombine.high %v7640_v23, %v7640_v23  ;;  %v12637_v48 = vrot.slane %v7633_v30, %v11123_v21  ;;  %v10309_v13 = vld [vmem:[#allocation8 + $0xc0] ss:$16 sps:$4 sm:$0xff]   ;;  %v10311_v14 = vld [vmem:[#allocation8 + $0xa4] ss:$16 sps:$4 sm:$0xff]  }
0x1559   :  { %v12639_v20 = vpack.c.bf16 %v7378_v45, %v7377_v62  ;;  %v7734_v39 = vrot.slane %v7656_v26, %v10785_v6  ;;  %v7670_v63 = vrot.slane %v7648_v37, %v11123_v21  ;;  %v7689_v55 = vrot.slane %v7378_v45, %v11123_v21  ;;  %v10308_v62 = vld [vmem:[#allocation8 + $0xc4] ss:$16 sps:$4 sm:$0xff]  }
0x155a   :  { %v7678_v8 = vcombine.high %v7656_v26, %v7656_v26  ;;  %v7682_v12 = vcombine.high %v7378_v45, %v7378_v45  ;;  %v12652_v44 = vrot.slane %v12637_v48, %v11123_v21  ;;  %v7649_v58 = vcombine.high %v12637_v48, %v12637_v48  ;;  %v10312_v45 = vld [vmem:[#allocation10 + $0x6c] ss:$16 sps:$4 sm:$0xff]   ;;  %v13175_v26 = vld [vmem:[#allocation27_spill] sm:$0xff] }
0x155b   :  { %9159 = vmatmul.mubr.bf16.vlgmr.msra.gmra.mxu0 %v12639_v20  ;;  %7484 = vmatmul.mubr.bf16.vlgmr.msra.gmra.mxu1 %v12639_v20  ;;  %v7811_v16 = vmul.f32 %v7734_v39, %v13113_v51  ;;  %v7738_v59 = vrot.slane %v7670_v63, %v10785_v6  ;;  %v7697_v25 = vcombine.high %v7689_v55, %v7689_v55  ;;  %v13176_v48 = vld [vmem:[#allocation19_spill] sm:$0xff] }
0x155c   :  { %7495 = vmatpush1.bf16.msra.mxu0 %v10301_v54  ;;  %v7742_v49 = vrot.slane %v7678_v8, %v10785_v6  ;;  %v7705_v10 = vrot.slane %v7689_v55, %v11123_v21  ;;  %v7696_v3 = vrot.slane %v7682_v12, %v11123_v21  ;;  %7526 = vmatprep.mubr.bf16.mxu0 %v13108_v38  ;;  %v10313_v8 = vld [vmem:[#allocation8 + $0xa0] ss:$16 sps:$4 sm:$0xff]   ;;  %v10314_v12 = vld [vmem:[#allocation10 + $0x68] ss:$16 sps:$4 sm:$0xff]   ;;  %v10315_v54 = vld [vmem:[#allocation8 + $0x84] ss:$16 sps:$4 sm:$0xff]  }
0x155d   :  { %7827 = vadd.xlane.f32.xlu1 %v7811_v16  ;;  %7496 = vmatprep.subr.bf16.mxu0 %v10302_v28  ;;  %v7812_v24 = vmul.f32 %v7738_v59, %v13114_v2  ;;  %v7719_v51 = vrot.slane %v7697_v25, %v11123_v21  ;;  %v7750_v53 = vrot.slane %v12652_v44, %v10785_v6  ;;  %v13177_v16 = vld [vmem:[#allocation26_spill] sm:$0xff] }
0x155e   :  { %v7727_v0 = vcombine.high %v7705_v10, %v7705_v10  ;;  %v7813_v2 = vmul.f32 %v7742_v49, %v13115_v17  ;;  %v12665_v1 = vrot.slane %v7696_v3, %v11123_v21  ;;  %7538 = vmatpush1.bf16.msra.mxu1 %v10305_v27  ;;  %v7680_v17 = vcombine.high %v7670_v63, %v7670_v63  ;;  %v10316_v49 = vld [vmem:[#allocation10 + $0x4c] ss:$16 sps:$4 sm:$0xff]  }
0x155f   :  { %7829 = vadd.xlane.f32.xlu0 %v7812_v24  ;;  %v7770_v34 = vrot.slane %v7719_v51, %v10785_v6  ;;  %v7815_v31 = vmul.f32 %v7750_v53, %v13117_v52  ;;  %v7729_v29 = vcombine.high %v7719_v51, %v7719_v51  ;;  %v7698_v42 = vcombine.high %v7696_v3, %v7696_v3  ;;  %v10310_v52 = vld [vmem:[#allocation10 + $0x88] ss:$16 sps:$4 sm:$0xff]   ;;  %v10317_v3 = vld [vmem:[#allocation8 + $0x80] ss:$16 sps:$4 sm:$0xff]   ;;  %v10319_v53 = vld [vmem:[#allocation8 + $0x64] ss:$16 sps:$4 sm:$0xff]  }
0x1560   :  { %7497 = vmatpush1.bf16.msra.mxu0 %v10303_v46  ;;  %v7774_v22 = vrot.slane %v7727_v0, %v10785_v6  ;;  %v7782_v47 = vrot.slane %v12665_v1, %v10785_v6  ;;  %7539 = vmatprep.subr.bf16.mxu1 %v10308_v62  ;;  %v7746_v23 = vrot.slane %v7680_v17, %v10785_v6  ;;  %v10318_v0 = vld [vmem:[#allocation10 + $0x48] ss:$16 sps:$4 sm:$0xff]  }
0x1561   :  { %7498 = vmatprep.subr.bf16.mxu0 %v10304_v9  ;;  %v7820_v35 = vmul.f32 %v7770_v34, %v13116_v60  ;;  %v7766_v60 = vrot.slane %v7705_v10, %v10785_v6  ;;  %7569 = vmatprep.mubr.bf16.mxu1 %v13108_v38  ;;  %v7677_v30 = vrot.slane %v7649_v58, %v11123_v21  ;;  %v13178_v10 = vld [vmem:[#allocation25_spill] sm:$0xff]  ;;  %v13179_v34 = vld [vmem:[#allocation30_spill] sm:$0xff] }
0x1562   :  { %v7821_v19 = vmul.f32 %v7774_v22, %v13174_v18  ;;  %7540 = vmatpush1.bf16.msra.mxu1 %v10309_v13  ;;  %v7823_v37 = vmul.f32 %v7782_v47, %v13175_v26  ;;  %v7778_v63 = vrot.slane %v7729_v29, %v10785_v6  ;;  %v7726_v55 = vrot.slane %v7698_v42, %v11123_v21  ;;  %v10320_v9 = vld [vmem:[#allocation10 + $0x2c] ss:$16 sps:$4 sm:$0xff]   ;;  %v10321_v58 = vld [vmem:[#allocation8 + $0x60] ss:$16 sps:$4 sm:$0xff]   ;;  %v10326_v62 = vld [vmem:[#allocation10 + $0x8] ss:$16 sps:$4 sm:$0xff]  }
0x1563   :  { %7845 = vadd.xlane.f32.xlu1 %v7820_v35  ;;  %7831 = vadd.xlane.f32.xlu0 %v7813_v2  ;;  %v7819_v39 = vmul.f32 %v7766_v60, %v13176_v48  ;;  %v7814_v59 = vmul.f32 %v7746_v23, %v13177_v16  ;;  %v7754_v25 = vrot.slane %v7677_v30, %v10785_v6  ;;  %v13180_v35 = vld [vmem:[#allocation29_spill] sm:$0xff]  ;;  %v10324_v60 = vld [vmem:[#allocation10 + $0xc] ss:$16 sps:$4 sm:$0xff]   ;;  %v13181_v29 = vld [vmem:[#allocation31_spill] sm:$0xff] }
0x1564   :  { %7499 = vmatpush1.bf16.msra.mxu0 %v10306_v41  ;;  %7541 = vmatprep.subr.bf16.mxu1 %v10311_v14  ;;  %v7822_v28 = vmul.f32 %v7778_v63, %v13178_v10  ;;  %v7786_v24 = vrot.slane %v7726_v55, %v10785_v6  ;;  %v7728_v21 = vcombine.high %v12665_v1, %v12665_v1  ;;  %v10322_v41 = vld [vmem:[#allocation10 + $0x28] ss:$16 sps:$4 sm:$0xff]   ;;  %v10325_v42 = vld [vmem:[#allocation8 + $0x40] ss:$16 sps:$4 sm:$0xff]   ;;  %v10327_v13 = vld [vmem:[#allocation8 + $0x24] ss:$16 sps:$4 sm:$0xff]  }
0x1565   :  { %7500 = vmatprep.subr.bf16.mxu0 %v10307_v61  ;;  %v7679_v51 = vcombine.high %v12652_v44, %v12652_v44  ;;  %v7816_v46 = vmul.f32 %v7754_v25, %v13179_v34  ;;  %v7730_v27 = vcombine.high %v7726_v55, %v7726_v55  ;;  %v7681_v44 = vcombine.high %v7677_v30, %v7677_v30  ;;  %v13182_v61 = vld [vmem:[#allocation32_spill] sm:$0xff]  ;;  %v13184_v14 = vld [vmem:[#allocation34_spill] sm:$0xff]  ;;  %v10329_v26 = vld [vmem:[#allocation8 + $0x20] ss:$16 sps:$4 sm:$0xff]  }
0x1566   :  { %7542 = vmatpush1.bf16.msra.mxu1 %v10313_v8  ;;  %v7824_v2 = vmul.f32 %v7786_v24, %v13180_v35  ;;  %v7790_v22 = vrot.slane %v7728_v21, %v10785_v6  ;;  %v10328_v30 = vld [vmem:[#allocation8 + $0xec] ss:$16 sps:$4 sm:$0xff]   ;;  %v10333_v63 = vld [vmem:[#allocation8] ss:$16 sps:$4 sm:$0xff]   ;;  %v10334_v55 = vld [vmem:[#allocation7 + $0xe4] ss:$16 sps:$4 sm:$0xff]  }
0x1567   :  { %7847 = vadd.xlane.f32.xlu1 %v7821_v19  ;;  %7835 = vadd.xlane.f32.xlu0 %v7815_v31  ;;  %v7758_v1 = vrot.slane %v7679_v51, %v10785_v6  ;;  %v10323_v31 = vld [vmem:[#allocation8 + $0x44] ss:$16 sps:$4 sm:$0xff]   ;;  %v7794_v19 = vrot.slane %v7730_v27, %v10785_v6  ;;  %v7762_v47 = vrot.slane %v7681_v44, %v10785_v6  ;;  %v10331_v48 = vld [vmem:[#allocation8 + $0xcc] ss:$16 sps:$4 sm:$0xff]   ;;  %v10335_v8 = vld [vmem:[#allocation8 + $0xc8] ss:$16 sps:$4 sm:$0xff]  }
0x1568   :  { %7501 = vmatpush1.bf16.msra.mxu0 %v10310_v52  ;;  %7543 = vmatprep.subr.bf16.mxu1 %v10315_v54  ;;  %v7825_v17 = vmul.f32 %v7790_v22, %v13181_v29  ;;  %v13183_v52 = vld [vmem:[#allocation33_spill] sm:$0xff]  ;;  %v10337_v16 = vld [vmem:[#allocation8 + $0xa8] ss:$16 sps:$4 sm:$0xff]   ;;  %v10340_v25 = vld [vmem:[#allocation8 + $0x6c] ss:$16 sps:$4 sm:$0xff]  }
0x1569   :  { %7502 = vmatprep.subr.bf16.mxu0 %v10312_v45  ;;  %v7817_v18 = vmul.f32 %v7758_v1, %v13182_v61  ;;  %v7826_v23 = vmul.f32 %v7794_v19, %v13183_v52  ;;  %v7818_v45 = vmul.f32 %v7762_v47, %v13184_v14  ;;  %v10341_v54 = vld [vmem:[#allocation8 + $0x68] ss:$16 sps:$4 sm:$0xff]   ;;  %v10346_v21 = vld [vmem:[#allocation8 + $0xc] ss:$16 sps:$4 sm:$0xff]  }
0x156a   :  { %7544 = vmatpush1.bf16.msra.mxu1 %v10317_v3  ;;  %v10343_v10 = vld [vmem:[#allocation8 + $0x48] ss:$16 sps:$4 sm:$0xff]   ;;  %v10348_v3 = vld [vmem:[#allocation7 + $0xec] ss:$16 sps:$4 sm:$0xff]  }
0x156b   :  { %7851 = vadd.xlane.f32.xlu1 %v7823_v37  ;;  %7843 = vadd.xlane.f32.xlu0 %v7819_v39  ;;  %v10330_v37 = vld [vmem:[#allocation8 + $0xe8] ss:$16 sps:$4 sm:$0xff]   ;;  %v10332_v39 = vld [vmem:[#allocation8 + $0x4] ss:$16 sps:$4 sm:$0xff]  }
0x156c   :  { %7503 = vmatpush1.bf16.msra.mxu0 %v10314_v12  ;;  %7545 = vmatprep.subr.bf16.mxu1 %v10319_v53  ;;  %v10336_v12 = vld [vmem:[#allocation8 + $0xac] ss:$16 sps:$4 sm:$0xff]   ;;  %v10345_v24 = vld [vmem:[#allocation8 + $0x28] ss:$16 sps:$4 sm:$0xff]  }
0x156d   :  { %7504 = vmatprep.subr.bf16.mxu0 %v10316_v49  ;;  %v10342_v49 = vld [vmem:[#allocation8 + $0x4c] ss:$16 sps:$4 sm:$0xff]   ;;  %v10347_v51 = vld [vmem:[#allocation8 + $0x8] ss:$16 sps:$4 sm:$0xff]  }
0x156e   :  { %7546 = vmatpush1.bf16.msra.mxu1 %v10321_v58 }
0x156f   :  { %7849 = vadd.xlane.f32.xlu1 %v7822_v28  ;;  %7833 = vadd.xlane.f32.xlu0 %v7814_v59  ;;  %v10339_v59 = vld [vmem:[#allocation8 + $0x88] ss:$16 sps:$4 sm:$0xff]   ;;  %v10344_v28 = vld [vmem:[#allocation8 + $0x2c] ss:$16 sps:$4 sm:$0xff]  }
0x1570   :  { %7505 = vmatpush1.bf16.msra.mxu0 %v10318_v0  ;;  %7547 = vmatprep.subr.bf16.mxu1 %v10323_v31 }
0x1571   :  { %7506 = vmatprep.subr.bf16.mxu0 %v10320_v9 }
0x1572   :  { %7548 = vmatpush1.bf16.msra.mxu1 %v10325_v42 }
0x1573   :  { %7853 = vadd.xlane.f32.xlu1 %v7824_v2  ;;  %7837 = vadd.xlane.f32.xlu0 %v7816_v46 }
0x1574   :  { %7507 = vmatpush1.bf16.msra.mxu0 %v10322_v41  ;;  %7549 = vmatprep.subr.bf16.mxu1 %v10327_v13 }
0x1575   :  { %7508 = vmatprep.subr.bf16.mxu0 %v10324_v60 }
0x1576   :  { %7550 = vmatpush1.bf16.msra.mxu1 %v10329_v26 }
0x1577   :  { %7855 = vadd.xlane.f32.xlu1 %v7825_v17  ;;  %7839 = vadd.xlane.f32.xlu0 %v7817_v18 }
0x1578   :  { %7509 = vmatpush1.bf16.msra.mxu0 %v10326_v62  ;;  %7551 = vmatprep.subr.bf16.mxu1 %v10332_v39 }
0x1579   :  { %7580 = vmatprep.subr.bf16.mxu0 %v10328_v30 }
0x157a   :  { %7552 = vmatpush1.bf16.msra.mxu1 %v10333_v63 }
0x157b   :  { %7527 = vmatmul.mubr.bf16.vlgmr.msra.gmra.mxu0 %v12639_v20  ;;  %7857 = vadd.xlane.f32.xlu1 %v7826_v23  ;;  %v10338_v20 = vld [vmem:[#allocation8 + $0x8c] ss:$16 sps:$4 sm:$0xff]  }
0x157c   :  { %7841 = vadd.xlane.f32.xlu0 %v7818_v45  ;;  %7581 = vmatpush1.bf16.msra.mxu0 %v10330_v37 }
0x157d   :  { %7582 = vmatprep.subr.bf16.mxu0 %v10331_v48  ;;  %7612 = vmatprep.mubr.bf16.mxu0 %v13108_v38 }
0x157e   :  { %8597 = vmatprep.subr.bf16.mxu1 %v10334_v55 }
0x1580   :  { %7583 = vmatpush1.bf16.msra.mxu0 %v10335_v8 }
0x1581   :  { %7584 = vmatprep.subr.bf16.mxu0 %v10336_v12 }
0x1584   :  { %7585 = vmatpush1.bf16.msra.mxu0 %v10337_v16 }
0x1585   :  { %7586 = vmatprep.subr.bf16.mxu0 %v10338_v20 }
0x1588   :  { %7587 = vmatpush1.bf16.msra.mxu0 %v10339_v59 }
0x1589   :  { %7588 = vmatprep.subr.bf16.mxu0 %v10340_v25 }
0x158c   :  { %7589 = vmatpush1.bf16.msra.mxu0 %v10341_v54 }
0x158d   :  { %7590 = vmatprep.subr.bf16.mxu0 %v10342_v49 }
0x1590   :  { %7591 = vmatpush1.bf16.msra.mxu0 %v10343_v10 }
0x1591   :  { %7592 = vmatprep.subr.bf16.mxu0 %v10344_v28 }
0x1594   :  { %7593 = vmatpush1.bf16.msra.mxu0 %v10345_v24 }
0x1595   :  { %7594 = vmatprep.subr.bf16.mxu0 %v10346_v21 }
0x1598   :  { %7595 = vmatpush1.bf16.msra.mxu0 %v10347_v51 }
0x1599   :  { %8640 = vmatprep.subr.bf16.mxu0 %v10348_v3 }
0x15e6   :  { %v12701_v0 = vpop.xlane.xlu1 %7827 }
0x15e7   :  { %v7878_v18 = vrot.slane %v12701_v0, %v13129_v40 }
0x15e8   :  { %v12703_v34 = vpop.xlane.xlu0 %7829 }
0x15e9   :  { %v7882_v41 = vrot.slane %v12703_v34, %v13129_v40 }
0x15eb   :  { %v7939_v42 = vsel %vm924_vm0, %v7882_v41, %v7878_v18  ;;  %v10349_v41 = vld [vmem:[%s13018_s7] ss:$0 sm:$0xff] }
0x15ec   :  { %v12705_v46 = vpop.xlane.xlu1 %7845  ;;  %v12707_v53 = vpop.xlane.xlu0 %7831 }
0x15ed   :  { %v7914_v58 = vrot.slane %v12705_v46, %v13129_v40  ;;  %v7886_v29 = vrot.slane %v12707_v53, %v13129_v40 }
0x15ef   :  { %v7940_v23 = vsel %vm926_vm1, %v7886_v29, %v7939_v42 }
0x15f0   :  { %v12709_v9 = vpop.xlane.xlu1 %7847  ;;  %v12711_v35 = vpop.xlane.xlu0 %7835 }
0x15f1   :  { %v7918_v19 = vrot.slane %v12709_v9, %v13129_v40  ;;  %v7894_v39 = vrot.slane %v12711_v35, %v13129_v40 }
0x15f4   :  { %v12713_v2 = vpop.xlane.xlu1 %7851  ;;  %v12715_v22 = vpop.xlane.xlu0 %7843 }
0x15f5   :  { %v7910_v44 = vrot.slane %v12715_v22, %v13129_v40  ;;  %v7926_v45 = vrot.slane %v12713_v2, %v13129_v40 }
0x15f7   :  { %v7946_v17 = vsel %vm924_vm0, %v7914_v58, %v7910_v44 }
0x15f8   :  { %v12717_v1 = vpop.xlane.xlu1 %7849  ;;  %v12719_v27 = vpop.xlane.xlu0 %7833  ;;  %v7947_v62 = vsel %vm926_vm1, %v7918_v19, %v7946_v17 }
0x15f9   :  { %v7922_v61 = vrot.slane %v12717_v1, %v13129_v40  ;;  %v7890_v47 = vrot.slane %v12719_v27, %v13129_v40 }
0x15fb   :  { %v7948_v30 = vsel %vm928_vm2, %v7922_v61, %v7947_v62  ;;  %v7941_v26 = vsel %vm928_vm2, %v7890_v47, %v7940_v23 }
0x15fc   :  { %v12727_v31 = vpop.xlane.xlu1 %7853  ;;  %v12729_v60 = vpop.xlane.xlu0 %7837  ;;  %v7949_v55 = vsel %vm930_vm3, %v7926_v45, %v7948_v30  ;;  %v7942_v16 = vsel %vm930_vm3, %v7894_v39, %v7941_v26 }
0x15fd   :  { %v7930_v14 = vrot.slane %v12727_v31, %v13129_v40  ;;  %v7898_v37 = vrot.slane %v12729_v60, %v13129_v40 }
0x15ff   :  { %v7950_v12 = vsel %vm932_vm4, %v7930_v14, %v7949_v55  ;;  %v7943_v25 = vsel %vm932_vm4, %v7898_v37, %v7942_v16 }
0x1600   :  { %v12744_v13 = vpop.xlane.xlu1 %7855  ;;  %v12746_v52 = vpop.xlane.xlu0 %7839 }
0x1601   :  { %v7934_v48 = vrot.slane %v12744_v13, %v13129_v40  ;;  %v7902_v63 = vrot.slane %v12746_v52, %v13129_v40 }
0x1603   :  { %v7951_v49 = vsel %vm934_vm5, %v7934_v48, %v7950_v12  ;;  %v7944_v28 = vsel %vm934_vm5, %v7902_v63, %v7943_v25 }
0x1604   :  { %v12764_v8 = vpop.xlane.xlu1 %7857 }
0x1605   :  { %v7938_v20 = vrot.slane %v12764_v8, %v13129_v40  ;;  %v12770_v59 = vpop.xlane.xlu0 %7841 }
0x1606   :  { %v7906_v54 = vrot.slane %v12770_v59, %v13129_v40 }
0x1607   :  { %v7952_v10 = vsel %vm936_vm6, %v7938_v20, %v7951_v49 }
0x1608   :  { %v7958_v24 = vsel %vm947_vm7, %v7952_v10, -inf  ;;  %v7945_v21 = vsel %vm936_vm6, %v7906_v54, %v7944_v28 }
0x1609   :  { %7959 = vmax.xlane.f32.xlu1 %v7958_v24  ;;  %v7955_v51 = vsel %vm947_vm7, %v7945_v21, -inf }
0x160a   :  { %7956 = vmax.xlane.f32.xlu0 %v7955_v51 }
0x161b   :  { %v7414_v3 = vpop.f32.mrf.mxu0 }
0x161c   :  { %v12784_v29 = vadd.f32 %v10349_v41, %v7414_v3  ;;  %v13185_v3 = vld [vmem:[#allocation41_spill] sm:$0xff] }
0x161d   :  { %v9160_v44 = vpop.f32.mrf.mxu0 }
0x161f   :  { %v7417_v58 = vpop.f32.mrf.mxu0 }
0x1620   :  { %v12786_v17 = vadd.f32 %v10349_v41, %v7417_v58 }
0x1621   :  { %v9161_v61 = vpop.f32.mrf.mxu0 }
0x1622   :  { %v9001_v18 = vpack.c.bf16 %v12786_v17, %v12784_v29 }
0x1624   :  { %9002 = vst [vmem:[#allocation13 + $0x20] sm:$0xff] %v9001_v18  }
0x1692   :  { %v7960_v47 = vpop.xlane.xlu1 %7959 }
0x1693   :  { %v12790_v19 = vpop.xlane.xlu0 %7956  ;;  %v8002_v23 = vrot.slane %v7960_v47, %v13109_v11  ;;  %v8006_v26 = vrot.slane %v7960_v47, %v13111_v50  ;;  %v8010_v12 = vrot.slane %v7960_v47, %v13110_v43  ;;  %v8014_v25 = vrot.slane %v7960_v47, %v13130_v56 }
0x1694   :  { %v7966_v42 = vrot.slane %v12790_v19, %v10785_v6  ;;  %v7970_v62 = vrot.slane %v12790_v19, %v13109_v11  ;;  %v7974_v30 = vrot.slane %v12790_v19, %v13111_v50  ;;  %v7978_v48 = vrot.slane %v12790_v19, %v13110_v43 }
0x1695   :  { %v8052_v37 = vsub.f32 %v12705_v46, %v8002_v23  ;;  %v8053_v16 = vsub.f32 %v12709_v9, %v8006_v26  ;;  %v8054_v54 = vsub.f32 %v12717_v1, %v8010_v12  ;;  %v7986_v49 = vrot.slane %v12790_v19, %v13145_v57 }
0x1696   :  { %v8043_v14 = vsub.f32 %v12701_v0, %v7966_v42  ;;  %v8044_v45 = vsub.f32 %v12703_v34, %v7970_v62  ;;  %v8045_v39 = vsub.f32 %v12707_v53, %v7974_v30  ;;  %v7982_v0 = vrot.slane %v12790_v19, %v13130_v56 }
0x1697   :  { %v8077_v20 = vmul.f32 1.442695, %v8052_v37  ;;  %v8046_v34 = vsub.f32 %v12719_v27, %v7978_v48  ;;  %v8079_v53 = vmul.f32 1.442695, %v8053_v16  ;;  %v8018_v28 = vrot.slane %v7960_v47, %v13145_v57 }
0x1698   :  { %v8059_v63 = vmul.f32 1.442695, %v8043_v14  ;;  %v8061_v55 = vmul.f32 1.442695, %v8044_v45  ;;  %v8063_v46 = vmul.f32 1.442695, %v8045_v39  ;;  %v8047_v9 = vsub.f32 %v12711_v35, %v7982_v0 }
0x1699   :  { %v8065_v10 = vmul.f32 1.442695, %v8046_v34  ;;  %v8055_v24 = vsub.f32 %v12713_v2, %v8014_v25  ;;  %v8081_v27 = vmul.f32 1.442695, %v8054_v54  ;;  %v7998_v21 = vrot.slane %v7960_v47, %v10785_v6 }
0x169a   :  { %9726 = vpow2.f32 %v8059_v63  ;;  %v8048_v51 = vsub.f32 %v12729_v60, %v7986_v49  ;;  %v8067_v1 = vmul.f32 1.442695, %v8047_v9  ;;  %v8022_v44 = vrot.slane %v7960_v47, %v13185_v3  ;;  %v13186_v60 = vld [vmem:[#allocation42_spill] sm:$0xff] }
0x169b   :  { %9728 = vpow2.f32 %v8061_v55  ;;  %v8056_v58 = vsub.f32 %v12727_v31, %v8018_v28  ;;  %v8083_v35 = vmul.f32 1.442695, %v8055_v24  ;;  %v8051_v61 = vsub.f32 %v12715_v22, %v7998_v21 }
0x169c   :  { %9730 = vpow2.f32 %v8077_v20  ;;  %v7990_v2 = vrot.slane %v12790_v19, %v13185_v3  ;;  %v8069_v18 = vmul.f32 1.442695, %v8048_v51  ;;  %v8026_v62 = vrot.slane %v7960_v47, %v13186_v60 }
0x169d   :  { %9732 = vpow2.f32 %v8063_v46  ;;  %v8057_v31 = vsub.f32 %v12744_v13, %v8022_v44  ;;  %v8085_v23 = vmul.f32 1.442695, %v8056_v58  ;;  %v8075_v22 = vmul.f32 1.442695, %v8051_v61 }
0x169e   :  { %9734 = vpow2.f32 %v8079_v53  ;;  %v7994_v14 = vrot.slane %v12790_v19, %v13186_v60  ;;  %v8049_v45 = vsub.f32 %v12746_v52, %v7990_v2  ;;  %v8058_v47 = vsub.f32 %v12764_v8, %v8026_v62 }
0x169f   :  { %9736 = vpow2.f32 %v8065_v10  ;;  %v8087_v13 = vmul.f32 1.442695, %v8057_v31 }
0x16a0   :  { %9738 = vpow2.f32 %v8081_v27  ;;  %v8050_v48 = vsub.f32 %v12770_v59, %v7994_v14  ;;  %v8071_v39 = vmul.f32 1.442695, %v8049_v45  ;;  %v8089_v52 = vmul.f32 1.442695, %v8058_v47 }
0x16a1   :  { %9740 = vpow2.f32 %v8067_v1 }
0x16a2   :  { %9742 = vpow2.f32 %v8083_v35  ;;  %v8073_v8 = vmul.f32 1.442695, %v8050_v48 }
0x16a3   :  { %9744 = vpow2.f32 %v8069_v18 }
0x16a4   :  { %9746 = vpow2.f32 %v8085_v23 }
0x16a5   :  { %9748 = vpow2.f32 %v8075_v22 }
0x16a6   :  { %9750 = vpow2.f32 %v8087_v13 }
0x16a7   :  { %v12822_v41 = vpop.eup %9726  ;;  %9752 = vpow2.f32 %v8071_v39 }
0x16a8   :  { %v12827_v42 = vpop.eup %9728  ;;  %8108 = vperm.xlu0 %9199, %v12822_v41   ;;  %9754 = vpow2.f32 %v8089_v52 }
0x16a9   :  { %8111 = vperm.xlu1 %9200, %v12827_v42   ;;  %v12833_v30 = vpop.eup %9730  ;;  %9756 = vpow2.f32 %v8073_v8 }
0x16aa   :  { %v12838_v26 = vpop.eup %9732 }
0x16ab   :  { %v12843_v37 = vpop.eup %9734 }
0x16ac   :  { %8135 = vperm.xlu0 %9199, %v12833_v30   ;;  %v12846_v19 = vpop.eup %9736 }
0x16ad   :  { %8114 = vperm.xlu1 %9200, %v12838_v26   ;;  %v12850_v63 = vpop.eup %9738 }
0x16ae   :  { %v12852_v55 = vpop.eup %9740 }
0x16af   :  { %v12856_v59 = vpop.eup %9742 }
0x16b0   :  { %8138 = vperm.xlu0 %9199, %v12843_v37   ;;  %v12858_v12 = vpop.eup %9744 }
0x16b1   :  { %8117 = vperm.xlu1 %9200, %v12846_v19   ;;  %v12862_v16 = vpop.eup %9746 }
0x16b2   :  { %v12864_v20 = vpop.eup %9748 }
0x16b3   :  { %v12868_v0 = vpop.eup %9750 }
0x16b4   :  { %8141 = vperm.xlu0 %9199, %v12850_v63   ;;  %v12870_v34 = vpop.eup %9752 }
0x16b5   :  { %8120 = vperm.xlu1 %9200, %v12852_v55   ;;  %v12874_v46 = vpop.eup %9754 }
0x16b6   :  { %v12876_v25 = vpop.eup %9756 }
0x16b8   :  { %8144 = vperm.xlu0 %9199, %v12856_v59  }
0x16b9   :  { %8123 = vperm.xlu1 %9200, %v12858_v12  }
0x16bc   :  { %8147 = vperm.xlu0 %9199, %v12862_v16  }
0x16bd   :  { %8132 = vperm.xlu1 %9200, %v12864_v20  }
0x16c0   :  { %8150 = vperm.xlu0 %9199, %v12868_v0  }
0x16c1   :  { %8126 = vperm.xlu1 %9200, %v12870_v34  }
0x16c4   :  { %8153 = vperm.xlu0 %9199, %v12874_v46  }
0x16c5   :  { %8129 = vperm.xlu1 %9200, %v12876_v25  }
0x16e3   :  { %7434 = vmax.xlane.f32.xlu0 %v12786_v17 }
0x16e9   :  { %7432 = vmax.xlane.f32.xlu1 %v12784_v29 }
0x1723   :  { %v8109_v54 = vpop.permute.xlu0 %8108 }
0x1724   :  { %v8112_v53 = vpop.permute.xlu1 %8111  ;;  %v8158_v58 = vrot.slane %v8109_v54, %v13129_v40 }
0x1725   :  { %v8162_v44 = vrot.slane %v8112_v53, %v13129_v40 }
0x1727   :  { %v8136_v49 = vpop.permute.xlu0 %8135  ;;  %v8219_v45 = vsel %vm924_vm0, %v8162_v44, %v8158_v58 }
0x1728   :  { %v8115_v9 = vpop.permute.xlu1 %8114  ;;  %v8194_v61 = vrot.slane %v8136_v49, %v13129_v40 }
0x1729   :  { %v8166_v18 = vrot.slane %v8115_v9, %v13129_v40 }
0x172b   :  { %v8139_v10 = vpop.permute.xlu0 %8138  ;;  %v8220_v49 = vsel %vm926_vm1, %v8166_v18, %v8219_v45 }
0x172c   :  { %v8118_v28 = vpop.permute.xlu1 %8117  ;;  %v8198_v62 = vrot.slane %v8139_v10, %v13129_v40 }
0x172d   :  { %v8170_v31 = vrot.slane %v8118_v28, %v13129_v40 }
0x172f   :  { %v8142_v24 = vpop.permute.xlu0 %8141  ;;  %v8221_v28 = vsel %vm928_vm2, %v8170_v31, %v8220_v49 }
0x1730   :  { %v8121_v27 = vpop.permute.xlu1 %8120  ;;  %v8202_v23 = vrot.slane %v8142_v24, %v13129_v40 }
0x1731   :  { %v8174_v47 = vrot.slane %v8121_v27, %v13129_v40 }
0x1733   :  { %v8145_v21 = vpop.permute.xlu0 %8144 }
0x1734   :  { %v8124_v51 = vpop.permute.xlu1 %8123  ;;  %v8206_v13 = vrot.slane %v8145_v21, %v13129_v40  ;;  %v8222_v21 = vsel %vm930_vm3, %v8174_v47, %v8221_v28 }
0x1735   :  { %v8178_v52 = vrot.slane %v8124_v51, %v13129_v40 }
0x1737   :  { %v8148_v1 = vpop.permute.xlu0 %8147 }
0x1738   :  { %v8133_v35 = vpop.permute.xlu1 %8132  ;;  %v8210_v54 = vrot.slane %v8148_v1, %v13129_v40  ;;  %v8223_v1 = vsel %vm932_vm4, %v8178_v52, %v8222_v21 }
0x1739   :  { %v8190_v2 = vrot.slane %v8133_v35, %v13129_v40 }
0x173b   :  { %v8226_v22 = vsel %vm924_vm0, %v8194_v61, %v8190_v2  ;;  %v8151_v14 = vpop.permute.xlu0 %8150 }
0x173c   :  { %v8227_v48 = vsel %vm926_vm1, %v8198_v62, %v8226_v22  ;;  %v8127_v39 = vpop.permute.xlu1 %8126  ;;  %v8214_v53 = vrot.slane %v8151_v14, %v13129_v40 }
0x173d   :  { %v8228_v8 = vsel %vm928_vm2, %v8202_v23, %v8227_v48  ;;  %v8182_v10 = vrot.slane %v8127_v39, %v13129_v40 }
0x173e   :  { %v8229_v9 = vsel %vm930_vm3, %v8206_v13, %v8228_v8 }
0x173f   :  { %v8230_v24 = vsel %vm932_vm4, %v8210_v54, %v8229_v9  ;;  %v8154_v27 = vpop.permute.xlu0 %8153  ;;  %v8224_v2 = vsel %vm934_vm5, %v8182_v10, %v8223_v1 }
0x1740   :  { %v8130_v51 = vpop.permute.xlu1 %8129  ;;  %v8218_v44 = vrot.slane %v8154_v27, %v13129_v40  ;;  %v8231_v35 = vsel %vm934_vm5, %v8214_v53, %v8230_v24 }
0x1741   :  { %v8186_v58 = vrot.slane %v8130_v51, %v13129_v40 }
0x1742   :  { %v8232_v61 = vsel %vm936_vm6, %v8218_v44, %v8231_v35 }
0x1743   :  { %v8238_v18 = vsel %vm947_vm7, %v8232_v61, 0.0  ;;  %v8225_v62 = vsel %vm936_vm6, %v8186_v58, %v8224_v2 }
0x1744   :  { %8239 = vadd.xlane.f32.xlu1 %v8238_v18  ;;  %v8235_v31 = vsel %vm947_vm7, %v8225_v62, 0.0  ;;  %v10351_v62 = vld [vmem:[#allocation7 + $0xe8] ss:$16 sps:$4 sm:$0xff]  }
0x1745   :  { %8236 = vadd.xlane.f32.xlu0 %v8235_v31  ;;  %v10354_v31 = vld [vmem:[#allocation7 + $0xc0] ss:$16 sps:$4 sm:$0xff]  }
0x176c   :  { %v7435_v23 = vpop.xlane.xlu0 %7434 }
0x176d   :  { %v7437_v22 = vsub.f32 %v12786_v17, %v7435_v23  ;;  %v10355_v23 = vld [vmem:[#allocation7 + $0xc8] ss:$16 sps:$4 sm:$0xff]  }
0x176f   :  { %v7440_v14 = vmul.f32 1.442695, %v7437_v22  ;;  %v10356_v22 = vld [vmem:[#allocation7 + $0xa4] ss:$16 sps:$4 sm:$0xff]  }
0x1771   :  { %9758 = vpow2.f32 %v7440_v14  ;;  %v10357_v14 = vld [vmem:[#allocation7 + $0xac] ss:$16 sps:$4 sm:$0xff]  }
0x1772   :  { %v7433_v40 = vpop.xlane.xlu1 %7432 }
0x1773   :  { %v7436_v45 = vsub.f32 %v12784_v29, %v7433_v40  ;;  %v10358_v40 = vld [vmem:[#allocation7 + $0xa0] ss:$16 sps:$4 sm:$0xff]  }
0x1775   :  { %v7438_v47 = vmul.f32 1.442695, %v7436_v45  ;;  %v10359_v45 = vld [vmem:[#allocation7 + $0xa8] ss:$16 sps:$4 sm:$0xff]  }
0x1777   :  { %9760 = vpow2.f32 %v7438_v47  ;;  %v10360_v47 = vld [vmem:[#allocation7 + $0x84] ss:$16 sps:$4 sm:$0xff]  }
0x177e   :  { %v12916_v13 = vpop.eup %9758 }
0x177f   :  { %7444 = vadd.xlane.f32.xlu1 %v12916_v13 }
0x1784   :  { %v9761_v48 = vpop.eup %9760 }
0x1785   :  { %7442 = vadd.xlane.f32.xlu0 %v9761_v48 }
0x17cd   :  { %v8240_v39 = vpop.xlane.xlu1 %8239 }
0x17ce   :  { %9762 = vrcp.f32 %v8240_v39  ;;  %v8237_v52 = vpop.xlane.xlu0 %8236  ;;  %v10363_v39 = vld [vmem:[#allocation7 + $0x88] ss:$16 sps:$4 sm:$0xff]  }
0x17cf   :  { %9764 = vrcp.f32 %v8237_v52  ;;  %v10365_v52 = vld [vmem:[#allocation7 + $0x6c] ss:$16 sps:$4 sm:$0xff]  }
0x17db   :  { %v9763_v8 = vpop.eup %9762 }
0x17dc   :  { %v9765_v54 = vpop.eup %9764  ;;  %v8284_v10 = vrot.slane %v9763_v8, %v13109_v11  ;;  %v8288_v21 = vrot.slane %v9763_v8, %v13111_v50  ;;  %v8280_v1 = vrot.slane %v9763_v8, %v10785_v6 }
0x17dd   :  { %v8252_v17 = vrot.slane %v9765_v54, %v13109_v11  ;;  %v8248_v53 = vrot.slane %v9765_v54, %v10785_v6  ;;  %v8256_v9 = vrot.slane %v9765_v54, %v13111_v50  ;;  %v8260_v27 = vrot.slane %v9765_v54, %v13110_v43 }
0x17de   :  { %v8334_v24 = vmul.f32 %v12833_v30, %v8284_v10  ;;  %v8264_v51 = vrot.slane %v9765_v54, %v13130_v56  ;;  %v8292_v11 = vrot.slane %v9763_v8, %v13110_v43  ;;  %v8268_v44 = vrot.slane %v9765_v54, %v13145_v57  ;;  %v10373_v10 = vld [vmem:[#allocation7 + $0x2c] ss:$16 sps:$4 sm:$0xff]  }
0x17df   :  { %v8326_v29 = vmul.f32 %v12827_v42, %v8252_v17  ;;  %v8325_v49 = vmul.f32 %v12822_v41, %v8248_v53  ;;  %v8327_v28 = vmul.f32 %v12838_v26, %v8256_v9  ;;  %v8328_v42 = vmul.f32 %v12846_v19, %v8260_v27  ;;  %v10368_v17 = vld [vmem:[#allocation7 + $0x44] ss:$16 sps:$4 sm:$0xff]   ;;  %v10369_v53 = vld [vmem:[#allocation7 + $0x4c] ss:$16 sps:$4 sm:$0xff]  }
0x17e0   :  { %v8335_v41 = vmul.f32 %v12843_v37, %v8288_v21  ;;  %v8329_v26 = vmul.f32 %v12852_v55, %v8264_v51  ;;  %v8336_v30 = vmul.f32 %v12850_v63, %v8292_v11  ;;  %v8296_v50 = vrot.slane %v9763_v8, %v13130_v56  ;;  %v10372_v9 = vld [vmem:[#allocation7 + $0x24] ss:$16 sps:$4 sm:$0xff]   ;;  %v10377_v21 = vld [vmem:[#allocation7 + $0xc] ss:$16 sps:$4 sm:$0xff]  }
0x17e1   :  { %8348 = vperm.xlu1 %9200, %v8326_v29   ;;  %8343 = vperm.xlu0 %9199, %v8325_v49   ;;  %v8330_v19 = vmul.f32 %v12858_v12, %v8268_v44  ;;  %v8300_v43 = vrot.slane %v9763_v8, %v13145_v57  ;;  %v8333_v55 = vmul.f32 %v12864_v20, %v8280_v1  ;;  %v10370_v29 = vld [vmem:[#allocation7 + $0x40] ss:$16 sps:$4 sm:$0xff]   ;;  %v10371_v49 = vld [vmem:[#allocation7 + $0x48] ss:$16 sps:$4 sm:$0xff]   ;;  %v10376_v27 = vld [vmem:[#allocation7 + $0x4] ss:$16 sps:$4 sm:$0xff]  }
0x17e2   :  { %v8337_v37 = vmul.f32 %v12856_v59, %v8296_v50  ;;  %v8272_v58 = vrot.slane %v9765_v54, %v13185_v3  ;;  %v8304_v56 = vrot.slane %v9763_v8, %v13185_v3  ;;  %v8276_v6 = vrot.slane %v9765_v54, %v13186_v60  ;;  %v10367_v54 = vld [vmem:[#allocation7 + $0x68] ss:$16 sps:$4 sm:$0xff]  }
0x17e3   :  { %v8338_v63 = vmul.f32 %v12862_v16, %v8300_v43  ;;  %v8308_v57 = vrot.slane %v9763_v8, %v13186_v60  ;;  %v10350_v60 = vld [vmem:[#allocation7 + $0xe0] ss:$16 sps:$4 sm:$0xff]   ;;  %v10381_v44 = vld [vmem:[#allocation2] sm:$0xff] }
0x17e4   :  { %v8331_v12 = vmul.f32 %v12870_v34, %v8272_v58  ;;  %v8339_v59 = vmul.f32 %v12868_v0, %v8304_v56  ;;  %v8332_v20 = vmul.f32 %v12876_v25, %v8276_v6  ;;  %v10352_v25 = vld [vmem:[#allocation7 + $0xc4] ss:$16 sps:$4 sm:$0xff]   ;;  %v10366_v8 = vld [vmem:[#allocation7 + $0x60] ss:$16 sps:$4 sm:$0xff]   ;;  %v10382_v58 = vld [vmem:[#allocation2 + $0x10] sm:$0xff] }
0x17e5   :  { %8353 = vperm.xlu1 %9200, %v8327_v28   ;;  %8388 = vperm.xlu0 %9199, %v8334_v24   ;;  %v8340_v16 = vmul.f32 %v12874_v46, %v8308_v57  ;;  %v10353_v46 = vld [vmem:[#allocation7 + $0xcc] ss:$16 sps:$4 sm:$0xff]   ;;  %v10374_v28 = vld [vmem:[#allocation7 + $0x20] ss:$16 sps:$4 sm:$0xff]   ;;  %v10375_v24 = vld [vmem:[#allocation7 + $0x28] ss:$16 sps:$4 sm:$0xff]  }
0x17e9   :  { %8358 = vperm.xlu1 %9200, %v8328_v42   ;;  %8393 = vperm.xlu0 %9199, %v8335_v41   ;;  %v10378_v42 = vld [vmem:[#allocation7] ss:$16 sps:$4 sm:$0xff]   ;;  %v10379_v41 = vld [vmem:[#allocation7 + $0x8] ss:$16 sps:$4 sm:$0xff]  }
0x17ed   :  { %8363 = vperm.xlu1 %9200, %v8329_v26   ;;  %8398 = vperm.xlu0 %9199, %v8336_v30   ;;  %v10380_v26 = vld [vmem:[#allocation2 + $0x8] sm:$0xff] }
0x17f1   :  { %8368 = vperm.xlu1 %9200, %v8330_v19   ;;  %8403 = vperm.xlu0 %9199, %v8337_v37  }
0x17f5   :  { %8383 = vperm.xlu1 %9200, %v8333_v55   ;;  %8408 = vperm.xlu0 %9199, %v8338_v63  }
0x17f9   :  { %8373 = vperm.xlu1 %9200, %v8331_v12   ;;  %8413 = vperm.xlu0 %9199, %v8339_v59   ;;  %v10383_v12 = vld [vmem:[#allocation2 + $0x48] sm:$0xff] }
0x17fd   :  { %8378 = vperm.xlu1 %9200, %v8332_v20   ;;  %8418 = vperm.xlu0 %9199, %v8340_v16  }
0x1808   :  { %v7445_v35 = vpop.xlane.xlu1 %7444 }
0x1809   :  { %9766 = vrcp.f32 %v7445_v35 }
0x180e   :  { %v7443_v3 = vpop.xlane.xlu0 %7442 }
0x180f   :  { %9768 = vrcp.f32 %v7443_v3 }
0x1816   :  { %v9767_v61 = vpop.eup %9766 }
0x1817   :  { %v7449_v0 = vmul.f32 %v9767_v61, %v12916_v13  ;;  %v10361_v13 = vld [vmem:[#allocation7 + $0x8c] ss:$16 sps:$4 sm:$0xff]  }
0x181c   :  { %v9769_v34 = vpop.eup %9768 }
0x181d   :  { %v7447_v2 = vmul.f32 %v9769_v34, %v9761_v48  ;;  %v10362_v48 = vld [vmem:[#allocation7 + $0x80] ss:$16 sps:$4 sm:$0xff]  }
0x181f   :  { %v7450_v18 = vpack.c.bf16 %v7449_v0, %v7447_v2 }
0x1821   :  { %7570 = vmatmul.mubr.bf16.vlgmr.msra.gmra.mxu1 %v7450_v18  ;;  %7613 = vmatmul.mubr.bf16.vlgmr.msra.gmra.mxu0 %v7450_v18  ;;  %v10384_v18 = vld [vmem:[#allocation2 + $0x18] sm:$0xff] }
0x1822   :  { %8598 = vmatpush1.bf16.msra.mxu1 %v10350_v60  ;;  %8641 = vmatpush1.bf16.msra.mxu0 %v10351_v62  ;;  %v10385_v62 = vld [vmem:[#allocation2 + $0x50] sm:$0xff] }
0x1823   :  { %8599 = vmatprep.subr.bf16.mxu1 %v10352_v25  ;;  %8642 = vmatprep.subr.bf16.mxu0 %v10353_v46 }
0x1824   :  { %8629 = vmatprep.mubr.bf16.mxu1 %v13108_v38  ;;  %8672 = vmatprep.mubr.bf16.mxu0 %v13108_v38  ;;  %v10364_v38 = vld [vmem:[#allocation7 + $0x64] ss:$16 sps:$4 sm:$0xff]  }
0x1826   :  { %8600 = vmatpush1.bf16.msra.mxu1 %v10354_v31  ;;  %8643 = vmatpush1.bf16.msra.mxu0 %v10355_v23 }
0x1827   :  { %8601 = vmatprep.subr.bf16.mxu1 %v10356_v22  ;;  %8644 = vmatprep.subr.bf16.mxu0 %v10357_v14 }
0x182a   :  { %8602 = vmatpush1.bf16.msra.mxu1 %v10358_v40  ;;  %8645 = vmatpush1.bf16.msra.mxu0 %v10359_v45 }
0x182b   :  { %8603 = vmatprep.subr.bf16.mxu1 %v10360_v47  ;;  %8646 = vmatprep.subr.bf16.mxu0 %v10361_v13 }
0x182e   :  { %8604 = vmatpush1.bf16.msra.mxu1 %v10362_v48  ;;  %8647 = vmatpush1.bf16.msra.mxu0 %v10363_v39 }
0x182f   :  { %8605 = vmatprep.subr.bf16.mxu1 %v10364_v38  ;;  %8648 = vmatprep.subr.bf16.mxu0 %v10365_v52  ;;  %v10386_v38 = vld [vmem:[#allocation2 + $0x20] sm:$0xff] }
0x1832   :  { %8606 = vmatpush1.bf16.msra.mxu1 %v10366_v8  ;;  %8649 = vmatpush1.bf16.msra.mxu0 %v10367_v54  ;;  %v10387_v8 = vld [vmem:[#allocation2 + $0x58] sm:$0xff] }
0x1833   :  { %8607 = vmatprep.subr.bf16.mxu1 %v10368_v17  ;;  %8650 = vmatprep.subr.bf16.mxu0 %v10369_v53 }
0x1836   :  { %8608 = vmatpush1.bf16.msra.mxu1 %v10370_v29  ;;  %8651 = vmatpush1.bf16.msra.mxu0 %v10371_v49 }
0x1837   :  { %8609 = vmatprep.subr.bf16.mxu1 %v10372_v9  ;;  %8652 = vmatprep.subr.bf16.mxu0 %v10373_v10 }
0x183a   :  { %8610 = vmatpush1.bf16.msra.mxu1 %v10374_v28  ;;  %8653 = vmatpush1.bf16.msra.mxu0 %v10375_v24 }
0x183b   :  { %8611 = vmatprep.subr.bf16.mxu1 %v10376_v27  ;;  %8654 = vmatprep.subr.bf16.mxu0 %v10377_v21 }
0x183e   :  { %8612 = vmatpush1.bf16.msra.mxu1 %v10378_v42  ;;  %8655 = vmatpush1.bf16.msra.mxu0 %v10379_v41 }
0x183f   :  { %9162 = vmatprep.subr.bf16.mxu1 %v13134_v7 }
0x185c   :  { %v8349_v51 = vpop.permute.xlu1 %8348  ;;  %v8344_v11 = vpop.permute.xlu0 %8343 }
0x185d   :  { %v8422_v30 = vmul.f32 %v10380_v26, %v8349_v51  ;;  %v8421_v50 = vmul.f32 %v10381_v44, %v8344_v11  ;;  %v10388_v11 = vld [vmem:[#allocation2 + $0x28] sm:$0xff] }
0x185f   :  { %v8443_v19 = vrot.slane %v8422_v30, 4  ;;  %v8437_v37 = vrot.slane %v8421_v50, 4 }
0x1860   :  { %v8354_v1 = vpop.permute.xlu1 %8353  ;;  %v8389_v43 = vpop.permute.xlu0 %8388 }
0x1861   :  { %v8444_v55 = vadd.f32 %v8443_v19, %v8422_v30  ;;  %v8438_v63 = vadd.f32 %v8437_v37, %v8421_v50  ;;  %v8423_v56 = vmul.f32 %v10382_v58, %v8354_v1  ;;  %v8430_v59 = vmul.f32 %v10383_v12, %v8389_v43  ;;  %v10389_v43 = vld [vmem:[#allocation2 + $0x60] sm:$0xff] }
0x1863   :  { %v8445_v6 = vrot.slane %v8444_v55, 2  ;;  %v8439_v57 = vrot.slane %v8438_v63, 2  ;;  %v8449_v20 = vrot.slane %v8423_v56, 4  ;;  %v8491_v16 = vrot.slane %v8430_v59, 4 }
0x1864   :  { %v8359_v35 = vpop.permute.xlu1 %8358  ;;  %v8394_v3 = vpop.permute.xlu0 %8393 }
0x1865   :  { %v8446_v61 = vadd.f32 %v8445_v6, %v8444_v55  ;;  %v8440_v34 = vadd.f32 %v8439_v57, %v8438_v63  ;;  %v8450_v2 = vadd.f32 %v8449_v20, %v8423_v56  ;;  %v8492_v0 = vadd.f32 %v8491_v16, %v8430_v59  ;;  %v10390_v20 = vld [vmem:[#allocation2 + $0x40] sm:$0xff] }
0x1866   :  { %v8424_v60 = vmul.f32 %v10384_v18, %v8359_v35  ;;  %v8431_v25 = vmul.f32 %v10385_v62, %v8394_v3 }
0x1867   :  { %v8451_v46 = vrot.slane %v8450_v2, 2  ;;  %v8493_v31 = vrot.slane %v8492_v0, 2  ;;  %v8447_v45 = vrot.slane %v8446_v61, 1  ;;  %v8441_v47 = vrot.slane %v8440_v34, 1 }
0x1868   :  { %v8455_v23 = vrot.slane %v8424_v60, 4  ;;  %v8497_v22 = vrot.slane %v8431_v25, 4  ;;  %v8364_v14 = vpop.permute.xlu1 %8363  ;;  %v8399_v40 = vpop.permute.xlu0 %8398 }
0x1869   :  { %v8494_v13 = vadd.f32 %v8493_v31, %v8492_v0  ;;  %v8425_v52 = vmul.f32 %v10386_v38, %v8364_v14  ;;  %v8432_v54 = vmul.f32 %v10387_v8, %v8399_v40  ;;  %v8452_v17 = vadd.f32 %v8451_v46, %v8450_v2  ;;  %v10392_v38 = vld [vmem:[#allocation2 + $0x30] sm:$0xff] }
0x186a   :  { %v8456_v48 = vadd.f32 %v8455_v23, %v8424_v60  ;;  %v8498_v39 = vadd.f32 %v8497_v22, %v8431_v25  ;;  %v8448_v24 = vadd.f32 %v8447_v45, %v8446_v61  ;;  %v8442_v27 = vadd.f32 %v8441_v47, %v8440_v34  ;;  %v10391_v60 = vld [vmem:[#allocation2 + $0x68] sm:$0xff] }
0x186b   :  { %v8461_v49 = vrot.slane %v8425_v52, 4  ;;  %v8503_v9 = vrot.slane %v8432_v54, 4  ;;  %v8495_v21 = vrot.slane %v8494_v13, 1  ;;  %v8453_v30 = vrot.slane %v8452_v17, 1 }
0x186c   :  { %v8457_v53 = vrot.slane %v8456_v48, 2  ;;  %v8499_v29 = vrot.slane %v8498_v39, 2  ;;  %v8369_v10 = vpop.permute.xlu1 %8368  ;;  %v8404_v28 = vpop.permute.xlu0 %8403  ;;  %v8534_v63 = vpack.c.bf16 %v8448_v24, %v8448_v24  ;;  %v8533_v58 = vpack.c.bf16 %v8442_v27, %v8442_v27 }
0x186d   :  { %v8504_v41 = vadd.f32 %v8503_v9, %v8432_v54  ;;  %v8462_v51 = vadd.f32 %v8461_v49, %v8425_v52  ;;  %v8426_v26 = vmul.f32 %v10388_v11, %v8369_v10  ;;  %v8433_v55 = vmul.f32 %v10389_v43, %v8404_v28  ;;  %v10393_v28 = vld [vmem:[#allocation2 + $0x70] sm:$0xff] }
0x186e   :  { %v8458_v42 = vadd.f32 %v8457_v53, %v8456_v48  ;;  %v8500_v44 = vadd.f32 %v8499_v29, %v8498_v39  ;;  %v8496_v56 = vadd.f32 %v8495_v21, %v8494_v13  ;;  %v12955_v35 = vadd.f32 %v8453_v30, %v8452_v17 }
0x186f   :  { %v8505_v50 = vrot.slane %v8504_v41, 2  ;;  %v8467_v1 = vrot.slane %v8426_v26, 4  ;;  %v8463_v59 = vrot.slane %v8462_v51, 2  ;;  %v8509_v57 = vrot.slane %v8433_v55, 4 }
0x1870   :  { %v8384_v19 = vpop.permute.xlu1 %8383  ;;  %v8409_v37 = vpop.permute.xlu0 %8408  ;;  %v8459_v12 = vrot.slane %v8458_v42, 1  ;;  %v8501_v3 = vrot.slane %v8500_v44, 1  ;;  %v12957_v46 = vunpack.c.l.b16 %v8534_v63  ;;  %v12959_v31 = vunpack.c.l.b16 %v8533_v58 }
0x1871   :  { %v8468_v6 = vadd.f32 %v8467_v1, %v8426_v26  ;;  %v8429_v16 = vmul.f32 %v10390_v20, %v8384_v19  ;;  %v8506_v61 = vadd.f32 %v8505_v50, %v8504_v41  ;;  %v8510_v0 = vadd.f32 %v8509_v57, %v8433_v55 }
0x1872   :  { %v8434_v62 = vmul.f32 %v10391_v60, %v8409_v37  ;;  %v8542_v23 = vpack.c.bf16 %v8496_v56, %v8496_v56  ;;  %v12961_v22 = vadd.f32 %v8459_v12, %v8458_v42  ;;  %v8464_v14 = vadd.f32 %v8463_v59, %v8462_v51  ;;  %v10395_v56 = vld [vmem:[#allocation2 + $0x78] sm:$0xff] }
0x1873   :  { %v8469_v2 = vrot.slane %v8468_v6, 2  ;;  %v8485_v18 = vrot.slane %v8429_v16, 4  ;;  %v8511_v40 = vrot.slane %v8510_v0, 2  ;;  %v8535_v13 = vpack.c.bf16 %v12955_v35, %v12955_v35 }
0x1874   :  { %v8374_v34 = vpop.permute.xlu1 %8373  ;;  %v8414_v25 = vpop.permute.xlu0 %8413  ;;  %v8515_v47 = vrot.slane %v8434_v62, 4  ;;  %v8502_v48 = vadd.f32 %v8501_v3, %v8500_v44  ;;  %v8507_v39 = vrot.slane %v8506_v61, 1  ;;  %v8574_v49 = vunpack.c.l.b16 %v8542_v23  ;;  %v10394_v44 = vld [vmem:[#allocation2 + $0x38] sm:$0xff] }
0x1875   :  { %v8486_v45 = vadd.f32 %v8485_v18, %v8429_v16  ;;  %v8427_v52 = vmul.f32 %v10392_v38, %v8374_v34  ;;  %v8470_v8 = vadd.f32 %v8469_v2, %v8468_v6  ;;  %v8512_v54 = vadd.f32 %v8511_v40, %v8510_v0 }
0x1876   :  { %v8516_v53 = vadd.f32 %v8515_v47, %v8434_v62  ;;  %v8536_v9 = vpack.c.bf16 %v12961_v22, %v12961_v22  ;;  %v8435_v24 = vmul.f32 %v10393_v28, %v8414_v25  ;;  %v8465_v27 = vrot.slane %v8464_v14, 1 }
0x1877   :  { %v8487_v17 = vrot.slane %v8486_v45, 2  ;;  %v8473_v10 = vrot.slane %v8427_v52, 4  ;;  %v8513_v21 = vrot.slane %v8512_v54, 1  ;;  %v8543_v11 = vpack.c.bf16 %v8502_v48, %v8502_v48 }
0x1878   :  { %v8379_v29 = vpop.permute.xlu1 %8378  ;;  %v8517_v41 = vrot.slane %v8516_v53, 2  ;;  %v8419_v51 = vpop.permute.xlu0 %8418  ;;  %v8521_v30 = vrot.slane %v8435_v24, 4  ;;  %v8508_v19 = vadd.f32 %v8507_v39, %v8506_v61  ;;  %v8471_v37 = vrot.slane %v8470_v8, 1 }
0x1879   :  { %v8488_v42 = vadd.f32 %v8487_v17, %v8486_v45  ;;  %v8474_v26 = vadd.f32 %v8473_v10, %v8427_v52  ;;  %v8428_v50 = vmul.f32 %v10394_v44, %v8379_v29  ;;  %v8436_v12 = vmul.f32 %v10395_v56, %v8419_v51 }
0x187a   :  { %v8518_v43 = vadd.f32 %v8517_v41, %v8516_v53  ;;  %v8522_v63 = vadd.f32 %v8521_v30, %v8435_v24  ;;  %v8466_v59 = vadd.f32 %v8465_v27, %v8464_v14  ;;  %v8514_v6 = vadd.f32 %v8513_v21, %v8512_v54 }
0x187b   :  { %v8489_v1 = vrot.slane %v8488_v42, 1  ;;  %v8475_v55 = vrot.slane %v8474_v26, 2  ;;  %v8479_v58 = vrot.slane %v8428_v50, 4  ;;  %v8527_v34 = vrot.slane %v8436_v12, 4 }
0x187c   :  { %v8519_v20 = vrot.slane %v8518_v43, 1  ;;  %v8523_v35 = vrot.slane %v8522_v63, 2  ;;  %v8575_v2 = vunpack.c.l.b16 %v8543_v11  ;;  %v8544_v0 = vpack.c.bf16 %v8508_v19, %v8508_v19 }
0x187d   :  { %v8490_v57 = vadd.f32 %v8489_v1, %v8488_v42  ;;  %v8476_v16 = vadd.f32 %v8475_v55, %v8474_v26  ;;  %v8480_v3 = vadd.f32 %v8479_v58, %v8428_v50  ;;  %v8472_v18 = vadd.f32 %v8471_v37, %v8470_v8 }
0x187e   :  { %v8524_v62 = vadd.f32 %v8523_v35, %v8522_v63  ;;  %v8528_v23 = vadd.f32 %v8527_v34, %v8436_v12  ;;  %v8537_v22 = vpack.c.bf16 %v8466_v59, %v8466_v59  ;;  %v8545_v40 = vpack.c.bf16 %v8514_v6, %v8514_v6  ;;  %v10396_v35 = vld [vmem:[#allocation11 + $0x38] sm:$0xff]   ;;  %v10398_v34 = vld [vmem:[#allocation11 + $0x28] sm:$0xff]  }
0x187f   :  { %v8541_v61 = vpack.c.bf16 %v8490_v57, %v8490_v57  ;;  %v8477_v60 = vrot.slane %v8476_v16, 1  ;;  %v8481_v25 = vrot.slane %v8480_v3, 2  ;;  %v8520_v47 = vadd.f32 %v8519_v20, %v8518_v43 }
0x1880   :  { %v8525_v48 = vrot.slane %v8524_v62, 1  ;;  %v8529_v38 = vrot.slane %v8528_v23, 2  ;;  %v8567_v52 = vunpack.c.l.b16 %v8535_v13  ;;  %v8576_v54 = vunpack.c.l.b16 %v8544_v0  ;;  %v10400_v0 = vld [vmem:[#allocation11 + $0x18] sm:$0xff]  }
0x1881   :  { %v8573_v45 = vunpack.c.l.b16 %v8541_v61  ;;  %v8478_v14 = vadd.f32 %v8477_v60, %v8476_v16  ;;  %v8482_v39 = vadd.f32 %v8481_v25, %v8480_v3  ;;  %v8538_v17 = vpack.c.bf16 %v8472_v18, %v8472_v18  ;;  %v10397_v3 = vld [vmem:[#allocation11 + $0x30] sm:$0xff]   ;;  %v10402_v61 = vld [vmem:[#allocation11 + $0x8] sm:$0xff]   ;;  %v10403_v60 = vld [vmem:[#allocation11] sm:$0xff]   ;;  %v7528_v25 = vpop.f32.mrf.mxu0 }
0x1882   :  { %v8526_v10 = vadd.f32 %v8525_v48, %v8524_v62  ;;  %v8568_v24 = vunpack.c.l.b16 %v8536_v9  ;;  %v8546_v21 = vpack.c.bf16 %v8520_v47, %v8520_v47  ;;  %v8530_v42 = vadd.f32 %v8529_v38, %v8528_v23  ;;  %v10401_v18 = vld [vmem:[#allocation11 + $0x10] sm:$0xff]   ;;  %v7485_v62 = vpop.f32.mrf.mxu1 }
0x1883   :  { %v8588_v53 = vsel %vm924_vm0, %v8574_v49, %v8573_v45  ;;  %v8539_v29 = vpack.c.bf16 %v8478_v14, %v8478_v14  ;;  %v8483_v28 = vrot.slane %v8482_v39, 1  ;;  %v8569_v41 = vunpack.c.l.b16 %v8537_v22  ;;  %v7530_v22 = vpop.f32.mrf.mxu0 }
0x1884   :  { %v8589_v8 = vsel %vm926_vm1, %v8575_v2, %v8588_v53  ;;  %v8577_v51 = vunpack.c.l.b16 %v8545_v40  ;;  %v8547_v11 = vpack.c.bf16 %v8526_v10, %v8526_v10  ;;  %v8581_v13 = vsel %vm924_vm0, %v12957_v46, %v12959_v31  ;;  %v10399_v2 = vld [vmem:[#allocation11 + $0x20] sm:$0xff]   ;;  %v7487_v23 = vpop.f32.mrf.mxu1 }
0x1885   :  { %v8590_v27 = vsel %vm928_vm2, %v8576_v54, %v8589_v8  ;;  %v8484_v26 = vadd.f32 %v8483_v28, %v8482_v39  ;;  %v8570_v30 = vunpack.c.l.b16 %v8538_v17  ;;  %v8531_v49 = vrot.slane %v8530_v42, 1  ;;  %v7532_v45 = vpop.f32.mrf.mxu0 }
0x1886   :  { %v8582_v44 = vsel %vm926_vm1, %v8567_v52, %v8581_v13  ;;  %v8591_v50 = vsel %vm930_vm3, %v8577_v51, %v8590_v27  ;;  %v8571_v19 = vunpack.c.l.b16 %v8539_v29  ;;  %v8578_v1 = vunpack.c.l.b16 %v8546_v21  ;;  %v7489_v40 = vpop.f32.mrf.mxu1 }
0x1887   :  { %v8540_v9 = vpack.c.bf16 %v8484_v26, %v8484_v26  ;;  %v8583_v37 = vsel %vm928_vm2, %v8568_v24, %v8582_v44  ;;  %v8532_v43 = vadd.f32 %v8531_v49, %v8530_v42  ;;  %v8579_v63 = vunpack.c.l.b16 %v8547_v11  ;;  %v7534_v14 = vpop.f32.mrf.mxu0 }
0x1888   :  { %v8584_v55 = vsel %vm930_vm3, %v8569_v41, %v8583_v37  ;;  %v8592_v46 = vsel %vm932_vm4, %v8578_v1, %v8591_v50  ;;  %v7491_v47 = vpop.f32.mrf.mxu1 }
0x1889   :  { %v8572_v58 = vunpack.c.l.b16 %v8540_v9  ;;  %v8585_v56 = vsel %vm932_vm4, %v8570_v30, %v8584_v55  ;;  %v8548_v31 = vpack.c.bf16 %v8532_v43, %v8532_v43  ;;  %v8593_v57 = vsel %vm934_vm5, %v8579_v63, %v8592_v46 }
0x188a   :  { %v8586_v12 = vsel %vm934_vm5, %v8571_v19, %v8585_v56 }
0x188b   :  { %v8580_v59 = vunpack.c.l.b16 %v8548_v31  ;;  %v8587_v6 = vsel %vm936_vm6, %v8572_v58, %v8586_v12 }
0x188d   :  { %v8594_v20 = vsel %vm936_vm6, %v8580_v59, %v8593_v57 }
0x188e   :  { %v8595_v16 = vpack.c.b16 %v8594_v20, %v8587_v6 }
0x1890   :  { %8630 = vmatmul.mubr.bf16.vlgmr.msra.gmra.mxu1 %v8595_v16  ;;  %8673 = vmatmul.mubr.bf16.vlgmr.msra.gmra.mxu0 %v8595_v16 }
0x1891   :  { %9163 = vmatpush3.bf16.msra.mxu1 %v10396_v35  ;;  %9178 = vmatprep.mubr.msk.bf16.mxu1 %vm10569_vm8, %v13134_v7 }
0x1892   :  { %9164 = vmatprep.subr.bf16.mxu1 %v13134_v7 }
0x1895   :  { %9165 = vmatpush3.bf16.msra.mxu1 %v10397_v3 }
0x1896   :  { %9166 = vmatprep.subr.bf16.mxu1 %v13134_v7 }
0x1899   :  { %9167 = vmatpush3.bf16.msra.mxu1 %v10398_v34 }
0x189a   :  { %9168 = vmatprep.subr.bf16.mxu1 %v13134_v7 }
0x189d   :  { %9169 = vmatpush3.bf16.msra.mxu1 %v10399_v2 }
0x189e   :  { %9170 = vmatprep.subr.bf16.mxu1 %v13134_v7 }
0x18a1   :  { %9171 = vmatpush3.bf16.msra.mxu1 %v10400_v0 }
0x18a2   :  { %9172 = vmatprep.subr.bf16.mxu1 %v13134_v7 }
0x18a5   :  { %9173 = vmatpush3.bf16.msra.mxu1 %v10401_v18 }
0x18a6   :  { %9174 = vmatprep.subr.bf16.mxu1 %v13134_v7 }
0x18a9   :  { %9175 = vmatpush3.bf16.msra.mxu1 %v10402_v61 }
0x18aa   :  { %9176 = vmatprep.subr.bf16.mxu1 %v13134_v7 }
0x18ad   :  { %9177 = vmatpush3.bf16.msra.mxu1 %v10403_v60 }
0x18e1   :  { %v7571_v48 = vpop.f32.mrf.mxu1  ;;  %v7614_v39 = vpop.f32.mrf.mxu0 }
0x18e2   :  { %v7572_v17 = vadd.f32 %v7571_v48, %v7485_v62  ;;  %v7615_v58 = vadd.f32 %v7614_v39, %v7528_v25 }
0x18e3   :  { %v7573_v38 = vpop.f32.mrf.mxu1  ;;  %v7616_v52 = vpop.f32.mrf.mxu0 }
0x18e4   :  { %v7574_v8 = vadd.f32 %v7573_v38, %v7487_v23  ;;  %v7623_v28 = vadd.f32 %v7572_v17, %v11097_v36  ;;  %v7617_v43 = vadd.f32 %v7616_v52, %v7530_v22  ;;  %v7625_v31 = vadd.f32 %v7615_v58, %v11111_v32 }
0x18e5   :  { %v7575_v54 = vpop.f32.mrf.mxu1  ;;  %v7618_v53 = vpop.f32.mrf.mxu0 }
0x18e6   :  { %v7576_v7 = vadd.f32 %v7575_v54, %v7489_v40  ;;  %v7624_v41 = vadd.f32 %v7574_v8, %v11100_v4 }
0x18e7   :  { %v7577_v29 = vpop.f32.mrf.mxu1  ;;  %v7620_v10 = vpop.f32.mrf.mxu0 }
0x18e8   :  { %v7578_v27 = vadd.f32 %v7577_v29, %v7491_v47  ;;  %v7627_v13 = vadd.f32 %v7576_v7, %v11097_v36  ;;  %v7621_v56 = vadd.f32 %v7620_v10, %v7534_v14  ;;  %v7626_v36 = vadd.f32 %v7617_v43, %v11107_v15 }
0x18ea   :  { %v7628_v19 = vadd.f32 %v7578_v27, %v11100_v4  ;;  %v7630_v59 = vadd.f32 %v7621_v56, %v11107_v15  ;;  %v7619_v4 = vadd.f32 %v7618_v53, %v7532_v45 }
0x18ec   :  { %v7629_v34 = vadd.f32 %v7619_v4, %v11111_v32 }
0x1950   :  { %v8631_v24 = vpop.f32.mrf.mxu1  ;;  %v8674_v42 = vpop.f32.mrf.mxu0 }
0x1951   :  { %v8683_v21 = vadd.f32 %v8631_v24, %v7623_v28  ;;  %v8685_v6 = vadd.f32 %v8674_v42, %v7625_v31 }
0x1952   :  { %v8633_v51 = vpop.f32.mrf.mxu1  ;;  %v8676_v44 = vpop.f32.mrf.mxu0 }
0x1953   :  { %v8958_v11 = vmul.f32 -1.442695, %v8683_v21  ;;  %v8684_v26 = vadd.f32 %v8633_v51, %v7624_v41  ;;  %v8686_v12 = vadd.f32 %v8676_v44, %v7626_v36 }
0x1954   :  { %v8635_v30 = vpop.f32.mrf.mxu1  ;;  %v8678_v55 = vpop.f32.mrf.mxu0 }
0x1955   :  { %9770 = vpow2.f32 %v8958_v11  ;;  %v8960_v49 = vmul.f32 -1.442695, %v8684_v26  ;;  %v8687_v50 = vadd.f32 %v8635_v30, %v7627_v13  ;;  %v8962_v16 = vmul.f32 -1.442695, %v8686_v12 }
0x1956   :  { %v8637_v9 = vpop.f32.mrf.mxu1  ;;  %v8680_v46 = vpop.f32.mrf.mxu0  ;;  %v8689_v61 = vadd.f32 %v8678_v55, %v7629_v34 }
0x1957   :  { %9772 = vpow2.f32 %v8960_v49  ;;  %v8959_v37 = vmul.f32 -1.442695, %v8687_v50  ;;  %v8688_v1 = vadd.f32 %v8637_v9, %v7628_v19  ;;  %v8690_v57 = vadd.f32 %v8680_v46, %v7630_v59 }
0x1959   :  { %9774 = vpow2.f32 %v8959_v37  ;;  %v8961_v63 = vmul.f32 -1.442695, %v8688_v1  ;;  %v8963_v2 = vmul.f32 -1.442695, %v8690_v57 }
0x195b   :  { %9776 = vpow2.f32 %v8961_v63 }
0x195c   :  { %9778 = vtanh.f32 %v8685_v6 }
0x1962   :  { %v9771_v20 = vpop.eup %9770 }
0x1963   :  { %v8697_v35 = vadd.f32 1.0, %v9771_v20 }
0x1964   :  { %v9773_v3 = vpop.eup %9772 }
0x1965   :  { %9780 = vrcp.f32 %v8697_v35  ;;  %v8709_v0 = vadd.f32 1.0, %v9773_v3 }
0x1966   :  { %v9775_v18 = vpop.eup %9774  ;;  %9782 = vpow2.f32 %v8962_v16 }
0x1967   :  { %9784 = vrcp.f32 %v8709_v0  ;;  %v8698_v60 = vadd.f32 1.0, %v9775_v18 }
0x1968   :  { %v9777_v62 = vpop.eup %9776  ;;  %9786 = vpow2.f32 %v8963_v2 }
0x1969   :  { %9788 = vrcp.f32 %v8698_v60  ;;  %v8710_v15 = vadd.f32 1.0, %v9777_v62  ;;  %v9779_v25 = vpop.eup %9778 }
0x196a   :  { %9790 = vtanh.f32 %v8689_v61 }
0x196b   :  { %9792 = vrcp.f32 %v8710_v15 }
0x1972   :  { %v9781_v23 = vpop.eup %9780 }
0x1973   :  { %v9783_v22 = vpop.eup %9782  ;;  %v8731_v32 = vmul.f32 %v9781_v23, %v9779_v25 }
0x1974   :  { %v9785_v40 = vpop.eup %9784  ;;  %v8723_v48 = vadd.f32 1.0, %v9783_v22 }
0x1975   :  { %v9787_v45 = vpop.eup %9786  ;;  %v8729_v47 = vmul.f32 %v9785_v40, %v12627_v5 }
0x1976   :  { %v9789_v14 = vpop.eup %9788  ;;  %v8724_v54 = vadd.f32 1.0, %v9787_v45  ;;  %9794 = vrcp.f32 %v8723_v48 }
0x1977   :  { %v9791_v39 = vpop.eup %9790  ;;  %v8733_v38 = vadd.f32 %v8731_v32, %v8729_v47 }
0x1978   :  { %v9793_v52 = vpop.eup %9792  ;;  %v8732_v17 = vmul.f32 %v9791_v39, %v9789_v14 }
0x1979   :  { %v8730_v53 = vmul.f32 %v9793_v52, %v12631_v33  ;;  %9796 = vtanh.f32 %v8733_v38  ;;  %v10404_v33 = vld [vmem:[%s13018_s7] ss:$0 sm:$0xff] }
0x197a   :  { %9798 = vrcp.f32 %v8724_v54 }
0x197b   :  { %v8734_v8 = vadd.f32 %v8732_v17, %v8730_v53 }
0x197d   :  { %9800 = vtanh.f32 %v8734_v8 }
0x1983   :  { %v9795_v29 = vpop.eup %9794 }
0x1986   :  { %v9797_v7 = vpop.eup %9796 }
0x1987   :  { %v9799_v10 = vpop.eup %9798  ;;  %v8737_v24 = vmul.f32 %v9797_v7, %v9795_v29 }
0x198a   :  { %v9801_v28 = vpop.eup %9800 }
0x198b   :  { %v8738_v5 = vmul.f32 %v9801_v28, %v9799_v10 }
0x198d   :  { %v8739_v27 = vpack.c.bf16 %v8738_v5, %v8737_v24 }
0x198f   :  { %9179 = vmatmul.mubr.bf16.vlgmr.msra.gmra.mxu1 %v8739_v27 }
0x1a4f   :  { %v8774_v21 = vpop.f32.mrf.mxu1 }
0x1a50   :  { %v8775_v51 = vadd.f32 %v10404_v33, %v8774_v21 }
0x1a51   :  { %v9180_v42 = vpop.f32.mrf.mxu1 }
0x1a53   :  { %v8777_v41 = vpop.f32.mrf.mxu1 }
0x1a54   :  { %v8778_v11 = vadd.f32 %v10404_v33, %v8777_v41 }
0x1a55   :  { %v9181_v26 = vpop.f32.mrf.mxu1 }
0x1a56   :  { %v9006_v13 = vpack.c.bf16 %v8778_v11, %v8775_v51 }
0x1a58   :  { %9007 = vst [vmem:[#allocation13 + $0x28] sm:$0xff] %v9006_v13  }
0x1a59   :  { %10536 = shalt.err (!%p10533_p6)
}
0x1a5a   :  { %8803 = dma.vmem_to_hbm [thread:$0]  %s8798_s26, 768, %s13019_s8, [#allocation4], %s10556_s30, %s10556_s30, %s10557_s9  }
0x1a5b   :  { %10553 = dma.done.wait [#allocation4], 768  }
0x1a5c   :  { %10554 = vsyncadd [#allocation4], 4294966528 }
0x1a5d   :  { %8807 = vsyncpa [#allocation3], 1 }
0x1a5e   :  { %8808 = vsyncpa [#allocation6], 1 }
0x1a5f   :  { %8809 = vsyncpa [#allocation9], 1 }
0x1a60   :  { %8810 = vsyncpa [#allocation12], 1 }
0x1a61   :  { %8811 = vsyncpa [#allocation4], 1 }

</bundles_post_ra>
